<compile_context>
chip_gen: v5e
topology: v5e:2x2
jax: 0.10.0
libtpu: 0.0.40
codegen_flags: <defaults>
</compile_context>

<pallas_src>
import functools

import jax
import jax.numpy as jnp
from jax.experimental import pallas as pl
from jax.experimental.pallas import tpu as pltpu

_VMEM = pl.BlockSpec(memory_space=pltpu.MemorySpace.VMEM)
_LANE = 128          # lane-dense channel padding
_VMEM_LIMIT = 32 * 1024 * 1024   # safe on v5e/v6e (128 MiB) and v7x (64 MiB)


def _round_up(x, m):
    return (x + m - 1) // m * m


def _choose_tm(m):
    m8 = _round_up(m, 8)
    return 512 if m8 >= 512 else m8


def _choose_tk(kp):
    # kp is always a multiple of 128
    if kp <= 2048:
        return kp
    for c in (2048, 1024, 512, 256, 128):
        if kp % c == 0:
            return c
    return 128


# ----------------------------- Pallas kernels ------------------------------

def _mm_bn_kernel(x_ref, w_ref, scale_ref, shift_ref, o_ref, acc_ref, *, relu):
    # gridded: acc += x_tile @ w_tile (bf16 MXU, f32 acc); BN affine (+ReLU) epilogue.
    @pl.when(pl.program_id(2) == 0)
    def _():
        acc_ref[...] = jnp.zeros_like(acc_ref)

    acc_ref[...] += jnp.dot(x_ref[...], w_ref[...],
                            preferred_element_type=jnp.float32)

    @pl.when(pl.program_id(2) == pl.num_programs(2) - 1)
    def _():
        y = acc_ref[...] * scale_ref[...] + shift_ref[...]
        if relu:
            y = jnp.maximum(y, 0.0)
        o_ref[...] = y.astype(o_ref.dtype)


def _mm_bn_res_kernel(x_ref, w_ref, scale_ref, shift_ref, res_ref, o_ref, acc_ref):
    # same as above + fused residual add + ReLU (conv2+bn2+skip+relu of a block)
    @pl.when(pl.program_id(2) == 0)
    def _():
        acc_ref[...] = jnp.zeros_like(acc_ref)

    acc_ref[...] += jnp.dot(x_ref[...], w_ref[...],
                            preferred_element_type=jnp.float32)

    @pl.when(pl.program_id(2) == pl.num_programs(2) - 1)
    def _():
        y = (acc_ref[...] * scale_ref[...] + shift_ref[...]
             + res_ref[...].astype(jnp.float32))
        o_ref[...] = jnp.maximum(y, 0.0).astype(o_ref.dtype)


def _max_reduce_kernel(p_ref, o_ref):
    # p: (k*k, tm, C) -> max over window axis (MaxPool2d), lane-dense C=128
    o_ref[...] = jnp.max(p_ref[...], axis=0)


def _avgpool_fc_kernel(x_ref, w_ref, b_ref, o_ref):
    # x: (N, H*W, C) bf16 -> mean over spatial axis, then (N,C)@(C,NCpad)+bias
    pooled = jnp.mean(x_ref[...].astype(jnp.float32), axis=1)
    y = jnp.dot(pooled.astype(jnp.bfloat16), w_ref[...],
                preferred_element_type=jnp.float32)
    o_ref[...] = y + b_ref[...]


# ----------------------------- kernel wrappers ------------------------------

def gridded_mm_bn(patches, w2d, scale, shift, residual=None, relu=True):
    """patches (M,Kp) bf16 @ w2d (Kp,Npad) bf16, fused BN affine (+res)(+ReLU)."""
    M, Kp = patches.shape
    Npad = w2d.shape[1]
    tm = _choose_tm(M)
    Mp = _round_up(M, tm)
    tk = _choose_tk(Kp)
    tn = 256 if Npad % 256 == 0 else 128

    if Mp != M:
        patches = jnp.pad(patches, ((0, Mp - M), (0, 0)))
        if residual is not None:
            residual = jnp.pad(residual, ((0, Mp - M), (0, 0)))

    grid = (Mp // tm, Npad // tn, Kp // tk)
    x_spec = pl.BlockSpec((tm, tk), lambda i, j, k: (i, k))
    w_spec = pl.BlockSpec((tk, tn), lambda i, j, k: (k, j))      # constant along M
    s_spec = pl.BlockSpec((1, tn), lambda i, j, k: (0, j))
    o_spec = pl.BlockSpec((tm, tn), lambda i, j, k: (i, j))
    scratch = [pltpu.VMEM((tm, tn), jnp.float32)]
    cparams = pltpu.CompilerParams(
        dimension_semantics=("parallel", "parallel", "arbitrary"),
        vmem_limit_bytes=_VMEM_LIMIT)

    if residual is not None:
        out = pl.pallas_call(
            _mm_bn_res_kernel,
            out_shape=jax.ShapeDtypeStruct((Mp, Npad), jnp.bfloat16),
            grid_spec=pltpu.PrefetchScalarGridSpec(
                num_scalar_prefetch=0, grid=grid,
                in_specs=[x_spec, w_spec, s_spec, s_spec,
                          pl.BlockSpec((tm, tn), lambda i, j, k: (i, j))],
                out_specs=o_spec, scratch_shapes=scratch),
            compiler_params=cparams,
        )(patches, w2d, scale, shift, residual)
    else:
        out = pl.pallas_call(
            functools.partial(_mm_bn_kernel, relu=relu),
            out_shape=jax.ShapeDtypeStruct((Mp, Npad), jnp.bfloat16),
            grid_spec=pltpu.PrefetchScalarGridSpec(
                num_scalar_prefetch=0, grid=grid,
                in_specs=[x_spec, w_spec, s_spec, s_spec],
                out_specs=o_spec, scratch_shapes=scratch),
            compiler_params=cparams,
        )(patches, w2d, scale, shift)
    return out[:M]


def max_pool_2d(x, k, stride, padding):
    # x: NHWC bf16 with lane-dense (padded) C
    N, H, W, C = x.shape
    xp = jnp.pad(x, ((0, 0), (padding, padding), (padding, padding), (0, 0)),
                 constant_values=float("-inf"))
    Ho = (H + 2 * padding - k) // stride + 1
    Wo = (W + 2 * padding - k) // stride + 1
    cols = []
    for i in range(k):
        for j in range(k):
            cols.append(
                xp[:, i:i + (Ho - 1) * stride + 1:stride,
                      j:j + (Wo - 1) * stride + 1:stride, :])
    M = N * Ho * Wo
    patches = jnp.stack(cols, axis=0).reshape(k * k, M, C)
    tm = _choose_tm(M)
    Mp = _round_up(M, tm)
    if Mp != M:
        patches = jnp.pad(patches, ((0, 0), (0, Mp - M), (0, 0)),
                          constant_values=float("-inf"))
    out = pl.pallas_call(
        _max_reduce_kernel,
        out_shape=jax.ShapeDtypeStruct((Mp, C), x.dtype),
        grid_spec=pltpu.PrefetchScalarGridSpec(
            num_scalar_prefetch=0, grid=(Mp // tm,),
            in_specs=[pl.BlockSpec((k * k, tm, C), lambda i: (0, i, 0))],
            out_specs=pl.BlockSpec((tm, C), lambda i: (i, 0))),
        compiler_params=pltpu.CompilerParams(
            dimension_semantics=("parallel",), vmem_limit_bytes=_VMEM_LIMIT),
    )(patches)
    return out[:M].reshape(N, Ho, Wo, C)


def avgpool_fc(x, linear_w, linear_b):
    # Fused AdaptiveAvgPool2d(1) + flatten + Linear.  x: (N,H,W,Cpad) bf16.
    N, H, W, Cpad = x.shape
    num_classes, cin_real = linear_w.shape
    NCp = _round_up(num_classes, _LANE)
    wt = jnp.pad(linear_w.T, ((0, Cpad - cin_real), (0, NCp - num_classes)))
    wt = wt.astype(jnp.bfloat16)
    bp = jnp.pad(linear_b, (0, NCp - num_classes)).reshape(1, NCp)
    bp = bp.astype(jnp.float32)
    xr = x.reshape(N, H * W, Cpad)
    out = pl.pallas_call(
        _avgpool_fc_kernel,
        out_shape=jax.ShapeDtypeStruct((N, NCp), jnp.float32),
        in_specs=[_VMEM, _VMEM, _VMEM],
        out_specs=_VMEM,
        compiler_params=pltpu.CompilerParams(vmem_limit_bytes=_VMEM_LIMIT),
    )(xr, wt, bp)
    return out[:, :num_classes]


# ----------------------------- plain-JAX glue ------------------------------

def im2col(x, kh, kw, stride, padding):
    # x: NHWC (bf16) -> patches (N*Ho*Wo, kh*kw*C), ordered (i, j, c).
    N, H, W, C = x.shape
    xp = jnp.pad(x, ((0, 0), (padding, padding), (padding, padding), (0, 0)))
    Ho = (H + 2 * padding - kh) // stride + 1
    Wo = (W + 2 * padding - kw) // stride + 1
    cols = []
    for i in range(kh):
        for j in range(kw):
            cols.append(
                xp[:, i:i + (Ho - 1) * stride + 1:stride,
                      j:j + (Wo - 1) * stride + 1:stride, :])
    patches = jnp.stack(cols, axis=3)  # (N, Ho, Wo, kh*kw, C)
    return patches.reshape(N * Ho * Wo, kh * kw * C), Ho, Wo


def bn_scale_shift(bn, eps=1e-5):
    scale = bn["gamma"] / jnp.sqrt(bn["var"] + eps)
    shift = bn["beta"] - bn["mean"] * scale
    return scale.reshape(1, -1), shift.reshape(1, -1)


def conv_bn(x, w, bn, stride, padding, relu=True, residual=None):
    """x: NHWC bf16 (channels possibly lane-padded); w: torch (Cout,Cin,kh,kw)."""
    Cout, Cin_w, kh, kw = w.shape
    N, H, W, C_in = x.shape
    if kh == 1 and kw == 1 and padding == 0:
        xs = x[:, ::stride, ::stride, :]            # 1x1 conv: no im2col needed
        Ho, Wo = xs.shape[1], xs.shape[2]
        patches = xs.reshape(N * Ho * Wo, C_in)
    else:
        patches, Ho, Wo = im2col(x, kh, kw, stride, padding)

    K = patches.shape[1]                 # kh*kw*C_in
    Kp = _round_up(K, _LANE)
    Npad = _round_up(Cout, _LANE)

    # weight -> (kh,kw,Cin,Cout), zero-pad Cin to activation's padded channels
    # and Cout to 128, flatten to (Kp, Npad).
    w_t = jnp.transpose(w, (2, 3, 1, 0))
    w_t = jnp.pad(w_t, ((0, 0), (0, 0), (0, C_in - Cin_w), (0, Npad - Cout)))
    w2d = w_t.reshape(kh * kw * C_in, Npad)
    w2d = jnp.pad(w2d, ((0, Kp - kh * kw * C_in), (0, 0))).astype(jnp.bfloat16)

    patches = jnp.pad(patches, ((0, 0), (0, Kp - K))).astype(jnp.bfloat16)

    scale, shift = bn_scale_shift(bn)
    scale = jnp.pad(scale, ((0, 0), (0, Npad - Cout)))   # pad lanes stay 0
    shift = jnp.pad(shift, ((0, 0), (0, Npad - Cout)))

    res2d = None
    if residual is not None:
        res2d = residual.reshape(-1, residual.shape[-1])

    out = gridded_mm_bn(patches, w2d, scale, shift, residual=res2d, relu=relu)
    return out.reshape(N, Ho, Wo, Npad)


def basic_block_fwd(x, p, stride, down_sample):
    identity = x
    h = conv_bn(x, p["conv1"], p["bn1"], stride=stride, padding=1, relu=True)
    if down_sample:
        identity = conv_bn(x, p["conv"], p["bn"], stride=stride, padding=0,
                           relu=False)
    # conv2 + bn2 + residual add + relu fused in one gridded kernel
    return conv_bn(h, p["conv2"], p["bn2"], stride=1, padding=1,
                   residual=identity)


def resnet_forward(x_nchw, params):
    x = jnp.transpose(x_nchw, (0, 2, 3, 1)).astype(jnp.bfloat16)  # NCHW -> NHWC
    # stem: conv7x7 s2 p3 + BN + ReLU, then maxpool 3x3 s2 p1
    x = conv_bn(x, params["conv"], params["bn"], stride=2, padding=3, relu=True)
    x = max_pool_2d(x, k=3, stride=2, padding=1)
    for blocks in params["layers"]:
        for blk in blocks:
            x = basic_block_fwd(x, blk["p"], blk["stride"], blk["down_sample"])
    # fused AdaptiveAvgPool2d(1) + flatten + Linear
    return avgpool_fc(x, params["linear_w"], params["linear_b"])


# ----------------------------- parameter init ------------------------------

def init_conv(key, cout, cin, k):
    fan_in = cin * k * k
    return jax.random.normal(key, (cout, cin, k, k), jnp.float32) / jnp.sqrt(
        jnp.float32(fan_in))


def init_bn(key, c):
    k1, k2, k3, k4 = jax.random.split(key, 4)
    return dict(
        gamma=1.0 + 0.1 * jax.random.normal(k1, (c,), jnp.float32),
        beta=0.1 * jax.random.normal(k2, (c,), jnp.float32),
        mean=0.1 * jax.random.normal(k3, (c,), jnp.float32),
        var=jax.random.uniform(k4, (c,), jnp.float32, minval=0.5, maxval=1.5),
    )


def init_basic_block(key, cin, cout, down_sample):
    ks = jax.random.split(key, 6)
    p = dict(
        conv1=init_conv(ks[0], cout, cin, 3), bn1=init_bn(ks[1], cout),
        conv2=init_conv(ks[2], cout, cout, 3), bn2=init_bn(ks[3], cout),
    )
    if down_sample:
        p["conv"] = init_conv(ks[4], cout, cin, 1)
        p["bn"] = init_bn(ks[5], cout)
    return p


def init_resnet(key, image_channels, channels, n_blocks, num_classes):
    counter = iter(range(10_000))

    def nk():
        return jax.random.fold_in(key, next(counter))

    params = {}
    params["conv"] = init_conv(nk(), channels[0], image_channels, 7)
    params["bn"] = init_bn(nk(), channels[0])

    in_ch = channels[0]
    layers = []
    for li, (nb, ch) in enumerate(zip(n_blocks, channels)):
        blocks = []
        down_sample = in_ch != ch  # BasicBlock.expansion == 1
        for bi in range(nb):
            if bi == 0:
                stride = 1 if li == 0 else 2  # layer_first vs layer_other
                blocks.append(dict(
                    p=init_basic_block(nk(), in_ch, ch, down_sample),
                    stride=stride, down_sample=down_sample))
            else:
                blocks.append(dict(
                    p=init_basic_block(nk(), ch, ch, False),
                    stride=1, down_sample=False))
        in_ch = ch
        layers.append(blocks)
    params["layers"] = layers
    params["linear_w"] = jax.random.normal(
        nk(), (num_classes, in_ch), jnp.float32) / jnp.sqrt(jnp.float32(in_ch))
    params["linear_b"] = 0.01 * jax.random.normal(nk(), (num_classes,),
                                                  jnp.float32)
    return params


# ----------------------------------- main -----------------------------------

if __name__ == "__main__":
    key = jax.random.PRNGKey(0)

    # Small ResNet-18-style config: BasicBlock, n_blocks=[2,2,2,2], channels scaled down.
    image_channels = 3
    channels = (8, 16, 32, 64)
    n_blocks = (2, 2, 2, 2)
    num_classes = 10

    params = init_resnet(jax.random.fold_in(key, 1), image_channels, channels,
                         n_blocks, num_classes)
    x = jax.random.normal(jax.random.fold_in(key, 2),
                          (2, image_channels, 32, 32), jnp.float32)

    fwd = jax.jit(lambda inp: resnet_forward(inp, params))
    logits = fwd(x)
    jax.block_until_ready(logits)

    assert logits.shape == (2, num_classes)
    assert bool(jnp.all(jnp.isfinite(logits)))
    print("KERNEL_OK")
</pallas_src>

<mosaic_0001>
module attributes {stable_mosaic.version = 11 : i64} {
  func.func @_mm_bn_kernel(%arg0: i32, %arg1: i32, %arg2: i32, %arg3: memref<512x256xbf16, #tpu.memory_space<vmem>>, %arg4: memref<256x128xbf16, #tpu.memory_space<vmem>>, %arg5: memref<1x128xf32, #tpu.memory_space<vmem>>, %arg6: memref<1x128xf32, #tpu.memory_space<vmem>>, %arg7: memref<512x128xbf16, #tpu.memory_space<vmem>>, %arg8: memref<512x128xf32, #tpu.memory_space<vmem>>) attributes {dimension_semantics = [#tpu.dimension_semantics<parallel>, #tpu.dimension_semantics<parallel>, #tpu.dimension_semantics<arbitrary>], iteration_bounds = array<i64: 1, 1, 1>, scalar_prefetch = 0 : i64, scratch_operands = 1 : i64, tpu.core_type = #tpu.core_type<tc>, window_params = [{transform_indices = @transform_0, window_bounds = array<i64: 512, 256>}, {transform_indices = @transform_1, window_bounds = array<i64: 256, 128>}, {transform_indices = @transform_2, window_bounds = array<i64: 1, 128>}, {transform_indices = @transform_3, window_bounds = array<i64: 1, 128>}, {transform_indices = @transform_4, window_bounds = array<i64: 512, 128>}]} {
    %c0_i32 = arith.constant 0 : i32
    %0 = arith.cmpi eq, %arg2, %c0_i32 : i32
    %1 = arith.extui %0 : i1 to i32
    %c0_i32_0 = arith.constant 0 : i32
    %2 = arith.cmpi ne, %1, %c0_i32_0 : i32
    scf.if %2 {
      %cst_10 = arith.constant 0.000000e+00 : f32
      %12 = vector.broadcast %cst_10 : f32 to vector<512x128xf32>
      %c0_11 = arith.constant 0 : index
      %c0_12 = arith.constant 0 : index
      %13 = vector.load %arg8[%c0_11, %c0_12] : memref<512x128xf32, #tpu.memory_space<vmem>>, vector<512x128xf32>
      tpu.vector_store %arg8[%c0_11, %c0_12], %12 {strides = array<i32>} : memref<512x128xf32, #tpu.memory_space<vmem>>, vector<512x128xf32>,
    } else {
    }
    %c0 = arith.constant 0 : index
    %c0_1 = arith.constant 0 : index
    %3 = vector.load %arg8[%c0, %c0_1] : memref<512x128xf32, #tpu.memory_space<vmem>>, vector<512x128xf32>
    %c0_2 = arith.constant 0 : index
    %c0_3 = arith.constant 0 : index
    %4 = vector.load %arg3[%c0_2, %c0_3] : memref<512x256xbf16, #tpu.memory_space<vmem>>, vector<512x256xbf16>
    %c0_4 = arith.constant 0 : index
    %c0_5 = arith.constant 0 : index
    %5 = vector.load %arg4[%c0_4, %c0_5] : memref<256x128xbf16, #tpu.memory_space<vmem>>, vector<256x128xbf16>
    %cst = arith.constant dense<0.000000e+00> : vector<512x128xf32>
    %6 = tpu.matmul %4, %5, %cst {dimension_numbers = #tpu.dot_dimension_numbers<[1], [0], [0], [1], [0, 0, 1, 1], [], []>} : vector<512x256xbf16>, vector<256x128xbf16>, vector<512x128xf32> -> vector<512x128xf32>
    %7 = arith.addf %3, %6 : vector<512x128xf32>
    %c0_6 = arith.constant 0 : index
    %c0_7 = arith.constant 0 : index
    %8 = vector.load %arg8[%c0_6, %c0_7] : memref<512x128xf32, #tpu.memory_space<vmem>>, vector<512x128xf32>
    tpu.vector_store %arg8[%c0_6, %c0_7], %7 {strides = array<i32>} : memref<512x128xf32, #tpu.memory_space<vmem>>, vector<512x128xf32>,
    %c0_i32_8 = arith.constant 0 : i32
    %9 = arith.cmpi eq, %arg2, %c0_i32_8 : i32
    %10 = arith.extui %9 : i1 to i32
    %c0_i32_9 = arith.constant 0 : i32
    %11 = arith.cmpi ne, %10, %c0_i32_9 : i32
    scf.if %11 {
      %c0_10 = arith.constant 0 : index
      %c0_11 = arith.constant 0 : index
      %12 = vector.load %arg8[%c0_10, %c0_11] : memref<512x128xf32, #tpu.memory_space<vmem>>, vector<512x128xf32>
      %c0_12 = arith.constant 0 : index
      %c0_13 = arith.constant 0 : index
      %13 = vector.load %arg5[%c0_12, %c0_13] : memref<1x128xf32, #tpu.memory_space<vmem>>, vector<1x128xf32>
      %14 = vector.broadcast %13 : vector<1x128xf32> to vector<512x128xf32>
      %15 = arith.mulf %12, %14 : vector<512x128xf32>
      %c0_14 = arith.constant 0 : index
      %c0_15 = arith.constant 0 : index
      %16 = vector.load %arg6[%c0_14, %c0_15] : memref<1x128xf32, #tpu.memory_space<vmem>>, vector<1x128xf32>
      %17 = vector.broadcast %16 : vector<1x128xf32> to vector<512x128xf32>
      %18 = arith.addf %15, %17 : vector<512x128xf32>
      %cst_16 = arith.constant 0.000000e+00 : f32
      %19 = vector.broadcast %cst_16 : f32 to vector<512x128xf32>
      %20 = arith.maximumf %18, %19 : vector<512x128xf32>
      %21 = arith.truncf %20 : vector<512x128xf32> to vector<512x128xbf16>
      %c0_17 = arith.constant 0 : index
      %c0_18 = arith.constant 0 : index
      %22 = vector.load %arg7[%c0_17, %c0_18] : memref<512x128xbf16, #tpu.memory_space<vmem>>, vector<512x128xbf16>
      tpu.vector_store %arg7[%c0_17, %c0_18], %21 {strides = array<i32>} : memref<512x128xbf16, #tpu.memory_space<vmem>>, vector<512x128xbf16>,
    } else {
    }
    return
  }
  func.func @transform_0(%arg0: i32, %arg1: i32, %arg2: i32) -> (i32, i32) {
    %c0_i32 = arith.constant 0 : i32
    return %arg0, %arg2 : i32, i32
  }
  func.func @transform_1(%arg0: i32, %arg1: i32, %arg2: i32) -> (i32, i32) {
    %c0_i32 = arith.constant 0 : i32
    return %arg2, %arg1 : i32, i32
  }
  func.func @transform_2(%arg0: i32, %arg1: i32, %arg2: i32) -> (i32, i32) {
    %c0_i32 = arith.constant 0 : i32
    %c0_i32_0 = arith.constant 0 : i32
    return %c0_i32, %arg1 : i32, i32
  }
  func.func @transform_3(%arg0: i32, %arg1: i32, %arg2: i32) -> (i32, i32) {
    %c0_i32 = arith.constant 0 : i32
    %c0_i32_0 = arith.constant 0 : i32
    return %c0_i32, %arg1 : i32, i32
  }
  func.func @transform_4(%arg0: i32, %arg1: i32, %arg2: i32) -> (i32, i32) {
    %c0_i32 = arith.constant 0 : i32
    return %arg0, %arg1 : i32, i32
  }
}

module attributes {stable_mosaic.version = 11 : i64} {
  func.func @_max_reduce_kernel(%arg0: i32, %arg1: memref<9x128x128xbf16, #tpu.memory_space<vmem>>, %arg2: memref<128x128xbf16, #tpu.memory_space<vmem>>) attributes {dimension_semantics = [#tpu.dimension_semantics<parallel>], iteration_bounds = array<i64: 1>, scalar_prefetch = 0 : i64, scratch_operands = 0 : i64, tpu.core_type = #tpu.core_type<tc>, window_params = [{transform_indices = @transform_0, window_bounds = array<i64: 9, 128, 128>}, {transform_indices = @transform_1, window_bounds = array<i64: 128, 128>}]} {
    %c0 = arith.constant 0 : index
    %c0_0 = arith.constant 0 : index
    %c0_1 = arith.constant 0 : index
    %0 = vector.load %arg1[%c0, %c0_0, %c0_1] : memref<9x128x128xbf16, #tpu.memory_space<vmem>>, vector<9x128x128xbf16>
    %cst = arith.constant dense<0xFF80> : vector<128x128xbf16>
    %1 = vector.multi_reduction <maximumf>, %0, %cst [0] : vector<9x128x128xbf16> to vector<128x128xbf16>
    %c0_2 = arith.constant 0 : index
    %c0_3 = arith.constant 0 : index
    %2 = vector.load %arg2[%c0_2, %c0_3] : memref<128x128xbf16, #tpu.memory_space<vmem>>, vector<128x128xbf16>
    tpu.vector_store %arg2[%c0_2, %c0_3], %1 {strides = array<i32>} : memref<128x128xbf16, #tpu.memory_space<vmem>>, vector<128x128xbf16>,
    return
  }
  func.func @transform_0(%arg0: i32) -> (i32, i32, i32) {
    %c0_i32 = arith.constant 0 : i32
    %c0_i32_0 = arith.constant 0 : i32
    %c0_i32_1 = arith.constant 0 : i32
    return %c0_i32, %arg0, %c0_i32_0 : i32, i32, i32
  }
  func.func @transform_1(%arg0: i32) -> (i32, i32) {
    %c0_i32 = arith.constant 0 : i32
    %c0_i32_0 = arith.constant 0 : i32
    return %arg0, %c0_i32 : i32, i32
  }
}

module attributes {stable_mosaic.version = 11 : i64} {
  func.func @_mm_bn_kernel(%arg0: i32, %arg1: i32, %arg2: i32, %arg3: memref<128x1152xbf16, #tpu.memory_space<vmem>>, %arg4: memref<1152x128xbf16, #tpu.memory_space<vmem>>, %arg5: memref<1x128xf32, #tpu.memory_space<vmem>>, %arg6: memref<1x128xf32, #tpu.memory_space<vmem>>, %arg7: memref<128x128xbf16, #tpu.memory_space<vmem>>, %arg8: memref<128x128xf32, #tpu.memory_space<vmem>>) attributes {dimension_semantics = [#tpu.dimension_semantics<parallel>, #tpu.dimension_semantics<parallel>, #tpu.dimension_semantics<arbitrary>], iteration_bounds = array<i64: 1, 1, 1>, scalar_prefetch = 0 : i64, scratch_operands = 1 : i64, tpu.core_type = #tpu.core_type<tc>, window_params = [{transform_indices = @transform_0, window_bounds = array<i64: 128, 1152>}, {transform_indices = @transform_1, window_bounds = array<i64: 1152, 128>}, {transform_indices = @transform_2, window_bounds = array<i64: 1, 128>}, {transform_indices = @transform_3, window_bounds = array<i64: 1, 128>}, {transform_indices = @transform_4, window_bounds = array<i64: 128, 128>}]} {
    %c0_i32 = arith.constant 0 : i32
    %0 = arith.cmpi eq, %arg2, %c0_i32 : i32
    %1 = arith.extui %0 : i1 to i32
    %c0_i32_0 = arith.constant 0 : i32
    %2 = arith.cmpi ne, %1, %c0_i32_0 : i32
    scf.if %2 {
      %cst_10 = arith.constant 0.000000e+00 : f32
      %12 = vector.broadcast %cst_10 : f32 to vector<128x128xf32>
      %c0_11 = arith.constant 0 : index
      %c0_12 = arith.constant 0 : index
      %13 = vector.load %arg8[%c0_11, %c0_12] : memref<128x128xf32, #tpu.memory_space<vmem>>, vector<128x128xf32>
      tpu.vector_store %arg8[%c0_11, %c0_12], %12 {strides = array<i32>} : memref<128x128xf32, #tpu.memory_space<vmem>>, vector<128x128xf32>,
    } else {
    }
    %c0 = arith.constant 0 : index
    %c0_1 = arith.constant 0 : index
    %3 = vector.load %arg8[%c0, %c0_1] : memref<128x128xf32, #tpu.memory_space<vmem>>, vector<128x128xf32>
    %c0_2 = arith.constant 0 : index
    %c0_3 = arith.constant 0 : index
    %4 = vector.load %arg3[%c0_2, %c0_3] : memref<128x1152xbf16, #tpu.memory_space<vmem>>, vector<128x1152xbf16>
    %c0_4 = arith.constant 0 : index
    %c0_5 = arith.constant 0 : index
    %5 = vector.load %arg4[%c0_4, %c0_5] : memref<1152x128xbf16, #tpu.memory_space<vmem>>, vector<1152x128xbf16>
    %cst = arith.constant dense<0.000000e+00> : vector<128x128xf32>
    %6 = tpu.matmul %4, %5, %cst {dimension_numbers = #tpu.dot_dimension_numbers<[1], [0], [0], [1], [0, 0, 1, 1], [], []>} : vector<128x1152xbf16>, vector<1152x128xbf16>, vector<128x128xf32> -> vector<128x128xf32>
    %7 = arith.addf %3, %6 : vector<128x128xf32>
    %c0_6 = arith.constant 0 : index
    %c0_7 = arith.constant 0 : index
    %8 = vector.load %arg8[%c0_6, %c0_7] : memref<128x128xf32, #tpu.memory_space<vmem>>, vector<128x128xf32>
    tpu.vector_store %arg8[%c0_6, %c0_7], %7 {strides = array<i32>} : memref<128x128xf32, #tpu.memory_space<vmem>>, vector<128x128xf32>,
    %c0_i32_8 = arith.constant 0 : i32
    %9 = arith.cmpi eq, %arg2, %c0_i32_8 : i32
    %10 = arith.extui %9 : i1 to i32
    %c0_i32_9 = arith.constant 0 : i32
    %11 = arith.cmpi ne, %10, %c0_i32_9 : i32
    scf.if %11 {
      %c0_10 = arith.constant 0 : index
      %c0_11 = arith.constant 0 : index
      %12 = vector.load %arg8[%c0_10, %c0_11] : memref<128x128xf32, #tpu.memory_space<vmem>>, vector<128x128xf32>
      %c0_12 = arith.constant 0 : index
      %c0_13 = arith.constant 0 : index
      %13 = vector.load %arg5[%c0_12, %c0_13] : memref<1x128xf32, #tpu.memory_space<vmem>>, vector<1x128xf32>
      %14 = vector.broadcast %13 : vector<1x128xf32> to vector<128x128xf32>
      %15 = arith.mulf %12, %14 : vector<128x128xf32>
      %c0_14 = arith.constant 0 : index
      %c0_15 = arith.constant 0 : index
      %16 = vector.load %arg6[%c0_14, %c0_15] : memref<1x128xf32, #tpu.memory_space<vmem>>, vector<1x128xf32>
      %17 = vector.broadcast %16 : vector<1x128xf32> to vector<128x128xf32>
      %18 = arith.addf %15, %17 : vector<128x128xf32>
      %cst_16 = arith.constant 0.000000e+00 : f32
      %19 = vector.broadcast %cst_16 : f32 to vector<128x128xf32>
      %20 = arith.maximumf %18, %19 : vector<128x128xf32>
      %21 = arith.truncf %20 : vector<128x128xf32> to vector<128x128xbf16>
      %c0_17 = arith.constant 0 : index
      %c0_18 = arith.constant 0 : index
      %22 = vector.load %arg7[%c0_17, %c0_18] : memref<128x128xbf16, #tpu.memory_space<vmem>>, vector<128x128xbf16>
      tpu.vector_store %arg7[%c0_17, %c0_18], %21 {strides = array<i32>} : memref<128x128xbf16, #tpu.memory_space<vmem>>, vector<128x128xbf16>,
    } else {
    }
    return
  }
  func.func @transform_0(%arg0: i32, %arg1: i32, %arg2: i32) -> (i32, i32) {
    %c0_i32 = arith.constant 0 : i32
    return %arg0, %arg2 : i32, i32
  }
  func.func @transform_1(%arg0: i32, %arg1: i32, %arg2: i32) -> (i32, i32) {
    %c0_i32 = arith.constant 0 : i32
    return %arg2, %arg1 : i32, i32
  }
  func.func @transform_2(%arg0: i32, %arg1: i32, %arg2: i32) -> (i32, i32) {
    %c0_i32 = arith.constant 0 : i32
    %c0_i32_0 = arith.constant 0 : i32
    return %c0_i32, %arg1 : i32, i32
  }
  func.func @transform_3(%arg0: i32, %arg1: i32, %arg2: i32) -> (i32, i32) {
    %c0_i32 = arith.constant 0 : i32
    %c0_i32_0 = arith.constant 0 : i32
    return %c0_i32, %arg1 : i32, i32
  }
  func.func @transform_4(%arg0: i32, %arg1: i32, %arg2: i32) -> (i32, i32) {
    %c0_i32 = arith.constant 0 : i32
    return %arg0, %arg1 : i32, i32
  }
}

module attributes {stable_mosaic.version = 11 : i64} {
  func.func @_mm_bn_res_kernel(%arg0: i32, %arg1: i32, %arg2: i32, %arg3: memref<128x1152xbf16, #tpu.memory_space<vmem>>, %arg4: memref<1152x128xbf16, #tpu.memory_space<vmem>>, %arg5: memref<1x128xf32, #tpu.memory_space<vmem>>, %arg6: memref<1x128xf32, #tpu.memory_space<vmem>>, %arg7: memref<128x128xbf16, #tpu.memory_space<vmem>>, %arg8: memref<128x128xbf16, #tpu.memory_space<vmem>>, %arg9: memref<128x128xf32, #tpu.memory_space<vmem>>) attributes {dimension_semantics = [#tpu.dimension_semantics<parallel>, #tpu.dimension_semantics<parallel>, #tpu.dimension_semantics<arbitrary>], iteration_bounds = array<i64: 1, 1, 1>, scalar_prefetch = 0 : i64, scratch_operands = 1 : i64, tpu.core_type = #tpu.core_type<tc>, window_params = [{transform_indices = @transform_0, window_bounds = array<i64: 128, 1152>}, {transform_indices = @transform_1, window_bounds = array<i64: 1152, 128>}, {transform_indices = @transform_2, window_bounds = array<i64: 1, 128>}, {transform_indices = @transform_3, window_bounds = array<i64: 1, 128>}, {transform_indices = @transform_4, window_bounds = array<i64: 128, 128>}, {transform_indices = @transform_5, window_bounds = array<i64: 128, 128>}]} {
    %c0_i32 = arith.constant 0 : i32
    %0 = arith.cmpi eq, %arg2, %c0_i32 : i32
    %1 = arith.extui %0 : i1 to i32
    %c0_i32_0 = arith.constant 0 : i32
    %2 = arith.cmpi ne, %1, %c0_i32_0 : i32
    scf.if %2 {
      %cst_10 = arith.constant 0.000000e+00 : f32
      %12 = vector.broadcast %cst_10 : f32 to vector<128x128xf32>
      %c0_11 = arith.constant 0 : index
      %c0_12 = arith.constant 0 : index
      %13 = vector.load %arg9[%c0_11, %c0_12] : memref<128x128xf32, #tpu.memory_space<vmem>>, vector<128x128xf32>
      tpu.vector_store %arg9[%c0_11, %c0_12], %12 {strides = array<i32>} : memref<128x128xf32, #tpu.memory_space<vmem>>, vector<128x128xf32>,
    } else {
    }
    %c0 = arith.constant 0 : index
    %c0_1 = arith.constant 0 : index
    %3 = vector.load %arg9[%c0, %c0_1] : memref<128x128xf32, #tpu.memory_space<vmem>>, vector<128x128xf32>
    %c0_2 = arith.constant 0 : index
    %c0_3 = arith.constant 0 : index
    %4 = vector.load %arg3[%c0_2, %c0_3] : memref<128x1152xbf16, #tpu.memory_space<vmem>>, vector<128x1152xbf16>
    %c0_4 = arith.constant 0 : index
    %c0_5 = arith.constant 0 : index
    %5 = vector.load %arg4[%c0_4, %c0_5] : memref<1152x128xbf16, #tpu.memory_space<vmem>>, vector<1152x128xbf16>
    %cst = arith.constant dense<0.000000e+00> : vector<128x128xf32>
    %6 = tpu.matmul %4, %5, %cst {dimension_numbers = #tpu.dot_dimension_numbers<[1], [0], [0], [1], [0, 0, 1, 1], [], []>} : vector<128x1152xbf16>, vector<1152x128xbf16>, vector<128x128xf32> -> vector<128x128xf32>
    %7 = arith.addf %3, %6 : vector<128x128xf32>
    %c0_6 = arith.constant 0 : index
    %c0_7 = arith.constant 0 : index
    %8 = vector.load %arg9[%c0_6, %c0_7] : memref<128x128xf32, #tpu.memory_space<vmem>>, vector<128x128xf32>
    tpu.vector_store %arg9[%c0_6, %c0_7], %7 {strides = array<i32>} : memref<128x128xf32, #tpu.memory_space<vmem>>, vector<128x128xf32>,
    %c0_i32_8 = arith.constant 0 : i32
    %9 = arith.cmpi eq, %arg2, %c0_i32_8 : i32
    %10 = arith.extui %9 : i1 to i32
    %c0_i32_9 = arith.constant 0 : i32
    %11 = arith.cmpi ne, %10, %c0_i32_9 : i32
    scf.if %11 {
      %c0_10 = arith.constant 0 : index
      %c0_11 = arith.constant 0 : index
      %12 = vector.load %arg9[%c0_10, %c0_11] : memref<128x128xf32, #tpu.memory_space<vmem>>, vector<128x128xf32>
      %c0_12 = arith.constant 0 : index
      %c0_13 = arith.constant 0 : index
      %13 = vector.load %arg5[%c0_12, %c0_13] : memref<1x128xf32, #tpu.memory_space<vmem>>, vector<1x128xf32>
      %14 = vector.broadcast %13 : vector<1x128xf32> to vector<128x128xf32>
      %15 = arith.mulf %12, %14 : vector<128x128xf32>
      %c0_14 = arith.constant 0 : index
      %c0_15 = arith.constant 0 : index
      %16 = vector.load %arg6[%c0_14, %c0_15] : memref<1x128xf32, #tpu.memory_space<vmem>>, vector<1x128xf32>
      %17 = vector.broadcast %16 : vector<1x128xf32> to vector<128x128xf32>
      %18 = arith.addf %15, %17 : vector<128x128xf32>
      %c0_16 = arith.constant 0 : index
      %c0_17 = arith.constant 0 : index
      %19 = vector.load %arg7[%c0_16, %c0_17] : memref<128x128xbf16, #tpu.memory_space<vmem>>, vector<128x128xbf16>
      %20 = arith.extf %19 : vector<128x128xbf16> to vector<128x128xf32>
      %21 = arith.addf %18, %20 : vector<128x128xf32>
      %cst_18 = arith.constant 0.000000e+00 : f32
      %22 = vector.broadcast %cst_18 : f32 to vector<128x128xf32>
      %23 = arith.maximumf %21, %22 : vector<128x128xf32>
      %24 = arith.truncf %23 : vector<128x128xf32> to vector<128x128xbf16>
      %c0_19 = arith.constant 0 : index
      %c0_20 = arith.constant 0 : index
      %25 = vector.load %arg8[%c0_19, %c0_20] : memref<128x128xbf16, #tpu.memory_space<vmem>>, vector<128x128xbf16>
      tpu.vector_store %arg8[%c0_19, %c0_20], %24 {strides = array<i32>} : memref<128x128xbf16, #tpu.memory_space<vmem>>, vector<128x128xbf16>,
    } else {
    }
    return
  }
  func.func @transform_0(%arg0: i32, %arg1: i32, %arg2: i32) -> (i32, i32) {
    %c0_i32 = arith.constant 0 : i32
    return %arg0, %arg2 : i32, i32
  }
  func.func @transform_1(%arg0: i32, %arg1: i32, %arg2: i32) -> (i32, i32) {
    %c0_i32 = arith.constant 0 : i32
    return %arg2, %arg1 : i32, i32
  }
  func.func @transform_2(%arg0: i32, %arg1: i32, %arg2: i32) -> (i32, i32) {
    %c0_i32 = arith.constant 0 : i32
    %c0_i32_0 = arith.constant 0 : i32
    return %c0_i32, %arg1 : i32, i32
  }
  func.func @transform_3(%arg0: i32, %arg1: i32, %arg2: i32) -> (i32, i32) {
    %c0_i32 = arith.constant 0 : i32
    %c0_i32_0 = arith.constant 0 : i32
    return %c0_i32, %arg1 : i32, i32
  }
  func.func @transform_4(%arg0: i32, %arg1: i32, %arg2: i32) -> (i32, i32) {
    %c0_i32 = arith.constant 0 : i32
    return %arg0, %arg1 : i32, i32
  }
  func.func @transform_5(%arg0: i32, %arg1: i32, %arg2: i32) -> (i32, i32) {
    %c0_i32 = arith.constant 0 : i32
    return %arg0, %arg1 : i32, i32
  }
}

module attributes {stable_mosaic.version = 11 : i64} {
  func.func @_mm_bn_kernel(%arg0: i32, %arg1: i32, %arg2: i32, %arg3: memref<32x1152xbf16, #tpu.memory_space<vmem>>, %arg4: memref<1152x128xbf16, #tpu.memory_space<vmem>>, %arg5: memref<1x128xf32, #tpu.memory_space<vmem>>, %arg6: memref<1x128xf32, #tpu.memory_space<vmem>>, %arg7: memref<32x128xbf16, #tpu.memory_space<vmem>>, %arg8: memref<32x128xf32, #tpu.memory_space<vmem>>) attributes {dimension_semantics = [#tpu.dimension_semantics<parallel>, #tpu.dimension_semantics<parallel>, #tpu.dimension_semantics<arbitrary>], iteration_bounds = array<i64: 1, 1, 1>, scalar_prefetch = 0 : i64, scratch_operands = 1 : i64, tpu.core_type = #tpu.core_type<tc>, window_params = [{transform_indices = @transform_0, window_bounds = array<i64: 32, 1152>}, {transform_indices = @transform_1, window_bounds = array<i64: 1152, 128>}, {transform_indices = @transform_2, window_bounds = array<i64: 1, 128>}, {transform_indices = @transform_3, window_bounds = array<i64: 1, 128>}, {transform_indices = @transform_4, window_bounds = array<i64: 32, 128>}]} {
    %c0_i32 = arith.constant 0 : i32
    %0 = arith.cmpi eq, %arg2, %c0_i32 : i32
    %1 = arith.extui %0 : i1 to i32
    %c0_i32_0 = arith.constant 0 : i32
    %2 = arith.cmpi ne, %1, %c0_i32_0 : i32
    scf.if %2 {
      %cst_10 = arith.constant 0.000000e+00 : f32
      %12 = vector.broadcast %cst_10 : f32 to vector<32x128xf32>
      %c0_11 = arith.constant 0 : index
      %c0_12 = arith.constant 0 : index
      %13 = vector.load %arg8[%c0_11, %c0_12] : memref<32x128xf32, #tpu.memory_space<vmem>>, vector<32x128xf32>
      tpu.vector_store %arg8[%c0_11, %c0_12], %12 {strides = array<i32>} : memref<32x128xf32, #tpu.memory_space<vmem>>, vector<32x128xf32>,
    } else {
    }
    %c0 = arith.constant 0 : index
    %c0_1 = arith.constant 0 : index
    %3 = vector.load %arg8[%c0, %c0_1] : memref<32x128xf32, #tpu.memory_space<vmem>>, vector<32x128xf32>
    %c0_2 = arith.constant 0 : index
    %c0_3 = arith.constant 0 : index
    %4 = vector.load %arg3[%c0_2, %c0_3] : memref<32x1152xbf16, #tpu.memory_space<vmem>>, vector<32x1152xbf16>
    %c0_4 = arith.constant 0 : index
    %c0_5 = arith.constant 0 : index
    %5 = vector.load %arg4[%c0_4, %c0_5] : memref<1152x128xbf16, #tpu.memory_space<vmem>>, vector<1152x128xbf16>
    %cst = arith.constant dense<0.000000e+00> : vector<32x128xf32>
    %6 = tpu.matmul %4, %5, %cst {dimension_numbers = #tpu.dot_dimension_numbers<[1], [0], [0], [1], [0, 0, 1, 1], [], []>} : vector<32x1152xbf16>, vector<1152x128xbf16>, vector<32x128xf32> -> vector<32x128xf32>
    %7 = arith.addf %3, %6 : vector<32x128xf32>
    %c0_6 = arith.constant 0 : index
    %c0_7 = arith.constant 0 : index
    %8 = vector.load %arg8[%c0_6, %c0_7] : memref<32x128xf32, #tpu.memory_space<vmem>>, vector<32x128xf32>
    tpu.vector_store %arg8[%c0_6, %c0_7], %7 {strides = array<i32>} : memref<32x128xf32, #tpu.memory_space<vmem>>, vector<32x128xf32>,
    %c0_i32_8 = arith.constant 0 : i32
    %9 = arith.cmpi eq, %arg2, %c0_i32_8 : i32
    %10 = arith.extui %9 : i1 to i32
    %c0_i32_9 = arith.constant 0 : i32
    %11 = arith.cmpi ne, %10, %c0_i32_9 : i32
    scf.if %11 {
      %c0_10 = arith.constant 0 : index
      %c0_11 = arith.constant 0 : index
      %12 = vector.load %arg8[%c0_10, %c0_11] : memref<32x128xf32, #tpu.memory_space<vmem>>, vector<32x128xf32>
      %c0_12 = arith.constant 0 : index
      %c0_13 = arith.constant 0 : index
      %13 = vector.load %arg5[%c0_12, %c0_13] : memref<1x128xf32, #tpu.memory_space<vmem>>, vector<1x128xf32>
      %14 = vector.broadcast %13 : vector<1x128xf32> to vector<32x128xf32>
      %15 = arith.mulf %12, %14 : vector<32x128xf32>
      %c0_14 = arith.constant 0 : index
      %c0_15 = arith.constant 0 : index
      %16 = vector.load %arg6[%c0_14, %c0_15] : memref<1x128xf32, #tpu.memory_space<vmem>>, vector<1x128xf32>
      %17 = vector.broadcast %16 : vector<1x128xf32> to vector<32x128xf32>
      %18 = arith.addf %15, %17 : vector<32x128xf32>
      %cst_16 = arith.constant 0.000000e+00 : f32
      %19 = vector.broadcast %cst_16 : f32 to vector<32x128xf32>
      %20 = arith.maximumf %18, %19 : vector<32x128xf32>
      %21 = arith.truncf %20 : vector<32x128xf32> to vector<32x128xbf16>
      %c0_17 = arith.constant 0 : index
      %c0_18 = arith.constant 0 : index
      %22 = vector.load %arg7[%c0_17, %c0_18] : memref<32x128xbf16, #tpu.memory_space<vmem>>, vector<32x128xbf16>
      tpu.vector_store %arg7[%c0_17, %c0_18], %21 {strides = array<i32>} : memref<32x128xbf16, #tpu.memory_space<vmem>>, vector<32x128xbf16>,
    } else {
    }
    return
  }
  func.func @transform_0(%arg0: i32, %arg1: i32, %arg2: i32) -> (i32, i32) {
    %c0_i32 = arith.constant 0 : i32
    return %arg0, %arg2 : i32, i32
  }
  func.func @transform_1(%arg0: i32, %arg1: i32, %arg2: i32) -> (i32, i32) {
    %c0_i32 = arith.constant 0 : i32
    return %arg2, %arg1 : i32, i32
  }
  func.func @transform_2(%arg0: i32, %arg1: i32, %arg2: i32) -> (i32, i32) {
    %c0_i32 = arith.constant 0 : i32
    %c0_i32_0 = arith.constant 0 : i32
    return %c0_i32, %arg1 : i32, i32
  }
  func.func @transform_3(%arg0: i32, %arg1: i32, %arg2: i32) -> (i32, i32) {
    %c0_i32 = arith.constant 0 : i32
    %c0_i32_0 = arith.constant 0 : i32
    return %c0_i32, %arg1 : i32, i32
  }
  func.func @transform_4(%arg0: i32, %arg1: i32, %arg2: i32) -> (i32, i32) {
    %c0_i32 = arith.constant 0 : i32
    return %arg0, %arg1 : i32, i32
  }
}

module attributes {stable_mosaic.version = 11 : i64} {
  func.func @_mm_bn_kernel(%arg0: i32, %arg1: i32, %arg2: i32, %arg3: memref<32x128xbf16, #tpu.memory_space<vmem>>, %arg4: memref<128x128xbf16, #tpu.memory_space<vmem>>, %arg5: memref<1x128xf32, #tpu.memory_space<vmem>>, %arg6: memref<1x128xf32, #tpu.memory_space<vmem>>, %arg7: memref<32x128xbf16, #tpu.memory_space<vmem>>, %arg8: memref<32x128xf32, #tpu.memory_space<vmem>>) attributes {dimension_semantics = [#tpu.dimension_semantics<parallel>, #tpu.dimension_semantics<parallel>, #tpu.dimension_semantics<arbitrary>], iteration_bounds = array<i64: 1, 1, 1>, scalar_prefetch = 0 : i64, scratch_operands = 1 : i64, tpu.core_type = #tpu.core_type<tc>, window_params = [{transform_indices = @transform_0, window_bounds = array<i64: 32, 128>}, {transform_indices = @transform_1, window_bounds = array<i64: 128, 128>}, {transform_indices = @transform_2, window_bounds = array<i64: 1, 128>}, {transform_indices = @transform_3, window_bounds = array<i64: 1, 128>}, {transform_indices = @transform_4, window_bounds = array<i64: 32, 128>}]} {
    %c0_i32 = arith.constant 0 : i32
    %0 = arith.cmpi eq, %arg2, %c0_i32 : i32
    %1 = arith.extui %0 : i1 to i32
    %c0_i32_0 = arith.constant 0 : i32
    %2 = arith.cmpi ne, %1, %c0_i32_0 : i32
    scf.if %2 {
      %cst_10 = arith.constant 0.000000e+00 : f32
      %12 = vector.broadcast %cst_10 : f32 to vector<32x128xf32>
      %c0_11 = arith.constant 0 : index
      %c0_12 = arith.constant 0 : index
      %13 = vector.load %arg8[%c0_11, %c0_12] : memref<32x128xf32, #tpu.memory_space<vmem>>, vector<32x128xf32>
      tpu.vector_store %arg8[%c0_11, %c0_12], %12 {strides = array<i32>} : memref<32x128xf32, #tpu.memory_space<vmem>>, vector<32x128xf32>,
    } else {
    }
    %c0 = arith.constant 0 : index
    %c0_1 = arith.constant 0 : index
    %3 = vector.load %arg8[%c0, %c0_1] : memref<32x128xf32, #tpu.memory_space<vmem>>, vector<32x128xf32>
    %c0_2 = arith.constant 0 : index
    %c0_3 = arith.constant 0 : index
    %4 = vector.load %arg3[%c0_2, %c0_3] : memref<32x128xbf16, #tpu.memory_space<vmem>>, vector<32x128xbf16>
    %c0_4 = arith.constant 0 : index
    %c0_5 = arith.constant 0 : index
    %5 = vector.load %arg4[%c0_4, %c0_5] : memref<128x128xbf16, #tpu.memory_space<vmem>>, vector<128x128xbf16>
    %cst = arith.constant dense<0.000000e+00> : vector<32x128xf32>
    %6 = tpu.matmul %4, %5, %cst {dimension_numbers = #tpu.dot_dimension_numbers<[1], [0], [0], [1], [0, 0, 1, 1], [], []>} : vector<32x128xbf16>, vector<128x128xbf16>, vector<32x128xf32> -> vector<32x128xf32>
    %7 = arith.addf %3, %6 : vector<32x128xf32>
    %c0_6 = arith.constant 0 : index
    %c0_7 = arith.constant 0 : index
    %8 = vector.load %arg8[%c0_6, %c0_7] : memref<32x128xf32, #tpu.memory_space<vmem>>, vector<32x128xf32>
    tpu.vector_store %arg8[%c0_6, %c0_7], %7 {strides = array<i32>} : memref<32x128xf32, #tpu.memory_space<vmem>>, vector<32x128xf32>,
    %c0_i32_8 = arith.constant 0 : i32
    %9 = arith.cmpi eq, %arg2, %c0_i32_8 : i32
    %10 = arith.extui %9 : i1 to i32
    %c0_i32_9 = arith.constant 0 : i32
    %11 = arith.cmpi ne, %10, %c0_i32_9 : i32
    scf.if %11 {
      %c0_10 = arith.constant 0 : index
      %c0_11 = arith.constant 0 : index
      %12 = vector.load %arg8[%c0_10, %c0_11] : memref<32x128xf32, #tpu.memory_space<vmem>>, vector<32x128xf32>
      %c0_12 = arith.constant 0 : index
      %c0_13 = arith.constant 0 : index
      %13 = vector.load %arg5[%c0_12, %c0_13] : memref<1x128xf32, #tpu.memory_space<vmem>>, vector<1x128xf32>
      %14 = vector.broadcast %13 : vector<1x128xf32> to vector<32x128xf32>
      %15 = arith.mulf %12, %14 : vector<32x128xf32>
      %c0_14 = arith.constant 0 : index
      %c0_15 = arith.constant 0 : index
      %16 = vector.load %arg6[%c0_14, %c0_15] : memref<1x128xf32, #tpu.memory_space<vmem>>, vector<1x128xf32>
      %17 = vector.broadcast %16 : vector<1x128xf32> to vector<32x128xf32>
      %18 = arith.addf %15, %17 : vector<32x128xf32>
      %19 = arith.truncf %18 : vector<32x128xf32> to vector<32x128xbf16>
      %c0_16 = arith.constant 0 : index
      %c0_17 = arith.constant 0 : index
      %20 = vector.load %arg7[%c0_16, %c0_17] : memref<32x128xbf16, #tpu.memory_space<vmem>>, vector<32x128xbf16>
      tpu.vector_store %arg7[%c0_16, %c0_17], %19 {strides = array<i32>} : memref<32x128xbf16, #tpu.memory_space<vmem>>, vector<32x128xbf16>,
    } else {
    }
    return
  }
  func.func @transform_0(%arg0: i32, %arg1: i32, %arg2: i32) -> (i32, i32) {
    %c0_i32 = arith.constant 0 : i32
    return %arg0, %arg2 : i32, i32
  }
  func.func @transform_1(%arg0: i32, %arg1: i32, %arg2: i32) -> (i32, i32) {
    %c0_i32 = arith.constant 0 : i32
    return %arg2, %arg1 : i32, i32
  }
  func.func @transform_2(%arg0: i32, %arg1: i32, %arg2: i32) -> (i32, i32) {
    %c0_i32 = arith.constant 0 : i32
    %c0_i32_0 = arith.constant 0 : i32
    return %c0_i32, %arg1 : i32, i32
  }
  func.func @transform_3(%arg0: i32, %arg1: i32, %arg2: i32) -> (i32, i32) {
    %c0_i32 = arith.constant 0 : i32
    %c0_i32_0 = arith.constant 0 : i32
    return %c0_i32, %arg1 : i32, i32
  }
  func.func @transform_4(%arg0: i32, %arg1: i32, %arg2: i32) -> (i32, i32) {
    %c0_i32 = arith.constant 0 : i32
    return %arg0, %arg1 : i32, i32
  }
}

module attributes {stable_mosaic.version = 11 : i64} {
  func.func @_mm_bn_res_kernel(%arg0: i32, %arg1: i32, %arg2: i32, %arg3: memref<32x1152xbf16, #tpu.memory_space<vmem>>, %arg4: memref<1152x128xbf16, #tpu.memory_space<vmem>>, %arg5: memref<1x128xf32, #tpu.memory_space<vmem>>, %arg6: memref<1x128xf32, #tpu.memory_space<vmem>>, %arg7: memref<32x128xbf16, #tpu.memory_space<vmem>>, %arg8: memref<32x128xbf16, #tpu.memory_space<vmem>>, %arg9: memref<32x128xf32, #tpu.memory_space<vmem>>) attributes {dimension_semantics = [#tpu.dimension_semantics<parallel>, #tpu.dimension_semantics<parallel>, #tpu.dimension_semantics<arbitrary>], iteration_bounds = array<i64: 1, 1, 1>, scalar_prefetch = 0 : i64, scratch_operands = 1 : i64, tpu.core_type = #tpu.core_type<tc>, window_params = [{transform_indices = @transform_0, window_bounds = array<i64: 32, 1152>}, {transform_indices = @transform_1, window_bounds = array<i64: 1152, 128>}, {transform_indices = @transform_2, window_bounds = array<i64: 1, 128>}, {transform_indices = @transform_3, window_bounds = array<i64: 1, 128>}, {transform_indices = @transform_4, window_bounds = array<i64: 32, 128>}, {transform_indices = @transform_5, window_bounds = array<i64: 32, 128>}]} {
    %c0_i32 = arith.constant 0 : i32
    %0 = arith.cmpi eq, %arg2, %c0_i32 : i32
    %1 = arith.extui %0 : i1 to i32
    %c0_i32_0 = arith.constant 0 : i32
    %2 = arith.cmpi ne, %1, %c0_i32_0 : i32
    scf.if %2 {
      %cst_10 = arith.constant 0.000000e+00 : f32
      %12 = vector.broadcast %cst_10 : f32 to vector<32x128xf32>
      %c0_11 = arith.constant 0 : index
      %c0_12 = arith.constant 0 : index
      %13 = vector.load %arg9[%c0_11, %c0_12] : memref<32x128xf32, #tpu.memory_space<vmem>>, vector<32x128xf32>
      tpu.vector_store %arg9[%c0_11, %c0_12], %12 {strides = array<i32>} : memref<32x128xf32, #tpu.memory_space<vmem>>, vector<32x128xf32>,
    } else {
    }
    %c0 = arith.constant 0 : index
    %c0_1 = arith.constant 0 : index
    %3 = vector.load %arg9[%c0, %c0_1] : memref<32x128xf32, #tpu.memory_space<vmem>>, vector<32x128xf32>
    %c0_2 = arith.constant 0 : index
    %c0_3 = arith.constant 0 : index
    %4 = vector.load %arg3[%c0_2, %c0_3] : memref<32x1152xbf16, #tpu.memory_space<vmem>>, vector<32x1152xbf16>
    %c0_4 = arith.constant 0 : index
    %c0_5 = arith.constant 0 : index
    %5 = vector.load %arg4[%c0_4, %c0_5] : memref<1152x128xbf16, #tpu.memory_space<vmem>>, vector<1152x128xbf16>
    %cst = arith.constant dense<0.000000e+00> : vector<32x128xf32>
    %6 = tpu.matmul %4, %5, %cst {dimension_numbers = #tpu.dot_dimension_numbers<[1], [0], [0], [1], [0, 0, 1, 1], [], []>} : vector<32x1152xbf16>, vector<1152x128xbf16>, vector<32x128xf32> -> vector<32x128xf32>
    %7 = arith.addf %3, %6 : vector<32x128xf32>
    %c0_6 = arith.constant 0 : index
    %c0_7 = arith.constant 0 : index
    %8 = vector.load %arg9[%c0_6, %c0_7] : memref<32x128xf32, #tpu.memory_space<vmem>>, vector<32x128xf32>
    tpu.vector_store %arg9[%c0_6, %c0_7], %7 {strides = array<i32>} : memref<32x128xf32, #tpu.memory_space<vmem>>, vector<32x128xf32>,
    %c0_i32_8 = arith.constant 0 : i32
    %9 = arith.cmpi eq, %arg2, %c0_i32_8 : i32
    %10 = arith.extui %9 : i1 to i32
    %c0_i32_9 = arith.constant 0 : i32
    %11 = arith.cmpi ne, %10, %c0_i32_9 : i32
    scf.if %11 {
      %c0_10 = arith.constant 0 : index
      %c0_11 = arith.constant 0 : index
      %12 = vector.load %arg9[%c0_10, %c0_11] : memref<32x128xf32, #tpu.memory_space<vmem>>, vector<32x128xf32>
      %c0_12 = arith.constant 0 : index
      %c0_13 = arith.constant 0 : index
      %13 = vector.load %arg5[%c0_12, %c0_13] : memref<1x128xf32, #tpu.memory_space<vmem>>, vector<1x128xf32>
      %14 = vector.broadcast %13 : vector<1x128xf32> to vector<32x128xf32>
      %15 = arith.mulf %12, %14 : vector<32x128xf32>
      %c0_14 = arith.constant 0 : index
      %c0_15 = arith.constant 0 : index
      %16 = vector.load %arg6[%c0_14, %c0_15] : memref<1x128xf32, #tpu.memory_space<vmem>>, vector<1x128xf32>
      %17 = vector.broadcast %16 : vector<1x128xf32> to vector<32x128xf32>
      %18 = arith.addf %15, %17 : vector<32x128xf32>
      %c0_16 = arith.constant 0 : index
      %c0_17 = arith.constant 0 : index
      %19 = vector.load %arg7[%c0_16, %c0_17] : memref<32x128xbf16, #tpu.memory_space<vmem>>, vector<32x128xbf16>
      %20 = arith.extf %19 : vector<32x128xbf16> to vector<32x128xf32>
      %21 = arith.addf %18, %20 : vector<32x128xf32>
      %cst_18 = arith.constant 0.000000e+00 : f32
      %22 = vector.broadcast %cst_18 : f32 to vector<32x128xf32>
      %23 = arith.maximumf %21, %22 : vector<32x128xf32>
      %24 = arith.truncf %23 : vector<32x128xf32> to vector<32x128xbf16>
      %c0_19 = arith.constant 0 : index
      %c0_20 = arith.constant 0 : index
      %25 = vector.load %arg8[%c0_19, %c0_20] : memref<32x128xbf16, #tpu.memory_space<vmem>>, vector<32x128xbf16>
      tpu.vector_store %arg8[%c0_19, %c0_20], %24 {strides = array<i32>} : memref<32x128xbf16, #tpu.memory_space<vmem>>, vector<32x128xbf16>,
    } else {
    }
    return
  }
  func.func @transform_0(%arg0: i32, %arg1: i32, %arg2: i32) -> (i32, i32) {
    %c0_i32 = arith.constant 0 : i32
    return %arg0, %arg2 : i32, i32
  }
  func.func @transform_1(%arg0: i32, %arg1: i32, %arg2: i32) -> (i32, i32) {
    %c0_i32 = arith.constant 0 : i32
    return %arg2, %arg1 : i32, i32
  }
  func.func @transform_2(%arg0: i32, %arg1: i32, %arg2: i32) -> (i32, i32) {
    %c0_i32 = arith.constant 0 : i32
    %c0_i32_0 = arith.constant 0 : i32
    return %c0_i32, %arg1 : i32, i32
  }
  func.func @transform_3(%arg0: i32, %arg1: i32, %arg2: i32) -> (i32, i32) {
    %c0_i32 = arith.constant 0 : i32
    %c0_i32_0 = arith.constant 0 : i32
    return %c0_i32, %arg1 : i32, i32
  }
  func.func @transform_4(%arg0: i32, %arg1: i32, %arg2: i32) -> (i32, i32) {
    %c0_i32 = arith.constant 0 : i32
    return %arg0, %arg1 : i32, i32
  }
  func.func @transform_5(%arg0: i32, %arg1: i32, %arg2: i32) -> (i32, i32) {
    %c0_i32 = arith.constant 0 : i32
    return %arg0, %arg1 : i32, i32
  }
}

module attributes {stable_mosaic.version = 11 : i64} {
  func.func @_mm_bn_res_kernel(%arg0: i32, %arg1: i32, %arg2: i32, %arg3: memref<32x1152xbf16, #tpu.memory_space<vmem>>, %arg4: memref<1152x128xbf16, #tpu.memory_space<vmem>>, %arg5: memref<1x128xf32, #tpu.memory_space<vmem>>, %arg6: memref<1x128xf32, #tpu.memory_space<vmem>>, %arg7: memref<32x128xbf16, #tpu.memory_space<vmem>>, %arg8: memref<32x128xbf16, #tpu.memory_space<vmem>>, %arg9: memref<32x128xf32, #tpu.memory_space<vmem>>) attributes {dimension_semantics = [#tpu.dimension_semantics<parallel>, #tpu.dimension_semantics<parallel>, #tpu.dimension_semantics<arbitrary>], iteration_bounds = array<i64: 1, 1, 1>, scalar_prefetch = 0 : i64, scratch_operands = 1 : i64, tpu.core_type = #tpu.core_type<tc>, window_params = [{transform_indices = @transform_0, window_bounds = array<i64: 32, 1152>}, {transform_indices = @transform_1, window_bounds = array<i64: 1152, 128>}, {transform_indices = @transform_2, window_bounds = array<i64: 1, 128>}, {transform_indices = @transform_3, window_bounds = array<i64: 1, 128>}, {transform_indices = @transform_4, window_bounds = array<i64: 32, 128>}, {transform_indices = @transform_5, window_bounds = array<i64: 32, 128>}]} {
    %c0_i32 = arith.constant 0 : i32
    %0 = arith.cmpi eq, %arg2, %c0_i32 : i32
    %1 = arith.extui %0 : i1 to i32
    %c0_i32_0 = arith.constant 0 : i32
    %2 = arith.cmpi ne, %1, %c0_i32_0 : i32
    scf.if %2 {
      %cst_10 = arith.constant 0.000000e+00 : f32
      %12 = vector.broadcast %cst_10 : f32 to vector<32x128xf32>
      %c0_11 = arith.constant 0 : index
      %c0_12 = arith.constant 0 : index
      %13 = vector.load %arg9[%c0_11, %c0_12] : memref<32x128xf32, #tpu.memory_space<vmem>>, vector<32x128xf32>
      tpu.vector_store %arg9[%c0_11, %c0_12], %12 {strides = array<i32>} : memref<32x128xf32, #tpu.memory_space<vmem>>, vector<32x128xf32>,
    } else {
    }
    %c0 = arith.constant 0 : index
    %c0_1 = arith.constant 0 : index
    %3 = vector.load %arg9[%c0, %c0_1] : memref<32x128xf32, #tpu.memory_space<vmem>>, vector<32x128xf32>
    %c0_2 = arith.constant 0 : index
    %c0_3 = arith.constant 0 : index
    %4 = vector.load %arg3[%c0_2, %c0_3] : memref<32x1152xbf16, #tpu.memory_space<vmem>>, vector<32x1152xbf16>
    %c0_4 = arith.constant 0 : index
    %c0_5 = arith.constant 0 : index
    %5 = vector.load %arg4[%c0_4, %c0_5] : memref<1152x128xbf16, #tpu.memory_space<vmem>>, vector<1152x128xbf16>
    %cst = arith.constant dense<0.000000e+00> : vector<32x128xf32>
    %6 = tpu.matmul %4, %5, %cst {dimension_numbers = #tpu.dot_dimension_numbers<[1], [0], [0], [1], [0, 0, 1, 1], [], []>} : vector<32x1152xbf16>, vector<1152x128xbf16>, vector<32x128xf32> -> vector<32x128xf32>
    %7 = arith.addf %3, %6 : vector<32x128xf32>
    %c0_6 = arith.constant 0 : index
    %c0_7 = arith.constant 0 : index
    %8 = vector.load %arg9[%c0_6, %c0_7] : memref<32x128xf32, #tpu.memory_space<vmem>>, vector<32x128xf32>
    tpu.vector_store %arg9[%c0_6, %c0_7], %7 {strides = array<i32>} : memref<32x128xf32, #tpu.memory_space<vmem>>, vector<32x128xf32>,
    %c0_i32_8 = arith.constant 0 : i32
    %9 = arith.cmpi eq, %arg2, %c0_i32_8 : i32
    %10 = arith.extui %9 : i1 to i32
    %c0_i32_9 = arith.constant 0 : i32
    %11 = arith.cmpi ne, %10, %c0_i32_9 : i32
    scf.if %11 {
      %c0_10 = arith.constant 0 : index
      %c0_11 = arith.constant 0 : index
      %12 = vector.load %arg9[%c0_10, %c0_11] : memref<32x128xf32, #tpu.memory_space<vmem>>, vector<32x128xf32>
      %c0_12 = arith.constant 0 : index
      %c0_13 = arith.constant 0 : index
      %13 = vector.load %arg5[%c0_12, %c0_13] : memref<1x128xf32, #tpu.memory_space<vmem>>, vector<1x128xf32>
      %14 = vector.broadcast %13 : vector<1x128xf32> to vector<32x128xf32>
      %15 = arith.mulf %12, %14 : vector<32x128xf32>
      %c0_14 = arith.constant 0 : index
      %c0_15 = arith.constant 0 : index
      %16 = vector.load %arg6[%c0_14, %c0_15] : memref<1x128xf32, #tpu.memory_space<vmem>>, vector<1x128xf32>
      %17 = vector.broadcast %16 : vector<1x128xf32> to vector<32x128xf32>
      %18 = arith.addf %15, %17 : vector<32x128xf32>
      %c0_16 = arith.constant 0 : index
      %c0_17 = arith.constant 0 : index
      %19 = vector.load %arg7[%c0_16, %c0_17] : memref<32x128xbf16, #tpu.memory_space<vmem>>, vector<32x128xbf16>
      %20 = arith.extf %19 : vector<32x128xbf16> to vector<32x128xf32>
      %21 = arith.addf %18, %20 : vector<32x128xf32>
      %cst_18 = arith.constant 0.000000e+00 : f32
      %22 = vector.broadcast %cst_18 : f32 to vector<32x128xf32>
      %23 = arith.maximumf %21, %22 : vector<32x128xf32>
      %24 = arith.truncf %23 : vector<32x128xf32> to vector<32x128xbf16>
      %c0_19 = arith.constant 0 : index
      %c0_20 = arith.constant 0 : index
      %25 = vector.load %arg8[%c0_19, %c0_20] : memref<32x128xbf16, #tpu.memory_space<vmem>>, vector<32x128xbf16>
      tpu.vector_store %arg8[%c0_19, %c0_20], %24 {strides = array<i32>} : memref<32x128xbf16, #tpu.memory_space<vmem>>, vector<32x128xbf16>,
    } else {
    }
    return
  }
  func.func @transform_0(%arg0: i32, %arg1: i32, %arg2: i32) -> (i32, i32) {
    %c0_i32 = arith.constant 0 : i32
    return %arg0, %arg2 : i32, i32
  }
  func.func @transform_1(%arg0: i32, %arg1: i32, %arg2: i32) -> (i32, i32) {
    %c0_i32 = arith.constant 0 : i32
    return %arg2, %arg1 : i32, i32
  }
  func.func @transform_2(%arg0: i32, %arg1: i32, %arg2: i32) -> (i32, i32) {
    %c0_i32 = arith.constant 0 : i32
    %c0_i32_0 = arith.constant 0 : i32
    return %c0_i32, %arg1 : i32, i32
  }
  func.func @transform_3(%arg0: i32, %arg1: i32, %arg2: i32) -> (i32, i32) {
    %c0_i32 = arith.constant 0 : i32
    %c0_i32_0 = arith.constant 0 : i32
    return %c0_i32, %arg1 : i32, i32
  }
  func.func @transform_4(%arg0: i32, %arg1: i32, %arg2: i32) -> (i32, i32) {
    %c0_i32 = arith.constant 0 : i32
    return %arg0, %arg1 : i32, i32
  }
  func.func @transform_5(%arg0: i32, %arg1: i32, %arg2: i32) -> (i32, i32) {
    %c0_i32 = arith.constant 0 : i32
    return %arg0, %arg1 : i32, i32
  }
}

module attributes {stable_mosaic.version = 11 : i64} {
  func.func @_mm_bn_kernel(%arg0: i32, %arg1: i32, %arg2: i32, %arg3: memref<8x1152xbf16, #tpu.memory_space<vmem>>, %arg4: memref<1152x128xbf16, #tpu.memory_space<vmem>>, %arg5: memref<1x128xf32, #tpu.memory_space<vmem>>, %arg6: memref<1x128xf32, #tpu.memory_space<vmem>>, %arg7: memref<8x128xbf16, #tpu.memory_space<vmem>>, %arg8: memref<8x128xf32, #tpu.memory_space<vmem>>) attributes {dimension_semantics = [#tpu.dimension_semantics<parallel>, #tpu.dimension_semantics<parallel>, #tpu.dimension_semantics<arbitrary>], iteration_bounds = array<i64: 1, 1, 1>, scalar_prefetch = 0 : i64, scratch_operands = 1 : i64, tpu.core_type = #tpu.core_type<tc>, window_params = [{transform_indices = @transform_0, window_bounds = array<i64: 8, 1152>}, {transform_indices = @transform_1, window_bounds = array<i64: 1152, 128>}, {transform_indices = @transform_2, window_bounds = array<i64: 1, 128>}, {transform_indices = @transform_3, window_bounds = array<i64: 1, 128>}, {transform_indices = @transform_4, window_bounds = array<i64: 8, 128>}]} {
    %c0_i32 = arith.constant 0 : i32
    %0 = arith.cmpi eq, %arg2, %c0_i32 : i32
    %1 = arith.extui %0 : i1 to i32
    %c0_i32_0 = arith.constant 0 : i32
    %2 = arith.cmpi ne, %1, %c0_i32_0 : i32
    scf.if %2 {
      %cst_10 = arith.constant 0.000000e+00 : f32
      %12 = vector.broadcast %cst_10 : f32 to vector<8x128xf32>
      %c0_11 = arith.constant 0 : index
      %c0_12 = arith.constant 0 : index
      %13 = vector.load %arg8[%c0_11, %c0_12] : memref<8x128xf32, #tpu.memory_space<vmem>>, vector<8x128xf32>
      tpu.vector_store %arg8[%c0_11, %c0_12], %12 {strides = array<i32>} : memref<8x128xf32, #tpu.memory_space<vmem>>, vector<8x128xf32>,
    } else {
    }
    %c0 = arith.constant 0 : index
    %c0_1 = arith.constant 0 : index
    %3 = vector.load %arg8[%c0, %c0_1] : memref<8x128xf32, #tpu.memory_space<vmem>>, vector<8x128xf32>
    %c0_2 = arith.constant 0 : index
    %c0_3 = arith.constant 0 : index
    %4 = vector.load %arg3[%c0_2, %c0_3] : memref<8x1152xbf16, #tpu.memory_space<vmem>>, vector<8x1152xbf16>
    %c0_4 = arith.constant 0 : index
    %c0_5 = arith.constant 0 : index
    %5 = vector.load %arg4[%c0_4, %c0_5] : memref<1152x128xbf16, #tpu.memory_space<vmem>>, vector<1152x128xbf16>
    %cst = arith.constant dense<0.000000e+00> : vector<8x128xf32>
    %6 = tpu.matmul %4, %5, %cst {dimension_numbers = #tpu.dot_dimension_numbers<[1], [0], [0], [1], [0, 0, 1, 1], [], []>} : vector<8x1152xbf16>, vector<1152x128xbf16>, vector<8x128xf32> -> vector<8x128xf32>
    %7 = arith.addf %3, %6 : vector<8x128xf32>
    %c0_6 = arith.constant 0 : index
    %c0_7 = arith.constant 0 : index
    %8 = vector.load %arg8[%c0_6, %c0_7] : memref<8x128xf32, #tpu.memory_space<vmem>>, vector<8x128xf32>
    tpu.vector_store %arg8[%c0_6, %c0_7], %7 {strides = array<i32>} : memref<8x128xf32, #tpu.memory_space<vmem>>, vector<8x128xf32>,
    %c0_i32_8 = arith.constant 0 : i32
    %9 = arith.cmpi eq, %arg2, %c0_i32_8 : i32
    %10 = arith.extui %9 : i1 to i32
    %c0_i32_9 = arith.constant 0 : i32
    %11 = arith.cmpi ne, %10, %c0_i32_9 : i32
    scf.if %11 {
      %c0_10 = arith.constant 0 : index
      %c0_11 = arith.constant 0 : index
      %12 = vector.load %arg8[%c0_10, %c0_11] : memref<8x128xf32, #tpu.memory_space<vmem>>, vector<8x128xf32>
      %c0_12 = arith.constant 0 : index
      %c0_13 = arith.constant 0 : index
      %13 = vector.load %arg5[%c0_12, %c0_13] : memref<1x128xf32, #tpu.memory_space<vmem>>, vector<1x128xf32>
      %14 = vector.broadcast %13 : vector<1x128xf32> to vector<8x128xf32>
      %15 = arith.mulf %12, %14 : vector<8x128xf32>
      %c0_14 = arith.constant 0 : index
      %c0_15 = arith.constant 0 : index
      %16 = vector.load %arg6[%c0_14, %c0_15] : memref<1x128xf32, #tpu.memory_space<vmem>>, vector<1x128xf32>
      %17 = vector.broadcast %16 : vector<1x128xf32> to vector<8x128xf32>
      %18 = arith.addf %15, %17 : vector<8x128xf32>
      %cst_16 = arith.constant 0.000000e+00 : f32
      %19 = vector.broadcast %cst_16 : f32 to vector<8x128xf32>
      %20 = arith.maximumf %18, %19 : vector<8x128xf32>
      %21 = arith.truncf %20 : vector<8x128xf32> to vector<8x128xbf16>
      %c0_17 = arith.constant 0 : index
      %c0_18 = arith.constant 0 : index
      %22 = vector.load %arg7[%c0_17, %c0_18] : memref<8x128xbf16, #tpu.memory_space<vmem>>, vector<8x128xbf16>
      tpu.vector_store %arg7[%c0_17, %c0_18], %21 {strides = array<i32>} : memref<8x128xbf16, #tpu.memory_space<vmem>>, vector<8x128xbf16>,
    } else {
    }
    return
  }
  func.func @transform_0(%arg0: i32, %arg1: i32, %arg2: i32) -> (i32, i32) {
    %c0_i32 = arith.constant 0 : i32
    return %arg0, %arg2 : i32, i32
  }
  func.func @transform_1(%arg0: i32, %arg1: i32, %arg2: i32) -> (i32, i32) {
    %c0_i32 = arith.constant 0 : i32
    return %arg2, %arg1 : i32, i32
  }
  func.func @transform_2(%arg0: i32, %arg1: i32, %arg2: i32) -> (i32, i32) {
    %c0_i32 = arith.constant 0 : i32
    %c0_i32_0 = arith.constant 0 : i32
    return %c0_i32, %arg1 : i32, i32
  }
  func.func @transform_3(%arg0: i32, %arg1: i32, %arg2: i32) -> (i32, i32) {
    %c0_i32 = arith.constant 0 : i32
    %c0_i32_0 = arith.constant 0 : i32
    return %c0_i32, %arg1 : i32, i32
  }
  func.func @transform_4(%arg0: i32, %arg1: i32, %arg2: i32) -> (i32, i32) {
    %c0_i32 = arith.constant 0 : i32
    return %arg0, %arg1 : i32, i32
  }
}

module attributes {stable_mosaic.version = 11 : i64} {
  func.func @_mm_bn_res_kernel(%arg0: i32, %arg1: i32, %arg2: i32, %arg3: memref<8x1152xbf16, #tpu.memory_space<vmem>>, %arg4: memref<1152x128xbf16, #tpu.memory_space<vmem>>, %arg5: memref<1x128xf32, #tpu.memory_space<vmem>>, %arg6: memref<1x128xf32, #tpu.memory_space<vmem>>, %arg7: memref<8x128xbf16, #tpu.memory_space<vmem>>, %arg8: memref<8x128xbf16, #tpu.memory_space<vmem>>, %arg9: memref<8x128xf32, #tpu.memory_space<vmem>>) attributes {dimension_semantics = [#tpu.dimension_semantics<parallel>, #tpu.dimension_semantics<parallel>, #tpu.dimension_semantics<arbitrary>], iteration_bounds = array<i64: 1, 1, 1>, scalar_prefetch = 0 : i64, scratch_operands = 1 : i64, tpu.core_type = #tpu.core_type<tc>, window_params = [{transform_indices = @transform_0, window_bounds = array<i64: 8, 1152>}, {transform_indices = @transform_1, window_bounds = array<i64: 1152, 128>}, {transform_indices = @transform_2, window_bounds = array<i64: 1, 128>}, {transform_indices = @transform_3, window_bounds = array<i64: 1, 128>}, {transform_indices = @transform_4, window_bounds = array<i64: 8, 128>}, {transform_indices = @transform_5, window_bounds = array<i64: 8, 128>}]} {
    %c0_i32 = arith.constant 0 : i32
    %0 = arith.cmpi eq, %arg2, %c0_i32 : i32
    %1 = arith.extui %0 : i1 to i32
    %c0_i32_0 = arith.constant 0 : i32
    %2 = arith.cmpi ne, %1, %c0_i32_0 : i32
    scf.if %2 {
      %cst_10 = arith.constant 0.000000e+00 : f32
      %12 = vector.broadcast %cst_10 : f32 to vector<8x128xf32>
      %c0_11 = arith.constant 0 : index
      %c0_12 = arith.constant 0 : index
      %13 = vector.load %arg9[%c0_11, %c0_12] : memref<8x128xf32, #tpu.memory_space<vmem>>, vector<8x128xf32>
      tpu.vector_store %arg9[%c0_11, %c0_12], %12 {strides = array<i32>} : memref<8x128xf32, #tpu.memory_space<vmem>>, vector<8x128xf32>,
    } else {
    }
    %c0 = arith.constant 0 : index
    %c0_1 = arith.constant 0 : index
    %3 = vector.load %arg9[%c0, %c0_1] : memref<8x128xf32, #tpu.memory_space<vmem>>, vector<8x128xf32>
    %c0_2 = arith.constant 0 : index
    %c0_3 = arith.constant 0 : index
    %4 = vector.load %arg3[%c0_2, %c0_3] : memref<8x1152xbf16, #tpu.memory_space<vmem>>, vector<8x1152xbf16>
    %c0_4 = arith.constant 0 : index
    %c0_5 = arith.constant 0 : index
    %5 = vector.load %arg4[%c0_4, %c0_5] : memref<1152x128xbf16, #tpu.memory_space<vmem>>, vector<1152x128xbf16>
    %cst = arith.constant dense<0.000000e+00> : vector<8x128xf32>
    %6 = tpu.matmul %4, %5, %cst {dimension_numbers = #tpu.dot_dimension_numbers<[1], [0], [0], [1], [0, 0, 1, 1], [], []>} : vector<8x1152xbf16>, vector<1152x128xbf16>, vector<8x128xf32> -> vector<8x128xf32>
    %7 = arith.addf %3, %6 : vector<8x128xf32>
    %c0_6 = arith.constant 0 : index
    %c0_7 = arith.constant 0 : index
    %8 = vector.load %arg9[%c0_6, %c0_7] : memref<8x128xf32, #tpu.memory_space<vmem>>, vector<8x128xf32>
    tpu.vector_store %arg9[%c0_6, %c0_7], %7 {strides = array<i32>} : memref<8x128xf32, #tpu.memory_space<vmem>>, vector<8x128xf32>,
    %c0_i32_8 = arith.constant 0 : i32
    %9 = arith.cmpi eq, %arg2, %c0_i32_8 : i32
    %10 = arith.extui %9 : i1 to i32
    %c0_i32_9 = arith.constant 0 : i32
    %11 = arith.cmpi ne, %10, %c0_i32_9 : i32
    scf.if %11 {
      %c0_10 = arith.constant 0 : index
      %c0_11 = arith.constant 0 : index
      %12 = vector.load %arg9[%c0_10, %c0_11] : memref<8x128xf32, #tpu.memory_space<vmem>>, vector<8x128xf32>
      %c0_12 = arith.constant 0 : index
      %c0_13 = arith.constant 0 : index
      %13 = vector.load %arg5[%c0_12, %c0_13] : memref<1x128xf32, #tpu.memory_space<vmem>>, vector<1x128xf32>
      %14 = vector.broadcast %13 : vector<1x128xf32> to vector<8x128xf32>
      %15 = arith.mulf %12, %14 : vector<8x128xf32>
      %c0_14 = arith.constant 0 : index
      %c0_15 = arith.constant 0 : index
      %16 = vector.load %arg6[%c0_14, %c0_15] : memref<1x128xf32, #tpu.memory_space<vmem>>, vector<1x128xf32>
      %17 = vector.broadcast %16 : vector<1x128xf32> to vector<8x128xf32>
      %18 = arith.addf %15, %17 : vector<8x128xf32>
      %c0_16 = arith.constant 0 : index
      %c0_17 = arith.constant 0 : index
      %19 = vector.load %arg7[%c0_16, %c0_17] : memref<8x128xbf16, #tpu.memory_space<vmem>>, vector<8x128xbf16>
      %20 = arith.extf %19 : vector<8x128xbf16> to vector<8x128xf32>
      %21 = arith.addf %18, %20 : vector<8x128xf32>
      %cst_18 = arith.constant 0.000000e+00 : f32
      %22 = vector.broadcast %cst_18 : f32 to vector<8x128xf32>
      %23 = arith.maximumf %21, %22 : vector<8x128xf32>
      %24 = arith.truncf %23 : vector<8x128xf32> to vector<8x128xbf16>
      %c0_19 = arith.constant 0 : index
      %c0_20 = arith.constant 0 : index
      %25 = vector.load %arg8[%c0_19, %c0_20] : memref<8x128xbf16, #tpu.memory_space<vmem>>, vector<8x128xbf16>
      tpu.vector_store %arg8[%c0_19, %c0_20], %24 {strides = array<i32>} : memref<8x128xbf16, #tpu.memory_space<vmem>>, vector<8x128xbf16>,
    } else {
    }
    return
  }
  func.func @transform_0(%arg0: i32, %arg1: i32, %arg2: i32) -> (i32, i32) {
    %c0_i32 = arith.constant 0 : i32
    return %arg0, %arg2 : i32, i32
  }
  func.func @transform_1(%arg0: i32, %arg1: i32, %arg2: i32) -> (i32, i32) {
    %c0_i32 = arith.constant 0 : i32
    return %arg2, %arg1 : i32, i32
  }
  func.func @transform_2(%arg0: i32, %arg1: i32, %arg2: i32) -> (i32, i32) {
    %c0_i32 = arith.constant 0 : i32
    %c0_i32_0 = arith.constant 0 : i32
    return %c0_i32, %arg1 : i32, i32
  }
  func.func @transform_3(%arg0: i32, %arg1: i32, %arg2: i32) -> (i32, i32) {
    %c0_i32 = arith.constant 0 : i32
    %c0_i32_0 = arith.constant 0 : i32
    return %c0_i32, %arg1 : i32, i32
  }
  func.func @transform_4(%arg0: i32, %arg1: i32, %arg2: i32) -> (i32, i32) {
    %c0_i32 = arith.constant 0 : i32
    return %arg0, %arg1 : i32, i32
  }
  func.func @transform_5(%arg0: i32, %arg1: i32, %arg2: i32) -> (i32, i32) {
    %c0_i32 = arith.constant 0 : i32
    return %arg0, %arg1 : i32, i32
  }
}

module attributes {stable_mosaic.version = 11 : i64} {
  func.func @_mm_bn_kernel(%arg0: i32, %arg1: i32, %arg2: i32, %arg3: memref<8x128xbf16, #tpu.memory_space<vmem>>, %arg4: memref<128x128xbf16, #tpu.memory_space<vmem>>, %arg5: memref<1x128xf32, #tpu.memory_space<vmem>>, %arg6: memref<1x128xf32, #tpu.memory_space<vmem>>, %arg7: memref<8x128xbf16, #tpu.memory_space<vmem>>, %arg8: memref<8x128xf32, #tpu.memory_space<vmem>>) attributes {dimension_semantics = [#tpu.dimension_semantics<parallel>, #tpu.dimension_semantics<parallel>, #tpu.dimension_semantics<arbitrary>], iteration_bounds = array<i64: 1, 1, 1>, scalar_prefetch = 0 : i64, scratch_operands = 1 : i64, tpu.core_type = #tpu.core_type<tc>, window_params = [{transform_indices = @transform_0, window_bounds = array<i64: 8, 128>}, {transform_indices = @transform_1, window_bounds = array<i64: 128, 128>}, {transform_indices = @transform_2, window_bounds = array<i64: 1, 128>}, {transform_indices = @transform_3, window_bounds = array<i64: 1, 128>}, {transform_indices = @transform_4, window_bounds = array<i64: 8, 128>}]} {
    %c0_i32 = arith.constant 0 : i32
    %0 = arith.cmpi eq, %arg2, %c0_i32 : i32
    %1 = arith.extui %0 : i1 to i32
    %c0_i32_0 = arith.constant 0 : i32
    %2 = arith.cmpi ne, %1, %c0_i32_0 : i32
    scf.if %2 {
      %cst_10 = arith.constant 0.000000e+00 : f32
      %12 = vector.broadcast %cst_10 : f32 to vector<8x128xf32>
      %c0_11 = arith.constant 0 : index
      %c0_12 = arith.constant 0 : index
      %13 = vector.load %arg8[%c0_11, %c0_12] : memref<8x128xf32, #tpu.memory_space<vmem>>, vector<8x128xf32>
      tpu.vector_store %arg8[%c0_11, %c0_12], %12 {strides = array<i32>} : memref<8x128xf32, #tpu.memory_space<vmem>>, vector<8x128xf32>,
    } else {
    }
    %c0 = arith.constant 0 : index
    %c0_1 = arith.constant 0 : index
    %3 = vector.load %arg8[%c0, %c0_1] : memref<8x128xf32, #tpu.memory_space<vmem>>, vector<8x128xf32>
    %c0_2 = arith.constant 0 : index
    %c0_3 = arith.constant 0 : index
    %4 = vector.load %arg3[%c0_2, %c0_3] : memref<8x128xbf16, #tpu.memory_space<vmem>>, vector<8x128xbf16>
    %c0_4 = arith.constant 0 : index
    %c0_5 = arith.constant 0 : index
    %5 = vector.load %arg4[%c0_4, %c0_5] : memref<128x128xbf16, #tpu.memory_space<vmem>>, vector<128x128xbf16>
    %cst = arith.constant dense<0.000000e+00> : vector<8x128xf32>
    %6 = tpu.matmul %4, %5, %cst {dimension_numbers = #tpu.dot_dimension_numbers<[1], [0], [0], [1], [0, 0, 1, 1], [], []>} : vector<8x128xbf16>, vector<128x128xbf16>, vector<8x128xf32> -> vector<8x128xf32>
    %7 = arith.addf %3, %6 : vector<8x128xf32>
    %c0_6 = arith.constant 0 : index
    %c0_7 = arith.constant 0 : index
    %8 = vector.load %arg8[%c0_6, %c0_7] : memref<8x128xf32, #tpu.memory_space<vmem>>, vector<8x128xf32>
    tpu.vector_store %arg8[%c0_6, %c0_7], %7 {strides = array<i32>} : memref<8x128xf32, #tpu.memory_space<vmem>>, vector<8x128xf32>,
    %c0_i32_8 = arith.constant 0 : i32
    %9 = arith.cmpi eq, %arg2, %c0_i32_8 : i32
    %10 = arith.extui %9 : i1 to i32
    %c0_i32_9 = arith.constant 0 : i32
    %11 = arith.cmpi ne, %10, %c0_i32_9 : i32
    scf.if %11 {
      %c0_10 = arith.constant 0 : index
      %c0_11 = arith.constant 0 : index
      %12 = vector.load %arg8[%c0_10, %c0_11] : memref<8x128xf32, #tpu.memory_space<vmem>>, vector<8x128xf32>
      %c0_12 = arith.constant 0 : index
      %c0_13 = arith.constant 0 : index
      %13 = vector.load %arg5[%c0_12, %c0_13] : memref<1x128xf32, #tpu.memory_space<vmem>>, vector<1x128xf32>
      %14 = vector.broadcast %13 : vector<1x128xf32> to vector<8x128xf32>
      %15 = arith.mulf %12, %14 : vector<8x128xf32>
      %c0_14 = arith.constant 0 : index
      %c0_15 = arith.constant 0 : index
      %16 = vector.load %arg6[%c0_14, %c0_15] : memref<1x128xf32, #tpu.memory_space<vmem>>, vector<1x128xf32>
      %17 = vector.broadcast %16 : vector<1x128xf32> to vector<8x128xf32>
      %18 = arith.addf %15, %17 : vector<8x128xf32>
      %19 = arith.truncf %18 : vector<8x128xf32> to vector<8x128xbf16>
      %c0_16 = arith.constant 0 : index
      %c0_17 = arith.constant 0 : index
      %20 = vector.load %arg7[%c0_16, %c0_17] : memref<8x128xbf16, #tpu.memory_space<vmem>>, vector<8x128xbf16>
      tpu.vector_store %arg7[%c0_16, %c0_17], %19 {strides = array<i32>} : memref<8x128xbf16, #tpu.memory_space<vmem>>, vector<8x128xbf16>,
    } else {
    }
    return
  }
  func.func @transform_0(%arg0: i32, %arg1: i32, %arg2: i32) -> (i32, i32) {
    %c0_i32 = arith.constant 0 : i32
    return %arg0, %arg2 : i32, i32
  }
  func.func @transform_1(%arg0: i32, %arg1: i32, %arg2: i32) -> (i32, i32) {
    %c0_i32 = arith.constant 0 : i32
    return %arg2, %arg1 : i32, i32
  }
  func.func @transform_2(%arg0: i32, %arg1: i32, %arg2: i32) -> (i32, i32) {
    %c0_i32 = arith.constant 0 : i32
    %c0_i32_0 = arith.constant 0 : i32
    return %c0_i32, %arg1 : i32, i32
  }
  func.func @transform_3(%arg0: i32, %arg1: i32, %arg2: i32) -> (i32, i32) {
    %c0_i32 = arith.constant 0 : i32
    %c0_i32_0 = arith.constant 0 : i32
    return %c0_i32, %arg1 : i32, i32
  }
  func.func @transform_4(%arg0: i32, %arg1: i32, %arg2: i32) -> (i32, i32) {
    %c0_i32 = arith.constant 0 : i32
    return %arg0, %arg1 : i32, i32
  }
}

module attributes {stable_mosaic.version = 11 : i64} {
  func.func @_avgpool_fc_kernel(%arg0: memref<2x1x128xbf16, #tpu.memory_space<vmem>>, %arg1: memref<128x128xbf16, #tpu.memory_space<vmem>>, %arg2: memref<1x128xf32, #tpu.memory_space<vmem>>, %arg3: memref<2x128xf32, #tpu.memory_space<vmem>>) attributes {dimension_semantics = [], scalar_prefetch = 0 : i64, scratch_operands = 0 : i64, tpu.core_type = #tpu.core_type<tc>} {
    %c0 = arith.constant 0 : index
    %c0_0 = arith.constant 0 : index
    %c0_1 = arith.constant 0 : index
    %0 = vector.load %arg0[%c0, %c0_0, %c0_1] : memref<2x1x128xbf16, #tpu.memory_space<vmem>>, vector<2x1x128xbf16>
    %1 = arith.extf %0 : vector<2x1x128xbf16> to vector<2x1x128xf32>
    %cst = arith.constant dense<0.000000e+00> : vector<2x128xf32>
    %2 = vector.multi_reduction <add>, %1, %cst [1] : vector<2x1x128xf32> to vector<2x128xf32>
    %cst_2 = arith.constant 1.000000e+00 : f32
    %3 = vector.broadcast %cst_2 : f32 to vector<2x128xf32>
    %4 = arith.divf %2, %3 : vector<2x128xf32>
    %5 = arith.truncf %4 : vector<2x128xf32> to vector<2x128xbf16>
    %c0_3 = arith.constant 0 : index
    %c0_4 = arith.constant 0 : index
    %6 = vector.load %arg1[%c0_3, %c0_4] : memref<128x128xbf16, #tpu.memory_space<vmem>>, vector<128x128xbf16>
    %cst_5 = arith.constant dense<0.000000e+00> : vector<2x128xf32>
    %7 = tpu.matmul %5, %6, %cst_5 {dimension_numbers = #tpu.dot_dimension_numbers<[1], [0], [0], [1], [0, 0, 1, 1], [], []>} : vector<2x128xbf16>, vector<128x128xbf16>, vector<2x128xf32> -> vector<2x128xf32>
    %c0_6 = arith.constant 0 : index
    %c0_7 = arith.constant 0 : index
    %8 = vector.load %arg2[%c0_6, %c0_7] : memref<1x128xf32, #tpu.memory_space<vmem>>, vector<1x128xf32>
    %9 = vector.broadcast %8 : vector<1x128xf32> to vector<2x128xf32>
    %10 = arith.addf %7, %9 : vector<2x128xf32>
    %c0_8 = arith.constant 0 : index
    %c0_9 = arith.constant 0 : index
    %11 = vector.load %arg3[%c0_8, %c0_9] : memref<2x128xf32, #tpu.memory_space<vmem>>, vector<2x128xf32>
    tpu.vector_store %arg3[%c0_8, %c0_9], %10 {strides = array<i32>} : memref<2x128xf32, #tpu.memory_space<vmem>>, vector<2x128xf32>,
    return
  }
}

</mosaic_0001>

<bundles_post_ra>
// kernel: _lambda_.22
= control target key start
LH: loop header
LB: loop body
LE: loop exit
PB: predicated region body
PF: predicated region fallthrough
CT: control target
= control target key end

     0   :  { %s2820_s1 = inlined_call_operand.vmem [shape: bf16[256,128], index: 1, kind: input, shape index: {}]   ;;  %s2821_s0 = inlined_call_operand.vmem [shape: bf16[512,256], index: 0, kind: input, shape index: {}]   ;;  %s2822_s2 = inlined_call_operand.vmem [shape: f32[1,128], index: 2, kind: input, shape index: {}]   ;;  %s2823_s3 = inlined_call_operand.vmem [shape: f32[1,128], index: 3, kind: input, shape index: {}]   ;;  %s2824_s4 = inlined_call_operand.vmem [shape: bf16[512,128], index: 4, kind: output, shape index: {}]  }
   0x1   :  { %v1917_v0 = vld [vmem:[%s2820_s1 + $0x38] sm:$0xff]  ;;  %v1916_v2 = vld [vmem:[%s2820_s1 + $0x30] sm:$0xff]  ;;  %v1915_v4 = vld [vmem:[%s2820_s1 + $0x28] sm:$0xff] }
   0x2   :  { %v1925_v1 = vld [vmem:[%s2820_s1 + $0x78] sm:$0xff]  ;;  %661 = vmatpush.bf16.msra.mxu0 %v1917_v0  ;;  %2117 = vmatpush.bf16.msra.mxu2 %v1917_v0  ;;  %v1924_v3 = vld [vmem:[%s2820_s1 + $0x70] sm:$0xff]  ;;  %v1923_v5 = vld [vmem:[%s2820_s1 + $0x68] sm:$0xff] }
   0x3   :  { %830 = vmatpush.bf16.msra.mxu1 %v1925_v1  ;;  %2125 = vmatpush.bf16.msra.mxu3 %v1925_v1  ;;  %v1914_v6 = vld [vmem:[%s2820_s1 + $0x20] sm:$0xff]  ;;  %v1913_v8 = vld [vmem:[%s2820_s1 + $0x18] sm:$0xff]  ;;  %v1912_v10 = vld [vmem:[%s2820_s1 + $0x10] sm:$0xff] }
   0x4   :  { %v1922_v7 = vld [vmem:[%s2820_s1 + $0x60] sm:$0xff]  ;;  %v1921_v9 = vld [vmem:[%s2820_s1 + $0x58] sm:$0xff]  ;;  %v1920_v11 = vld [vmem:[%s2820_s1 + $0x50] sm:$0xff] }
   0x5   :  { %v1911_v12 = vld [vmem:[%s2820_s1 + $0x8] sm:$0xff]  ;;  %v1910_v14 = vld [vmem:[%s2820_s1] sm:$0xff]  ;;  %v1536_v28 = vld [vmem:[%s2821_s0 + $0x10] sm:$0xf] }
   0x6   :  { %662 = vmatpush.bf16.msra.mxu0 %v1916_v2  ;;  %2118 = vmatpush.bf16.msra.mxu2 %v1916_v2  ;;  %v1919_v13 = vld [vmem:[%s2820_s1 + $0x48] sm:$0xff]  ;;  %v1918_v15 = vld [vmem:[%s2820_s1 + $0x40] sm:$0xff]  ;;  %v1849_v29 = vld [vmem:[%s2821_s0 + $0x14] sm:$0xf0] }
   0x7   :  { %831 = vmatpush.bf16.msra.mxu1 %v1924_v3  ;;  %2126 = vmatpush.bf16.msra.mxu3 %v1924_v3  ;;  %v1528_v16 = vld [vmem:[%s2821_s0] sm:$0xf]  ;;  %v1847_v17 = vld [vmem:[%s2821_s0 + $0x4] sm:$0xf0]  ;;  %v1846_v20 = vld [vmem:[%s2821_s0 + $0x4] sm:$0xf]  ;;  %v1537_v36 = vor.u32 %v1849_v29, %v1536_v28 }
   0x8   :  { %v1656_v18 = vld [vmem:[%s2821_s0 + $0x100] sm:$0xf]  ;;  %v1879_v19 = vld [vmem:[%s2821_s0 + $0x104] sm:$0xf0]  ;;  %v1530_v21 = vld [vmem:[%s2821_s0 + $0x8] sm:$0xf0]  ;;  %v1529_v24 = vor.u32 %v1847_v17, %v1528_v16 }
   0x9   :  { %v1878_v22 = vld [vmem:[%s2821_s0 + $0x104] sm:$0xf]  ;;  %v1658_v23 = vld [vmem:[%s2821_s0 + $0x108] sm:$0xf0]  ;;  %v1657_v25 = vor.u32 %v1879_v19, %v1656_v18  ;;  %v1533_v26 = vor.u32 %v1846_v20, %v1530_v21  ;;  %v1664_v30 = vld [vmem:[%s2821_s0 + $0x110] sm:$0xf] }
   0xa   :  { %663 = vmatpush.bf16.msra.mxu0 %v1915_v4  ;;  %2119 = vmatpush.bf16.msra.mxu2 %v1915_v4  ;;  %v1661_v27 = vor.u32 %v1878_v22, %v1658_v23  ;;  %v1881_v31 = vld [vmem:[%s2821_s0 + $0x114] sm:$0xf0]  ;;  %v1848_v32 = vld [vmem:[%s2821_s0 + $0x14] sm:$0xf]  ;;  %v1538_v33 = vld [vmem:[%s2821_s0 + $0x18] sm:$0xf0] }
   0xb   :  { %832 = vmatpush.bf16.msra.mxu1 %v1923_v5  ;;  %2127 = vmatpush.bf16.msra.mxu3 %v1923_v5  ;;  %v1880_v34 = vld [vmem:[%s2821_s0 + $0x114] sm:$0xf]  ;;  %v1666_v35 = vld [vmem:[%s2821_s0 + $0x118] sm:$0xf0]  ;;  %v1665_v37 = vor.u32 %v1881_v31, %v1664_v30  ;;  %v1541_v38 = vor.u32 %v1848_v32, %v1538_v33  ;;  %v1544_v40 = vld [vmem:[%s2821_s0 + $0x20] sm:$0xf] }
   0xc   :  { %v1669_v39 = vor.u32 %v1880_v34, %v1666_v35  ;;  %v1851_v41 = vld [vmem:[%s2821_s0 + $0x24] sm:$0xf0]  ;;  %v1672_v42 = vld [vmem:[%s2821_s0 + $0x120] sm:$0xf]  ;;  %v1850_v44 = vld [vmem:[%s2821_s0 + $0x24] sm:$0xf] }
   0xd   :  { %v1883_v43 = vld [vmem:[%s2821_s0 + $0x124] sm:$0xf0]  ;;  %v1546_v45 = vld [vmem:[%s2821_s0 + $0x28] sm:$0xf0]  ;;  %v1882_v46 = vld [vmem:[%s2821_s0 + $0x124] sm:$0xf]  ;;  %v1545_v48 = vor.u32 %v1851_v41, %v1544_v40 }
   0xe   :  { %664 = vmatpush.bf16.msra.mxu0 %v1914_v6  ;;  %2120 = vmatpush.bf16.msra.mxu2 %v1914_v6  ;;  %v1674_v47 = vld [vmem:[%s2821_s0 + $0x128] sm:$0xf0]  ;;  %v1673_v49 = vor.u32 %v1883_v43, %v1672_v42  ;;  %v1549_v50 = vor.u32 %v1850_v44, %v1546_v45  ;;  %v1552_v52 = vld [vmem:[%s2821_s0 + $0x30] sm:$0xf]  ;;  %v1853_v53 = vld [vmem:[%s2821_s0 + $0x34] sm:$0xf0] }
   0xf   :  { %833 = vmatpush.bf16.msra.mxu1 %v1922_v7  ;;  %2128 = vmatpush.bf16.msra.mxu3 %v1922_v7  ;;  %v1677_v51 = vor.u32 %v1882_v46, %v1674_v47  ;;  %v1680_v54 = vld [vmem:[%s2821_s0 + $0x130] sm:$0xf]  ;;  %v1885_v55 = vld [vmem:[%s2821_s0 + $0x134] sm:$0xf0]  ;;  %v1852_v56 = vld [vmem:[%s2821_s0 + $0x34] sm:$0xf]  ;;  %v1553_v60 = vor.u32 %v1853_v53, %v1552_v52 }
  0x10   :  { %v1554_v57 = vld [vmem:[%s2821_s0 + $0x38] sm:$0xf0]  ;;  %v1884_v58 = vld [vmem:[%s2821_s0 + $0x134] sm:$0xf]  ;;  %v1681_v61 = vor.u32 %v1885_v55, %v1680_v54  ;;  %v1560_v0 = vld [vmem:[%s2821_s0 + $0x40] sm:$0xf] }
  0x11   :  { %v1682_v59 = vld [vmem:[%s2821_s0 + $0x138] sm:$0xf0]  ;;  %v1557_v62 = vor.u32 %v1852_v56, %v1554_v57  ;;  %v1855_v1 = vld [vmem:[%s2821_s0 + $0x44] sm:$0xf0]  ;;  %v1688_v2 = vld [vmem:[%s2821_s0 + $0x140] sm:$0xf] }
  0x12   :  { %665 = vmatpush.bf16.msra.mxu0 %v1913_v8  ;;  %2121 = vmatpush.bf16.msra.mxu2 %v1913_v8  ;;  %v1685_v63 = vor.u32 %v1884_v58, %v1682_v59  ;;  %v1887_v3 = vld [vmem:[%s2821_s0 + $0x144] sm:$0xf0]  ;;  %v1854_v4 = vld [vmem:[%s2821_s0 + $0x44] sm:$0xf]  ;;  %v1562_v5 = vld [vmem:[%s2821_s0 + $0x48] sm:$0xf0]  ;;  %v1561_v8 = vor.u32 %v1855_v1, %v1560_v0 }
  0x13   :  { %834 = vmatpush.bf16.msra.mxu1 %v1921_v9  ;;  %2129 = vmatpush.bf16.msra.mxu3 %v1921_v9  ;;  %v1886_v6 = vld [vmem:[%s2821_s0 + $0x144] sm:$0xf]  ;;  %v1690_v7 = vld [vmem:[%s2821_s0 + $0x148] sm:$0xf0]  ;;  %v1689_v9 = vor.u32 %v1887_v3, %v1688_v2  ;;  %v1856_v16 = vld [vmem:[%s2821_s0 + $0x54] sm:$0xf] }
  0x14   :  { %v1570_v17 = vld [vmem:[%s2821_s0 + $0x58] sm:$0xf0]  ;;  %v1888_v18 = vld [vmem:[%s2821_s0 + $0x154] sm:$0xf]  ;;  %v1858_v28 = vld [vmem:[%s2821_s0 + $0x64] sm:$0xf] }
  0x15   :  { %v1698_v19 = vld [vmem:[%s2821_s0 + $0x158] sm:$0xf0]  ;;  %v1573_v22 = vor.u32 %v1856_v16, %v1570_v17  ;;  %v1578_v29 = vld [vmem:[%s2821_s0 + $0x68] sm:$0xf0]  ;;  %v1890_v30 = vld [vmem:[%s2821_s0 + $0x164] sm:$0xf] }
  0x16   :  { %666 = vmatpush.bf16.msra.mxu0 %v1912_v10  ;;  %2122 = vmatpush.bf16.msra.mxu2 %v1912_v10  ;;  %v1565_v10 = vor.u32 %v1854_v4, %v1562_v5  ;;  %v1701_v23 = vor.u32 %v1888_v18, %v1698_v19  ;;  %v1706_v31 = vld [vmem:[%s2821_s0 + $0x168] sm:$0xf0]  ;;  %v1581_v34 = vor.u32 %v1858_v28, %v1578_v29  ;;  %v1860_v40 = vld [vmem:[%s2821_s0 + $0x74] sm:$0xf]  ;;  %v1586_v41 = vld [vmem:[%s2821_s0 + $0x78] sm:$0xf0] }
  0x17   :  { %835 = vmatpush.bf16.msra.mxu1 %v1920_v11  ;;  %2130 = vmatpush.bf16.msra.mxu3 %v1920_v11  ;;  %v1693_v11 = vor.u32 %v1886_v6, %v1690_v7  ;;  %v1709_v35 = vor.u32 %v1890_v30, %v1706_v31  ;;  %v1892_v42 = vld [vmem:[%s2821_s0 + $0x174] sm:$0xf]  ;;  %v1714_v43 = vld [vmem:[%s2821_s0 + $0x178] sm:$0xf0]  ;;  %v1589_v46 = vor.u32 %v1860_v40, %v1586_v41  ;;  %v1862_v52 = vld [vmem:[%s2821_s0 + $0x84] sm:$0xf] }
  0x18   :  { %v1717_v47 = vor.u32 %v1892_v42, %v1714_v43  ;;  %v1594_v53 = vld [vmem:[%s2821_s0 + $0x88] sm:$0xf0]  ;;  %v1894_v54 = vld [vmem:[%s2821_s0 + $0x184] sm:$0xf]  ;;  %v2435_v3 = vld [vmem:[%s2823_s3] ss:$0 sm:$0xff] }
  0x19   :  { %v1722_v55 = vld [vmem:[%s2821_s0 + $0x188] sm:$0xf0]  ;;  %v1597_v59 = vor.u32 %v1862_v52, %v1594_v53  ;;  %v1896_v16 = vld [vmem:[%s2821_s0 + $0x194] sm:$0xf]  ;;  %v1730_v17 = vld [vmem:[%s2821_s0 + $0x198] sm:$0xf0] }
  0x1a   :  { %667 = vmatpush.bf16.msra.mxu0 %v1911_v12  ;;  %2123 = vmatpush.bf16.msra.mxu2 %v1911_v12  ;;  %v1568_v12 = vld [vmem:[%s2821_s0 + $0x50] sm:$0xf]  ;;  %v1733_v29 = vor.u32 %v1896_v16, %v1730_v17  ;;  %v1866_v52 = vld [vmem:[%s2821_s0 + $0xa4] sm:$0xf]  ;;  %v1610_v53 = vld [vmem:[%s2821_s0 + $0xa8] sm:$0xf0] }
  0x1b   :  { %836 = vmatpush.bf16.msra.mxu1 %v1919_v13  ;;  %2131 = vmatpush.bf16.msra.mxu3 %v1919_v13  ;;  %v1857_v13 = vld [vmem:[%s2821_s0 + $0x54] sm:$0xf0] }
  0x1c   :  { %v1569_v20 = vor.u32 %v1857_v13, %v1568_v12  ;;  %v1897_v13 = vld [vmem:[%s2821_s0 + $0x194] sm:$0xf0] }
  0x1e   :  { %668 = vmatpush.bf16.msra.mxu0 %v1910_v14  ;;  %2124 = vmatpush.bf16.msra.mxu2 %v1910_v14  ;;  %v1696_v14 = vld [vmem:[%s2821_s0 + $0x150] sm:$0xf] }
  0x1f   :  { %837 = vmatpush.bf16.msra.mxu1 %v1918_v15  ;;  %2132 = vmatpush.bf16.msra.mxu3 %v1918_v15  ;;  %v1889_v15 = vld [vmem:[%s2821_s0 + $0x154] sm:$0xf0] }
  0x20   :  { %v1697_v21 = vor.u32 %v1889_v15, %v1696_v14  ;;  %v1864_v14 = vld [vmem:[%s2821_s0 + $0x94] sm:$0xf]  ;;  %v1602_v15 = vld [vmem:[%s2821_s0 + $0x98] sm:$0xf0] }
  0x21   :  { %669 = vmatmul.bf16.vlgmr.msra.gmra.mxu0 %v1529_v24  ;;  %749 = vmatmul.bf16.vlgmr.msra.gmra.mxu2 %v1657_v25  ;;  %v1576_v24 = vld [vmem:[%s2821_s0 + $0x60] sm:$0xf]  ;;  %v1859_v25 = vld [vmem:[%s2821_s0 + $0x64] sm:$0xf0] }
  0x22   :  { %838 = vmatmul.bf16.vlgmr.msra.gmra.mxu1 %v1533_v26  ;;  %918 = vmatmul.bf16.vlgmr.msra.gmra.mxu3 %v1661_v27  ;;  %v1704_v26 = vld [vmem:[%s2821_s0 + $0x160] sm:$0xf]  ;;  %v1891_v27 = vld [vmem:[%s2821_s0 + $0x164] sm:$0xf0]  ;;  %v1577_v32 = vor.u32 %v1859_v25, %v1576_v24  ;;  %v1605_v24 = vor.u32 %v1864_v14, %v1602_v15 }
  0x23   :  { %v1705_v33 = vor.u32 %v1891_v27, %v1704_v26 }
  0x31   :  { %674 = vmatmul.bf16.gmra.mxu0 %v1537_v36  ;;  %754 = vmatmul.bf16.gmra.mxu2 %v1665_v37  ;;  %v1584_v36 = vld [vmem:[%s2821_s0 + $0x70] sm:$0xf]  ;;  %v1861_v37 = vld [vmem:[%s2821_s0 + $0x74] sm:$0xf0] }
  0x32   :  { %843 = vmatmul.bf16.gmra.mxu1 %v1541_v38  ;;  %923 = vmatmul.bf16.gmra.mxu3 %v1669_v39  ;;  %v1712_v38 = vld [vmem:[%s2821_s0 + $0x170] sm:$0xf]  ;;  %v1893_v39 = vld [vmem:[%s2821_s0 + $0x174] sm:$0xf0]  ;;  %v1585_v44 = vor.u32 %v1861_v37, %v1584_v36 }
  0x33   :  { %v1713_v45 = vor.u32 %v1893_v39, %v1712_v38 }
  0x41   :  { %679 = vmatmul.bf16.gmra.mxu0 %v1545_v48  ;;  %759 = vmatmul.bf16.gmra.mxu2 %v1673_v49  ;;  %v1592_v48 = vld [vmem:[%s2821_s0 + $0x80] sm:$0xf]  ;;  %v1863_v49 = vld [vmem:[%s2821_s0 + $0x84] sm:$0xf0] }
  0x42   :  { %848 = vmatmul.bf16.gmra.mxu1 %v1549_v50  ;;  %928 = vmatmul.bf16.gmra.mxu3 %v1677_v51  ;;  %v1720_v50 = vld [vmem:[%s2821_s0 + $0x180] sm:$0xf]  ;;  %v1895_v51 = vld [vmem:[%s2821_s0 + $0x184] sm:$0xf0]  ;;  %v1593_v56 = vor.u32 %v1863_v49, %v1592_v48 }
  0x43   :  { %v1721_v57 = vor.u32 %v1895_v51, %v1720_v50  ;;  %v1736_v48 = vld [vmem:[%s2821_s0 + $0x1a0] sm:$0xf]  ;;  %v1899_v51 = vld [vmem:[%s2821_s0 + $0x1a4] sm:$0xf0] }
  0x51   :  { %684 = vmatmul.bf16.gmra.mxu0 %v1553_v60  ;;  %764 = vmatmul.bf16.gmra.mxu2 %v1681_v61  ;;  %v1725_v60 = vor.u32 %v1894_v54, %v1722_v55  ;;  %v1898_v54 = vld [vmem:[%s2821_s0 + $0x1a4] sm:$0xf]  ;;  %v1738_v55 = vld [vmem:[%s2821_s0 + $0x1a8] sm:$0xf0] }
  0x52   :  { %853 = vmatmul.bf16.gmra.mxu1 %v1557_v62  ;;  %933 = vmatmul.bf16.gmra.mxu3 %v1685_v63  ;;  %v2429_v63 = vld [vmem:[%s2822_s2] ss:$0 sm:$0xff] }
  0x61   :  { %689 = vmatmul.bf16.gmra.mxu0 %v1561_v8  ;;  %769 = vmatmul.bf16.gmra.mxu2 %v1689_v9  ;;  %v1600_v8 = vld [vmem:[%s2821_s0 + $0x90] sm:$0xf]  ;;  %v1865_v9 = vld [vmem:[%s2821_s0 + $0x94] sm:$0xf0] }
  0x62   :  { %858 = vmatmul.bf16.gmra.mxu1 %v1565_v10  ;;  %938 = vmatmul.bf16.gmra.mxu3 %v1693_v11  ;;  %v1728_v10 = vld [vmem:[%s2821_s0 + $0x190] sm:$0xf] }
  0x71   :  { %694 = vmatmul.bf16.gmra.mxu0 %v1569_v20  ;;  %774 = vmatmul.bf16.gmra.mxu2 %v1697_v21 }
  0x72   :  { %863 = vmatmul.bf16.gmra.mxu1 %v1573_v22  ;;  %943 = vmatmul.bf16.gmra.mxu3 %v1701_v23  ;;  %v1601_v22 = vor.u32 %v1865_v9, %v1600_v8  ;;  %v1729_v23 = vor.u32 %v1897_v13, %v1728_v10 }
  0x81   :  { %699 = vmatmul.bf16.gmra.mxu0 %v1577_v32  ;;  %779 = vmatmul.bf16.gmra.mxu2 %v1705_v33 }
  0x82   :  { %868 = vmatmul.bf16.gmra.mxu1 %v1581_v34  ;;  %948 = vmatmul.bf16.gmra.mxu3 %v1709_v35 }
  0x91   :  { %704 = vmatmul.bf16.gmra.mxu0 %v1585_v44  ;;  %784 = vmatmul.bf16.gmra.mxu2 %v1713_v45 }
  0x92   :  { %873 = vmatmul.bf16.gmra.mxu1 %v1589_v46  ;;  %953 = vmatmul.bf16.gmra.mxu3 %v1717_v47  ;;  %v1608_v46 = vld [vmem:[%s2821_s0 + $0xa0] sm:$0xf]  ;;  %v1867_v47 = vld [vmem:[%s2821_s0 + $0xa4] sm:$0xf0] }
  0x9e   :  { %v670_v58 = vpop.f32.mrf.mxu0 }
  0x9f   :  { %v839_v61 = vpop.f32.mrf.mxu1 }
  0xa0   :  { %v840_v62 = vadd.f32 %v839_v61, %v670_v58  ;;  %v1737_v61 = vor.u32 %v1899_v51, %v1736_v48 }
  0xa1   :  { %709 = vmatmul.bf16.gmra.mxu0 %v1593_v56  ;;  %789 = vmatmul.bf16.gmra.mxu2 %v1721_v57 }
  0xa2   :  { %878 = vmatmul.bf16.gmra.mxu1 %v1597_v59  ;;  %958 = vmatmul.bf16.gmra.mxu3 %v1725_v60  ;;  %v1198_v2 = vmul.f32 %v2429_v63, %v840_v62  ;;  %v1609_v60 = vor.u32 %v1867_v47, %v1608_v46  ;;  %v1613_v62 = vor.u32 %v1866_v52, %v1610_v53 }
  0xa4   :  { %v750_v0 = vpop.f32.mrf.mxu2  ;;  %v1266_v11 = vadd.f32 %v2435_v3, %v1198_v2 }
  0xa5   :  { %v919_v1 = vpop.f32.mrf.mxu3 }
  0xa6   :  { %v672_v4 = vpop.f32.mrf.mxu0  ;;  %v920_v6 = vadd.f32 %v919_v1, %v750_v0  ;;  %v1330_v25 = vmax.f32 %v1266_v11, 0.0 }
  0xa7   :  { %v841_v5 = vpop.f32.mrf.mxu1 }
  0xa8   :  { %v842_v7 = vadd.f32 %v841_v5, %v672_v4  ;;  %v1230_v18 = vmul.f32 %v2429_v63, %v920_v6  ;;  %v1741_v5 = vor.u32 %v1898_v54, %v1738_v55 }
  0xaa   :  { %v1199_v12 = vmul.f32 %v2429_v63, %v842_v7  ;;  %v1298_v31 = vadd.f32 %v2435_v3, %v1230_v18 }
  0xac   :  { %v1267_v19 = vadd.f32 %v2435_v3, %v1199_v12  ;;  %v752_v20 = vpop.f32.mrf.mxu2  ;;  %v1362_v36 = vmax.f32 %v1298_v31, 0.0  ;;  %v1746_v31 = vld [vmem:[%s2821_s0 + $0x1b8] sm:$0xf0] }
  0xad   :  { %v921_v21 = vpop.f32.mrf.mxu3 }
  0xae   :  { %v1331_v26 = vmax.f32 %v1267_v19, 0.0  ;;  %v922_v27 = vadd.f32 %v921_v21, %v752_v20  ;;  %v675_v28 = vpop.f32.mrf.mxu0 }
  0xaf   :  { %v844_v30 = vpop.f32.mrf.mxu1 }
  0xb0   :  { %v1929_v32 = vpack.c.bf16 %v1331_v26, %v1330_v25  ;;  %v1231_v33 = vmul.f32 %v2429_v63, %v922_v27  ;;  %v845_v35 = vadd.f32 %v844_v30, %v675_v28  ;;  %v1901_v27 = vld [vmem:[%s2821_s0 + $0x1b4] sm:$0xf0]  ;;  %v1868_v28 = vld [vmem:[%s2821_s0 + $0xb4] sm:$0xf] }
  0xb1   :  { %714 = vmatmul.bf16.gmra.mxu0 %v1601_v22  ;;  %794 = vmatmul.bf16.gmra.mxu2 %v1729_v23  ;;  %v1616_v22 = vld [vmem:[%s2821_s0 + $0xb0] sm:$0xf]  ;;  %v1869_v23 = vld [vmem:[%s2821_s0 + $0xb4] sm:$0xf0]  ;;  %v1900_v30 = vld [vmem:[%s2821_s0 + $0x1b4] sm:$0xf] }
  0xb2   :  { %1930 = vst [vmem:[%s2824_s4] sm:$0xff] %v1929_v32   ;;  %v1299_v34 = vadd.f32 %v2435_v3, %v1231_v33  ;;  %883 = vmatmul.bf16.gmra.mxu1 %v1605_v24  ;;  %963 = vmatmul.bf16.gmra.mxu3 %v1733_v29  ;;  %v1200_v41 = vmul.f32 %v2429_v63, %v845_v35  ;;  %v1744_v24 = vld [vmem:[%s2821_s0 + $0x1b0] sm:$0xf]  ;;  %v1618_v29 = vld [vmem:[%s2821_s0 + $0xb8] sm:$0xf0] }
  0xb4   :  { %v1363_v37 = vmax.f32 %v1299_v34, 0.0  ;;  %v755_v38 = vpop.f32.mrf.mxu2  ;;  %v1268_v49 = vadd.f32 %v2435_v3, %v1200_v41 }
  0xb5   :  { %v924_v39 = vpop.f32.mrf.mxu3 }
  0xb6   :  { %v2009_v40 = vpack.c.bf16 %v1363_v37, %v1362_v36  ;;  %v677_v42 = vpop.f32.mrf.mxu0  ;;  %v925_v44 = vadd.f32 %v924_v39, %v755_v38  ;;  %v1332_v0 = vmax.f32 %v1268_v49, 0.0  ;;  %v1617_v36 = vor.u32 %v1869_v23, %v1616_v22 }
  0xb7   :  { %v846_v43 = vpop.f32.mrf.mxu1  ;;  %v1745_v37 = vor.u32 %v1901_v27, %v1744_v24  ;;  %v1621_v38 = vor.u32 %v1868_v28, %v1618_v29 }
  0xb8   :  { %2101 = vst [vmem:[%s2824_s4 + $0x80] sm:$0xff] %v2009_v40   ;;  %v847_v45 = vadd.f32 %v846_v43, %v677_v42  ;;  %v1232_v56 = vmul.f32 %v2429_v63, %v925_v44  ;;  %v1749_v43 = vor.u32 %v1900_v30, %v1746_v31 }
  0xba   :  { %v1201_v50 = vmul.f32 %v2429_v63, %v847_v45  ;;  %v1300_v7 = vadd.f32 %v2435_v3, %v1232_v56 }
  0xbc   :  { %v1269_v57 = vadd.f32 %v2435_v3, %v1201_v50  ;;  %v757_v58 = vpop.f32.mrf.mxu2  ;;  %v1364_v12 = vmax.f32 %v1300_v7, 0.0  ;;  %v1754_v7 = vld [vmem:[%s2821_s0 + $0x1c8] sm:$0xf0] }
  0xbd   :  { %v926_v59 = vpop.f32.mrf.mxu3 }
  0xbe   :  { %v1333_v1 = vmax.f32 %v1269_v57, 0.0  ;;  %v927_v2 = vadd.f32 %v926_v59, %v757_v58  ;;  %v680_v4 = vpop.f32.mrf.mxu0 }
  0xbf   :  { %v849_v6 = vpop.f32.mrf.mxu1 }
  0xc0   :  { %v1934_v8 = vpack.c.bf16 %v1333_v1, %v1332_v0  ;;  %v1233_v9 = vmul.f32 %v2429_v63, %v927_v2  ;;  %v850_v11 = vadd.f32 %v849_v6, %v680_v4  ;;  %v1903_v2 = vld [vmem:[%s2821_s0 + $0x1c4] sm:$0xf0]  ;;  %v1870_v4 = vld [vmem:[%s2821_s0 + $0xc4] sm:$0xf] }
  0xc1   :  { %719 = vmatmul.bf16.gmra.mxu0 %v1609_v60  ;;  %799 = vmatmul.bf16.gmra.mxu2 %v1737_v61  ;;  %v1624_v60 = vld [vmem:[%s2821_s0 + $0xc0] sm:$0xf]  ;;  %v1871_v61 = vld [vmem:[%s2821_s0 + $0xc4] sm:$0xf0]  ;;  %v1902_v6 = vld [vmem:[%s2821_s0 + $0x1c4] sm:$0xf] }
  0xc2   :  { %2086 = vst [vmem:[%s2824_s4 + $0x8] sm:$0xff] %v1934_v8   ;;  %v1301_v10 = vadd.f32 %v2435_v3, %v1233_v9  ;;  %888 = vmatmul.bf16.gmra.mxu1 %v1613_v62  ;;  %968 = vmatmul.bf16.gmra.mxu3 %v1741_v5  ;;  %v1202_v17 = vmul.f32 %v2429_v63, %v850_v11  ;;  %v1752_v62 = vld [vmem:[%s2821_s0 + $0x1c0] sm:$0xf]  ;;  %v1626_v5 = vld [vmem:[%s2821_s0 + $0xc8] sm:$0xf0] }
  0xc4   :  { %v1365_v13 = vmax.f32 %v1301_v10, 0.0  ;;  %v760_v14 = vpop.f32.mrf.mxu2  ;;  %v1270_v25 = vadd.f32 %v2435_v3, %v1202_v17 }
  0xc5   :  { %v929_v15 = vpop.f32.mrf.mxu3 }
  0xc6   :  { %v2014_v16 = vpack.c.bf16 %v1365_v13, %v1364_v12  ;;  %v682_v18 = vpop.f32.mrf.mxu0  ;;  %v930_v20 = vadd.f32 %v929_v15, %v760_v14  ;;  %v1334_v39 = vmax.f32 %v1270_v25, 0.0  ;;  %v1625_v12 = vor.u32 %v1871_v61, %v1624_v60 }
  0xc7   :  { %v851_v19 = vpop.f32.mrf.mxu1  ;;  %v1753_v13 = vor.u32 %v1903_v2, %v1752_v62  ;;  %v1629_v14 = vor.u32 %v1870_v4, %v1626_v5 }
  0xc8   :  { %2102 = vst [vmem:[%s2824_s4 + $0x88] sm:$0xff] %v2014_v16   ;;  %v852_v21 = vadd.f32 %v851_v19, %v682_v18  ;;  %v1234_v32 = vmul.f32 %v2429_v63, %v930_v20  ;;  %v1757_v19 = vor.u32 %v1902_v6, %v1754_v7 }
  0xca   :  { %v1203_v26 = vmul.f32 %v2429_v63, %v852_v21  ;;  %v1302_v45 = vadd.f32 %v2435_v3, %v1234_v32 }
  0xcc   :  { %v1271_v33 = vadd.f32 %v2435_v3, %v1203_v26  ;;  %v762_v34 = vpop.f32.mrf.mxu2  ;;  %v1366_v50 = vmax.f32 %v1302_v45, 0.0  ;;  %v1762_v45 = vld [vmem:[%s2821_s0 + $0x1d8] sm:$0xf0] }
  0xcd   :  { %v931_v35 = vpop.f32.mrf.mxu3 }
  0xce   :  { %v1335_v40 = vmax.f32 %v1271_v33, 0.0  ;;  %v932_v41 = vadd.f32 %v931_v35, %v762_v34  ;;  %v685_v42 = vpop.f32.mrf.mxu0 }
  0xcf   :  { %v854_v44 = vpop.f32.mrf.mxu1 }
  0xd0   :  { %v1939_v46 = vpack.c.bf16 %v1335_v40, %v1334_v39  ;;  %v1235_v47 = vmul.f32 %v2429_v63, %v932_v41  ;;  %v855_v49 = vadd.f32 %v854_v44, %v685_v42  ;;  %v1905_v41 = vld [vmem:[%s2821_s0 + $0x1d4] sm:$0xf0]  ;;  %v1872_v42 = vld [vmem:[%s2821_s0 + $0xd4] sm:$0xf] }
  0xd1   :  { %724 = vmatmul.bf16.gmra.mxu0 %v1617_v36  ;;  %804 = vmatmul.bf16.gmra.mxu2 %v1745_v37  ;;  %v1632_v36 = vld [vmem:[%s2821_s0 + $0xd0] sm:$0xf]  ;;  %v1873_v37 = vld [vmem:[%s2821_s0 + $0xd4] sm:$0xf0]  ;;  %v1904_v44 = vld [vmem:[%s2821_s0 + $0x1d4] sm:$0xf] }
  0xd2   :  { %2087 = vst [vmem:[%s2824_s4 + $0x10] sm:$0xff] %v1939_v46   ;;  %v1303_v48 = vadd.f32 %v2435_v3, %v1235_v47  ;;  %893 = vmatmul.bf16.gmra.mxu1 %v1621_v38  ;;  %973 = vmatmul.bf16.gmra.mxu3 %v1749_v43  ;;  %v1204_v55 = vmul.f32 %v2429_v63, %v855_v49  ;;  %v1760_v38 = vld [vmem:[%s2821_s0 + $0x1d0] sm:$0xf]  ;;  %v1634_v43 = vld [vmem:[%s2821_s0 + $0xd8] sm:$0xf0] }
  0xd4   :  { %v1367_v51 = vmax.f32 %v1303_v48, 0.0  ;;  %v765_v52 = vpop.f32.mrf.mxu2  ;;  %v1272_v0 = vadd.f32 %v2435_v3, %v1204_v55 }
  0xd5   :  { %v934_v53 = vpop.f32.mrf.mxu3 }
  0xd6   :  { %v2019_v54 = vpack.c.bf16 %v1367_v51, %v1366_v50  ;;  %v687_v56 = vpop.f32.mrf.mxu0  ;;  %v935_v58 = vadd.f32 %v934_v53, %v765_v52  ;;  %v1336_v15 = vmax.f32 %v1272_v0, 0.0  ;;  %v1633_v50 = vor.u32 %v1873_v37, %v1632_v36 }
  0xd7   :  { %v856_v57 = vpop.f32.mrf.mxu1  ;;  %v1761_v51 = vor.u32 %v1905_v41, %v1760_v38  ;;  %v1637_v52 = vor.u32 %v1872_v42, %v1634_v43 }
  0xd8   :  { %2103 = vst [vmem:[%s2824_s4 + $0x90] sm:$0xff] %v2019_v54   ;;  %v857_v59 = vadd.f32 %v856_v57, %v687_v56  ;;  %v1236_v8 = vmul.f32 %v2429_v63, %v935_v58  ;;  %v1765_v57 = vor.u32 %v1904_v44, %v1762_v45 }
  0xda   :  { %v1205_v1 = vmul.f32 %v2429_v63, %v857_v59  ;;  %v1304_v21 = vadd.f32 %v2435_v3, %v1236_v8 }
  0xdc   :  { %v1273_v9 = vadd.f32 %v2435_v3, %v1205_v1  ;;  %v767_v10 = vpop.f32.mrf.mxu2  ;;  %v1368_v26 = vmax.f32 %v1304_v21, 0.0  ;;  %v1770_v21 = vld [vmem:[%s2821_s0 + $0x1e8] sm:$0xf0] }
  0xdd   :  { %v936_v11 = vpop.f32.mrf.mxu3 }
  0xde   :  { %v1337_v16 = vmax.f32 %v1273_v9, 0.0  ;;  %v937_v17 = vadd.f32 %v936_v11, %v767_v10  ;;  %v690_v18 = vpop.f32.mrf.mxu0 }
  0xdf   :  { %v859_v20 = vpop.f32.mrf.mxu1 }
  0xe0   :  { %v1944_v22 = vpack.c.bf16 %v1337_v16, %v1336_v15  ;;  %v1237_v23 = vmul.f32 %v2429_v63, %v937_v17  ;;  %v860_v25 = vadd.f32 %v859_v20, %v690_v18  ;;  %v1907_v17 = vld [vmem:[%s2821_s0 + $0x1e4] sm:$0xf0]  ;;  %v1874_v18 = vld [vmem:[%s2821_s0 + $0xe4] sm:$0xf] }
  0xe1   :  { %729 = vmatmul.bf16.gmra.mxu0 %v1625_v12  ;;  %809 = vmatmul.bf16.gmra.mxu2 %v1753_v13  ;;  %v1640_v12 = vld [vmem:[%s2821_s0 + $0xe0] sm:$0xf]  ;;  %v1875_v13 = vld [vmem:[%s2821_s0 + $0xe4] sm:$0xf0]  ;;  %v1906_v20 = vld [vmem:[%s2821_s0 + $0x1e4] sm:$0xf] }
  0xe2   :  { %2088 = vst [vmem:[%s2824_s4 + $0x18] sm:$0xff] %v1944_v22   ;;  %v1305_v24 = vadd.f32 %v2435_v3, %v1237_v23  ;;  %898 = vmatmul.bf16.gmra.mxu1 %v1629_v14  ;;  %978 = vmatmul.bf16.gmra.mxu3 %v1757_v19  ;;  %v1206_v31 = vmul.f32 %v2429_v63, %v860_v25  ;;  %v1768_v14 = vld [vmem:[%s2821_s0 + $0x1e0] sm:$0xf]  ;;  %v1642_v19 = vld [vmem:[%s2821_s0 + $0xe8] sm:$0xf0] }
  0xe4   :  { %v1369_v27 = vmax.f32 %v1305_v24, 0.0  ;;  %v770_v28 = vpop.f32.mrf.mxu2  ;;  %v1274_v39 = vadd.f32 %v2435_v3, %v1206_v31 }
  0xe5   :  { %v939_v29 = vpop.f32.mrf.mxu3 }
  0xe6   :  { %v2024_v30 = vpack.c.bf16 %v1369_v27, %v1368_v26  ;;  %v692_v32 = vpop.f32.mrf.mxu0  ;;  %v940_v34 = vadd.f32 %v939_v29, %v770_v28  ;;  %v1338_v53 = vmax.f32 %v1274_v39, 0.0  ;;  %v1641_v26 = vor.u32 %v1875_v13, %v1640_v12 }
  0xe7   :  { %v861_v33 = vpop.f32.mrf.mxu1  ;;  %v1769_v27 = vor.u32 %v1907_v17, %v1768_v14  ;;  %v1645_v28 = vor.u32 %v1874_v18, %v1642_v19 }
  0xe8   :  { %2104 = vst [vmem:[%s2824_s4 + $0x98] sm:$0xff] %v2024_v30   ;;  %v862_v35 = vadd.f32 %v861_v33, %v692_v32  ;;  %v1238_v46 = vmul.f32 %v2429_v63, %v940_v34  ;;  %v1773_v33 = vor.u32 %v1906_v20, %v1770_v21 }
  0xea   :  { %v1207_v40 = vmul.f32 %v2429_v63, %v862_v35  ;;  %v1306_v59 = vadd.f32 %v2435_v3, %v1238_v46 }
  0xec   :  { %v1275_v47 = vadd.f32 %v2435_v3, %v1207_v40  ;;  %v772_v48 = vpop.f32.mrf.mxu2  ;;  %v1370_v1 = vmax.f32 %v1306_v59, 0.0  ;;  %v1778_v59 = vld [vmem:[%s2821_s0 + $0x1f8] sm:$0xf0] }
  0xed   :  { %v941_v49 = vpop.f32.mrf.mxu3 }
  0xee   :  { %v1339_v54 = vmax.f32 %v1275_v47, 0.0  ;;  %v942_v55 = vadd.f32 %v941_v49, %v772_v48  ;;  %v695_v56 = vpop.f32.mrf.mxu0 }
  0xef   :  { %v864_v58 = vpop.f32.mrf.mxu1 }
  0xf0   :  { %v1949_v60 = vpack.c.bf16 %v1339_v54, %v1338_v53  ;;  %v1239_v61 = vmul.f32 %v2429_v63, %v942_v55  ;;  %v865_v0 = vadd.f32 %v864_v58, %v695_v56  ;;  %v1909_v55 = vld [vmem:[%s2821_s0 + $0x1f4] sm:$0xf0]  ;;  %v1876_v56 = vld [vmem:[%s2821_s0 + $0xf4] sm:$0xf] }
  0xf1   :  { %734 = vmatmul.bf16.gmra.mxu0 %v1633_v50  ;;  %814 = vmatmul.bf16.gmra.mxu2 %v1761_v51  ;;  %v1648_v50 = vld [vmem:[%s2821_s0 + $0xf0] sm:$0xf]  ;;  %v1877_v51 = vld [vmem:[%s2821_s0 + $0xf4] sm:$0xf0]  ;;  %v1908_v58 = vld [vmem:[%s2821_s0 + $0x1f4] sm:$0xf] }
  0xf2   :  { %2089 = vst [vmem:[%s2824_s4 + $0x20] sm:$0xff] %v1949_v60   ;;  %v1307_v62 = vadd.f32 %v2435_v3, %v1239_v61  ;;  %903 = vmatmul.bf16.gmra.mxu1 %v1637_v52  ;;  %983 = vmatmul.bf16.gmra.mxu3 %v1765_v57  ;;  %v1208_v7 = vmul.f32 %v2429_v63, %v865_v0  ;;  %v1776_v52 = vld [vmem:[%s2821_s0 + $0x1f0] sm:$0xf]  ;;  %v1650_v57 = vld [vmem:[%s2821_s0 + $0xf8] sm:$0xf0] }
  0xf4   :  { %v1371_v2 = vmax.f32 %v1307_v62, 0.0  ;;  %v775_v4 = vpop.f32.mrf.mxu2  ;;  %v1276_v15 = vadd.f32 %v2435_v3, %v1208_v7 }
  0xf5   :  { %v944_v5 = vpop.f32.mrf.mxu3 }
  0xf6   :  { %v2029_v6 = vpack.c.bf16 %v1371_v2, %v1370_v1  ;;  %v697_v8 = vpop.f32.mrf.mxu0  ;;  %v945_v10 = vadd.f32 %v944_v5, %v775_v4  ;;  %v1340_v29 = vmax.f32 %v1276_v15, 0.0  ;;  %v1649_v1 = vor.u32 %v1877_v51, %v1648_v50 }
  0xf7   :  { %v866_v9 = vpop.f32.mrf.mxu1  ;;  %v1777_v2 = vor.u32 %v1909_v55, %v1776_v52  ;;  %v1653_v4 = vor.u32 %v1876_v56, %v1650_v57 }
  0xf8   :  { %2105 = vst [vmem:[%s2824_s4 + $0xa0] sm:$0xff] %v2029_v6   ;;  %v867_v11 = vadd.f32 %v866_v9, %v697_v8  ;;  %v1240_v22 = vmul.f32 %v2429_v63, %v945_v10  ;;  %v1781_v9 = vor.u32 %v1908_v58, %v1778_v59 }
  0xfa   :  { %v1209_v16 = vmul.f32 %v2429_v63, %v867_v11  ;;  %v1308_v35 = vadd.f32 %v2435_v3, %v1240_v22 }
  0xfc   :  { %v1277_v23 = vadd.f32 %v2435_v3, %v1209_v16  ;;  %v777_v24 = vpop.f32.mrf.mxu2  ;;  %v1372_v40 = vmax.f32 %v1308_v35, 0.0 }
  0xfd   :  { %v946_v25 = vpop.f32.mrf.mxu3 }
  0xfe   :  { %v1341_v30 = vmax.f32 %v1277_v23, 0.0  ;;  %v947_v31 = vadd.f32 %v946_v25, %v777_v24  ;;  %v700_v32 = vpop.f32.mrf.mxu0 }
  0xff   :  { %v869_v34 = vpop.f32.mrf.mxu1 }
 0x100   :  { %v1954_v36 = vpack.c.bf16 %v1341_v30, %v1340_v29  ;;  %v1241_v37 = vmul.f32 %v2429_v63, %v947_v31  ;;  %v870_v39 = vadd.f32 %v869_v34, %v700_v32 }
 0x101   :  { %739 = vmatmul.bf16.gmra.mxu0 %v1641_v26  ;;  %819 = vmatmul.bf16.gmra.mxu2 %v1769_v27 }
 0x102   :  { %2090 = vst [vmem:[%s2824_s4 + $0x28] sm:$0xff] %v1954_v36   ;;  %v1309_v38 = vadd.f32 %v2435_v3, %v1241_v37  ;;  %908 = vmatmul.bf16.gmra.mxu1 %v1645_v28  ;;  %988 = vmatmul.bf16.gmra.mxu3 %v1773_v33  ;;  %v1210_v45 = vmul.f32 %v2429_v63, %v870_v39 }
 0x104   :  { %v1373_v41 = vmax.f32 %v1309_v38, 0.0  ;;  %v780_v42 = vpop.f32.mrf.mxu2  ;;  %v1278_v53 = vadd.f32 %v2435_v3, %v1210_v45 }
 0x105   :  { %v949_v43 = vpop.f32.mrf.mxu3 }
 0x106   :  { %v2034_v44 = vpack.c.bf16 %v1373_v41, %v1372_v40  ;;  %v702_v46 = vpop.f32.mrf.mxu0  ;;  %v950_v48 = vadd.f32 %v949_v43, %v780_v42  ;;  %v1342_v5 = vmax.f32 %v1278_v53, 0.0 }
 0x107   :  { %v871_v47 = vpop.f32.mrf.mxu1 }
 0x108   :  { %2106 = vst [vmem:[%s2824_s4 + $0xa8] sm:$0xff] %v2034_v44   ;;  %v872_v49 = vadd.f32 %v871_v47, %v702_v46  ;;  %v1242_v60 = vmul.f32 %v2429_v63, %v950_v48 }
 0x10a   :  { %v1211_v54 = vmul.f32 %v2429_v63, %v872_v49  ;;  %v1310_v11 = vadd.f32 %v2435_v3, %v1242_v60 }
 0x10c   :  { %v1279_v61 = vadd.f32 %v2435_v3, %v1211_v54  ;;  %v782_v62 = vpop.f32.mrf.mxu2  ;;  %v1374_v16 = vmax.f32 %v1310_v11, 0.0 }
 0x10d   :  { %v951_v0 = vpop.f32.mrf.mxu3 }
 0x10e   :  { %v1343_v6 = vmax.f32 %v1279_v61, 0.0  ;;  %v952_v7 = vadd.f32 %v951_v0, %v782_v62  ;;  %v705_v8 = vpop.f32.mrf.mxu0 }
 0x10f   :  { %v874_v10 = vpop.f32.mrf.mxu1 }
 0x110   :  { %v1959_v12 = vpack.c.bf16 %v1343_v6, %v1342_v5  ;;  %v1243_v13 = vmul.f32 %v2429_v63, %v952_v7  ;;  %v875_v15 = vadd.f32 %v874_v10, %v705_v8 }
 0x111   :  { %744 = vmatmul.bf16.gmra.mxu0 %v1649_v1  ;;  %824 = vmatmul.bf16.gmra.mxu2 %v1777_v2 }
 0x112   :  { %2091 = vst [vmem:[%s2824_s4 + $0x30] sm:$0xff] %v1959_v12   ;;  %v1311_v14 = vadd.f32 %v2435_v3, %v1243_v13  ;;  %913 = vmatmul.bf16.gmra.mxu1 %v1653_v4  ;;  %993 = vmatmul.bf16.gmra.mxu3 %v1781_v9  ;;  %v1212_v21 = vmul.f32 %v2429_v63, %v875_v15 }
 0x114   :  { %v1375_v17 = vmax.f32 %v1311_v14, 0.0  ;;  %v785_v18 = vpop.f32.mrf.mxu2  ;;  %v1280_v26 = vadd.f32 %v2435_v3, %v1212_v21 }
 0x115   :  { %v954_v19 = vpop.f32.mrf.mxu3 }
 0x116   :  { %v2039_v20 = vpack.c.bf16 %v1375_v17, %v1374_v16  ;;  %v707_v22 = vpop.f32.mrf.mxu0  ;;  %v955_v24 = vadd.f32 %v954_v19, %v785_v18  ;;  %v1344_v32 = vmax.f32 %v1280_v26, 0.0 }
 0x117   :  { %v876_v23 = vpop.f32.mrf.mxu1 }
 0x118   :  { %2107 = vst [vmem:[%s2824_s4 + $0xb0] sm:$0xff] %v2039_v20   ;;  %v877_v25 = vadd.f32 %v876_v23, %v707_v22  ;;  %v1244_v28 = vmul.f32 %v2429_v63, %v955_v24 }
 0x11a   :  { %v1213_v27 = vmul.f32 %v2429_v63, %v877_v25  ;;  %v1312_v37 = vadd.f32 %v2435_v3, %v1244_v28 }
 0x11c   :  { %v1281_v29 = vadd.f32 %v2435_v3, %v1213_v27  ;;  %v787_v30 = vpop.f32.mrf.mxu2  ;;  %v1376_v42 = vmax.f32 %v1312_v37, 0.0 }
 0x11d   :  { %v956_v31 = vpop.f32.mrf.mxu3 }
 0x11e   :  { %v1345_v33 = vmax.f32 %v1281_v29, 0.0  ;;  %v957_v34 = vadd.f32 %v956_v31, %v787_v30  ;;  %v710_v35 = vpop.f32.mrf.mxu0 }
 0x11f   :  { %v879_v36 = vpop.f32.mrf.mxu1 }
 0x120   :  { %v1964_v38 = vpack.c.bf16 %v1345_v33, %v1344_v32  ;;  %v1245_v39 = vmul.f32 %v2429_v63, %v957_v34  ;;  %v880_v41 = vadd.f32 %v879_v36, %v710_v35 }
 0x122   :  { %2092 = vst [vmem:[%s2824_s4 + $0x38] sm:$0xff] %v1964_v38   ;;  %v1313_v40 = vadd.f32 %v2435_v3, %v1245_v39  ;;  %v1214_v47 = vmul.f32 %v2429_v63, %v880_v41 }
 0x124   :  { %v1377_v43 = vmax.f32 %v1313_v40, 0.0  ;;  %v790_v44 = vpop.f32.mrf.mxu2  ;;  %v1282_v52 = vadd.f32 %v2435_v3, %v1214_v47 }
 0x125   :  { %v959_v45 = vpop.f32.mrf.mxu3 }
 0x126   :  { %v2044_v46 = vpack.c.bf16 %v1377_v43, %v1376_v42  ;;  %v712_v48 = vpop.f32.mrf.mxu0  ;;  %v960_v50 = vadd.f32 %v959_v45, %v790_v44  ;;  %v1346_v58 = vmax.f32 %v1282_v52, 0.0 }
 0x127   :  { %v881_v49 = vpop.f32.mrf.mxu1 }
 0x128   :  { %2108 = vst [vmem:[%s2824_s4 + $0xb8] sm:$0xff] %v2044_v46   ;;  %v882_v51 = vadd.f32 %v881_v49, %v712_v48  ;;  %v1246_v54 = vmul.f32 %v2429_v63, %v960_v50 }
 0x12a   :  { %v1215_v53 = vmul.f32 %v2429_v63, %v882_v51  ;;  %v1314_v0 = vadd.f32 %v2435_v3, %v1246_v54 }
 0x12c   :  { %v1283_v55 = vadd.f32 %v2435_v3, %v1215_v53  ;;  %v792_v56 = vpop.f32.mrf.mxu2  ;;  %v1378_v6 = vmax.f32 %v1314_v0, 0.0 }
 0x12d   :  { %v961_v57 = vpop.f32.mrf.mxu3 }
 0x12e   :  { %v1347_v59 = vmax.f32 %v1283_v55, 0.0  ;;  %v962_v60 = vadd.f32 %v961_v57, %v792_v56  ;;  %v715_v61 = vpop.f32.mrf.mxu0 }
 0x12f   :  { %v884_v62 = vpop.f32.mrf.mxu1 }
 0x130   :  { %v1969_v1 = vpack.c.bf16 %v1347_v59, %v1346_v58  ;;  %v1247_v2 = vmul.f32 %v2429_v63, %v962_v60  ;;  %v885_v5 = vadd.f32 %v884_v62, %v715_v61 }
 0x132   :  { %2093 = vst [vmem:[%s2824_s4 + $0x40] sm:$0xff] %v1969_v1   ;;  %v1315_v4 = vadd.f32 %v2435_v3, %v1247_v2  ;;  %v1216_v11 = vmul.f32 %v2429_v63, %v885_v5 }
 0x134   :  { %v1379_v7 = vmax.f32 %v1315_v4, 0.0  ;;  %v795_v8 = vpop.f32.mrf.mxu2  ;;  %v1284_v16 = vadd.f32 %v2435_v3, %v1216_v11 }
 0x135   :  { %v964_v9 = vpop.f32.mrf.mxu3 }
 0x136   :  { %v2049_v10 = vpack.c.bf16 %v1379_v7, %v1378_v6  ;;  %v717_v12 = vpop.f32.mrf.mxu0  ;;  %v965_v14 = vadd.f32 %v964_v9, %v795_v8  ;;  %v1348_v22 = vmax.f32 %v1284_v16, 0.0 }
 0x137   :  { %v886_v13 = vpop.f32.mrf.mxu1 }
 0x138   :  { %2109 = vst [vmem:[%s2824_s4 + $0xc0] sm:$0xff] %v2049_v10   ;;  %v887_v15 = vadd.f32 %v886_v13, %v717_v12  ;;  %v1248_v18 = vmul.f32 %v2429_v63, %v965_v14 }
 0x13a   :  { %v1217_v17 = vmul.f32 %v2429_v63, %v887_v15  ;;  %v1316_v27 = vadd.f32 %v2435_v3, %v1248_v18 }
 0x13c   :  { %v1285_v19 = vadd.f32 %v2435_v3, %v1217_v17  ;;  %v797_v20 = vpop.f32.mrf.mxu2  ;;  %v1380_v32 = vmax.f32 %v1316_v27, 0.0 }
 0x13d   :  { %v966_v21 = vpop.f32.mrf.mxu3 }
 0x13e   :  { %v1349_v23 = vmax.f32 %v1285_v19, 0.0  ;;  %v967_v24 = vadd.f32 %v966_v21, %v797_v20  ;;  %v720_v25 = vpop.f32.mrf.mxu0 }
 0x13f   :  { %v889_v26 = vpop.f32.mrf.mxu1 }
 0x140   :  { %v1974_v28 = vpack.c.bf16 %v1349_v23, %v1348_v22  ;;  %v1249_v29 = vmul.f32 %v2429_v63, %v967_v24  ;;  %v890_v31 = vadd.f32 %v889_v26, %v720_v25 }
 0x142   :  { %2094 = vst [vmem:[%s2824_s4 + $0x48] sm:$0xff] %v1974_v28   ;;  %v1317_v30 = vadd.f32 %v2435_v3, %v1249_v29  ;;  %v1218_v37 = vmul.f32 %v2429_v63, %v890_v31 }
 0x144   :  { %v1381_v33 = vmax.f32 %v1317_v30, 0.0  ;;  %v800_v34 = vpop.f32.mrf.mxu2  ;;  %v1286_v42 = vadd.f32 %v2435_v3, %v1218_v37 }
 0x145   :  { %v969_v35 = vpop.f32.mrf.mxu3 }
 0x146   :  { %v2054_v36 = vpack.c.bf16 %v1381_v33, %v1380_v32  ;;  %v722_v38 = vpop.f32.mrf.mxu0  ;;  %v970_v40 = vadd.f32 %v969_v35, %v800_v34  ;;  %v1350_v48 = vmax.f32 %v1286_v42, 0.0 }
 0x147   :  { %v891_v39 = vpop.f32.mrf.mxu1 }
 0x148   :  { %2110 = vst [vmem:[%s2824_s4 + $0xc8] sm:$0xff] %v2054_v36   ;;  %v892_v41 = vadd.f32 %v891_v39, %v722_v38  ;;  %v1250_v44 = vmul.f32 %v2429_v63, %v970_v40 }
 0x14a   :  { %v1219_v43 = vmul.f32 %v2429_v63, %v892_v41  ;;  %v1318_v53 = vadd.f32 %v2435_v3, %v1250_v44 }
 0x14c   :  { %v1287_v45 = vadd.f32 %v2435_v3, %v1219_v43  ;;  %v802_v46 = vpop.f32.mrf.mxu2  ;;  %v1382_v58 = vmax.f32 %v1318_v53, 0.0 }
 0x14d   :  { %v971_v47 = vpop.f32.mrf.mxu3 }
 0x14e   :  { %v1351_v49 = vmax.f32 %v1287_v45, 0.0  ;;  %v972_v50 = vadd.f32 %v971_v47, %v802_v46  ;;  %v725_v51 = vpop.f32.mrf.mxu0 }
 0x14f   :  { %v894_v52 = vpop.f32.mrf.mxu1 }
 0x150   :  { %v1979_v54 = vpack.c.bf16 %v1351_v49, %v1350_v48  ;;  %v1251_v55 = vmul.f32 %v2429_v63, %v972_v50  ;;  %v895_v57 = vadd.f32 %v894_v52, %v725_v51 }
 0x152   :  { %2095 = vst [vmem:[%s2824_s4 + $0x50] sm:$0xff] %v1979_v54   ;;  %v1319_v56 = vadd.f32 %v2435_v3, %v1251_v55  ;;  %v1220_v0 = vmul.f32 %v2429_v63, %v895_v57 }
 0x154   :  { %v1383_v59 = vmax.f32 %v1319_v56, 0.0  ;;  %v805_v60 = vpop.f32.mrf.mxu2  ;;  %v1288_v6 = vadd.f32 %v2435_v3, %v1220_v0 }
 0x155   :  { %v974_v61 = vpop.f32.mrf.mxu3 }
 0x156   :  { %v2059_v62 = vpack.c.bf16 %v1383_v59, %v1382_v58  ;;  %v727_v1 = vpop.f32.mrf.mxu0  ;;  %v975_v4 = vadd.f32 %v974_v61, %v805_v60  ;;  %v1352_v12 = vmax.f32 %v1288_v6, 0.0 }
 0x157   :  { %v896_v2 = vpop.f32.mrf.mxu1 }
 0x158   :  { %2111 = vst [vmem:[%s2824_s4 + $0xd0] sm:$0xff] %v2059_v62   ;;  %v897_v5 = vadd.f32 %v896_v2, %v727_v1  ;;  %v1252_v8 = vmul.f32 %v2429_v63, %v975_v4 }
 0x15a   :  { %v1221_v7 = vmul.f32 %v2429_v63, %v897_v5  ;;  %v1320_v17 = vadd.f32 %v2435_v3, %v1252_v8 }
 0x15c   :  { %v1289_v9 = vadd.f32 %v2435_v3, %v1221_v7  ;;  %v807_v10 = vpop.f32.mrf.mxu2  ;;  %v1384_v22 = vmax.f32 %v1320_v17, 0.0 }
 0x15d   :  { %v976_v11 = vpop.f32.mrf.mxu3 }
 0x15e   :  { %v1353_v13 = vmax.f32 %v1289_v9, 0.0  ;;  %v977_v14 = vadd.f32 %v976_v11, %v807_v10  ;;  %v730_v15 = vpop.f32.mrf.mxu0 }
 0x15f   :  { %v899_v16 = vpop.f32.mrf.mxu1 }
 0x160   :  { %v1984_v18 = vpack.c.bf16 %v1353_v13, %v1352_v12  ;;  %v1253_v19 = vmul.f32 %v2429_v63, %v977_v14  ;;  %v900_v21 = vadd.f32 %v899_v16, %v730_v15 }
 0x162   :  { %2096 = vst [vmem:[%s2824_s4 + $0x58] sm:$0xff] %v1984_v18   ;;  %v1321_v20 = vadd.f32 %v2435_v3, %v1253_v19  ;;  %v1222_v27 = vmul.f32 %v2429_v63, %v900_v21 }
 0x164   :  { %v1385_v23 = vmax.f32 %v1321_v20, 0.0  ;;  %v810_v24 = vpop.f32.mrf.mxu2  ;;  %v1290_v32 = vadd.f32 %v2435_v3, %v1222_v27 }
 0x165   :  { %v979_v25 = vpop.f32.mrf.mxu3 }
 0x166   :  { %v2064_v26 = vpack.c.bf16 %v1385_v23, %v1384_v22  ;;  %v732_v28 = vpop.f32.mrf.mxu0  ;;  %v980_v30 = vadd.f32 %v979_v25, %v810_v24  ;;  %v1354_v38 = vmax.f32 %v1290_v32, 0.0  ;;  %v2135_v23 = vld [vmem:[%s2822_s2] ss:$0 sm:$0xff] }
 0x167   :  { %v901_v29 = vpop.f32.mrf.mxu1 }
 0x168   :  { %2112 = vst [vmem:[%s2824_s4 + $0xd8] sm:$0xff] %v2064_v26   ;;  %v902_v31 = vadd.f32 %v901_v29, %v732_v28  ;;  %v1254_v34 = vmul.f32 %v2429_v63, %v980_v30 }
 0x16a   :  { %v1223_v33 = vmul.f32 %v2429_v63, %v902_v31  ;;  %v1322_v43 = vadd.f32 %v2435_v3, %v1254_v34 }
 0x16c   :  { %v1291_v35 = vadd.f32 %v2435_v3, %v1223_v33  ;;  %v812_v36 = vpop.f32.mrf.mxu2  ;;  %v1386_v48 = vmax.f32 %v1322_v43, 0.0 }
 0x16d   :  { %v981_v37 = vpop.f32.mrf.mxu3 }
 0x16e   :  { %v1355_v39 = vmax.f32 %v1291_v35, 0.0  ;;  %v982_v40 = vadd.f32 %v981_v37, %v812_v36  ;;  %v735_v41 = vpop.f32.mrf.mxu0 }
 0x16f   :  { %v904_v42 = vpop.f32.mrf.mxu1 }
 0x170   :  { %v1989_v44 = vpack.c.bf16 %v1355_v39, %v1354_v38  ;;  %v1255_v45 = vmul.f32 %v2429_v63, %v982_v40  ;;  %v905_v47 = vadd.f32 %v904_v42, %v735_v41 }
 0x172   :  { %2097 = vst [vmem:[%s2824_s4 + $0x60] sm:$0xff] %v1989_v44   ;;  %v1323_v46 = vadd.f32 %v2435_v3, %v1255_v45  ;;  %v1224_v53 = vmul.f32 %v2429_v63, %v905_v47 }
 0x174   :  { %v1387_v49 = vmax.f32 %v1323_v46, 0.0  ;;  %v815_v50 = vpop.f32.mrf.mxu2  ;;  %v1292_v58 = vadd.f32 %v2435_v3, %v1224_v53 }
 0x175   :  { %v984_v51 = vpop.f32.mrf.mxu3 }
 0x176   :  { %v2069_v52 = vpack.c.bf16 %v1387_v49, %v1386_v48  ;;  %v737_v54 = vpop.f32.mrf.mxu0  ;;  %v985_v56 = vadd.f32 %v984_v51, %v815_v50  ;;  %v1356_v1 = vmax.f32 %v1292_v58, 0.0 }
 0x177   :  { %v906_v55 = vpop.f32.mrf.mxu1 }
 0x178   :  { %2113 = vst [vmem:[%s2824_s4 + $0xe0] sm:$0xff] %v2069_v52   ;;  %v907_v57 = vadd.f32 %v906_v55, %v737_v54  ;;  %v1256_v60 = vmul.f32 %v2429_v63, %v985_v56 }
 0x17a   :  { %v1225_v59 = vmul.f32 %v2429_v63, %v907_v57  ;;  %v1324_v7 = vadd.f32 %v2435_v3, %v1256_v60 }
 0x17c   :  { %v1293_v61 = vadd.f32 %v2435_v3, %v1225_v59  ;;  %v817_v62 = vpop.f32.mrf.mxu2  ;;  %v1388_v12 = vmax.f32 %v1324_v7, 0.0 }
 0x17d   :  { %v986_v0 = vpop.f32.mrf.mxu3 }
 0x17e   :  { %v1357_v2 = vmax.f32 %v1293_v61, 0.0  ;;  %v987_v4 = vadd.f32 %v986_v0, %v817_v62  ;;  %v740_v5 = vpop.f32.mrf.mxu0 }
 0x17f   :  { %v909_v6 = vpop.f32.mrf.mxu1 }
 0x180   :  { %v1994_v8 = vpack.c.bf16 %v1357_v2, %v1356_v1  ;;  %v1257_v9 = vmul.f32 %v2429_v63, %v987_v4  ;;  %v910_v11 = vadd.f32 %v909_v6, %v740_v5 }
 0x182   :  { %2098 = vst [vmem:[%s2824_s4 + $0x68] sm:$0xff] %v1994_v8   ;;  %v1325_v10 = vadd.f32 %v2435_v3, %v1257_v9  ;;  %v1226_v17 = vmul.f32 %v2429_v63, %v910_v11  ;;  %v2136_v63 = vld [vmem:[%s2823_s3] ss:$0 sm:$0xff] }
 0x184   :  { %v1389_v13 = vmax.f32 %v1325_v10, 0.0  ;;  %v820_v14 = vpop.f32.mrf.mxu2  ;;  %v1294_v22 = vadd.f32 %v2435_v3, %v1226_v17 }
 0x185   :  { %v989_v15 = vpop.f32.mrf.mxu3 }
 0x186   :  { %v2074_v16 = vpack.c.bf16 %v1389_v13, %v1388_v12  ;;  %v742_v18 = vpop.f32.mrf.mxu0  ;;  %v990_v20 = vadd.f32 %v989_v15, %v820_v14  ;;  %v1358_v29 = vmax.f32 %v1294_v22, 0.0 }
 0x187   :  { %v911_v19 = vpop.f32.mrf.mxu1 }
 0x188   :  { %2114 = vst [vmem:[%s2824_s4 + $0xe8] sm:$0xff] %v2074_v16   ;;  %v912_v21 = vadd.f32 %v911_v19, %v742_v18  ;;  %v1258_v25 = vmul.f32 %v2135_v23, %v990_v20 }
 0x18a   :  { %v1227_v24 = vmul.f32 %v2135_v23, %v912_v21  ;;  %v1326_v34 = vadd.f32 %v2136_v63, %v1258_v25 }
 0x18c   :  { %v1295_v26 = vadd.f32 %v2136_v63, %v1227_v24  ;;  %v822_v27 = vpop.f32.mrf.mxu2  ;;  %v1390_v38 = vmax.f32 %v1326_v34, 0.0 }
 0x18d   :  { %v991_v28 = vpop.f32.mrf.mxu3 }
 0x18e   :  { %v1359_v30 = vmax.f32 %v1295_v26, 0.0  ;;  %v992_v31 = vadd.f32 %v991_v28, %v822_v27  ;;  %v745_v32 = vpop.f32.mrf.mxu0 }
 0x18f   :  { %v914_v33 = vpop.f32.mrf.mxu1 }
 0x190   :  { %v1999_v3 = vpack.c.bf16 %v1359_v30, %v1358_v29  ;;  %v1259_v35 = vmul.f32 %v2135_v23, %v992_v31  ;;  %v915_v37 = vadd.f32 %v914_v33, %v745_v32 }
 0x192   :  { %2099 = vst [vmem:[%s2824_s4 + $0x70] sm:$0xff] %v1999_v3   ;;  %v1327_v36 = vadd.f32 %v2136_v63, %v1259_v35  ;;  %v1228_v43 = vmul.f32 %v2135_v23, %v915_v37 }
 0x194   :  { %v1391_v39 = vmax.f32 %v1327_v36, 0.0  ;;  %v825_v40 = vpop.f32.mrf.mxu2  ;;  %v1296_v48 = vadd.f32 %v2136_v63, %v1228_v43 }
 0x195   :  { %v994_v41 = vpop.f32.mrf.mxu3 }
 0x196   :  { %v2079_v42 = vpack.c.bf16 %v1391_v39, %v1390_v38  ;;  %v747_v44 = vpop.f32.mrf.mxu0  ;;  %v995_v46 = vadd.f32 %v994_v41, %v825_v40  ;;  %v1360_v54 = vmax.f32 %v1296_v48, 0.0 }
 0x197   :  { %v916_v45 = vpop.f32.mrf.mxu1 }
 0x198   :  { %2115 = vst [vmem:[%s2824_s4 + $0xf0] sm:$0xff] %v2079_v42   ;;  %v917_v47 = vadd.f32 %v916_v45, %v747_v44  ;;  %v1260_v50 = vmul.f32 %v2135_v23, %v995_v46 }
 0x19a   :  { %v1229_v49 = vmul.f32 %v2135_v23, %v917_v47  ;;  %v1328_v57 = vadd.f32 %v2136_v63, %v1260_v50 }
 0x19c   :  { %v1297_v51 = vadd.f32 %v2136_v63, %v1229_v49  ;;  %v827_v52 = vpop.f32.mrf.mxu2  ;;  %v1392_v61 = vmax.f32 %v1328_v57, 0.0 }
 0x19d   :  { %v996_v53 = vpop.f32.mrf.mxu3 }
 0x19e   :  { %v1361_v55 = vmax.f32 %v1297_v51, 0.0  ;;  %v997_v56 = vadd.f32 %v996_v53, %v827_v52 }
 0x1a0   :  { %v2004_v58 = vpack.c.bf16 %v1361_v55, %v1360_v54  ;;  %v1261_v59 = vmul.f32 %v2135_v23, %v997_v56 }
 0x1a2   :  { %2100 = vst [vmem:[%s2824_s4 + $0x78] sm:$0xff] %v2004_v58   ;;  %v1329_v60 = vadd.f32 %v2136_v63, %v1261_v59 }
 0x1a4   :  { %v1393_v62 = vmax.f32 %v1329_v60, 0.0 }
 0x1a6   :  { %v2084_v0 = vpack.c.bf16 %v1393_v62, %v1392_v61 }
 0x1a8   :  { %2116 = vst [vmem:[%s2824_s4 + $0xf8] sm:$0xff] %v2084_v0  }

// kernel: _lambda_.23
= control target key start
LH: loop header
LB: loop body
LE: loop exit
PB: predicated region body
PF: predicated region fallthrough
CT: control target
= control target key end

     0   :  { %s1116_s0 = inlined_call_operand.vmem [shape: bf16[9,128,128], index: 0, kind: input, shape index: {}]   ;;  %s1117_s1 = inlined_call_operand.vmem [shape: bf16[128,128], index: 1, kind: output, shape index: {}]  }
   0x1   :  { %v461_v0 = vld [vmem:[%s1116_s0] sm:$0xff]   ;;  %v788_v16 = vld [vmem:[%s1116_s0 + $0x8] sm:$0xff]   ;;  %v789_v56 = vld [vmem:[%s1116_s0 + $0x10] sm:$0xff]  }
   0x2   :  { %v795_v1 = vld [vmem:[%s1116_s0 + $0x40] sm:$0xff]   ;;  %v462_v3 = vunpack.c.l.bf16 %v461_v0  ;;  %v463_v4 = vunpack.c.h.bf16 %v461_v0  ;;  %v796_v17 = vld [vmem:[%s1116_s0 + $0x48] sm:$0xff]   ;;  %v466_v28 = vunpack.c.l.bf16 %v788_v16  ;;  %v467_v29 = vunpack.c.h.bf16 %v788_v16  ;;  %v797_v61 = vld [vmem:[%s1116_s0 + $0x50] sm:$0xff]  }
   0x3   :  { %v803_v2 = vld [vmem:[%s1116_s0 + $0x80] sm:$0xff]   ;;  %v494_v5 = vunpack.c.l.bf16 %v795_v1  ;;  %v495_v6 = vunpack.c.h.bf16 %v795_v1  ;;  %v804_v26 = vld [vmem:[%s1116_s0 + $0x88] sm:$0xff]   ;;  %v498_v30 = vunpack.c.l.bf16 %v796_v17  ;;  %v499_v31 = vunpack.c.h.bf16 %v796_v17 }
   0x4   :  { %v811_v7 = vld [vmem:[%s1116_s0 + $0xc0] sm:$0xff]   ;;  %v526_v8 = vunpack.c.l.bf16 %v803_v2  ;;  %v527_v9 = vunpack.c.h.bf16 %v803_v2  ;;  %v812_v36 = vld [vmem:[%s1116_s0 + $0xc8] sm:$0xff]   ;;  %v530_v39 = vunpack.c.l.bf16 %v804_v26  ;;  %v531_v40 = vunpack.c.h.bf16 %v804_v26 }
   0x5   :  { %v819_v10 = vld [vmem:[%s1116_s0 + $0x100] sm:$0xff]   ;;  %v558_v12 = vunpack.c.l.bf16 %v811_v7  ;;  %v559_v13 = vunpack.c.h.bf16 %v811_v7  ;;  %v296_v14 = vmax.f32 %v462_v3, %v494_v5  ;;  %v304_v15 = vmax.f32 %v463_v4, %v495_v6  ;;  %v820_v41 = vld [vmem:[%s1116_s0 + $0x108] sm:$0xff]   ;;  %v805_v7 = vld [vmem:[%s1116_s0 + $0x90] sm:$0xff]  }
   0x6   :  { %v827_v11 = vld [vmem:[%s1116_s0 + $0x140] sm:$0xff]   ;;  %v590_v18 = vunpack.c.l.bf16 %v819_v10  ;;  %v591_v19 = vunpack.c.h.bf16 %v819_v10  ;;  %v828_v46 = vld [vmem:[%s1116_s0 + $0x148] sm:$0xff]   ;;  %v562_v47 = vunpack.c.l.bf16 %v812_v36  ;;  %v563_v48 = vunpack.c.h.bf16 %v812_v36 }
   0x7   :  { %v835_v20 = vld [vmem:[%s1116_s0 + $0x180] sm:$0xff]   ;;  %v622_v21 = vunpack.c.l.bf16 %v827_v11  ;;  %v623_v22 = vunpack.c.h.bf16 %v827_v11  ;;  %v297_v24 = vmax.f32 %v296_v14, %v526_v8  ;;  %v305_v25 = vmax.f32 %v304_v15, %v527_v9  ;;  %v836_v49 = vld [vmem:[%s1116_s0 + $0x188] sm:$0xff]  }
   0x8   :  { %v843_v23 = vld [vmem:[%s1116_s0 + $0x1c0] sm:$0xff]   ;;  %v654_v32 = vunpack.c.l.bf16 %v835_v20  ;;  %v655_v33 = vunpack.c.h.bf16 %v835_v20  ;;  %v312_v50 = vmax.f32 %v466_v28, %v498_v30  ;;  %v320_v51 = vmax.f32 %v467_v29, %v499_v31  ;;  %v844_v2 = vld [vmem:[%s1116_s0 + $0x1c8] sm:$0xff]   ;;  %v837_v30 = vld [vmem:[%s1116_s0 + $0x190] sm:$0xff]  }
   0x9   :  { %v851_v27 = vld [vmem:[%s1116_s0 + $0x200] sm:$0xff]   ;;  %v298_v34 = vmax.f32 %v297_v24, %v558_v12  ;;  %v306_v35 = vmax.f32 %v305_v25, %v559_v13  ;;  %v686_v37 = vunpack.c.l.bf16 %v843_v23  ;;  %v687_v38 = vunpack.c.h.bf16 %v843_v23  ;;  %v852_v10 = vld [vmem:[%s1116_s0 + $0x208] sm:$0xff]   ;;  %v813_v13 = vld [vmem:[%s1116_s0 + $0xd0] sm:$0xff]  }
   0xa   :  { %v718_v42 = vunpack.c.l.bf16 %v851_v27  ;;  %v719_v43 = vunpack.c.h.bf16 %v851_v27  ;;  %v594_v54 = vunpack.c.l.bf16 %v820_v41  ;;  %v595_v55 = vunpack.c.h.bf16 %v820_v41  ;;  %v829_v27 = vld [vmem:[%s1116_s0 + $0x150] sm:$0xff]  }
   0xb   :  { %v299_v44 = vmax.f32 %v298_v34, %v590_v18  ;;  %v307_v45 = vmax.f32 %v306_v35, %v591_v19  ;;  %v626_v57 = vunpack.c.l.bf16 %v828_v46  ;;  %v627_v58 = vunpack.c.h.bf16 %v828_v46 }
   0xc   :  { %v313_v59 = vmax.f32 %v312_v50, %v530_v39  ;;  %v321_v60 = vmax.f32 %v320_v51, %v531_v40  ;;  %v658_v0 = vunpack.c.l.bf16 %v836_v49  ;;  %v659_v1 = vunpack.c.h.bf16 %v836_v49 }
   0xd   :  { %v300_v52 = vmax.f32 %v299_v44, %v622_v21  ;;  %v308_v53 = vmax.f32 %v307_v45, %v623_v22  ;;  %v470_v5 = vunpack.c.l.bf16 %v789_v56  ;;  %v471_v6 = vunpack.c.h.bf16 %v789_v56  ;;  %v821_v22 = vld [vmem:[%s1116_s0 + $0x110] sm:$0xff]  }
   0xe   :  { %v314_v3 = vmax.f32 %v313_v59, %v562_v47  ;;  %v322_v4 = vmax.f32 %v321_v60, %v563_v48  ;;  %v502_v11 = vunpack.c.l.bf16 %v797_v61  ;;  %v503_v12 = vunpack.c.h.bf16 %v797_v61  ;;  %v845_v47 = vld [vmem:[%s1116_s0 + $0x1d0] sm:$0xff]  }
   0xf   :  { %v301_v62 = vmax.f32 %v300_v52, %v654_v32  ;;  %v309_v63 = vmax.f32 %v308_v53, %v655_v33  ;;  %v690_v14 = vunpack.c.l.bf16 %v844_v2  ;;  %v691_v15 = vunpack.c.h.bf16 %v844_v2  ;;  %v806_v52 = vld [vmem:[%s1116_s0 + $0x98] sm:$0xff]  }
  0x10   :  { %v315_v16 = vmax.f32 %v314_v3, %v594_v54  ;;  %v323_v17 = vmax.f32 %v322_v4, %v595_v55  ;;  %v534_v20 = vunpack.c.l.bf16 %v805_v7  ;;  %v535_v21 = vunpack.c.h.bf16 %v805_v7  ;;  %v853_v55 = vld [vmem:[%s1116_s0 + $0x210] sm:$0xff]   ;;  %v822_v3 = vld [vmem:[%s1116_s0 + $0x118] sm:$0xff]  }
  0x11   :  { %v302_v8 = vmax.f32 %v301_v62, %v686_v37  ;;  %v310_v9 = vmax.f32 %v309_v63, %v687_v38  ;;  %v722_v23 = vunpack.c.l.bf16 %v852_v10  ;;  %v566_v26 = vunpack.c.l.bf16 %v813_v13  ;;  %v790_v37 = vld [vmem:[%s1116_s0 + $0x18] sm:$0xff]  }
  0x12   :  { %v316_v24 = vmax.f32 %v315_v16, %v626_v57  ;;  %v324_v25 = vmax.f32 %v323_v17, %v627_v58  ;;  %v567_v29 = vunpack.c.h.bf16 %v813_v13  ;;  %v328_v31 = vmax.f32 %v470_v5, %v502_v11  ;;  %v814_v62 = vld [vmem:[%s1116_s0 + $0xd8] sm:$0xff]  }
  0x13   :  { %v303_v18 = vmax.f32 %v302_v8, %v718_v42  ;;  %v311_v19 = vmax.f32 %v310_v9, %v719_v43  ;;  %v336_v32 = vmax.f32 %v471_v6, %v503_v12  ;;  %v723_v33 = vunpack.c.h.bf16 %v852_v10  ;;  %v798_v42 = vld [vmem:[%s1116_s0 + $0x58] sm:$0xff]  }
  0x14   :  { %v317_v34 = vmax.f32 %v316_v24, %v658_v0  ;;  %v325_v35 = vmax.f32 %v324_v25, %v659_v1  ;;  %v598_v36 = vunpack.c.l.bf16 %v821_v22  ;;  %v599_v38 = vunpack.c.h.bf16 %v821_v22  ;;  %v830_v8 = vld [vmem:[%s1116_s0 + $0x158] sm:$0xff]  }
  0x15   :  { %v751_v28 = vpack.c.bf16 %v311_v19, %v303_v18  ;;  %v630_v39 = vunpack.c.l.bf16 %v829_v27  ;;  %v329_v40 = vmax.f32 %v328_v31, %v534_v20  ;;  %v337_v41 = vmax.f32 %v336_v32, %v535_v21  ;;  %v838_v11 = vld [vmem:[%s1116_s0 + $0x198] sm:$0xff]   ;;  %v791_v18 = vld [vmem:[%s1116_s0 + $0x20] sm:$0xff]  }
  0x16   :  { %v318_v43 = vmax.f32 %v317_v34, %v690_v14  ;;  %v326_v44 = vmax.f32 %v325_v35, %v691_v15  ;;  %v631_v45 = vunpack.c.h.bf16 %v829_v27  ;;  %v662_v46 = vunpack.c.l.bf16 %v837_v30  ;;  %v799_v19 = vld [vmem:[%s1116_s0 + $0x60] sm:$0xff]  }
  0x17   :  { %752 = vst [vmem:[%s1117_s1] sm:$0xff] %v751_v28   ;;  %v330_v48 = vmax.f32 %v329_v40, %v566_v26  ;;  %v338_v49 = vmax.f32 %v337_v41, %v567_v29  ;;  %v474_v50 = vunpack.c.l.bf16 %v790_v37  ;;  %v475_v51 = vunpack.c.h.bf16 %v790_v37  ;;  %v846_v28 = vld [vmem:[%s1116_s0 + $0x1d8] sm:$0xff]   ;;  %v807_v29 = vld [vmem:[%s1116_s0 + $0xa0] sm:$0xff]  }
  0x18   :  { %v319_v53 = vmax.f32 %v318_v43, %v722_v23  ;;  %v327_v54 = vmax.f32 %v326_v44, %v723_v33  ;;  %v506_v56 = vunpack.c.l.bf16 %v798_v42  ;;  %v507_v57 = vunpack.c.h.bf16 %v798_v42  ;;  %v823_v44 = vld [vmem:[%s1116_s0 + $0x120] sm:$0xff]  }
  0x19   :  { %v663_v58 = vunpack.c.h.bf16 %v837_v30  ;;  %v694_v59 = vunpack.c.l.bf16 %v845_v47  ;;  %v331_v60 = vmax.f32 %v330_v48, %v598_v36  ;;  %v339_v61 = vmax.f32 %v338_v49, %v599_v38  ;;  %v854_v30 = vld [vmem:[%s1116_s0 + $0x218] sm:$0xff]  }
  0x1a   :  { %v756_v63 = vpack.c.bf16 %v327_v54, %v319_v53  ;;  %v695_v0 = vunpack.c.h.bf16 %v845_v47  ;;  %v538_v1 = vunpack.c.l.bf16 %v806_v52  ;;  %v539_v2 = vunpack.c.h.bf16 %v806_v52  ;;  %v831_v52 = vld [vmem:[%s1116_s0 + $0x160] sm:$0xff]  }
  0x1b   :  { %v726_v4 = vunpack.c.l.bf16 %v853_v55  ;;  %v727_v5 = vunpack.c.h.bf16 %v853_v55  ;;  %v332_v6 = vmax.f32 %v331_v60, %v630_v39  ;;  %v340_v7 = vmax.f32 %v339_v61, %v631_v45  ;;  %v815_v39 = vld [vmem:[%s1116_s0 + $0xe0] sm:$0xff]  }
  0x1c   :  { %859 = vst [vmem:[%s1117_s1 + $0x8] sm:$0xff] %v756_v63   ;;  %v570_v9 = vunpack.c.l.bf16 %v814_v62  ;;  %v571_v10 = vunpack.c.h.bf16 %v814_v62  ;;  %v344_v12 = vmax.f32 %v474_v50, %v506_v56  ;;  %v352_v13 = vmax.f32 %v475_v51, %v507_v57  ;;  %v839_v53 = vld [vmem:[%s1116_s0 + $0x1a0] sm:$0xff]  }
  0x1d   :  { %v333_v14 = vmax.f32 %v332_v6, %v662_v46  ;;  %v341_v15 = vmax.f32 %v340_v7, %v663_v58  ;;  %v602_v16 = vunpack.c.l.bf16 %v822_v3  ;;  %v603_v17 = vunpack.c.h.bf16 %v822_v3  ;;  %v847_v7 = vld [vmem:[%s1116_s0 + $0x1e0] sm:$0xff]  }
  0x1e   :  { %v634_v20 = vunpack.c.l.bf16 %v830_v8  ;;  %v635_v21 = vunpack.c.h.bf16 %v830_v8  ;;  %v345_v22 = vmax.f32 %v344_v12, %v538_v1  ;;  %v353_v23 = vmax.f32 %v352_v13, %v539_v2 }
  0x1f   :  { %v334_v24 = vmax.f32 %v333_v14, %v694_v59  ;;  %v342_v25 = vmax.f32 %v341_v15, %v695_v0  ;;  %v666_v26 = vunpack.c.l.bf16 %v838_v11  ;;  %v667_v27 = vunpack.c.h.bf16 %v838_v11  ;;  %v792_v59 = vld [vmem:[%s1116_s0 + $0x28] sm:$0xff]  }
  0x20   :  { %v346_v31 = vmax.f32 %v345_v22, %v570_v9  ;;  %v354_v32 = vmax.f32 %v353_v23, %v571_v10  ;;  %v478_v33 = vunpack.c.l.bf16 %v791_v18  ;;  %v510_v34 = vunpack.c.l.bf16 %v799_v19  ;;  %v800_v0 = vld [vmem:[%s1116_s0 + $0x68] sm:$0xff]  }
  0x21   :  { %v335_v35 = vmax.f32 %v334_v24, %v726_v4  ;;  %v343_v36 = vmax.f32 %v342_v25, %v727_v5  ;;  %v479_v37 = vunpack.c.h.bf16 %v791_v18  ;;  %v511_v38 = vunpack.c.h.bf16 %v799_v19  ;;  %v808_v10 = vld [vmem:[%s1116_s0 + $0xa8] sm:$0xff]  }
  0x22   :  { %v698_v40 = vunpack.c.l.bf16 %v846_v28  ;;  %v347_v41 = vmax.f32 %v346_v31, %v602_v16  ;;  %v355_v42 = vmax.f32 %v354_v32, %v603_v17  ;;  %v542_v43 = vunpack.c.l.bf16 %v807_v29  ;;  %v816_v15 = vld [vmem:[%s1116_s0 + $0xe8] sm:$0xff]  }
  0x23   :  { %v761_v45 = vpack.c.bf16 %v343_v36, %v335_v35  ;;  %v699_v46 = vunpack.c.h.bf16 %v846_v28  ;;  %v730_v47 = vunpack.c.l.bf16 %v854_v30  ;;  %v543_v48 = vunpack.c.h.bf16 %v807_v29  ;;  %v824_v25 = vld [vmem:[%s1116_s0 + $0x128] sm:$0xff]  }
  0x24   :  { %v348_v49 = vmax.f32 %v347_v41, %v634_v20  ;;  %v356_v50 = vmax.f32 %v355_v42, %v635_v21  ;;  %v574_v51 = vunpack.c.l.bf16 %v815_v39  ;;  %v360_v54 = vmax.f32 %v478_v33, %v510_v34  ;;  %v855_v21 = vld [vmem:[%s1116_s0 + $0x220] sm:$0xff]   ;;  %v832_v32 = vld [vmem:[%s1116_s0 + $0x168] sm:$0xff]  }
  0x25   :  { %860 = vst [vmem:[%s1117_s1 + $0x10] sm:$0xff] %v761_v45   ;;  %v731_v55 = vunpack.c.h.bf16 %v854_v30  ;;  %v575_v56 = vunpack.c.h.bf16 %v815_v39  ;;  %v606_v57 = vunpack.c.l.bf16 %v823_v44  ;;  %v368_v58 = vmax.f32 %v479_v37, %v511_v38  ;;  %v840_v33 = vld [vmem:[%s1116_s0 + $0x1a8] sm:$0xff]   ;;  %v801_v45 = vld [vmem:[%s1116_s0 + $0x70] sm:$0xff]  }
  0x26   :  { %v349_v60 = vmax.f32 %v348_v49, %v666_v26  ;;  %v357_v61 = vmax.f32 %v356_v50, %v667_v27  ;;  %v607_v62 = vunpack.c.h.bf16 %v823_v44  ;;  %v361_v63 = vmax.f32 %v360_v54, %v542_v43 }
  0x27   :  { %v638_v1 = vunpack.c.l.bf16 %v831_v52  ;;  %v639_v2 = vunpack.c.h.bf16 %v831_v52  ;;  %v670_v3 = vunpack.c.l.bf16 %v839_v53  ;;  %v369_v4 = vmax.f32 %v368_v58, %v543_v48 }
  0x28   :  { %v350_v5 = vmax.f32 %v349_v60, %v698_v40  ;;  %v358_v6 = vmax.f32 %v357_v61, %v699_v46  ;;  %v362_v8 = vmax.f32 %v361_v63, %v574_v51  ;;  %v482_v9 = vunpack.c.l.bf16 %v792_v59  ;;  %v793_v40 = vld [vmem:[%s1116_s0 + $0x30] sm:$0xff]   ;;  %v848_v51 = vld [vmem:[%s1116_s0 + $0x1e8] sm:$0xff]  }
  0x29   :  { %v370_v11 = vmax.f32 %v369_v4, %v575_v56  ;;  %v483_v12 = vunpack.c.h.bf16 %v792_v59  ;;  %v514_v13 = vunpack.c.l.bf16 %v800_v0  ;;  %v515_v14 = vunpack.c.h.bf16 %v800_v0  ;;  %v817_v0 = vld [vmem:[%s1116_s0 + $0xf0] sm:$0xff]  }
  0x2a   :  { %v351_v16 = vmax.f32 %v350_v5, %v730_v47  ;;  %v359_v17 = vmax.f32 %v358_v6, %v731_v55  ;;  %v671_v18 = vunpack.c.h.bf16 %v839_v53  ;;  %v363_v19 = vmax.f32 %v362_v8, %v606_v57  ;;  %v809_v55 = vld [vmem:[%s1116_s0 + $0xb0] sm:$0xff]  }
  0x2b   :  { %v702_v20 = vunpack.c.l.bf16 %v847_v7  ;;  %v371_v22 = vmax.f32 %v370_v11, %v607_v62  ;;  %v546_v23 = vunpack.c.l.bf16 %v808_v10  ;;  %v547_v24 = vunpack.c.h.bf16 %v808_v10 }
  0x2c   :  { %v766_v26 = vpack.c.bf16 %v359_v17, %v351_v16  ;;  %v703_v27 = vunpack.c.h.bf16 %v847_v7  ;;  %v364_v28 = vmax.f32 %v363_v19, %v638_v1  ;;  %v578_v29 = vunpack.c.l.bf16 %v816_v15  ;;  %v794_v19 = vld [vmem:[%s1116_s0 + $0x38] sm:$0xff]  }
  0x2d   :  { %v372_v30 = vmax.f32 %v371_v22, %v639_v2  ;;  %v579_v31 = vunpack.c.h.bf16 %v816_v15  ;;  %v376_v34 = vmax.f32 %v482_v9, %v514_v13  ;;  %v384_v35 = vmax.f32 %v483_v12, %v515_v14  ;;  %v856_v2 = vld [vmem:[%s1116_s0 + $0x228] sm:$0xff]   ;;  %v825_v9 = vld [vmem:[%s1116_s0 + $0x130] sm:$0xff]  }
  0x2e   :  { %861 = vst [vmem:[%s1117_s1 + $0x18] sm:$0xff] %v766_v26   ;;  %v734_v36 = vunpack.c.l.bf16 %v855_v21  ;;  %v735_v37 = vunpack.c.h.bf16 %v855_v21  ;;  %v365_v38 = vmax.f32 %v364_v28, %v670_v3  ;;  %v610_v39 = vunpack.c.l.bf16 %v824_v25  ;;  %v833_v12 = vld [vmem:[%s1116_s0 + $0x170] sm:$0xff]  }
  0x2f   :  { %v373_v41 = vmax.f32 %v372_v30, %v671_v18  ;;  %v611_v42 = vunpack.c.h.bf16 %v824_v25  ;;  %v377_v43 = vmax.f32 %v376_v34, %v546_v23  ;;  %v385_v44 = vmax.f32 %v384_v35, %v547_v24  ;;  %v802_v24 = vld [vmem:[%s1116_s0 + $0x78] sm:$0xff]  }
  0x30   :  { %v366_v46 = vmax.f32 %v365_v38, %v702_v20  ;;  %v642_v47 = vunpack.c.l.bf16 %v832_v32  ;;  %v643_v48 = vunpack.c.h.bf16 %v832_v32  ;;  %v674_v49 = vunpack.c.l.bf16 %v840_v33  ;;  %v810_v34 = vld [vmem:[%s1116_s0 + $0xb8] sm:$0xff]  }
  0x31   :  { %v374_v50 = vmax.f32 %v373_v41, %v703_v27  ;;  %v378_v52 = vmax.f32 %v377_v43, %v578_v29  ;;  %v386_v53 = vmax.f32 %v385_v44, %v579_v31  ;;  %v486_v54 = vunpack.c.l.bf16 %v793_v40  ;;  %v841_v29 = vld [vmem:[%s1116_s0 + $0x1b0] sm:$0xff]   ;;  %v818_v44 = vld [vmem:[%s1116_s0 + $0xf8] sm:$0xff]  }
  0x32   :  { %v367_v56 = vmax.f32 %v366_v46, %v734_v36  ;;  %v487_v57 = vunpack.c.h.bf16 %v793_v40  ;;  %v518_v58 = vunpack.c.l.bf16 %v801_v45  ;;  %v519_v59 = vunpack.c.h.bf16 %v801_v45  ;;  %v857_v46 = vld [vmem:[%s1116_s0 + $0x230] sm:$0xff]  }
  0x33   :  { %v375_v60 = vmax.f32 %v374_v50, %v735_v37  ;;  %v675_v61 = vunpack.c.h.bf16 %v840_v33  ;;  %v379_v62 = vmax.f32 %v378_v52, %v610_v39  ;;  %v387_v63 = vmax.f32 %v386_v53, %v611_v42  ;;  %v849_v37 = vld [vmem:[%s1116_s0 + $0x1f0] sm:$0xff]   ;;  %v826_v53 = vld [vmem:[%s1116_s0 + $0x138] sm:$0xff]  }
  0x34   :  { %v706_v1 = vunpack.c.l.bf16 %v848_v51  ;;  %v550_v3 = vunpack.c.l.bf16 %v809_v55  ;;  %v551_v4 = vunpack.c.h.bf16 %v809_v55  ;;  %v707_v6 = vunpack.c.h.bf16 %v848_v51 }
  0x35   :  { %v771_v5 = vpack.c.bf16 %v375_v60, %v367_v56  ;;  %v380_v7 = vmax.f32 %v379_v62, %v642_v47  ;;  %v388_v8 = vmax.f32 %v387_v63, %v643_v48  ;;  %v582_v10 = vunpack.c.l.bf16 %v817_v0  ;;  %v834_v62 = vld [vmem:[%s1116_s0 + $0x178] sm:$0xff]  }
  0x36   :  { %v583_v11 = vunpack.c.h.bf16 %v817_v0  ;;  %v392_v13 = vmax.f32 %v486_v54, %v518_v58  ;;  %v400_v14 = vmax.f32 %v487_v57, %v519_v59  ;;  %v738_v15 = vunpack.c.l.bf16 %v856_v2 }
  0x37   :  { %862 = vst [vmem:[%s1117_s1 + $0x20] sm:$0xff] %v771_v5   ;;  %v739_v16 = vunpack.c.h.bf16 %v856_v2  ;;  %v381_v17 = vmax.f32 %v380_v7, %v674_v49  ;;  %v389_v18 = vmax.f32 %v388_v8, %v675_v61  ;;  %v614_v20 = vunpack.c.l.bf16 %v825_v9  ;;  %v842_v5 = vld [vmem:[%s1116_s0 + $0x1b8] sm:$0xff]  }
  0x38   :  { %v615_v21 = vunpack.c.h.bf16 %v825_v9  ;;  %v393_v22 = vmax.f32 %v392_v13, %v550_v3  ;;  %v401_v23 = vmax.f32 %v400_v14, %v551_v4  ;;  %v646_v27 = vunpack.c.l.bf16 %v833_v12 }
  0x39   :  { %v382_v25 = vmax.f32 %v381_v17, %v706_v1  ;;  %v390_v26 = vmax.f32 %v389_v18, %v707_v6  ;;  %v647_v28 = vunpack.c.h.bf16 %v833_v12  ;;  %v490_v32 = vunpack.c.l.bf16 %v794_v19  ;;  %v850_v12 = vld [vmem:[%s1116_s0 + $0x1f8] sm:$0xff]  }
  0x3a   :  { %v394_v30 = vmax.f32 %v393_v22, %v582_v10  ;;  %v402_v31 = vmax.f32 %v401_v23, %v583_v11  ;;  %v491_v33 = vunpack.c.h.bf16 %v794_v19  ;;  %v522_v38 = vunpack.c.l.bf16 %v802_v24  ;;  %v858_v18 = vld [vmem:[%s1116_s0 + $0x238] sm:$0xff]  }
  0x3b   :  { %v383_v35 = vmax.f32 %v382_v25, %v738_v15  ;;  %v391_v36 = vmax.f32 %v390_v26, %v739_v16  ;;  %v523_v39 = vunpack.c.h.bf16 %v802_v24  ;;  %v678_v40 = vunpack.c.l.bf16 %v841_v29 }
  0x3c   :  { %v679_v41 = vunpack.c.h.bf16 %v841_v29  ;;  %v395_v42 = vmax.f32 %v394_v30, %v614_v20  ;;  %v403_v43 = vmax.f32 %v402_v31, %v615_v21  ;;  %v554_v47 = vunpack.c.l.bf16 %v810_v34 }
  0x3d   :  { %v776_v45 = vpack.c.bf16 %v391_v36, %v383_v35  ;;  %v555_v48 = vunpack.c.h.bf16 %v810_v34  ;;  %v710_v49 = vunpack.c.l.bf16 %v849_v37  ;;  %v711_v50 = vunpack.c.h.bf16 %v849_v37 }
  0x3e   :  { %v396_v51 = vmax.f32 %v395_v42, %v646_v27  ;;  %v404_v52 = vmax.f32 %v403_v43, %v647_v28  ;;  %v586_v54 = vunpack.c.l.bf16 %v818_v44  ;;  %v587_v55 = vunpack.c.h.bf16 %v818_v44 }
  0x3f   :  { %863 = vst [vmem:[%s1117_s1 + $0x28] sm:$0xff] %v776_v45   ;;  %v408_v56 = vmax.f32 %v490_v32, %v522_v38  ;;  %v416_v57 = vmax.f32 %v491_v33, %v523_v39  ;;  %v742_v58 = vunpack.c.l.bf16 %v857_v46  ;;  %v743_v59 = vunpack.c.h.bf16 %v857_v46 }
  0x40   :  { %v397_v60 = vmax.f32 %v396_v51, %v678_v40  ;;  %v405_v61 = vmax.f32 %v404_v52, %v679_v41  ;;  %v618_v63 = vunpack.c.l.bf16 %v826_v53  ;;  %v619_v0 = vunpack.c.h.bf16 %v826_v53 }
  0x41   :  { %v409_v1 = vmax.f32 %v408_v56, %v554_v47  ;;  %v417_v2 = vmax.f32 %v416_v57, %v555_v48  ;;  %v650_v6 = vunpack.c.l.bf16 %v834_v62  ;;  %v651_v7 = vunpack.c.h.bf16 %v834_v62 }
  0x42   :  { %v398_v3 = vmax.f32 %v397_v60, %v710_v49  ;;  %v406_v4 = vmax.f32 %v405_v61, %v711_v50  ;;  %v682_v13 = vunpack.c.l.bf16 %v842_v5  ;;  %v683_v14 = vunpack.c.h.bf16 %v842_v5 }
  0x43   :  { %v410_v8 = vmax.f32 %v409_v1, %v586_v54  ;;  %v418_v9 = vmax.f32 %v417_v2, %v587_v55  ;;  %v714_v19 = vunpack.c.l.bf16 %v850_v12  ;;  %v715_v20 = vunpack.c.h.bf16 %v850_v12 }
  0x44   :  { %v399_v10 = vmax.f32 %v398_v3, %v742_v58  ;;  %v407_v11 = vmax.f32 %v406_v4, %v743_v59  ;;  %v746_v23 = vunpack.c.l.bf16 %v858_v18  ;;  %v747_v24 = vunpack.c.h.bf16 %v858_v18 }
  0x45   :  { %v411_v15 = vmax.f32 %v410_v8, %v618_v63  ;;  %v419_v16 = vmax.f32 %v418_v9, %v619_v0 }
  0x46   :  { %v781_v17 = vpack.c.bf16 %v407_v11, %v399_v10 }
  0x47   :  { %v412_v21 = vmax.f32 %v411_v15, %v650_v6  ;;  %v420_v22 = vmax.f32 %v419_v16, %v651_v7 }
  0x48   :  { %864 = vst [vmem:[%s1117_s1 + $0x30] sm:$0xff] %v781_v17  }
  0x49   :  { %v413_v25 = vmax.f32 %v412_v21, %v682_v13  ;;  %v421_v26 = vmax.f32 %v420_v22, %v683_v14 }
  0x4b   :  { %v414_v27 = vmax.f32 %v413_v25, %v714_v19  ;;  %v422_v28 = vmax.f32 %v421_v26, %v715_v20 }
  0x4d   :  { %v415_v29 = vmax.f32 %v414_v27, %v746_v23  ;;  %v423_v30 = vmax.f32 %v422_v28, %v747_v24 }
  0x4f   :  { %v786_v31 = vpack.c.bf16 %v423_v30, %v415_v29 }
  0x51   :  { %865 = vst [vmem:[%s1117_s1 + $0x38] sm:$0xff] %v786_v31  }

// kernel: _lambda_.24
= control target key start
LH: loop header
LB: loop body
LE: loop exit
PB: predicated region body
PF: predicated region fallthrough
CT: control target
= control target key end

     0   :  { %s3277_s1 = inlined_call_operand.vmem [shape: bf16[1152,128], index: 1, kind: input, shape index: {}]   ;;  %s3278_s0 = inlined_call_operand.vmem [shape: bf16[128,1152], index: 0, kind: input, shape index: {}]   ;;  %s3279_s2 = inlined_call_operand.vmem [shape: f32[1,128], index: 2, kind: input, shape index: {}]   ;;  %s3280_s3 = inlined_call_operand.vmem [shape: f32[1,128], index: 3, kind: input, shape index: {}]   ;;  %s3281_s4 = inlined_call_operand.vmem [shape: bf16[128,128], index: 4, kind: output, shape index: {}]  }
   0x1   :  { %v2316_v0 = vld [vmem:[%s3277_s1 + $0x38] sm:$0xff]  ;;  %v2315_v1 = vld [vmem:[%s3277_s1 + $0x30] sm:$0xff]  ;;  %v2314_v2 = vld [vmem:[%s3277_s1 + $0x28] sm:$0xff] }
   0x2   :  { %2428 = vmatpush.bf16.msra.mxu1 %v2316_v0  ;;  %2429 = vmatpush.bf16.msra.mxu2 %v2316_v0  ;;  %v2313_v3 = vld [vmem:[%s3277_s1 + $0x20] sm:$0xff]  ;;  %v2312_v4 = vld [vmem:[%s3277_s1 + $0x18] sm:$0xff]  ;;  %v2311_v5 = vld [vmem:[%s3277_s1 + $0x10] sm:$0xff] }
   0x3   :  { %2430 = vmatpush.bf16.msra.mxu3 %v2316_v0  ;;  %1077 = vmatpush.bf16.msra.mxu0 %v2316_v0  ;;  %v2310_v6 = vld [vmem:[%s3277_s1 + $0x8] sm:$0xff]  ;;  %v2309_v7 = vld [vmem:[%s3277_s1] sm:$0xff]  ;;  %v1735_v8 = vld [vmem:[%s3278_s0 + $0x90] sm:$0xf] }
   0x4   :  { %v2259_v9 = vld [vmem:[%s3278_s0 + $0xb0] sm:$0xf0]  ;;  %v1807_v10 = vld [vmem:[%s3278_s0 + $0x120] sm:$0xf]  ;;  %v2277_v11 = vld [vmem:[%s3278_s0 + $0x140] sm:$0xf0] }
   0x5   :  { %v1879_v12 = vld [vmem:[%s3278_s0 + $0x1b0] sm:$0xf]  ;;  %v2295_v13 = vld [vmem:[%s3278_s0 + $0x1d0] sm:$0xf0]  ;;  %v1663_v14 = vld [vmem:[%s3278_s0] sm:$0xf]  ;;  %v1736_v18 = vor.u32 %v2259_v9, %v1735_v8  ;;  %v1808_v19 = vor.u32 %v2277_v11, %v1807_v10 }
   0x6   :  { %2431 = vmatpush.bf16.msra.mxu1 %v2315_v1  ;;  %2432 = vmatpush.bf16.msra.mxu2 %v2315_v1  ;;  %v2241_v15 = vld [vmem:[%s3278_s0 + $0x20] sm:$0xf0]  ;;  %v2332_v16 = vld [vmem:[%s3277_s1 + $0xb8] sm:$0xff]  ;;  %v1880_v20 = vor.u32 %v2295_v13, %v1879_v12  ;;  %v2331_v24 = vld [vmem:[%s3277_s1 + $0xb0] sm:$0xff] }
   0x7   :  { %2433 = vmatpush.bf16.msra.mxu3 %v2315_v1  ;;  %1078 = vmatpush.bf16.msra.mxu0 %v2315_v1  ;;  %v2324_v17 = vld [vmem:[%s3277_s1 + $0x78] sm:$0xff]  ;;  %v1664_v21 = vor.u32 %v2241_v15, %v1663_v14  ;;  %v2323_v25 = vld [vmem:[%s3277_s1 + $0x70] sm:$0xff]  ;;  %v2330_v28 = vld [vmem:[%s3277_s1 + $0xa8] sm:$0xff] }
   0x8   :  { %v2340_v22 = vld [vmem:[%s3277_s1 + $0xf8] sm:$0xff]  ;;  %v2339_v26 = vld [vmem:[%s3277_s1 + $0xf0] sm:$0xff]  ;;  %v2322_v29 = vld [vmem:[%s3277_s1 + $0x68] sm:$0xff] }
   0x9   :  { %v2348_v23 = vld [vmem:[%s3277_s1 + $0x138] sm:$0xff]  ;;  %v2347_v27 = vld [vmem:[%s3277_s1 + $0x130] sm:$0xff]  ;;  %v2338_v30 = vld [vmem:[%s3277_s1 + $0xe8] sm:$0xff] }
   0xa   :  { %2434 = vmatpush.bf16.msra.mxu1 %v2314_v2  ;;  %2435 = vmatpush.bf16.msra.mxu2 %v2314_v2  ;;  %v2346_v31 = vld [vmem:[%s3277_s1 + $0x128] sm:$0xff]  ;;  %v2329_v32 = vld [vmem:[%s3277_s1 + $0xa0] sm:$0xff]  ;;  %v1771_v36 = vld [vmem:[%s3278_s0 + $0xd8] sm:$0xf] }
   0xb   :  { %2436 = vmatpush.bf16.msra.mxu3 %v2314_v2  ;;  %1079 = vmatpush.bf16.msra.mxu0 %v2314_v2  ;;  %v2321_v33 = vld [vmem:[%s3277_s1 + $0x60] sm:$0xff]  ;;  %v2268_v37 = vld [vmem:[%s3278_s0 + $0xf8] sm:$0xf0]  ;;  %v1843_v38 = vld [vmem:[%s3278_s0 + $0x168] sm:$0xf] }
   0xc   :  { %v2337_v34 = vld [vmem:[%s3277_s1 + $0xe0] sm:$0xff]  ;;  %v2286_v39 = vld [vmem:[%s3278_s0 + $0x188] sm:$0xf0]  ;;  %v1915_v40 = vld [vmem:[%s3278_s0 + $0x1f8] sm:$0xf]  ;;  %v1772_v46 = vor.u32 %v2268_v37, %v1771_v36 }
   0xd   :  { %v2345_v35 = vld [vmem:[%s3277_s1 + $0x120] sm:$0xff]  ;;  %v2304_v41 = vld [vmem:[%s3278_s0 + $0x218] sm:$0xf0]  ;;  %v1699_v42 = vld [vmem:[%s3278_s0 + $0x48] sm:$0xf]  ;;  %v1844_v47 = vor.u32 %v2286_v39, %v1843_v38 }
   0xe   :  { %2437 = vmatpush.bf16.msra.mxu1 %v2313_v3  ;;  %2438 = vmatpush.bf16.msra.mxu2 %v2313_v3  ;;  %v2250_v43 = vld [vmem:[%s3278_s0 + $0x68] sm:$0xf0]  ;;  %v2328_v44 = vld [vmem:[%s3277_s1 + $0x98] sm:$0xff]  ;;  %v1916_v48 = vor.u32 %v2304_v41, %v1915_v40  ;;  %v2327_v52 = vld [vmem:[%s3277_s1 + $0x90] sm:$0xff] }
   0xf   :  { %2439 = vmatpush.bf16.msra.mxu3 %v2313_v3  ;;  %1080 = vmatpush.bf16.msra.mxu0 %v2313_v3  ;;  %v2320_v45 = vld [vmem:[%s3277_s1 + $0x58] sm:$0xff]  ;;  %v1700_v49 = vor.u32 %v2250_v43, %v1699_v42  ;;  %v2319_v53 = vld [vmem:[%s3277_s1 + $0x50] sm:$0xff]  ;;  %v2326_v56 = vld [vmem:[%s3277_s1 + $0x88] sm:$0xff] }
  0x10   :  { %v2336_v50 = vld [vmem:[%s3277_s1 + $0xd8] sm:$0xff]  ;;  %v2335_v54 = vld [vmem:[%s3277_s1 + $0xd0] sm:$0xff]  ;;  %v2318_v57 = vld [vmem:[%s3277_s1 + $0x48] sm:$0xff] }
  0x11   :  { %v2344_v51 = vld [vmem:[%s3277_s1 + $0x118] sm:$0xff]  ;;  %v2343_v55 = vld [vmem:[%s3277_s1 + $0x110] sm:$0xff]  ;;  %v2334_v58 = vld [vmem:[%s3277_s1 + $0xc8] sm:$0xff] }
  0x12   :  { %2440 = vmatpush.bf16.msra.mxu1 %v2312_v4  ;;  %2441 = vmatpush.bf16.msra.mxu2 %v2312_v4  ;;  %v2342_v59 = vld [vmem:[%s3277_s1 + $0x108] sm:$0xff]  ;;  %v2325_v60 = vld [vmem:[%s3277_s1 + $0x80] sm:$0xff]  ;;  %v2364_v2 = vld [vmem:[%s3277_s1 + $0x1b8] sm:$0xff] }
  0x13   :  { %2442 = vmatpush.bf16.msra.mxu3 %v2312_v4  ;;  %1081 = vmatpush.bf16.msra.mxu0 %v2312_v4  ;;  %v2317_v61 = vld [vmem:[%s3277_s1 + $0x40] sm:$0xff]  ;;  %v1665_v1 = vld [vmem:[%s3278_s0 + $0x24] sm:$0xf0]  ;;  %v2356_v3 = vld [vmem:[%s3277_s1 + $0x178] sm:$0xff] }
  0x14   :  { %v2237_v62 = vld [vmem:[%s3278_s0 + $0x4] sm:$0xf]  ;;  %v1671_v4 = vld [vmem:[%s3278_s0 + $0x8] sm:$0xf]  ;;  %v1679_v8 = vld [vmem:[%s3278_s0 + $0x10] sm:$0xf] }
  0x15   :  { %v2333_v63 = vld [vmem:[%s3277_s1 + $0xc0] sm:$0xff]  ;;  %v2243_v9 = vld [vmem:[%s3278_s0 + $0x30] sm:$0xf0]  ;;  %v2372_v10 = vld [vmem:[%s3277_s1 + $0x1f8] sm:$0xff]  ;;  %v1668_v12 = vor.u32 %v2237_v62, %v1665_v1 }
  0x16   :  { %2443 = vmatpush.bf16.msra.mxu1 %v2311_v5  ;;  %2444 = vmatpush.bf16.msra.mxu2 %v2311_v5  ;;  %v2341_v0 = vld [vmem:[%s3277_s1 + $0x100] sm:$0xff]  ;;  %v2380_v11 = vld [vmem:[%s3277_s1 + $0x238] sm:$0xff]  ;;  %v1680_v15 = vor.u32 %v2243_v9, %v1679_v8  ;;  %v2255_v40 = vld [vmem:[%s3278_s0 + $0x94] sm:$0xf] }
  0x17   :  { %2445 = vmatpush.bf16.msra.mxu3 %v2311_v5  ;;  %1082 = vmatpush.bf16.msra.mxu0 %v2311_v5  ;;  %v2242_v5 = vld [vmem:[%s3278_s0 + $0x28] sm:$0xf0]  ;;  %v2361_v36 = vld [vmem:[%s3277_s1 + $0x1a0] sm:$0xff]  ;;  %v1737_v41 = vld [vmem:[%s3278_s0 + $0xb4] sm:$0xf0] }
  0x18   :  { %v1672_v13 = vor.u32 %v2242_v5, %v1671_v4  ;;  %v2369_v37 = vld [vmem:[%s3277_s1 + $0x1e0] sm:$0xff]  ;;  %v1743_v42 = vld [vmem:[%s3278_s0 + $0x98] sm:$0xf]  ;;  %v2260_v43 = vld [vmem:[%s3278_s0 + $0xb8] sm:$0xf0] }
  0x19   :  { %v2353_v38 = vld [vmem:[%s3277_s1 + $0x160] sm:$0xff]  ;;  %v1787_v62 = vld [vmem:[%s3278_s0 + $0xe8] sm:$0xf]  ;;  %v2359_v4 = vld [vmem:[%s3277_s1 + $0x190] sm:$0xff] }
  0x1a   :  { %2446 = vmatpush.bf16.msra.mxu1 %v2310_v6  ;;  %2447 = vmatpush.bf16.msra.mxu2 %v2310_v6  ;;  %v2377_v39 = vld [vmem:[%s3277_s1 + $0x220] sm:$0xff]  ;;  %v2367_v5 = vld [vmem:[%s3277_s1 + $0x1d0] sm:$0xff]  ;;  %v1809_v9 = vld [vmem:[%s3278_s0 + $0x144] sm:$0xf0] }
  0x1b   :  { %2448 = vmatpush.bf16.msra.mxu3 %v2310_v6  ;;  %1083 = vmatpush.bf16.msra.mxu0 %v2310_v6  ;;  %v2238_v6 = vld [vmem:[%s3278_s0 + $0xc] sm:$0xf]  ;;  %v2273_v8 = vld [vmem:[%s3278_s0 + $0x124] sm:$0xf] }
  0x1e   :  { %2449 = vmatpush.bf16.msra.mxu1 %v2309_v7  ;;  %2450 = vmatpush.bf16.msra.mxu2 %v2309_v7 }
  0x1f   :  { %2451 = vmatpush.bf16.msra.mxu3 %v2309_v7  ;;  %1084 = vmatpush.bf16.msra.mxu0 %v2309_v7  ;;  %v1673_v7 = vld [vmem:[%s3278_s0 + $0x2c] sm:$0xf0] }
  0x20   :  { %v1676_v14 = vor.u32 %v2238_v6, %v1673_v7  ;;  %v2351_v6 = vld [vmem:[%s3277_s1 + $0x150] sm:$0xff] }
  0x21   :  { %1095 = vmatmul.bf16.vlgmr.msra.gmra.mxu1 %v1736_v18  ;;  %1105 = vmatmul.bf16.vlgmr.msra.gmra.mxu2 %v1808_v19  ;;  %v2371_v18 = vld [vmem:[%s3277_s1 + $0x1f0] sm:$0xff] }
  0x22   :  { %1175 = vmatpush.bf16.msrb.mxu2 %v2332_v16  ;;  %1126 = vmatpush.bf16.msrb.mxu1 %v2324_v17  ;;  %v2363_v16 = vld [vmem:[%s3277_s1 + $0x1b0] sm:$0xff] }
  0x23   :  { %1115 = vmatmul.bf16.vlgmr.msra.gmra.mxu3 %v1880_v20  ;;  %1085 = vmatmul.bf16.vlgmr.msra.gmra.mxu0 %v1664_v21  ;;  %v2355_v17 = vld [vmem:[%s3277_s1 + $0x170] sm:$0xff]  ;;  %v2362_v20 = vld [vmem:[%s3277_s1 + $0x1a8] sm:$0xff] }
  0x24   :  { %1224 = vmatpush.bf16.msrb.mxu3 %v2340_v22  ;;  %1273 = vmatpush.bf16.msrb.mxu0 %v2348_v23  ;;  %v2379_v19 = vld [vmem:[%s3277_s1 + $0x230] sm:$0xff]  ;;  %v2354_v21 = vld [vmem:[%s3277_s1 + $0x168] sm:$0xff] }
  0x25   :  { %v2370_v22 = vld [vmem:[%s3277_s1 + $0x1e8] sm:$0xff]  ;;  %v2375_v7 = vld [vmem:[%s3277_s1 + $0x210] sm:$0xff] }
  0x26   :  { %1176 = vmatpush.bf16.msrb.mxu2 %v2331_v24  ;;  %1127 = vmatpush.bf16.msrb.mxu1 %v2323_v25  ;;  %v2378_v23 = vld [vmem:[%s3277_s1 + $0x228] sm:$0xff]  ;;  %v1701_v25 = vld [vmem:[%s3278_s0 + $0x6c] sm:$0xf0] }
  0x27   :  { %v2246_v24 = vld [vmem:[%s3278_s0 + $0x4c] sm:$0xf] }
  0x28   :  { %1225 = vmatpush.bf16.msrb.mxu3 %v2339_v26  ;;  %1274 = vmatpush.bf16.msrb.mxu0 %v2347_v27  ;;  %v1707_v26 = vld [vmem:[%s3278_s0 + $0x50] sm:$0xf]  ;;  %v2251_v27 = vld [vmem:[%s3278_s0 + $0x70] sm:$0xf0] }
  0x2a   :  { %1177 = vmatpush.bf16.msrb.mxu2 %v2330_v28  ;;  %1128 = vmatpush.bf16.msrb.mxu1 %v2322_v29  ;;  %v2247_v28 = vld [vmem:[%s3278_s0 + $0x54] sm:$0xf]  ;;  %v1709_v29 = vld [vmem:[%s3278_s0 + $0x74] sm:$0xf0] }
  0x2c   :  { %1226 = vmatpush.bf16.msrb.mxu3 %v2338_v30  ;;  %1275 = vmatpush.bf16.msrb.mxu0 %v2346_v31  ;;  %v1715_v30 = vld [vmem:[%s3278_s0 + $0x58] sm:$0xf]  ;;  %v2252_v31 = vld [vmem:[%s3278_s0 + $0x78] sm:$0xf0] }
  0x2e   :  { %1178 = vmatpush.bf16.msrb.mxu2 %v2329_v32  ;;  %1129 = vmatpush.bf16.msrb.mxu1 %v2321_v33  ;;  %v1704_v32 = vor.u32 %v2246_v24, %v1701_v25  ;;  %v1708_v33 = vor.u32 %v2251_v27, %v1707_v26  ;;  %v2282_v24 = vld [vmem:[%s3278_s0 + $0x16c] sm:$0xf]  ;;  %v1845_v25 = vld [vmem:[%s3278_s0 + $0x18c] sm:$0xf0]  ;;  %v2287_v27 = vld [vmem:[%s3278_s0 + $0x190] sm:$0xf0] }
  0x2f   :  { %v1851_v26 = vld [vmem:[%s3278_s0 + $0x170] sm:$0xf] }
  0x30   :  { %1227 = vmatpush.bf16.msrb.mxu3 %v2337_v34  ;;  %1276 = vmatpush.bf16.msrb.mxu0 %v2345_v35  ;;  %v1712_v34 = vor.u32 %v2247_v28, %v1709_v29  ;;  %v1716_v35 = vor.u32 %v2252_v31, %v1715_v30  ;;  %v2283_v28 = vld [vmem:[%s3278_s0 + $0x174] sm:$0xf]  ;;  %v1853_v29 = vld [vmem:[%s3278_s0 + $0x194] sm:$0xf0]  ;;  %v2288_v31 = vld [vmem:[%s3278_s0 + $0x198] sm:$0xf0] }
  0x31   :  { %1100 = vmatmul.bf16.gmra.mxu1 %v1772_v46  ;;  %1110 = vmatmul.bf16.gmra.mxu2 %v1844_v47  ;;  %v1751_v46 = vld [vmem:[%s3278_s0 + $0xa0] sm:$0xf]  ;;  %v2261_v47 = vld [vmem:[%s3278_s0 + $0xc0] sm:$0xf0]  ;;  %v1859_v30 = vld [vmem:[%s3278_s0 + $0x178] sm:$0xf] }
  0x32   :  { %1179 = vmatpush.bf16.msrb.mxu2 %v2328_v44  ;;  %1130 = vmatpush.bf16.msrb.mxu1 %v2320_v45  ;;  %v2256_v44 = vld [vmem:[%s3278_s0 + $0x9c] sm:$0xf]  ;;  %v1745_v45 = vld [vmem:[%s3278_s0 + $0xbc] sm:$0xf0] }
  0x33   :  { %1120 = vmatmul.bf16.gmra.mxu3 %v1916_v48  ;;  %1090 = vmatmul.bf16.gmra.mxu0 %v1700_v49  ;;  %v1740_v48 = vor.u32 %v2255_v40, %v1737_v41  ;;  %v1744_v49 = vor.u32 %v2260_v43, %v1743_v42  ;;  %v2291_v40 = vld [vmem:[%s3278_s0 + $0x1b4] sm:$0xf]  ;;  %v1881_v41 = vld [vmem:[%s3278_s0 + $0x1d4] sm:$0xf0]  ;;  %v2296_v43 = vld [vmem:[%s3278_s0 + $0x1d8] sm:$0xf0] }
  0x34   :  { %1228 = vmatpush.bf16.msrb.mxu3 %v2336_v50  ;;  %1277 = vmatpush.bf16.msrb.mxu0 %v2344_v51  ;;  %v1748_v50 = vor.u32 %v2256_v44, %v1745_v45  ;;  %v1752_v51 = vor.u32 %v2261_v47, %v1751_v46  ;;  %v1887_v42 = vld [vmem:[%s3278_s0 + $0x1b8] sm:$0xf]  ;;  %v2292_v44 = vld [vmem:[%s3278_s0 + $0x1bc] sm:$0xf]  ;;  %v1889_v45 = vld [vmem:[%s3278_s0 + $0x1dc] sm:$0xf0] }
  0x35   :  { %v1895_v46 = vld [vmem:[%s3278_s0 + $0x1c0] sm:$0xf]  ;;  %v2297_v47 = vld [vmem:[%s3278_s0 + $0x1e0] sm:$0xf0] }
  0x36   :  { %1180 = vmatpush.bf16.msrb.mxu2 %v2327_v52  ;;  %1131 = vmatpush.bf16.msrb.mxu1 %v2319_v53  ;;  %v2360_v52 = vld [vmem:[%s3277_s1 + $0x198] sm:$0xff] }
  0x37   :  { %v2368_v53 = vld [vmem:[%s3277_s1 + $0x1d8] sm:$0xff] }
  0x38   :  { %1229 = vmatpush.bf16.msrb.mxu3 %v2335_v54  ;;  %1278 = vmatpush.bf16.msrb.mxu0 %v2343_v55  ;;  %v2352_v54 = vld [vmem:[%s3277_s1 + $0x158] sm:$0xff] }
  0x39   :  { %v2376_v55 = vld [vmem:[%s3277_s1 + $0x218] sm:$0xff] }
  0x3a   :  { %1181 = vmatpush.bf16.msrb.mxu2 %v2326_v56  ;;  %1132 = vmatpush.bf16.msrb.mxu1 %v2318_v57  ;;  %v2264_v56 = vld [vmem:[%s3278_s0 + $0xdc] sm:$0xf]  ;;  %v1773_v57 = vld [vmem:[%s3278_s0 + $0xfc] sm:$0xf0] }
  0x3c   :  { %1230 = vmatpush.bf16.msrb.mxu3 %v2334_v58  ;;  %1279 = vmatpush.bf16.msrb.mxu0 %v2342_v59  ;;  %v1779_v58 = vld [vmem:[%s3278_s0 + $0xe0] sm:$0xf]  ;;  %v2269_v59 = vld [vmem:[%s3278_s0 + $0x100] sm:$0xf0] }
  0x3d   :  { %v1780_v1 = vor.u32 %v2269_v59, %v1779_v58  ;;  %v2300_v58 = vld [vmem:[%s3278_s0 + $0x1fc] sm:$0xf]  ;;  %v1917_v59 = vld [vmem:[%s3278_s0 + $0x21c] sm:$0xf0] }
  0x3e   :  { %1182 = vmatpush.bf16.msrb.mxu2 %v2325_v60  ;;  %1133 = vmatpush.bf16.msrb.mxu1 %v2317_v61  ;;  %v2265_v60 = vld [vmem:[%s3278_s0 + $0xe4] sm:$0xf]  ;;  %v1781_v61 = vld [vmem:[%s3278_s0 + $0x104] sm:$0xf0] }
  0x40   :  { %1231 = vmatpush.bf16.msrb.mxu3 %v2333_v63  ;;  %1280 = vmatpush.bf16.msrb.mxu0 %v2341_v0  ;;  %v2270_v63 = vld [vmem:[%s3278_s0 + $0x108] sm:$0xf0]  ;;  %v1776_v0 = vor.u32 %v2264_v56, %v1773_v57 }
  0x41   :  { %1134 = vmatmul.bf16.vlgmr.msrb.gmra.mxu1 %v1668_v12  ;;  %1183 = vmatmul.bf16.vlgmr.msrb.gmra.mxu2 %v1672_v13  ;;  %v2274_v12 = vld [vmem:[%s3278_s0 + $0x12c] sm:$0xf]  ;;  %v1817_v13 = vld [vmem:[%s3278_s0 + $0x14c] sm:$0xf0] }
  0x42   :  { %1371 = vmatpush.bf16.msra.mxu2 %v2364_v2  ;;  %1322 = vmatpush.bf16.msra.mxu1 %v2356_v3  ;;  %v1784_v2 = vor.u32 %v2265_v60, %v1781_v61  ;;  %v1788_v3 = vor.u32 %v2270_v63, %v1787_v62  ;;  %v1923_v60 = vld [vmem:[%s3278_s0 + $0x200] sm:$0xf]  ;;  %v2305_v61 = vld [vmem:[%s3278_s0 + $0x220] sm:$0xf0]  ;;  %v1925_v63 = vld [vmem:[%s3278_s0 + $0x224] sm:$0xf0] }
  0x43   :  { %1232 = vmatmul.bf16.vlgmr.msrb.gmra.mxu3 %v1676_v14  ;;  %1281 = vmatmul.bf16.vlgmr.msrb.gmra.mxu0 %v1680_v15  ;;  %v1823_v14 = vld [vmem:[%s3278_s0 + $0x130] sm:$0xf]  ;;  %v2279_v15 = vld [vmem:[%s3278_s0 + $0x150] sm:$0xf0]  ;;  %v2301_v62 = vld [vmem:[%s3278_s0 + $0x204] sm:$0xf] }
  0x44   :  { %1420 = vmatpush.bf16.msra.mxu3 %v2372_v10  ;;  %1469 = vmatpush.bf16.msra.mxu0 %v2380_v11  ;;  %v1815_v10 = vld [vmem:[%s3278_s0 + $0x128] sm:$0xf]  ;;  %v2278_v11 = vld [vmem:[%s3278_s0 + $0x148] sm:$0xf0] }
  0x46   :  { %1372 = vmatpush.bf16.msra.mxu2 %v2363_v16  ;;  %1323 = vmatpush.bf16.msra.mxu1 %v2355_v17  ;;  %v1812_v16 = vor.u32 %v2273_v8, %v1809_v9  ;;  %v1816_v17 = vor.u32 %v2278_v11, %v1815_v10 }
  0x48   :  { %1421 = vmatpush.bf16.msra.mxu3 %v2371_v18  ;;  %1470 = vmatpush.bf16.msra.mxu0 %v2379_v19  ;;  %v1820_v18 = vor.u32 %v2274_v12, %v1817_v13  ;;  %v1824_v19 = vor.u32 %v2279_v15, %v1823_v14  ;;  %v2239_v14 = vld [vmem:[%s3278_s0 + $0x14] sm:$0xf]  ;;  %v1681_v15 = vld [vmem:[%s3278_s0 + $0x34] sm:$0xf0] }
  0x4a   :  { %1373 = vmatpush.bf16.msra.mxu2 %v2362_v20  ;;  %1324 = vmatpush.bf16.msra.mxu1 %v2354_v21  ;;  %v2358_v20 = vld [vmem:[%s3277_s1 + $0x188] sm:$0xff] }
  0x4b   :  { %v2366_v21 = vld [vmem:[%s3277_s1 + $0x1c8] sm:$0xff] }
  0x4c   :  { %1422 = vmatpush.bf16.msra.mxu3 %v2370_v22  ;;  %1471 = vmatpush.bf16.msra.mxu0 %v2378_v23  ;;  %v2350_v22 = vld [vmem:[%s3277_s1 + $0x148] sm:$0xff] }
  0x4d   :  { %v2374_v23 = vld [vmem:[%s3277_s1 + $0x208] sm:$0xff] }
  0x4e   :  { %1374 = vmatpush.bf16.msra.mxu2 %v2361_v36  ;;  %1325 = vmatpush.bf16.msra.mxu1 %v2353_v38  ;;  %v2357_v36 = vld [vmem:[%s3277_s1 + $0x180] sm:$0xff] }
  0x4f   :  { %v2349_v38 = vld [vmem:[%s3277_s1 + $0x140] sm:$0xff] }
  0x50   :  { %1423 = vmatpush.bf16.msra.mxu3 %v2369_v37  ;;  %1472 = vmatpush.bf16.msra.mxu0 %v2377_v39  ;;  %v2365_v37 = vld [vmem:[%s3277_s1 + $0x1c0] sm:$0xff] }
  0x51   :  { %1139 = vmatmul.bf16.gmra.mxu1 %v1704_v32  ;;  %1188 = vmatmul.bf16.gmra.mxu2 %v1708_v33  ;;  %v1848_v32 = vor.u32 %v2282_v24, %v1845_v25  ;;  %v1852_v33 = vor.u32 %v2287_v27, %v1851_v26  ;;  %v2373_v39 = vld [vmem:[%s3277_s1 + $0x200] sm:$0xff]  ;;  %v1684_v24 = vor.u32 %v2239_v14, %v1681_v15 }
  0x52   :  { %1375 = vmatpush.bf16.msra.mxu2 %v2360_v52  ;;  %1326 = vmatpush.bf16.msra.mxu1 %v2352_v54  ;;  %v1896_v52 = vor.u32 %v2297_v47, %v1895_v46  ;;  %v2254_v46 = vld [vmem:[%s3278_s0 + $0x88] sm:$0xf0]  ;;  %v2257_v14 = vld [vmem:[%s3278_s0 + $0xa4] sm:$0xf] }
  0x53   :  { %1237 = vmatmul.bf16.gmra.mxu3 %v1712_v34  ;;  %1286 = vmatmul.bf16.gmra.mxu0 %v1716_v35  ;;  %v1856_v34 = vor.u32 %v2283_v28, %v1853_v29  ;;  %v1860_v35 = vor.u32 %v2288_v31, %v1859_v30 }
  0x54   :  { %1424 = vmatpush.bf16.msra.mxu3 %v2368_v53  ;;  %1473 = vmatpush.bf16.msra.mxu0 %v2376_v55 }
  0x56   :  { %1376 = vmatpush.bf16.msra.mxu2 %v2359_v4  ;;  %1327 = vmatpush.bf16.msra.mxu1 %v2351_v6  ;;  %v1920_v4 = vor.u32 %v2300_v58, %v1917_v59 }
  0x58   :  { %1425 = vmatpush.bf16.msra.mxu3 %v2367_v5  ;;  %1474 = vmatpush.bf16.msra.mxu0 %v2375_v7  ;;  %v1924_v5 = vor.u32 %v2305_v61, %v1923_v60  ;;  %v1928_v7 = vor.u32 %v2301_v62, %v1925_v63 }
  0x5a   :  { %1377 = vmatpush.bf16.msra.mxu2 %v2358_v20  ;;  %1328 = vmatpush.bf16.msra.mxu1 %v2350_v22  ;;  %v1695_v20 = vld [vmem:[%s3278_s0 + $0x20] sm:$0xf] }
  0x5c   :  { %1426 = vmatpush.bf16.msra.mxu3 %v2366_v21  ;;  %1475 = vmatpush.bf16.msra.mxu0 %v2374_v23  ;;  %v2245_v21 = vld [vmem:[%s3278_s0 + $0x40] sm:$0xf0] }
  0x5d   :  { %v1696_v28 = vor.u32 %v2245_v21, %v1695_v20  ;;  %v2263_v20 = vld [vmem:[%s3278_s0 + $0xd0] sm:$0xf0] }
  0x5e   :  { %1378 = vmatpush.bf16.msra.mxu2 %v2357_v36  ;;  %1329 = vmatpush.bf16.msra.mxu1 %v2349_v38  ;;  %v2248_v38 = vld [vmem:[%s3278_s0 + $0x5c] sm:$0xf] }
  0x60   :  { %1427 = vmatpush.bf16.msra.mxu3 %v2365_v37  ;;  %1476 = vmatpush.bf16.msra.mxu0 %v2373_v39  ;;  %v1717_v39 = vld [vmem:[%s3278_s0 + $0x7c] sm:$0xf0] }
  0x61   :  { %1144 = vmatmul.bf16.gmra.mxu1 %v1740_v48  ;;  %1193 = vmatmul.bf16.gmra.mxu2 %v1744_v49  ;;  %v1884_v48 = vor.u32 %v2291_v40, %v1881_v41  ;;  %v1888_v49 = vor.u32 %v2296_v43, %v1887_v42  ;;  %v1723_v41 = vld [vmem:[%s3278_s0 + $0x60] sm:$0xf]  ;;  %v2253_v42 = vld [vmem:[%s3278_s0 + $0x80] sm:$0xf0] }
  0x62   :  { %v2249_v43 = vld [vmem:[%s3278_s0 + $0x64] sm:$0xf] }
  0x63   :  { %1242 = vmatmul.bf16.gmra.mxu3 %v1748_v50  ;;  %1291 = vmatmul.bf16.gmra.mxu0 %v1752_v51  ;;  %v1892_v51 = vor.u32 %v2292_v44, %v1889_v45  ;;  %v1725_v44 = vld [vmem:[%s3278_s0 + $0x84] sm:$0xf0] }
  0x64   :  { %v1731_v45 = vld [vmem:[%s3278_s0 + $0x68] sm:$0xf] }
  0x65   :  { %v1732_v58 = vor.u32 %v2254_v46, %v1731_v45  ;;  %v1795_v45 = vld [vmem:[%s3278_s0 + $0xf0] sm:$0xf]  ;;  %v2271_v46 = vld [vmem:[%s3278_s0 + $0x110] sm:$0xf0] }
  0x71   :  { %1149 = vmatmul.bf16.gmra.mxu1 %v1776_v0  ;;  %1198 = vmatmul.bf16.gmra.mxu2 %v1780_v1  ;;  %v1931_v0 = vld [vmem:[%s3278_s0 + $0x208] sm:$0xf]  ;;  %v2306_v1 = vld [vmem:[%s3278_s0 + $0x228] sm:$0xf0] }
  0x72   :  { %v1932_v8 = vor.u32 %v2306_v1, %v1931_v0 }
  0x73   :  { %1247 = vmatmul.bf16.gmra.mxu3 %v1784_v2  ;;  %1296 = vmatmul.bf16.gmra.mxu0 %v1788_v3 }
  0x81   :  { %1154 = vmatmul.bf16.gmra.mxu1 %v1812_v16  ;;  %1203 = vmatmul.bf16.gmra.mxu2 %v1816_v17  ;;  %v1687_v16 = vld [vmem:[%s3278_s0 + $0x18] sm:$0xf]  ;;  %v2244_v17 = vld [vmem:[%s3278_s0 + $0x38] sm:$0xf0] }
  0x82   :  { %v1688_v25 = vor.u32 %v2244_v17, %v1687_v16  ;;  %v1759_v16 = vld [vmem:[%s3278_s0 + $0xa8] sm:$0xf]  ;;  %v2262_v17 = vld [vmem:[%s3278_s0 + $0xc8] sm:$0xf0] }
  0x83   :  { %1252 = vmatmul.bf16.gmra.mxu3 %v1820_v18  ;;  %1301 = vmatmul.bf16.gmra.mxu0 %v1824_v19  ;;  %v2240_v18 = vld [vmem:[%s3278_s0 + $0x1c] sm:$0xf]  ;;  %v1689_v19 = vld [vmem:[%s3278_s0 + $0x3c] sm:$0xf0] }
  0x84   :  { %v1692_v27 = vor.u32 %v2240_v18, %v1689_v19  ;;  %v1761_v18 = vld [vmem:[%s3278_s0 + $0xcc] sm:$0xf0] }
  0x85   :  { %v1767_v19 = vld [vmem:[%s3278_s0 + $0xb0] sm:$0xf] }
  0x91   :  { %1159 = vmatmul.bf16.gmra.mxu1 %v1848_v32  ;;  %1208 = vmatmul.bf16.gmra.mxu2 %v1852_v33 }
  0x93   :  { %1257 = vmatmul.bf16.gmra.mxu3 %v1856_v34  ;;  %1306 = vmatmul.bf16.gmra.mxu0 %v1860_v35 }
  0x9e   :  { %v2911_v50 = vpop.f32.mrf.mxu1 }
  0xa0   :  { %v1086_v53 = vpop.f32.mrf.mxu0 }
  0xa1   :  { %1164 = vmatmul.bf16.gmra.mxu1 %v1884_v48  ;;  %1213 = vmatmul.bf16.gmra.mxu2 %v1888_v49 }
  0xa3   :  { %1262 = vmatmul.bf16.gmra.mxu3 %v1892_v51  ;;  %1311 = vmatmul.bf16.gmra.mxu0 %v1896_v52  ;;  %v1720_v51 = vor.u32 %v2248_v38, %v1717_v39  ;;  %v1724_v52 = vor.u32 %v2253_v42, %v1723_v41 }
  0xa4   :  { %v2913_v54 = vpop.f32.mrf.mxu2 }
  0xa6   :  { %v2915_v55 = vpop.f32.mrf.mxu3  ;;  %v2917_v56 = vpop.f32.mrf.mxu1 }
  0xa8   :  { %v1088_v57 = vpop.f32.mrf.mxu0 }
  0xac   :  { %v2943_v2 = vpop.f32.mrf.mxu2 }
  0xae   :  { %v2945_v3 = vpop.f32.mrf.mxu3  ;;  %v2947_v6 = vpop.f32.mrf.mxu1 }
  0xb0   :  { %v1091_v9 = vpop.f32.mrf.mxu0 }
  0xb1   :  { %1169 = vmatmul.bf16.gmra.mxu1 %v1920_v4  ;;  %1218 = vmatmul.bf16.gmra.mxu2 %v1924_v5 }
  0xb3   :  { %1267 = vmatmul.bf16.gmra.mxu3 %v1928_v7  ;;  %1316 = vmatmul.bf16.gmra.mxu0 %v1932_v8 }
  0xb4   :  { %v2949_v10 = vpop.f32.mrf.mxu2 }
  0xb6   :  { %v2951_v11 = vpop.f32.mrf.mxu3  ;;  %v2953_v12 = vpop.f32.mrf.mxu1 }
  0xb8   :  { %v1093_v13 = vpop.f32.mrf.mxu0 }
  0xbc   :  { %v2979_v22 = vpop.f32.mrf.mxu2 }
  0xbe   :  { %v2981_v23 = vpop.f32.mrf.mxu3  ;;  %v1135_v26 = vpop.f32.mrf.mxu1 }
  0xbf   :  { %v1136_v29 = vadd.f32 %v1135_v26, %v1086_v53 }
  0xc0   :  { %v1282_v30 = vpop.f32.mrf.mxu0 }
  0xc1   :  { %1330 = vmatmul.bf16.vlgmr.msra.gmra.mxu1 %v1684_v24  ;;  %1379 = vmatmul.bf16.vlgmr.msra.gmra.mxu2 %v1688_v25 }
  0xc3   :  { %1428 = vmatmul.bf16.vlgmr.msra.gmra.mxu3 %v1692_v27  ;;  %1477 = vmatmul.bf16.vlgmr.msra.gmra.mxu0 %v1696_v28  ;;  %v1760_v27 = vor.u32 %v2262_v17, %v1759_v16 }
  0xc4   :  { %v1184_v31 = vpop.f32.mrf.mxu2 }
  0xc5   :  { %v1185_v32 = vadd.f32 %v1184_v31, %v1136_v29 }
  0xc6   :  { %v1233_v33 = vpop.f32.mrf.mxu3  ;;  %v1137_v34 = vpop.f32.mrf.mxu1 }
  0xc7   :  { %v1234_v35 = vadd.f32 %v1233_v33, %v1185_v32  ;;  %v1138_v36 = vadd.f32 %v1137_v34, %v1088_v57  ;;  %v1728_v57 = vor.u32 %v2249_v43, %v1725_v44  ;;  %v2266_v43 = vld [vmem:[%s3278_s0 + $0xec] sm:$0xf] }
  0xc8   :  { %v1284_v37 = vpop.f32.mrf.mxu0 }
  0xc9   :  { %v2989_v40 = vadd.f32 %v1282_v30, %v1234_v35  ;;  %v1768_v30 = vor.u32 %v2263_v20, %v1767_v19  ;;  %v1831_v19 = vld [vmem:[%s3278_s0 + $0x138] sm:$0xf]  ;;  %v2280_v20 = vld [vmem:[%s3278_s0 + $0x158] sm:$0xf0] }
  0xcc   :  { %v1186_v47 = vpop.f32.mrf.mxu2 }
  0xcd   :  { %v1187_v48 = vadd.f32 %v1186_v47, %v1138_v36  ;;  %v1797_v47 = vld [vmem:[%s3278_s0 + $0x114] sm:$0xf0] }
  0xce   :  { %v1235_v49 = vpop.f32.mrf.mxu3  ;;  %v1140_v53 = vpop.f32.mrf.mxu1 }
  0xcf   :  { %v1236_v59 = vadd.f32 %v1235_v49, %v1187_v48  ;;  %v1141_v60 = vadd.f32 %v1140_v53, %v1091_v9  ;;  %v1753_v9 = vld [vmem:[%s3278_s0 + $0xc4] sm:$0xf0]  ;;  %v1803_v48 = vld [vmem:[%s3278_s0 + $0xf8] sm:$0xf]  ;;  %v2272_v49 = vld [vmem:[%s3278_s0 + $0x118] sm:$0xf0] }
  0xd0   :  { %v1287_v61 = vpop.f32.mrf.mxu0  ;;  %v1756_v26 = vor.u32 %v2257_v14, %v1753_v9 }
  0xd1   :  { %1335 = vmatmul.bf16.gmra.mxu1 %v1720_v51  ;;  %1384 = vmatmul.bf16.gmra.mxu2 %v1724_v52  ;;  %v3009_v62 = vadd.f32 %v1284_v37, %v1236_v59 }
  0xd3   :  { %1433 = vmatmul.bf16.gmra.mxu3 %v1728_v57  ;;  %1482 = vmatmul.bf16.gmra.mxu0 %v1732_v58  ;;  %v1796_v58 = vor.u32 %v2271_v46, %v1795_v45  ;;  %v2284_v46 = vld [vmem:[%s3278_s0 + $0x17c] sm:$0xf] }
  0xd4   :  { %v1189_v63 = vpop.f32.mrf.mxu2 }
  0xd5   :  { %v1190_v0 = vadd.f32 %v1189_v63, %v1141_v60 }
  0xd6   :  { %v1238_v1 = vpop.f32.mrf.mxu3  ;;  %v1142_v4 = vpop.f32.mrf.mxu1 }
  0xd7   :  { %v1239_v5 = vadd.f32 %v1238_v1, %v1190_v0  ;;  %v1143_v7 = vadd.f32 %v1142_v4, %v1093_v13  ;;  %v2258_v13 = vld [vmem:[%s3278_s0 + $0xac] sm:$0xf] }
  0xd8   :  { %v1289_v8 = vpop.f32.mrf.mxu0  ;;  %v1764_v29 = vor.u32 %v2258_v13, %v1761_v18  ;;  %v2275_v13 = vld [vmem:[%s3278_s0 + $0x134] sm:$0xf] }
  0xd9   :  { %v3017_v15 = vadd.f32 %v1287_v61, %v1239_v5  ;;  %v1804_v61 = vor.u32 %v2272_v49, %v1803_v48  ;;  %v2289_v48 = vld [vmem:[%s3278_s0 + $0x1a0] sm:$0xf0] }
  0xda   :  { %v2285_v49 = vld [vmem:[%s3278_s0 + $0x184] sm:$0xf] }
  0xdc   :  { %v1191_v21 = vpop.f32.mrf.mxu2 }
  0xdd   :  { %v1192_v24 = vadd.f32 %v1191_v21, %v1143_v7  ;;  %v1833_v21 = vld [vmem:[%s3278_s0 + $0x15c] sm:$0xf0] }
  0xde   :  { %v1240_v25 = vpop.f32.mrf.mxu3  ;;  %v1145_v28 = vpop.f32.mrf.mxu1 }
  0xdf   :  { %v1241_v31 = vadd.f32 %v1240_v25, %v1192_v24  ;;  %v1146_v32 = vadd.f32 %v1145_v28, %v2911_v50  ;;  %v1789_v50 = vld [vmem:[%s3278_s0 + $0x10c] sm:$0xf0]  ;;  %v1839_v24 = vld [vmem:[%s3278_s0 + $0x140] sm:$0xf]  ;;  %v2281_v25 = vld [vmem:[%s3278_s0 + $0x160] sm:$0xf0] }
  0xe0   :  { %v1292_v33 = vpop.f32.mrf.mxu0  ;;  %v1792_v57 = vor.u32 %v2266_v43, %v1789_v50 }
  0xe1   :  { %1340 = vmatmul.bf16.gmra.mxu1 %v1756_v26  ;;  %1389 = vmatmul.bf16.gmra.mxu2 %v1760_v27  ;;  %v3038_v34 = vadd.f32 %v1289_v8, %v1241_v31 }
  0xe3   :  { %1438 = vmatmul.bf16.gmra.mxu3 %v1764_v29  ;;  %1487 = vmatmul.bf16.gmra.mxu0 %v1768_v30  ;;  %v1832_v30 = vor.u32 %v2280_v20, %v1831_v19  ;;  %v2293_v20 = vld [vmem:[%s3278_s0 + $0x1c4] sm:$0xf] }
  0xe4   :  { %v1194_v35 = vpop.f32.mrf.mxu2 }
  0xe5   :  { %v1195_v36 = vadd.f32 %v1194_v35, %v1146_v32 }
  0xe6   :  { %v1243_v37 = vpop.f32.mrf.mxu3  ;;  %v1147_v38 = vpop.f32.mrf.mxu1 }
  0xe7   :  { %v1244_v39 = vadd.f32 %v1243_v37, %v1195_v36  ;;  %v1148_v41 = vadd.f32 %v1147_v38, %v2917_v56  ;;  %v2267_v56 = vld [vmem:[%s3278_s0 + $0xf4] sm:$0xf] }
  0xe8   :  { %v1294_v42 = vpop.f32.mrf.mxu0  ;;  %v1800_v60 = vor.u32 %v2267_v56, %v1797_v47  ;;  %v1861_v56 = vld [vmem:[%s3278_s0 + $0x19c] sm:$0xf0] }
  0xe9   :  { %v3047_v44 = vadd.f32 %v1292_v33, %v1244_v39  ;;  %v1840_v33 = vor.u32 %v2281_v25, %v1839_v24  ;;  %v2298_v24 = vld [vmem:[%s3278_s0 + $0x1e8] sm:$0xf0] }
  0xea   :  { %v2294_v25 = vld [vmem:[%s3278_s0 + $0x1cc] sm:$0xf] }
  0xec   :  { %v1196_v51 = vpop.f32.mrf.mxu2 }
  0xed   :  { %v1197_v52 = vadd.f32 %v1196_v51, %v1148_v41 }
  0xee   :  { %v1245_v53 = vpop.f32.mrf.mxu3  ;;  %v1150_v59 = vpop.f32.mrf.mxu1 }
  0xef   :  { %v1246_v63 = vadd.f32 %v1245_v53, %v1197_v52  ;;  %v1151_v0 = vadd.f32 %v1150_v59, %v2947_v6  ;;  %v1825_v6 = vld [vmem:[%s3278_s0 + $0x154] sm:$0xf0]  ;;  %v1869_v52 = vld [vmem:[%s3278_s0 + $0x1a4] sm:$0xf0] }
  0xf0   :  { %v1297_v1 = vpop.f32.mrf.mxu0  ;;  %v1828_v29 = vor.u32 %v2275_v13, %v1825_v6  ;;  %v1875_v53 = vld [vmem:[%s3278_s0 + $0x188] sm:$0xf] }
  0xf1   :  { %1345 = vmatmul.bf16.gmra.mxu1 %v1792_v57  ;;  %1394 = vmatmul.bf16.gmra.mxu2 %v1796_v58  ;;  %v3068_v4 = vadd.f32 %v1294_v42, %v1246_v63  ;;  %v2290_v57 = vld [vmem:[%s3278_s0 + $0x1a8] sm:$0xf0] }
  0xf3   :  { %1443 = vmatmul.bf16.gmra.mxu3 %v1800_v60  ;;  %1492 = vmatmul.bf16.gmra.mxu0 %v1804_v61  ;;  %v1864_v61 = vor.u32 %v2284_v46, %v1861_v56 }
  0xf4   :  { %v1199_v5 = vpop.f32.mrf.mxu2 }
  0xf5   :  { %v1200_v7 = vadd.f32 %v1199_v5, %v1151_v0 }
  0xf6   :  { %v1248_v8 = vpop.f32.mrf.mxu3  ;;  %v1152_v14 = vpop.f32.mrf.mxu1 }
  0xf7   :  { %v1249_v9 = vadd.f32 %v1248_v8, %v1200_v7  ;;  %v1153_v16 = vadd.f32 %v1152_v14, %v2953_v12  ;;  %v2276_v12 = vld [vmem:[%s3278_s0 + $0x13c] sm:$0xf] }
  0xf8   :  { %v1299_v17 = vpop.f32.mrf.mxu0  ;;  %v1836_v32 = vor.u32 %v2276_v12, %v1833_v21  ;;  %v1897_v12 = vld [vmem:[%s3278_s0 + $0x1e4] sm:$0xf0] }
  0xf9   :  { %v3077_v18 = vadd.f32 %v1297_v1, %v1249_v9  ;;  %v1872_v1 = vor.u32 %v2285_v49, %v1869_v52  ;;  %v2302_v49 = vld [vmem:[%s3278_s0 + $0x20c] sm:$0xf] }
  0xfc   :  { %v1201_v26 = vpop.f32.mrf.mxu2 }
  0xfd   :  { %v1202_v27 = vadd.f32 %v1201_v26, %v1153_v16 }
  0xfe   :  { %v1250_v28 = vpop.f32.mrf.mxu3  ;;  %v1155_v31 = vpop.f32.mrf.mxu1 }
  0xff   :  { %v1251_v35 = vadd.f32 %v1250_v28, %v1202_v27  ;;  %v1156_v38 = vadd.f32 %v1155_v31, %v2913_v54  ;;  %v1867_v54 = vld [vmem:[%s3278_s0 + $0x180] sm:$0xf]  ;;  %v1905_v27 = vld [vmem:[%s3278_s0 + $0x1ec] sm:$0xf0] }
 0x100   :  { %v1302_v36 = vpop.f32.mrf.mxu0  ;;  %v1868_v63 = vor.u32 %v2289_v48, %v1867_v54  ;;  %v1911_v28 = vld [vmem:[%s3278_s0 + $0x1d0] sm:$0xf] }
 0x101   :  { %1350 = vmatmul.bf16.gmra.mxu1 %v1828_v29  ;;  %1399 = vmatmul.bf16.gmra.mxu2 %v1832_v30  ;;  %v3097_v37 = vadd.f32 %v1299_v17, %v1251_v35  ;;  %v2299_v29 = vld [vmem:[%s3278_s0 + $0x1f0] sm:$0xf0] }
 0x103   :  { %1448 = vmatmul.bf16.gmra.mxu3 %v1836_v32  ;;  %1497 = vmatmul.bf16.gmra.mxu0 %v1840_v33  ;;  %v1900_v33 = vor.u32 %v2293_v20, %v1897_v12 }
 0x104   :  { %v1204_v39 = vpop.f32.mrf.mxu2 }
 0x105   :  { %v1205_v41 = vadd.f32 %v1204_v39, %v1156_v38  ;;  %v1908_v38 = vor.u32 %v2294_v25, %v1905_v27 }
 0x106   :  { %v1253_v42 = vpop.f32.mrf.mxu3  ;;  %v1157_v43 = vpop.f32.mrf.mxu1 }
 0x107   :  { %v1254_v50 = vadd.f32 %v1253_v42, %v1205_v41  ;;  %v1158_v51 = vadd.f32 %v1157_v43, %v2943_v2  ;;  %v1876_v2 = vor.u32 %v2290_v57, %v1875_v53  ;;  %v2307_v53 = vld [vmem:[%s3278_s0 + $0x230] sm:$0xf0] }
 0x108   :  { %v1304_v45 = vpop.f32.mrf.mxu0  ;;  %v2303_v57 = vld [vmem:[%s3278_s0 + $0x214] sm:$0xf] }
 0x109   :  { %v3106_v47 = vadd.f32 %v1302_v36, %v1254_v50 }
 0x10c   :  { %v1206_v58 = vpop.f32.mrf.mxu2 }
 0x10d   :  { %v1207_v59 = vadd.f32 %v1206_v58, %v1158_v51  ;;  %v1933_v51 = vld [vmem:[%s3278_s0 + $0x22c] sm:$0xf0] }
 0x10e   :  { %v1255_v60 = vpop.f32.mrf.mxu3  ;;  %v1160_v0 = vpop.f32.mrf.mxu1 }
 0x10f   :  { %v1256_v5 = vadd.f32 %v1255_v60, %v1207_v59  ;;  %v1161_v14 = vadd.f32 %v1160_v0, %v2949_v10  ;;  %v1903_v10 = vld [vmem:[%s3278_s0 + $0x1c8] sm:$0xf]  ;;  %v1941_v59 = vld [vmem:[%s3278_s0 + $0x234] sm:$0xf0] }
 0x110   :  { %v1307_v7 = vpop.f32.mrf.mxu0  ;;  %v1904_v35 = vor.u32 %v2298_v24, %v1903_v10  ;;  %v1947_v60 = vld [vmem:[%s3278_s0 + $0x218] sm:$0xf] }
 0x111   :  { %1355 = vmatmul.bf16.gmra.mxu1 %v1864_v61  ;;  %1404 = vmatmul.bf16.gmra.mxu2 %v1868_v63  ;;  %v3127_v8 = vadd.f32 %v1304_v45, %v1256_v5  ;;  %v2308_v61 = vld [vmem:[%s3278_s0 + $0x238] sm:$0xf0] }
 0x113   :  { %1453 = vmatmul.bf16.gmra.mxu3 %v1872_v1  ;;  %1502 = vmatmul.bf16.gmra.mxu0 %v1876_v2  ;;  %v1936_v2 = vor.u32 %v2302_v49, %v1933_v51 }
 0x114   :  { %v1209_v9 = vpop.f32.mrf.mxu2 }
 0x115   :  { %v1210_v16 = vadd.f32 %v1209_v9, %v1161_v14  ;;  %v1944_v14 = vor.u32 %v2303_v57, %v1941_v59 }
 0x116   :  { %v1258_v17 = vpop.f32.mrf.mxu3  ;;  %v1162_v13 = vpop.f32.mrf.mxu1 }
 0x117   :  { %v1259_v6 = vadd.f32 %v1258_v17, %v1210_v16  ;;  %v1163_v26 = vadd.f32 %v1162_v13, %v2979_v22  ;;  %v1912_v22 = vor.u32 %v2299_v29, %v1911_v28 }
 0x118   :  { %v1309_v19 = vpop.f32.mrf.mxu0 }
 0x119   :  { %v3136_v21 = vadd.f32 %v1307_v7, %v1259_v6 }
 0x11c   :  { %v1211_v30 = vpop.f32.mrf.mxu2 }
 0x11d   :  { %v1212_v31 = vadd.f32 %v1211_v30, %v1163_v26 }
 0x11e   :  { %v1260_v32 = vpop.f32.mrf.mxu3  ;;  %v1165_v36 = vpop.f32.mrf.mxu1 }
 0x11f   :  { %v1261_v39 = vadd.f32 %v1260_v32, %v1212_v31  ;;  %v1166_v43 = vadd.f32 %v1165_v36, %v2915_v55  ;;  %v1939_v55 = vld [vmem:[%s3278_s0 + $0x210] sm:$0xf] }
 0x120   :  { %v1312_v41 = vpop.f32.mrf.mxu0  ;;  %v1940_v5 = vor.u32 %v2307_v53, %v1939_v55 }
 0x121   :  { %1360 = vmatmul.bf16.gmra.mxu1 %v1900_v33  ;;  %1409 = vmatmul.bf16.gmra.mxu2 %v1904_v35  ;;  %v3157_v42 = vadd.f32 %v1309_v19, %v1261_v39 }
 0x123   :  { %1458 = vmatmul.bf16.gmra.mxu3 %v1908_v38  ;;  %1507 = vmatmul.bf16.gmra.mxu0 %v1912_v22 }
 0x124   :  { %v1214_v50 = vpop.f32.mrf.mxu2 }
 0x125   :  { %v1215_v45 = vadd.f32 %v1214_v50, %v1166_v43 }
 0x126   :  { %v1263_v46 = vpop.f32.mrf.mxu3  ;;  %v1167_v56 = vpop.f32.mrf.mxu1 }
 0x127   :  { %v1264_v54 = vadd.f32 %v1263_v46, %v1215_v45  ;;  %v1168_v58 = vadd.f32 %v1167_v56, %v2945_v3  ;;  %v1948_v3 = vor.u32 %v2308_v61, %v1947_v60 }
 0x128   :  { %v1314_v48 = vpop.f32.mrf.mxu0 }
 0x129   :  { %v3166_v52 = vadd.f32 %v1312_v41, %v1264_v54 }
 0x12c   :  { %v1216_v63 = vpop.f32.mrf.mxu2 }
 0x12d   :  { %v1217_v0 = vadd.f32 %v1216_v63, %v1168_v58 }
 0x12e   :  { %v1265_v1 = vpop.f32.mrf.mxu3  ;;  %v1170_v7 = vpop.f32.mrf.mxu1 }
 0x12f   :  { %v1266_v9 = vadd.f32 %v1265_v1, %v1217_v0  ;;  %v1171_v13 = vadd.f32 %v1170_v7, %v2951_v11 }
 0x130   :  { %v1317_v16 = vpop.f32.mrf.mxu0 }
 0x131   :  { %1365 = vmatmul.bf16.gmra.mxu1 %v1936_v2  ;;  %1414 = vmatmul.bf16.gmra.mxu2 %v1940_v5  ;;  %v3187_v17 = vadd.f32 %v1314_v48, %v1266_v9  ;;  %v3206_v48 = vld [vmem:[%s3280_s3] ss:$0 sm:$0xff] }
 0x133   :  { %1463 = vmatmul.bf16.gmra.mxu3 %v1944_v14  ;;  %1512 = vmatmul.bf16.gmra.mxu0 %v1948_v3 }
 0x134   :  { %v1219_v6 = vpop.f32.mrf.mxu2 }
 0x135   :  { %v1220_v19 = vadd.f32 %v1219_v6, %v1171_v13 }
 0x136   :  { %v1268_v20 = vpop.f32.mrf.mxu3  ;;  %v1172_v12 = vpop.f32.mrf.mxu1 }
 0x137   :  { %v1269_v10 = vadd.f32 %v1268_v20, %v1220_v19  ;;  %v1173_v26 = vadd.f32 %v1172_v12, %v2981_v23  ;;  %v3199_v23 = vld [vmem:[%s3279_s2] ss:$0 sm:$0xff] }
 0x138   :  { %v1319_v24 = vpop.f32.mrf.mxu0 }
 0x139   :  { %v3190_v25 = vadd.f32 %v1317_v16, %v1269_v10 }
 0x13c   :  { %v1221_v27 = vpop.f32.mrf.mxu2 }
 0x13d   :  { %v1222_v28 = vadd.f32 %v1221_v27, %v1173_v26 }
 0x13e   :  { %v1270_v29 = vpop.f32.mrf.mxu3  ;;  %v1331_v30 = vpop.f32.mrf.mxu1 }
 0x13f   :  { %v1271_v31 = vadd.f32 %v1270_v29, %v1222_v28  ;;  %v1332_v11 = vadd.f32 %v1331_v30, %v2989_v40 }
 0x140   :  { %v1478_v32 = vpop.f32.mrf.mxu0 }
 0x141   :  { %v3193_v33 = vadd.f32 %v1319_v24, %v1271_v31 }
 0x144   :  { %v1380_v35 = vpop.f32.mrf.mxu2 }
 0x145   :  { %v1381_v36 = vadd.f32 %v1380_v35, %v1332_v11 }
 0x146   :  { %v1429_v38 = vpop.f32.mrf.mxu3  ;;  %v1333_v22 = vpop.f32.mrf.mxu1 }
 0x147   :  { %v1430_v39 = vadd.f32 %v1429_v38, %v1381_v36  ;;  %v1334_v50 = vadd.f32 %v1333_v22, %v3009_v62 }
 0x148   :  { %v1480_v41 = vpop.f32.mrf.mxu0 }
 0x149   :  { %v1479_v43 = vadd.f32 %v1478_v32, %v1430_v39 }
 0x14b   :  { %v1573_v40 = vmul.f32 %v3199_v23, %v1479_v43 }
 0x14c   :  { %v1382_v45 = vpop.f32.mrf.mxu2 }
 0x14d   :  { %v1383_v46 = vadd.f32 %v1382_v45, %v1334_v50  ;;  %v1593_v53 = vadd.f32 %v3206_v48, %v1573_v40 }
 0x14e   :  { %v1431_v56 = vpop.f32.mrf.mxu3  ;;  %v1336_v54 = vpop.f32.mrf.mxu1 }
 0x14f   :  { %v1432_v49 = vadd.f32 %v1431_v56, %v1383_v46  ;;  %v1337_v62 = vadd.f32 %v1336_v54, %v3017_v15  ;;  %v1609_v0 = vmax.f32 %v1593_v53, 0.0 }
 0x150   :  { %v1483_v51 = vpop.f32.mrf.mxu0 }
 0x151   :  { %v1481_v55 = vadd.f32 %v1480_v41, %v1432_v49 }
 0x153   :  { %v1574_v57 = vmul.f32 %v3199_v23, %v1481_v55 }
 0x154   :  { %v1385_v58 = vpop.f32.mrf.mxu2 }
 0x155   :  { %v1594_v59 = vadd.f32 %v3206_v48, %v1574_v57  ;;  %v1386_v60 = vadd.f32 %v1385_v58, %v1337_v62 }
 0x156   :  { %v1434_v61 = vpop.f32.mrf.mxu3  ;;  %v1338_v63 = vpop.f32.mrf.mxu1 }
 0x157   :  { %v1610_v1 = vmax.f32 %v1594_v59, 0.0  ;;  %v1435_v2 = vadd.f32 %v1434_v61, %v1386_v60  ;;  %v1339_v3 = vadd.f32 %v1338_v63, %v3038_v34 }
 0x158   :  { %v1485_v5 = vpop.f32.mrf.mxu0 }
 0x159   :  { %v2384_v7 = vpack.c.bf16 %v1610_v1, %v1609_v0  ;;  %v1484_v14 = vadd.f32 %v1483_v51, %v1435_v2 }
 0x15b   :  { %2385 = vst [vmem:[%s3281_s4] sm:$0xff] %v2384_v7   ;;  %v1575_v6 = vmul.f32 %v3199_v23, %v1484_v14 }
 0x15c   :  { %v1387_v9 = vpop.f32.mrf.mxu2 }
 0x15d   :  { %v1388_v15 = vadd.f32 %v1387_v9, %v1339_v3  ;;  %v1595_v10 = vadd.f32 %v3206_v48, %v1575_v6 }
 0x15e   :  { %v1436_v16 = vpop.f32.mrf.mxu3  ;;  %v1341_v13 = vpop.f32.mrf.mxu1 }
 0x15f   :  { %v1437_v19 = vadd.f32 %v1436_v16, %v1388_v15  ;;  %v1342_v26 = vadd.f32 %v1341_v13, %v3047_v44  ;;  %v1611_v31 = vmax.f32 %v1595_v10, 0.0 }
 0x160   :  { %v1488_v20 = vpop.f32.mrf.mxu0 }
 0x161   :  { %v1486_v12 = vadd.f32 %v1485_v5, %v1437_v19 }
 0x163   :  { %v1576_v24 = vmul.f32 %v3199_v23, %v1486_v12 }
 0x164   :  { %v1390_v27 = vpop.f32.mrf.mxu2 }
 0x165   :  { %v1596_v28 = vadd.f32 %v3206_v48, %v1576_v24  ;;  %v1391_v29 = vadd.f32 %v1390_v27, %v1342_v26 }
 0x166   :  { %v1439_v34 = vpop.f32.mrf.mxu3  ;;  %v1343_v30 = vpop.f32.mrf.mxu1 }
 0x167   :  { %v1612_v32 = vmax.f32 %v1596_v28, 0.0  ;;  %v1440_v11 = vadd.f32 %v1439_v34, %v1391_v29  ;;  %v1344_v22 = vadd.f32 %v1343_v30, %v3068_v4 }
 0x168   :  { %v1490_v35 = vpop.f32.mrf.mxu0 }
 0x169   :  { %v2389_v36 = vpack.c.bf16 %v1612_v32, %v1611_v31  ;;  %v1489_v38 = vadd.f32 %v1488_v20, %v1440_v11 }
 0x16b   :  { %2421 = vst [vmem:[%s3281_s4 + $0x8] sm:$0xff] %v2389_v36   ;;  %v1577_v50 = vmul.f32 %v3199_v23, %v1489_v38 }
 0x16c   :  { %v1392_v39 = vpop.f32.mrf.mxu2 }
 0x16d   :  { %v1393_v44 = vadd.f32 %v1392_v39, %v1344_v22  ;;  %v1597_v54 = vadd.f32 %v3206_v48, %v1577_v50 }
 0x16e   :  { %v1441_v41 = vpop.f32.mrf.mxu3  ;;  %v1346_v43 = vpop.f32.mrf.mxu1 }
 0x16f   :  { %v1442_v45 = vadd.f32 %v1441_v41, %v1393_v44  ;;  %v1347_v49 = vadd.f32 %v1346_v43, %v3077_v18  ;;  %v1613_v62 = vmax.f32 %v1597_v54, 0.0 }
 0x170   :  { %v1493_v46 = vpop.f32.mrf.mxu0 }
 0x171   :  { %v1491_v56 = vadd.f32 %v1490_v35, %v1442_v45 }
 0x173   :  { %v1578_v40 = vmul.f32 %v3199_v23, %v1491_v56 }
 0x174   :  { %v1395_v51 = vpop.f32.mrf.mxu2 }
 0x175   :  { %v1598_v55 = vadd.f32 %v3206_v48, %v1578_v40  ;;  %v1396_v53 = vadd.f32 %v1395_v51, %v1347_v49 }
 0x176   :  { %v1444_v4 = vpop.f32.mrf.mxu3  ;;  %v1348_v57 = vpop.f32.mrf.mxu1 }
 0x177   :  { %v1614_v58 = vmax.f32 %v1598_v55, 0.0  ;;  %v1445_v59 = vadd.f32 %v1444_v4, %v1396_v53  ;;  %v1349_v0 = vadd.f32 %v1348_v57, %v3097_v37 }
 0x178   :  { %v1495_v60 = vpop.f32.mrf.mxu0 }
 0x179   :  { %v2394_v61 = vpack.c.bf16 %v1614_v58, %v1613_v62  ;;  %v1494_v63 = vadd.f32 %v1493_v46, %v1445_v59 }
 0x17b   :  { %2422 = vst [vmem:[%s3281_s4 + $0x10] sm:$0xff] %v2394_v61   ;;  %v1579_v7 = vmul.f32 %v3199_v23, %v1494_v63 }
 0x17c   :  { %v1397_v1 = vpop.f32.mrf.mxu2 }
 0x17d   :  { %v1398_v18 = vadd.f32 %v1397_v1, %v1349_v0  ;;  %v1599_v15 = vadd.f32 %v3206_v48, %v1579_v7 }
 0x17e   :  { %v1446_v2 = vpop.f32.mrf.mxu3  ;;  %v1351_v5 = vpop.f32.mrf.mxu1 }
 0x17f   :  { %v1447_v14 = vadd.f32 %v1446_v2, %v1398_v18  ;;  %v1352_v13 = vadd.f32 %v1351_v5, %v3106_v47  ;;  %v1615_v10 = vmax.f32 %v1599_v15, 0.0 }
 0x180   :  { %v1498_v3 = vpop.f32.mrf.mxu0 }
 0x181   :  { %v1496_v9 = vadd.f32 %v1495_v60, %v1447_v14 }
 0x183   :  { %v1580_v16 = vmul.f32 %v3199_v23, %v1496_v9 }
 0x184   :  { %v1400_v6 = vpop.f32.mrf.mxu2 }
 0x185   :  { %v1600_v19 = vadd.f32 %v3206_v48, %v1580_v16  ;;  %v1401_v20 = vadd.f32 %v1400_v6, %v1352_v13 }
 0x186   :  { %v1449_v37 = vpop.f32.mrf.mxu3  ;;  %v1353_v12 = vpop.f32.mrf.mxu1 }
 0x187   :  { %v1616_v24 = vmax.f32 %v1600_v19, 0.0  ;;  %v1450_v26 = vadd.f32 %v1449_v37, %v1401_v20  ;;  %v1354_v34 = vadd.f32 %v1353_v12, %v3127_v8 }
 0x188   :  { %v1500_v27 = vpop.f32.mrf.mxu0 }
 0x189   :  { %v2399_v28 = vpack.c.bf16 %v1616_v24, %v1615_v10  ;;  %v1499_v29 = vadd.f32 %v1498_v3, %v1450_v26 }
 0x18b   :  { %2423 = vst [vmem:[%s3281_s4 + $0x18] sm:$0xff] %v2399_v28   ;;  %v1581_v11 = vmul.f32 %v3199_v23, %v1499_v29 }
 0x18c   :  { %v1402_v30 = vpop.f32.mrf.mxu2 }
 0x18d   :  { %v1403_v47 = vadd.f32 %v1402_v30, %v1354_v34  ;;  %v1601_v22 = vadd.f32 %v3206_v48, %v1581_v11 }
 0x18e   :  { %v1451_v31 = vpop.f32.mrf.mxu3  ;;  %v1356_v32 = vpop.f32.mrf.mxu1 }
 0x18f   :  { %v1452_v35 = vadd.f32 %v1451_v31, %v1403_v47  ;;  %v1357_v44 = vadd.f32 %v1356_v32, %v3136_v21  ;;  %v1617_v46 = vmax.f32 %v1601_v22, 0.0 }
 0x190   :  { %v1503_v36 = vpop.f32.mrf.mxu0 }
 0x191   :  { %v1501_v38 = vadd.f32 %v1500_v27, %v1452_v35 }
 0x193   :  { %v1582_v39 = vmul.f32 %v3199_v23, %v1501_v38 }
 0x194   :  { %v1405_v41 = vpop.f32.mrf.mxu2 }
 0x195   :  { %v1602_v43 = vadd.f32 %v3206_v48, %v1582_v39  ;;  %v1406_v50 = vadd.f32 %v1405_v41, %v1357_v44 }
 0x196   :  { %v1454_v8 = vpop.f32.mrf.mxu3  ;;  %v1358_v45 = vpop.f32.mrf.mxu1 }
 0x197   :  { %v1618_v56 = vmax.f32 %v1602_v43, 0.0  ;;  %v1455_v54 = vadd.f32 %v1454_v8, %v1406_v50  ;;  %v1359_v55 = vadd.f32 %v1358_v45, %v3157_v42 }
 0x198   :  { %v1505_v40 = vpop.f32.mrf.mxu0 }
 0x199   :  { %v2404_v49 = vpack.c.bf16 %v1618_v56, %v1617_v46  ;;  %v1504_v51 = vadd.f32 %v1503_v36, %v1455_v54 }
 0x19b   :  { %2424 = vst [vmem:[%s3281_s4 + $0x20] sm:$0xff] %v2404_v49   ;;  %v1583_v62 = vmul.f32 %v3199_v23, %v1504_v51 }
 0x19c   :  { %v1407_v53 = vpop.f32.mrf.mxu2 }
 0x19d   :  { %v1408_v21 = vadd.f32 %v1407_v53, %v1359_v55  ;;  %v1603_v61 = vadd.f32 %v3206_v48, %v1583_v62 }
 0x19e   :  { %v1456_v4 = vpop.f32.mrf.mxu3  ;;  %v1361_v57 = vpop.f32.mrf.mxu1 }
 0x19f   :  { %v1457_v58 = vadd.f32 %v1456_v4, %v1408_v21  ;;  %v1362_v0 = vadd.f32 %v1361_v57, %v3166_v52  ;;  %v1619_v7 = vmax.f32 %v1603_v61, 0.0 }
 0x1a0   :  { %v1508_v60 = vpop.f32.mrf.mxu0 }
 0x1a1   :  { %v1506_v59 = vadd.f32 %v1505_v40, %v1457_v58 }
 0x1a3   :  { %v1584_v63 = vmul.f32 %v3199_v23, %v1506_v59 }
 0x1a4   :  { %v1410_v1 = vpop.f32.mrf.mxu2 }
 0x1a5   :  { %v1604_v18 = vadd.f32 %v3206_v48, %v1584_v63  ;;  %v1411_v2 = vadd.f32 %v1410_v1, %v1362_v0 }
 0x1a6   :  { %v1459_v42 = vpop.f32.mrf.mxu3  ;;  %v1363_v5 = vpop.f32.mrf.mxu1 }
 0x1a7   :  { %v1620_v14 = vmax.f32 %v1604_v18, 0.0  ;;  %v1460_v3 = vadd.f32 %v1459_v42, %v1411_v2  ;;  %v1364_v16 = vadd.f32 %v1363_v5, %v3187_v17 }
 0x1a8   :  { %v1510_v13 = vpop.f32.mrf.mxu0 }
 0x1a9   :  { %v2409_v9 = vpack.c.bf16 %v1620_v14, %v1619_v7  ;;  %v1509_v15 = vadd.f32 %v1508_v60, %v1460_v3 }
 0x1ab   :  { %2425 = vst [vmem:[%s3281_s4 + $0x28] sm:$0xff] %v2409_v9   ;;  %v1585_v37 = vmul.f32 %v3199_v23, %v1509_v15 }
 0x1ac   :  { %v1412_v6 = vpop.f32.mrf.mxu2 }
 0x1ad   :  { %v1413_v52 = vadd.f32 %v1412_v6, %v1364_v16  ;;  %v1605_v24 = vadd.f32 %v3206_v48, %v1585_v37 }
 0x1ae   :  { %v1461_v19 = vpop.f32.mrf.mxu3  ;;  %v1366_v20 = vpop.f32.mrf.mxu1 }
 0x1af   :  { %v1462_v12 = vadd.f32 %v1461_v19, %v1413_v52  ;;  %v1367_v27 = vadd.f32 %v1366_v20, %v3190_v25  ;;  %v1621_v47 = vmax.f32 %v1605_v24, 0.0 }
 0x1b0   :  { %v1513_v30 = vpop.f32.mrf.mxu0 }
 0x1b1   :  { %v1511_v10 = vadd.f32 %v1510_v13, %v1462_v12 }
 0x1b3   :  { %v1586_v26 = vmul.f32 %v3199_v23, %v1511_v10 }
 0x1b4   :  { %v1415_v28 = vpop.f32.mrf.mxu2 }
 0x1b5   :  { %v1606_v29 = vadd.f32 %v3206_v48, %v1586_v26  ;;  %v1416_v34 = vadd.f32 %v1415_v28, %v1367_v27 }
 0x1b6   :  { %v1464_v17 = vpop.f32.mrf.mxu3  ;;  %v1368_v11 = vpop.f32.mrf.mxu1 }
 0x1b7   :  { %v1622_v31 = vmax.f32 %v1606_v29, 0.0  ;;  %v1465_v32 = vadd.f32 %v1464_v17, %v1416_v34  ;;  %v1369_v38 = vadd.f32 %v1368_v11, %v3193_v33 }
 0x1b8   :  { %v1515_v43 = vpop.f32.mrf.mxu0 }
 0x1b9   :  { %v2414_v35 = vpack.c.bf16 %v1622_v31, %v1621_v47  ;;  %v1514_v36 = vadd.f32 %v1513_v30, %v1465_v32 }
 0x1bb   :  { %2426 = vst [vmem:[%s3281_s4 + $0x30] sm:$0xff] %v2414_v35   ;;  %v1587_v44 = vmul.f32 %v3199_v23, %v1514_v36 }
 0x1bc   :  { %v1417_v22 = vpop.f32.mrf.mxu2 }
 0x1bd   :  { %v1418_v25 = vadd.f32 %v1417_v22, %v1369_v38  ;;  %v1607_v8 = vadd.f32 %v3206_v48, %v1587_v44 }
 0x1be   :  { %v1466_v39 = vpop.f32.mrf.mxu3 }
 0x1bf   :  { %v1467_v41 = vadd.f32 %v1466_v39, %v1418_v25  ;;  %v1623_v56 = vmax.f32 %v1607_v8, 0.0 }
 0x1c1   :  { %v1516_v50 = vadd.f32 %v1515_v43, %v1467_v41 }
 0x1c3   :  { %v1588_v45 = vmul.f32 %v3199_v23, %v1516_v50 }
 0x1c5   :  { %v1608_v46 = vadd.f32 %v3206_v48, %v1588_v45 }
 0x1c7   :  { %v1624_v54 = vmax.f32 %v1608_v46, 0.0 }
 0x1c9   :  { %v2419_v40 = vpack.c.bf16 %v1624_v54, %v1623_v56 }
 0x1cb   :  { %2427 = vst [vmem:[%s3281_s4 + $0x38] sm:$0xff] %v2419_v40  }

// kernel: _lambda_.25
= control target key start
LH: loop header
LB: loop body
LE: loop exit
PB: predicated region body
PF: predicated region fallthrough
CT: control target
= control target key end

     0   :  { %s3396_s1 = inlined_call_operand.vmem [shape: bf16[1152,128], index: 1, kind: input, shape index: {}]   ;;  %s3397_s0 = inlined_call_operand.vmem [shape: bf16[128,1152], index: 0, kind: input, shape index: {}]   ;;  %s3398_s2 = inlined_call_operand.vmem [shape: f32[1,128], index: 2, kind: input, shape index: {}]   ;;  %s3399_s3 = inlined_call_operand.vmem [shape: f32[1,128], index: 3, kind: input, shape index: {}]   ;;  %s3400_s4 = inlined_call_operand.vmem [shape: bf16[128,128], index: 4, kind: input, shape index: {}]   ;;  %s3401_s5 = inlined_call_operand.vmem [shape: bf16[128,128], index: 5, kind: output, shape index: {}]  }
   0x1   :  { %v2367_v0 = vld [vmem:[%s3396_s1 + $0x38] sm:$0xff]  ;;  %v2366_v1 = vld [vmem:[%s3396_s1 + $0x30] sm:$0xff]  ;;  %v2365_v2 = vld [vmem:[%s3396_s1 + $0x28] sm:$0xff] }
   0x2   :  { %2518 = vmatpush.bf16.msra.mxu1 %v2367_v0  ;;  %2519 = vmatpush.bf16.msra.mxu2 %v2367_v0  ;;  %v2364_v3 = vld [vmem:[%s3396_s1 + $0x20] sm:$0xff]  ;;  %v2363_v4 = vld [vmem:[%s3396_s1 + $0x18] sm:$0xff]  ;;  %v2362_v5 = vld [vmem:[%s3396_s1 + $0x10] sm:$0xff] }
   0x3   :  { %2520 = vmatpush.bf16.msra.mxu3 %v2367_v0  ;;  %1080 = vmatpush.bf16.msra.mxu0 %v2367_v0  ;;  %v2361_v6 = vld [vmem:[%s3396_s1 + $0x8] sm:$0xff]  ;;  %v2360_v7 = vld [vmem:[%s3396_s1] sm:$0xff]  ;;  %v1786_v8 = vld [vmem:[%s3397_s0 + $0x90] sm:$0xf] }
   0x4   :  { %v2310_v9 = vld [vmem:[%s3397_s0 + $0xb0] sm:$0xf0]  ;;  %v1858_v10 = vld [vmem:[%s3397_s0 + $0x120] sm:$0xf]  ;;  %v2328_v11 = vld [vmem:[%s3397_s0 + $0x140] sm:$0xf0] }
   0x5   :  { %v1930_v12 = vld [vmem:[%s3397_s0 + $0x1b0] sm:$0xf]  ;;  %v2346_v13 = vld [vmem:[%s3397_s0 + $0x1d0] sm:$0xf0]  ;;  %v1714_v14 = vld [vmem:[%s3397_s0] sm:$0xf]  ;;  %v1787_v18 = vor.u32 %v2310_v9, %v1786_v8  ;;  %v1859_v19 = vor.u32 %v2328_v11, %v1858_v10 }
   0x6   :  { %2521 = vmatpush.bf16.msra.mxu1 %v2366_v1  ;;  %2522 = vmatpush.bf16.msra.mxu2 %v2366_v1  ;;  %v2292_v15 = vld [vmem:[%s3397_s0 + $0x20] sm:$0xf0]  ;;  %v2383_v16 = vld [vmem:[%s3396_s1 + $0xb8] sm:$0xff]  ;;  %v1931_v20 = vor.u32 %v2346_v13, %v1930_v12  ;;  %v2382_v24 = vld [vmem:[%s3396_s1 + $0xb0] sm:$0xff] }
   0x7   :  { %2523 = vmatpush.bf16.msra.mxu3 %v2366_v1  ;;  %1081 = vmatpush.bf16.msra.mxu0 %v2366_v1  ;;  %v2375_v17 = vld [vmem:[%s3396_s1 + $0x78] sm:$0xff]  ;;  %v1715_v21 = vor.u32 %v2292_v15, %v1714_v14  ;;  %v2374_v25 = vld [vmem:[%s3396_s1 + $0x70] sm:$0xff]  ;;  %v2381_v28 = vld [vmem:[%s3396_s1 + $0xa8] sm:$0xff] }
   0x8   :  { %v2391_v22 = vld [vmem:[%s3396_s1 + $0xf8] sm:$0xff]  ;;  %v2390_v26 = vld [vmem:[%s3396_s1 + $0xf0] sm:$0xff]  ;;  %v2373_v29 = vld [vmem:[%s3396_s1 + $0x68] sm:$0xff] }
   0x9   :  { %v2399_v23 = vld [vmem:[%s3396_s1 + $0x138] sm:$0xff]  ;;  %v2398_v27 = vld [vmem:[%s3396_s1 + $0x130] sm:$0xff]  ;;  %v2389_v30 = vld [vmem:[%s3396_s1 + $0xe8] sm:$0xff] }
   0xa   :  { %2524 = vmatpush.bf16.msra.mxu1 %v2365_v2  ;;  %2525 = vmatpush.bf16.msra.mxu2 %v2365_v2  ;;  %v2397_v31 = vld [vmem:[%s3396_s1 + $0x128] sm:$0xff]  ;;  %v2380_v32 = vld [vmem:[%s3396_s1 + $0xa0] sm:$0xff]  ;;  %v1822_v36 = vld [vmem:[%s3397_s0 + $0xd8] sm:$0xf] }
   0xb   :  { %2526 = vmatpush.bf16.msra.mxu3 %v2365_v2  ;;  %1082 = vmatpush.bf16.msra.mxu0 %v2365_v2  ;;  %v2372_v33 = vld [vmem:[%s3396_s1 + $0x60] sm:$0xff]  ;;  %v2319_v37 = vld [vmem:[%s3397_s0 + $0xf8] sm:$0xf0]  ;;  %v1894_v38 = vld [vmem:[%s3397_s0 + $0x168] sm:$0xf] }
   0xc   :  { %v2388_v34 = vld [vmem:[%s3396_s1 + $0xe0] sm:$0xff]  ;;  %v2337_v39 = vld [vmem:[%s3397_s0 + $0x188] sm:$0xf0]  ;;  %v1966_v40 = vld [vmem:[%s3397_s0 + $0x1f8] sm:$0xf]  ;;  %v1823_v46 = vor.u32 %v2319_v37, %v1822_v36 }
   0xd   :  { %v2396_v35 = vld [vmem:[%s3396_s1 + $0x120] sm:$0xff]  ;;  %v2355_v41 = vld [vmem:[%s3397_s0 + $0x218] sm:$0xf0]  ;;  %v1750_v42 = vld [vmem:[%s3397_s0 + $0x48] sm:$0xf]  ;;  %v1895_v47 = vor.u32 %v2337_v39, %v1894_v38 }
   0xe   :  { %2527 = vmatpush.bf16.msra.mxu1 %v2364_v3  ;;  %2528 = vmatpush.bf16.msra.mxu2 %v2364_v3  ;;  %v2301_v43 = vld [vmem:[%s3397_s0 + $0x68] sm:$0xf0]  ;;  %v2379_v44 = vld [vmem:[%s3396_s1 + $0x98] sm:$0xff]  ;;  %v1967_v48 = vor.u32 %v2355_v41, %v1966_v40  ;;  %v2378_v52 = vld [vmem:[%s3396_s1 + $0x90] sm:$0xff] }
   0xf   :  { %2529 = vmatpush.bf16.msra.mxu3 %v2364_v3  ;;  %1083 = vmatpush.bf16.msra.mxu0 %v2364_v3  ;;  %v2371_v45 = vld [vmem:[%s3396_s1 + $0x58] sm:$0xff]  ;;  %v1751_v49 = vor.u32 %v2301_v43, %v1750_v42  ;;  %v2370_v53 = vld [vmem:[%s3396_s1 + $0x50] sm:$0xff]  ;;  %v2377_v56 = vld [vmem:[%s3396_s1 + $0x88] sm:$0xff] }
  0x10   :  { %v2387_v50 = vld [vmem:[%s3396_s1 + $0xd8] sm:$0xff]  ;;  %v2386_v54 = vld [vmem:[%s3396_s1 + $0xd0] sm:$0xff]  ;;  %v2369_v57 = vld [vmem:[%s3396_s1 + $0x48] sm:$0xff] }
  0x11   :  { %v2395_v51 = vld [vmem:[%s3396_s1 + $0x118] sm:$0xff]  ;;  %v2394_v55 = vld [vmem:[%s3396_s1 + $0x110] sm:$0xff]  ;;  %v2385_v58 = vld [vmem:[%s3396_s1 + $0xc8] sm:$0xff] }
  0x12   :  { %2530 = vmatpush.bf16.msra.mxu1 %v2363_v4  ;;  %2531 = vmatpush.bf16.msra.mxu2 %v2363_v4  ;;  %v2393_v59 = vld [vmem:[%s3396_s1 + $0x108] sm:$0xff]  ;;  %v2376_v60 = vld [vmem:[%s3396_s1 + $0x80] sm:$0xff]  ;;  %v2415_v2 = vld [vmem:[%s3396_s1 + $0x1b8] sm:$0xff] }
  0x13   :  { %2532 = vmatpush.bf16.msra.mxu3 %v2363_v4  ;;  %1084 = vmatpush.bf16.msra.mxu0 %v2363_v4  ;;  %v2368_v61 = vld [vmem:[%s3396_s1 + $0x40] sm:$0xff]  ;;  %v1716_v1 = vld [vmem:[%s3397_s0 + $0x24] sm:$0xf0]  ;;  %v2407_v3 = vld [vmem:[%s3396_s1 + $0x178] sm:$0xff] }
  0x14   :  { %v2288_v62 = vld [vmem:[%s3397_s0 + $0x4] sm:$0xf]  ;;  %v1722_v4 = vld [vmem:[%s3397_s0 + $0x8] sm:$0xf]  ;;  %v1730_v8 = vld [vmem:[%s3397_s0 + $0x10] sm:$0xf] }
  0x15   :  { %v2384_v63 = vld [vmem:[%s3396_s1 + $0xc0] sm:$0xff]  ;;  %v2294_v9 = vld [vmem:[%s3397_s0 + $0x30] sm:$0xf0]  ;;  %v2423_v10 = vld [vmem:[%s3396_s1 + $0x1f8] sm:$0xff]  ;;  %v1719_v12 = vor.u32 %v2288_v62, %v1716_v1 }
  0x16   :  { %2533 = vmatpush.bf16.msra.mxu1 %v2362_v5  ;;  %2534 = vmatpush.bf16.msra.mxu2 %v2362_v5  ;;  %v2392_v0 = vld [vmem:[%s3396_s1 + $0x100] sm:$0xff]  ;;  %v2431_v11 = vld [vmem:[%s3396_s1 + $0x238] sm:$0xff]  ;;  %v1731_v15 = vor.u32 %v2294_v9, %v1730_v8  ;;  %v2306_v40 = vld [vmem:[%s3397_s0 + $0x94] sm:$0xf] }
  0x17   :  { %2535 = vmatpush.bf16.msra.mxu3 %v2362_v5  ;;  %1085 = vmatpush.bf16.msra.mxu0 %v2362_v5  ;;  %v2293_v5 = vld [vmem:[%s3397_s0 + $0x28] sm:$0xf0]  ;;  %v2412_v36 = vld [vmem:[%s3396_s1 + $0x1a0] sm:$0xff]  ;;  %v1788_v41 = vld [vmem:[%s3397_s0 + $0xb4] sm:$0xf0] }
  0x18   :  { %v1723_v13 = vor.u32 %v2293_v5, %v1722_v4  ;;  %v2420_v37 = vld [vmem:[%s3396_s1 + $0x1e0] sm:$0xff]  ;;  %v1794_v42 = vld [vmem:[%s3397_s0 + $0x98] sm:$0xf]  ;;  %v2311_v43 = vld [vmem:[%s3397_s0 + $0xb8] sm:$0xf0] }
  0x19   :  { %v2404_v38 = vld [vmem:[%s3396_s1 + $0x160] sm:$0xff]  ;;  %v1838_v62 = vld [vmem:[%s3397_s0 + $0xe8] sm:$0xf]  ;;  %v2410_v4 = vld [vmem:[%s3396_s1 + $0x190] sm:$0xff] }
  0x1a   :  { %2536 = vmatpush.bf16.msra.mxu1 %v2361_v6  ;;  %2537 = vmatpush.bf16.msra.mxu2 %v2361_v6  ;;  %v2428_v39 = vld [vmem:[%s3396_s1 + $0x220] sm:$0xff]  ;;  %v2418_v5 = vld [vmem:[%s3396_s1 + $0x1d0] sm:$0xff]  ;;  %v1860_v9 = vld [vmem:[%s3397_s0 + $0x144] sm:$0xf0] }
  0x1b   :  { %2538 = vmatpush.bf16.msra.mxu3 %v2361_v6  ;;  %1086 = vmatpush.bf16.msra.mxu0 %v2361_v6  ;;  %v2289_v6 = vld [vmem:[%s3397_s0 + $0xc] sm:$0xf]  ;;  %v2324_v8 = vld [vmem:[%s3397_s0 + $0x124] sm:$0xf] }
  0x1e   :  { %2539 = vmatpush.bf16.msra.mxu1 %v2360_v7  ;;  %2540 = vmatpush.bf16.msra.mxu2 %v2360_v7 }
  0x1f   :  { %2541 = vmatpush.bf16.msra.mxu3 %v2360_v7  ;;  %1087 = vmatpush.bf16.msra.mxu0 %v2360_v7  ;;  %v1724_v7 = vld [vmem:[%s3397_s0 + $0x2c] sm:$0xf0] }
  0x20   :  { %v1727_v14 = vor.u32 %v2289_v6, %v1724_v7  ;;  %v2402_v6 = vld [vmem:[%s3396_s1 + $0x150] sm:$0xff] }
  0x21   :  { %1098 = vmatmul.bf16.vlgmr.msra.gmra.mxu1 %v1787_v18  ;;  %1108 = vmatmul.bf16.vlgmr.msra.gmra.mxu2 %v1859_v19  ;;  %v2422_v18 = vld [vmem:[%s3396_s1 + $0x1f0] sm:$0xff] }
  0x22   :  { %1178 = vmatpush.bf16.msrb.mxu2 %v2383_v16  ;;  %1129 = vmatpush.bf16.msrb.mxu1 %v2375_v17  ;;  %v2414_v16 = vld [vmem:[%s3396_s1 + $0x1b0] sm:$0xff] }
  0x23   :  { %1118 = vmatmul.bf16.vlgmr.msra.gmra.mxu3 %v1931_v20  ;;  %1088 = vmatmul.bf16.vlgmr.msra.gmra.mxu0 %v1715_v21  ;;  %v2406_v17 = vld [vmem:[%s3396_s1 + $0x170] sm:$0xff]  ;;  %v2413_v20 = vld [vmem:[%s3396_s1 + $0x1a8] sm:$0xff] }
  0x24   :  { %1227 = vmatpush.bf16.msrb.mxu3 %v2391_v22  ;;  %1276 = vmatpush.bf16.msrb.mxu0 %v2399_v23  ;;  %v2430_v19 = vld [vmem:[%s3396_s1 + $0x230] sm:$0xff]  ;;  %v2405_v21 = vld [vmem:[%s3396_s1 + $0x168] sm:$0xff] }
  0x25   :  { %v2421_v22 = vld [vmem:[%s3396_s1 + $0x1e8] sm:$0xff]  ;;  %v2426_v7 = vld [vmem:[%s3396_s1 + $0x210] sm:$0xff] }
  0x26   :  { %1179 = vmatpush.bf16.msrb.mxu2 %v2382_v24  ;;  %1130 = vmatpush.bf16.msrb.mxu1 %v2374_v25  ;;  %v2429_v23 = vld [vmem:[%s3396_s1 + $0x228] sm:$0xff]  ;;  %v1752_v25 = vld [vmem:[%s3397_s0 + $0x6c] sm:$0xf0] }
  0x27   :  { %v2297_v24 = vld [vmem:[%s3397_s0 + $0x4c] sm:$0xf] }
  0x28   :  { %1228 = vmatpush.bf16.msrb.mxu3 %v2390_v26  ;;  %1277 = vmatpush.bf16.msrb.mxu0 %v2398_v27  ;;  %v1758_v26 = vld [vmem:[%s3397_s0 + $0x50] sm:$0xf]  ;;  %v2302_v27 = vld [vmem:[%s3397_s0 + $0x70] sm:$0xf0] }
  0x2a   :  { %1180 = vmatpush.bf16.msrb.mxu2 %v2381_v28  ;;  %1131 = vmatpush.bf16.msrb.mxu1 %v2373_v29  ;;  %v2298_v28 = vld [vmem:[%s3397_s0 + $0x54] sm:$0xf]  ;;  %v1760_v29 = vld [vmem:[%s3397_s0 + $0x74] sm:$0xf0] }
  0x2c   :  { %1229 = vmatpush.bf16.msrb.mxu3 %v2389_v30  ;;  %1278 = vmatpush.bf16.msrb.mxu0 %v2397_v31  ;;  %v1766_v30 = vld [vmem:[%s3397_s0 + $0x58] sm:$0xf]  ;;  %v2303_v31 = vld [vmem:[%s3397_s0 + $0x78] sm:$0xf0] }
  0x2e   :  { %1181 = vmatpush.bf16.msrb.mxu2 %v2380_v32  ;;  %1132 = vmatpush.bf16.msrb.mxu1 %v2372_v33  ;;  %v1755_v32 = vor.u32 %v2297_v24, %v1752_v25  ;;  %v1759_v33 = vor.u32 %v2302_v27, %v1758_v26  ;;  %v2333_v24 = vld [vmem:[%s3397_s0 + $0x16c] sm:$0xf]  ;;  %v1896_v25 = vld [vmem:[%s3397_s0 + $0x18c] sm:$0xf0]  ;;  %v2338_v27 = vld [vmem:[%s3397_s0 + $0x190] sm:$0xf0] }
  0x2f   :  { %v1902_v26 = vld [vmem:[%s3397_s0 + $0x170] sm:$0xf] }
  0x30   :  { %1230 = vmatpush.bf16.msrb.mxu3 %v2388_v34  ;;  %1279 = vmatpush.bf16.msrb.mxu0 %v2396_v35  ;;  %v1763_v34 = vor.u32 %v2298_v28, %v1760_v29  ;;  %v1767_v35 = vor.u32 %v2303_v31, %v1766_v30  ;;  %v2334_v28 = vld [vmem:[%s3397_s0 + $0x174] sm:$0xf]  ;;  %v1904_v29 = vld [vmem:[%s3397_s0 + $0x194] sm:$0xf0]  ;;  %v2339_v31 = vld [vmem:[%s3397_s0 + $0x198] sm:$0xf0] }
  0x31   :  { %1103 = vmatmul.bf16.gmra.mxu1 %v1823_v46  ;;  %1113 = vmatmul.bf16.gmra.mxu2 %v1895_v47  ;;  %v1802_v46 = vld [vmem:[%s3397_s0 + $0xa0] sm:$0xf]  ;;  %v2312_v47 = vld [vmem:[%s3397_s0 + $0xc0] sm:$0xf0]  ;;  %v1910_v30 = vld [vmem:[%s3397_s0 + $0x178] sm:$0xf] }
  0x32   :  { %1182 = vmatpush.bf16.msrb.mxu2 %v2379_v44  ;;  %1133 = vmatpush.bf16.msrb.mxu1 %v2371_v45  ;;  %v2307_v44 = vld [vmem:[%s3397_s0 + $0x9c] sm:$0xf]  ;;  %v1796_v45 = vld [vmem:[%s3397_s0 + $0xbc] sm:$0xf0] }
  0x33   :  { %1123 = vmatmul.bf16.gmra.mxu3 %v1967_v48  ;;  %1093 = vmatmul.bf16.gmra.mxu0 %v1751_v49  ;;  %v1791_v48 = vor.u32 %v2306_v40, %v1788_v41  ;;  %v1795_v49 = vor.u32 %v2311_v43, %v1794_v42  ;;  %v2342_v40 = vld [vmem:[%s3397_s0 + $0x1b4] sm:$0xf]  ;;  %v1932_v41 = vld [vmem:[%s3397_s0 + $0x1d4] sm:$0xf0]  ;;  %v2347_v43 = vld [vmem:[%s3397_s0 + $0x1d8] sm:$0xf0] }
  0x34   :  { %1231 = vmatpush.bf16.msrb.mxu3 %v2387_v50  ;;  %1280 = vmatpush.bf16.msrb.mxu0 %v2395_v51  ;;  %v1799_v50 = vor.u32 %v2307_v44, %v1796_v45  ;;  %v1803_v51 = vor.u32 %v2312_v47, %v1802_v46  ;;  %v1938_v42 = vld [vmem:[%s3397_s0 + $0x1b8] sm:$0xf]  ;;  %v2343_v44 = vld [vmem:[%s3397_s0 + $0x1bc] sm:$0xf]  ;;  %v1940_v45 = vld [vmem:[%s3397_s0 + $0x1dc] sm:$0xf0] }
  0x35   :  { %v1946_v46 = vld [vmem:[%s3397_s0 + $0x1c0] sm:$0xf]  ;;  %v2348_v47 = vld [vmem:[%s3397_s0 + $0x1e0] sm:$0xf0] }
  0x36   :  { %1183 = vmatpush.bf16.msrb.mxu2 %v2378_v52  ;;  %1134 = vmatpush.bf16.msrb.mxu1 %v2370_v53  ;;  %v2411_v52 = vld [vmem:[%s3396_s1 + $0x198] sm:$0xff] }
  0x37   :  { %v2419_v53 = vld [vmem:[%s3396_s1 + $0x1d8] sm:$0xff] }
  0x38   :  { %1232 = vmatpush.bf16.msrb.mxu3 %v2386_v54  ;;  %1281 = vmatpush.bf16.msrb.mxu0 %v2394_v55  ;;  %v2403_v54 = vld [vmem:[%s3396_s1 + $0x158] sm:$0xff] }
  0x39   :  { %v2427_v55 = vld [vmem:[%s3396_s1 + $0x218] sm:$0xff] }
  0x3a   :  { %1184 = vmatpush.bf16.msrb.mxu2 %v2377_v56  ;;  %1135 = vmatpush.bf16.msrb.mxu1 %v2369_v57  ;;  %v2315_v56 = vld [vmem:[%s3397_s0 + $0xdc] sm:$0xf]  ;;  %v1824_v57 = vld [vmem:[%s3397_s0 + $0xfc] sm:$0xf0] }
  0x3c   :  { %1233 = vmatpush.bf16.msrb.mxu3 %v2385_v58  ;;  %1282 = vmatpush.bf16.msrb.mxu0 %v2393_v59  ;;  %v1830_v58 = vld [vmem:[%s3397_s0 + $0xe0] sm:$0xf]  ;;  %v2320_v59 = vld [vmem:[%s3397_s0 + $0x100] sm:$0xf0] }
  0x3d   :  { %v1831_v1 = vor.u32 %v2320_v59, %v1830_v58  ;;  %v2351_v58 = vld [vmem:[%s3397_s0 + $0x1fc] sm:$0xf]  ;;  %v1968_v59 = vld [vmem:[%s3397_s0 + $0x21c] sm:$0xf0] }
  0x3e   :  { %1185 = vmatpush.bf16.msrb.mxu2 %v2376_v60  ;;  %1136 = vmatpush.bf16.msrb.mxu1 %v2368_v61  ;;  %v2316_v60 = vld [vmem:[%s3397_s0 + $0xe4] sm:$0xf]  ;;  %v1832_v61 = vld [vmem:[%s3397_s0 + $0x104] sm:$0xf0] }
  0x40   :  { %1234 = vmatpush.bf16.msrb.mxu3 %v2384_v63  ;;  %1283 = vmatpush.bf16.msrb.mxu0 %v2392_v0  ;;  %v2321_v63 = vld [vmem:[%s3397_s0 + $0x108] sm:$0xf0]  ;;  %v1827_v0 = vor.u32 %v2315_v56, %v1824_v57 }
  0x41   :  { %1137 = vmatmul.bf16.vlgmr.msrb.gmra.mxu1 %v1719_v12  ;;  %1186 = vmatmul.bf16.vlgmr.msrb.gmra.mxu2 %v1723_v13  ;;  %v2325_v12 = vld [vmem:[%s3397_s0 + $0x12c] sm:$0xf]  ;;  %v1868_v13 = vld [vmem:[%s3397_s0 + $0x14c] sm:$0xf0] }
  0x42   :  { %1374 = vmatpush.bf16.msra.mxu2 %v2415_v2  ;;  %1325 = vmatpush.bf16.msra.mxu1 %v2407_v3  ;;  %v1835_v2 = vor.u32 %v2316_v60, %v1832_v61  ;;  %v1839_v3 = vor.u32 %v2321_v63, %v1838_v62  ;;  %v1974_v60 = vld [vmem:[%s3397_s0 + $0x200] sm:$0xf]  ;;  %v2356_v61 = vld [vmem:[%s3397_s0 + $0x220] sm:$0xf0]  ;;  %v1976_v63 = vld [vmem:[%s3397_s0 + $0x224] sm:$0xf0] }
  0x43   :  { %1235 = vmatmul.bf16.vlgmr.msrb.gmra.mxu3 %v1727_v14  ;;  %1284 = vmatmul.bf16.vlgmr.msrb.gmra.mxu0 %v1731_v15  ;;  %v1874_v14 = vld [vmem:[%s3397_s0 + $0x130] sm:$0xf]  ;;  %v2330_v15 = vld [vmem:[%s3397_s0 + $0x150] sm:$0xf0]  ;;  %v2352_v62 = vld [vmem:[%s3397_s0 + $0x204] sm:$0xf] }
  0x44   :  { %1423 = vmatpush.bf16.msra.mxu3 %v2423_v10  ;;  %1472 = vmatpush.bf16.msra.mxu0 %v2431_v11  ;;  %v1866_v10 = vld [vmem:[%s3397_s0 + $0x128] sm:$0xf]  ;;  %v2329_v11 = vld [vmem:[%s3397_s0 + $0x148] sm:$0xf0] }
  0x46   :  { %1375 = vmatpush.bf16.msra.mxu2 %v2414_v16  ;;  %1326 = vmatpush.bf16.msra.mxu1 %v2406_v17  ;;  %v1863_v16 = vor.u32 %v2324_v8, %v1860_v9  ;;  %v1867_v17 = vor.u32 %v2329_v11, %v1866_v10 }
  0x48   :  { %1424 = vmatpush.bf16.msra.mxu3 %v2422_v18  ;;  %1473 = vmatpush.bf16.msra.mxu0 %v2430_v19  ;;  %v1871_v18 = vor.u32 %v2325_v12, %v1868_v13  ;;  %v1875_v19 = vor.u32 %v2330_v15, %v1874_v14  ;;  %v2290_v14 = vld [vmem:[%s3397_s0 + $0x14] sm:$0xf]  ;;  %v1732_v15 = vld [vmem:[%s3397_s0 + $0x34] sm:$0xf0] }
  0x4a   :  { %1376 = vmatpush.bf16.msra.mxu2 %v2413_v20  ;;  %1327 = vmatpush.bf16.msra.mxu1 %v2405_v21  ;;  %v2409_v20 = vld [vmem:[%s3396_s1 + $0x188] sm:$0xff] }
  0x4b   :  { %v2417_v21 = vld [vmem:[%s3396_s1 + $0x1c8] sm:$0xff] }
  0x4c   :  { %1425 = vmatpush.bf16.msra.mxu3 %v2421_v22  ;;  %1474 = vmatpush.bf16.msra.mxu0 %v2429_v23  ;;  %v2401_v22 = vld [vmem:[%s3396_s1 + $0x148] sm:$0xff] }
  0x4d   :  { %v2425_v23 = vld [vmem:[%s3396_s1 + $0x208] sm:$0xff] }
  0x4e   :  { %1377 = vmatpush.bf16.msra.mxu2 %v2412_v36  ;;  %1328 = vmatpush.bf16.msra.mxu1 %v2404_v38  ;;  %v2408_v36 = vld [vmem:[%s3396_s1 + $0x180] sm:$0xff] }
  0x4f   :  { %v2400_v38 = vld [vmem:[%s3396_s1 + $0x140] sm:$0xff] }
  0x50   :  { %1426 = vmatpush.bf16.msra.mxu3 %v2420_v37  ;;  %1475 = vmatpush.bf16.msra.mxu0 %v2428_v39  ;;  %v2416_v37 = vld [vmem:[%s3396_s1 + $0x1c0] sm:$0xff] }
  0x51   :  { %1142 = vmatmul.bf16.gmra.mxu1 %v1755_v32  ;;  %1191 = vmatmul.bf16.gmra.mxu2 %v1759_v33  ;;  %v1899_v32 = vor.u32 %v2333_v24, %v1896_v25  ;;  %v1903_v33 = vor.u32 %v2338_v27, %v1902_v26  ;;  %v2424_v39 = vld [vmem:[%s3396_s1 + $0x200] sm:$0xff]  ;;  %v1735_v24 = vor.u32 %v2290_v14, %v1732_v15 }
  0x52   :  { %1378 = vmatpush.bf16.msra.mxu2 %v2411_v52  ;;  %1329 = vmatpush.bf16.msra.mxu1 %v2403_v54  ;;  %v1947_v52 = vor.u32 %v2348_v47, %v1946_v46  ;;  %v2305_v46 = vld [vmem:[%s3397_s0 + $0x88] sm:$0xf0]  ;;  %v2308_v14 = vld [vmem:[%s3397_s0 + $0xa4] sm:$0xf] }
  0x53   :  { %1240 = vmatmul.bf16.gmra.mxu3 %v1763_v34  ;;  %1289 = vmatmul.bf16.gmra.mxu0 %v1767_v35  ;;  %v1907_v34 = vor.u32 %v2334_v28, %v1904_v29  ;;  %v1911_v35 = vor.u32 %v2339_v31, %v1910_v30 }
  0x54   :  { %1427 = vmatpush.bf16.msra.mxu3 %v2419_v53  ;;  %1476 = vmatpush.bf16.msra.mxu0 %v2427_v55 }
  0x56   :  { %1379 = vmatpush.bf16.msra.mxu2 %v2410_v4  ;;  %1330 = vmatpush.bf16.msra.mxu1 %v2402_v6  ;;  %v1971_v4 = vor.u32 %v2351_v58, %v1968_v59 }
  0x58   :  { %1428 = vmatpush.bf16.msra.mxu3 %v2418_v5  ;;  %1477 = vmatpush.bf16.msra.mxu0 %v2426_v7  ;;  %v1975_v5 = vor.u32 %v2356_v61, %v1974_v60  ;;  %v1979_v7 = vor.u32 %v2352_v62, %v1976_v63 }
  0x5a   :  { %1380 = vmatpush.bf16.msra.mxu2 %v2409_v20  ;;  %1331 = vmatpush.bf16.msra.mxu1 %v2401_v22  ;;  %v1746_v20 = vld [vmem:[%s3397_s0 + $0x20] sm:$0xf] }
  0x5c   :  { %1429 = vmatpush.bf16.msra.mxu3 %v2417_v21  ;;  %1478 = vmatpush.bf16.msra.mxu0 %v2425_v23  ;;  %v2296_v21 = vld [vmem:[%s3397_s0 + $0x40] sm:$0xf0] }
  0x5d   :  { %v1747_v28 = vor.u32 %v2296_v21, %v1746_v20  ;;  %v2314_v20 = vld [vmem:[%s3397_s0 + $0xd0] sm:$0xf0] }
  0x5e   :  { %1381 = vmatpush.bf16.msra.mxu2 %v2408_v36  ;;  %1332 = vmatpush.bf16.msra.mxu1 %v2400_v38  ;;  %v2299_v38 = vld [vmem:[%s3397_s0 + $0x5c] sm:$0xf] }
  0x60   :  { %1430 = vmatpush.bf16.msra.mxu3 %v2416_v37  ;;  %1479 = vmatpush.bf16.msra.mxu0 %v2424_v39  ;;  %v1768_v39 = vld [vmem:[%s3397_s0 + $0x7c] sm:$0xf0] }
  0x61   :  { %1147 = vmatmul.bf16.gmra.mxu1 %v1791_v48  ;;  %1196 = vmatmul.bf16.gmra.mxu2 %v1795_v49  ;;  %v1935_v48 = vor.u32 %v2342_v40, %v1932_v41  ;;  %v1939_v49 = vor.u32 %v2347_v43, %v1938_v42  ;;  %v1774_v41 = vld [vmem:[%s3397_s0 + $0x60] sm:$0xf]  ;;  %v2304_v42 = vld [vmem:[%s3397_s0 + $0x80] sm:$0xf0] }
  0x62   :  { %v2300_v43 = vld [vmem:[%s3397_s0 + $0x64] sm:$0xf] }
  0x63   :  { %1245 = vmatmul.bf16.gmra.mxu3 %v1799_v50  ;;  %1294 = vmatmul.bf16.gmra.mxu0 %v1803_v51  ;;  %v1943_v51 = vor.u32 %v2343_v44, %v1940_v45  ;;  %v1776_v44 = vld [vmem:[%s3397_s0 + $0x84] sm:$0xf0] }
  0x64   :  { %v1782_v45 = vld [vmem:[%s3397_s0 + $0x68] sm:$0xf] }
  0x65   :  { %v1783_v58 = vor.u32 %v2305_v46, %v1782_v45  ;;  %v1846_v45 = vld [vmem:[%s3397_s0 + $0xf0] sm:$0xf]  ;;  %v2322_v46 = vld [vmem:[%s3397_s0 + $0x110] sm:$0xf0] }
  0x71   :  { %1152 = vmatmul.bf16.gmra.mxu1 %v1827_v0  ;;  %1201 = vmatmul.bf16.gmra.mxu2 %v1831_v1  ;;  %v1982_v0 = vld [vmem:[%s3397_s0 + $0x208] sm:$0xf]  ;;  %v2357_v1 = vld [vmem:[%s3397_s0 + $0x228] sm:$0xf0] }
  0x72   :  { %v1983_v8 = vor.u32 %v2357_v1, %v1982_v0 }
  0x73   :  { %1250 = vmatmul.bf16.gmra.mxu3 %v1835_v2  ;;  %1299 = vmatmul.bf16.gmra.mxu0 %v1839_v3 }
  0x81   :  { %1157 = vmatmul.bf16.gmra.mxu1 %v1863_v16  ;;  %1206 = vmatmul.bf16.gmra.mxu2 %v1867_v17  ;;  %v1738_v16 = vld [vmem:[%s3397_s0 + $0x18] sm:$0xf]  ;;  %v2295_v17 = vld [vmem:[%s3397_s0 + $0x38] sm:$0xf0] }
  0x82   :  { %v1739_v25 = vor.u32 %v2295_v17, %v1738_v16  ;;  %v1810_v16 = vld [vmem:[%s3397_s0 + $0xa8] sm:$0xf]  ;;  %v2313_v17 = vld [vmem:[%s3397_s0 + $0xc8] sm:$0xf0] }
  0x83   :  { %1255 = vmatmul.bf16.gmra.mxu3 %v1871_v18  ;;  %1304 = vmatmul.bf16.gmra.mxu0 %v1875_v19  ;;  %v2291_v18 = vld [vmem:[%s3397_s0 + $0x1c] sm:$0xf]  ;;  %v1740_v19 = vld [vmem:[%s3397_s0 + $0x3c] sm:$0xf0] }
  0x84   :  { %v1743_v27 = vor.u32 %v2291_v18, %v1740_v19  ;;  %v1812_v18 = vld [vmem:[%s3397_s0 + $0xcc] sm:$0xf0] }
  0x85   :  { %v1818_v19 = vld [vmem:[%s3397_s0 + $0xb0] sm:$0xf] }
  0x91   :  { %1162 = vmatmul.bf16.gmra.mxu1 %v1899_v32  ;;  %1211 = vmatmul.bf16.gmra.mxu2 %v1903_v33 }
  0x93   :  { %1260 = vmatmul.bf16.gmra.mxu3 %v1907_v34  ;;  %1309 = vmatmul.bf16.gmra.mxu0 %v1911_v35 }
  0x9e   :  { %v3006_v50 = vpop.f32.mrf.mxu1 }
  0xa0   :  { %v1089_v53 = vpop.f32.mrf.mxu0 }
  0xa1   :  { %1167 = vmatmul.bf16.gmra.mxu1 %v1935_v48  ;;  %1216 = vmatmul.bf16.gmra.mxu2 %v1939_v49 }
  0xa3   :  { %1265 = vmatmul.bf16.gmra.mxu3 %v1943_v51  ;;  %1314 = vmatmul.bf16.gmra.mxu0 %v1947_v52  ;;  %v1771_v51 = vor.u32 %v2299_v38, %v1768_v39  ;;  %v1775_v52 = vor.u32 %v2304_v42, %v1774_v41 }
  0xa4   :  { %v3008_v54 = vpop.f32.mrf.mxu2 }
  0xa6   :  { %v3010_v55 = vpop.f32.mrf.mxu3  ;;  %v3012_v56 = vpop.f32.mrf.mxu1 }
  0xa8   :  { %v1091_v57 = vpop.f32.mrf.mxu0 }
  0xac   :  { %v3038_v2 = vpop.f32.mrf.mxu2 }
  0xae   :  { %v3040_v3 = vpop.f32.mrf.mxu3  ;;  %v3042_v6 = vpop.f32.mrf.mxu1 }
  0xb0   :  { %v1094_v9 = vpop.f32.mrf.mxu0 }
  0xb1   :  { %1172 = vmatmul.bf16.gmra.mxu1 %v1971_v4  ;;  %1221 = vmatmul.bf16.gmra.mxu2 %v1975_v5 }
  0xb3   :  { %1270 = vmatmul.bf16.gmra.mxu3 %v1979_v7  ;;  %1319 = vmatmul.bf16.gmra.mxu0 %v1983_v8 }
  0xb4   :  { %v3044_v10 = vpop.f32.mrf.mxu2 }
  0xb6   :  { %v3046_v11 = vpop.f32.mrf.mxu3  ;;  %v3048_v12 = vpop.f32.mrf.mxu1 }
  0xb8   :  { %v1096_v13 = vpop.f32.mrf.mxu0 }
  0xbc   :  { %v3074_v22 = vpop.f32.mrf.mxu2 }
  0xbe   :  { %v3076_v23 = vpop.f32.mrf.mxu3  ;;  %v1138_v26 = vpop.f32.mrf.mxu1 }
  0xbf   :  { %v1139_v29 = vadd.f32 %v1138_v26, %v1089_v53 }
  0xc0   :  { %v1285_v30 = vpop.f32.mrf.mxu0 }
  0xc1   :  { %1333 = vmatmul.bf16.vlgmr.msra.gmra.mxu1 %v1735_v24  ;;  %1382 = vmatmul.bf16.vlgmr.msra.gmra.mxu2 %v1739_v25 }
  0xc3   :  { %1431 = vmatmul.bf16.vlgmr.msra.gmra.mxu3 %v1743_v27  ;;  %1480 = vmatmul.bf16.vlgmr.msra.gmra.mxu0 %v1747_v28  ;;  %v1811_v27 = vor.u32 %v2313_v17, %v1810_v16 }
  0xc4   :  { %v1187_v31 = vpop.f32.mrf.mxu2 }
  0xc5   :  { %v1188_v32 = vadd.f32 %v1187_v31, %v1139_v29 }
  0xc6   :  { %v1236_v33 = vpop.f32.mrf.mxu3  ;;  %v1140_v34 = vpop.f32.mrf.mxu1 }
  0xc7   :  { %v1237_v35 = vadd.f32 %v1236_v33, %v1188_v32  ;;  %v1141_v36 = vadd.f32 %v1140_v34, %v1091_v57  ;;  %v1779_v57 = vor.u32 %v2300_v43, %v1776_v44  ;;  %v2317_v43 = vld [vmem:[%s3397_s0 + $0xec] sm:$0xf] }
  0xc8   :  { %v1287_v37 = vpop.f32.mrf.mxu0 }
  0xc9   :  { %v3084_v40 = vadd.f32 %v1285_v30, %v1237_v35  ;;  %v1819_v30 = vor.u32 %v2314_v20, %v1818_v19  ;;  %v1882_v19 = vld [vmem:[%s3397_s0 + $0x138] sm:$0xf]  ;;  %v2331_v20 = vld [vmem:[%s3397_s0 + $0x158] sm:$0xf0] }
  0xcc   :  { %v1189_v47 = vpop.f32.mrf.mxu2 }
  0xcd   :  { %v1190_v48 = vadd.f32 %v1189_v47, %v1141_v36  ;;  %v1848_v47 = vld [vmem:[%s3397_s0 + $0x114] sm:$0xf0] }
  0xce   :  { %v1238_v49 = vpop.f32.mrf.mxu3  ;;  %v1143_v53 = vpop.f32.mrf.mxu1 }
  0xcf   :  { %v1239_v59 = vadd.f32 %v1238_v49, %v1190_v48  ;;  %v1144_v60 = vadd.f32 %v1143_v53, %v1094_v9  ;;  %v1804_v9 = vld [vmem:[%s3397_s0 + $0xc4] sm:$0xf0]  ;;  %v1854_v48 = vld [vmem:[%s3397_s0 + $0xf8] sm:$0xf]  ;;  %v2323_v49 = vld [vmem:[%s3397_s0 + $0x118] sm:$0xf0] }
  0xd0   :  { %v1290_v61 = vpop.f32.mrf.mxu0  ;;  %v1807_v26 = vor.u32 %v2308_v14, %v1804_v9 }
  0xd1   :  { %1338 = vmatmul.bf16.gmra.mxu1 %v1771_v51  ;;  %1387 = vmatmul.bf16.gmra.mxu2 %v1775_v52  ;;  %v3104_v62 = vadd.f32 %v1287_v37, %v1239_v59 }
  0xd3   :  { %1436 = vmatmul.bf16.gmra.mxu3 %v1779_v57  ;;  %1485 = vmatmul.bf16.gmra.mxu0 %v1783_v58  ;;  %v1847_v58 = vor.u32 %v2322_v46, %v1846_v45  ;;  %v2335_v46 = vld [vmem:[%s3397_s0 + $0x17c] sm:$0xf] }
  0xd4   :  { %v1192_v63 = vpop.f32.mrf.mxu2 }
  0xd5   :  { %v1193_v0 = vadd.f32 %v1192_v63, %v1144_v60 }
  0xd6   :  { %v1241_v1 = vpop.f32.mrf.mxu3  ;;  %v1145_v4 = vpop.f32.mrf.mxu1 }
  0xd7   :  { %v1242_v5 = vadd.f32 %v1241_v1, %v1193_v0  ;;  %v1146_v7 = vadd.f32 %v1145_v4, %v1096_v13  ;;  %v2309_v13 = vld [vmem:[%s3397_s0 + $0xac] sm:$0xf] }
  0xd8   :  { %v1292_v8 = vpop.f32.mrf.mxu0  ;;  %v1815_v29 = vor.u32 %v2309_v13, %v1812_v18  ;;  %v2326_v13 = vld [vmem:[%s3397_s0 + $0x134] sm:$0xf] }
  0xd9   :  { %v3112_v15 = vadd.f32 %v1290_v61, %v1242_v5  ;;  %v1855_v61 = vor.u32 %v2323_v49, %v1854_v48  ;;  %v2340_v48 = vld [vmem:[%s3397_s0 + $0x1a0] sm:$0xf0] }
  0xda   :  { %v2336_v49 = vld [vmem:[%s3397_s0 + $0x184] sm:$0xf] }
  0xdc   :  { %v1194_v21 = vpop.f32.mrf.mxu2 }
  0xdd   :  { %v1195_v24 = vadd.f32 %v1194_v21, %v1146_v7  ;;  %v1884_v21 = vld [vmem:[%s3397_s0 + $0x15c] sm:$0xf0] }
  0xde   :  { %v1243_v25 = vpop.f32.mrf.mxu3  ;;  %v1148_v28 = vpop.f32.mrf.mxu1 }
  0xdf   :  { %v1244_v31 = vadd.f32 %v1243_v25, %v1195_v24  ;;  %v1149_v32 = vadd.f32 %v1148_v28, %v3006_v50  ;;  %v1840_v50 = vld [vmem:[%s3397_s0 + $0x10c] sm:$0xf0]  ;;  %v1890_v24 = vld [vmem:[%s3397_s0 + $0x140] sm:$0xf]  ;;  %v2332_v25 = vld [vmem:[%s3397_s0 + $0x160] sm:$0xf0] }
  0xe0   :  { %v1295_v33 = vpop.f32.mrf.mxu0  ;;  %v1843_v57 = vor.u32 %v2317_v43, %v1840_v50 }
  0xe1   :  { %1343 = vmatmul.bf16.gmra.mxu1 %v1807_v26  ;;  %1392 = vmatmul.bf16.gmra.mxu2 %v1811_v27  ;;  %v3133_v34 = vadd.f32 %v1292_v8, %v1244_v31 }
  0xe3   :  { %1441 = vmatmul.bf16.gmra.mxu3 %v1815_v29  ;;  %1490 = vmatmul.bf16.gmra.mxu0 %v1819_v30  ;;  %v1883_v30 = vor.u32 %v2331_v20, %v1882_v19  ;;  %v2344_v20 = vld [vmem:[%s3397_s0 + $0x1c4] sm:$0xf] }
  0xe4   :  { %v1197_v35 = vpop.f32.mrf.mxu2 }
  0xe5   :  { %v1198_v36 = vadd.f32 %v1197_v35, %v1149_v32 }
  0xe6   :  { %v1246_v37 = vpop.f32.mrf.mxu3  ;;  %v1150_v38 = vpop.f32.mrf.mxu1 }
  0xe7   :  { %v1247_v39 = vadd.f32 %v1246_v37, %v1198_v36  ;;  %v1151_v41 = vadd.f32 %v1150_v38, %v3012_v56  ;;  %v2318_v56 = vld [vmem:[%s3397_s0 + $0xf4] sm:$0xf] }
  0xe8   :  { %v1297_v42 = vpop.f32.mrf.mxu0  ;;  %v1851_v60 = vor.u32 %v2318_v56, %v1848_v47  ;;  %v1912_v56 = vld [vmem:[%s3397_s0 + $0x19c] sm:$0xf0] }
  0xe9   :  { %v3142_v44 = vadd.f32 %v1295_v33, %v1247_v39  ;;  %v1891_v33 = vor.u32 %v2332_v25, %v1890_v24  ;;  %v2349_v24 = vld [vmem:[%s3397_s0 + $0x1e8] sm:$0xf0] }
  0xea   :  { %v2345_v25 = vld [vmem:[%s3397_s0 + $0x1cc] sm:$0xf] }
  0xec   :  { %v1199_v51 = vpop.f32.mrf.mxu2 }
  0xed   :  { %v1200_v52 = vadd.f32 %v1199_v51, %v1151_v41 }
  0xee   :  { %v1248_v53 = vpop.f32.mrf.mxu3  ;;  %v1153_v59 = vpop.f32.mrf.mxu1 }
  0xef   :  { %v1249_v63 = vadd.f32 %v1248_v53, %v1200_v52  ;;  %v1154_v0 = vadd.f32 %v1153_v59, %v3042_v6  ;;  %v1876_v6 = vld [vmem:[%s3397_s0 + $0x154] sm:$0xf0]  ;;  %v1920_v52 = vld [vmem:[%s3397_s0 + $0x1a4] sm:$0xf0] }
  0xf0   :  { %v1300_v1 = vpop.f32.mrf.mxu0  ;;  %v1879_v29 = vor.u32 %v2326_v13, %v1876_v6  ;;  %v1926_v53 = vld [vmem:[%s3397_s0 + $0x188] sm:$0xf] }
  0xf1   :  { %1348 = vmatmul.bf16.gmra.mxu1 %v1843_v57  ;;  %1397 = vmatmul.bf16.gmra.mxu2 %v1847_v58  ;;  %v3163_v4 = vadd.f32 %v1297_v42, %v1249_v63  ;;  %v2341_v57 = vld [vmem:[%s3397_s0 + $0x1a8] sm:$0xf0] }
  0xf3   :  { %1446 = vmatmul.bf16.gmra.mxu3 %v1851_v60  ;;  %1495 = vmatmul.bf16.gmra.mxu0 %v1855_v61  ;;  %v1915_v61 = vor.u32 %v2335_v46, %v1912_v56 }
  0xf4   :  { %v1202_v5 = vpop.f32.mrf.mxu2 }
  0xf5   :  { %v1203_v7 = vadd.f32 %v1202_v5, %v1154_v0 }
  0xf6   :  { %v1251_v8 = vpop.f32.mrf.mxu3  ;;  %v1155_v14 = vpop.f32.mrf.mxu1 }
  0xf7   :  { %v1252_v9 = vadd.f32 %v1251_v8, %v1203_v7  ;;  %v1156_v16 = vadd.f32 %v1155_v14, %v3048_v12  ;;  %v2327_v12 = vld [vmem:[%s3397_s0 + $0x13c] sm:$0xf] }
  0xf8   :  { %v1302_v17 = vpop.f32.mrf.mxu0  ;;  %v1887_v32 = vor.u32 %v2327_v12, %v1884_v21  ;;  %v1948_v12 = vld [vmem:[%s3397_s0 + $0x1e4] sm:$0xf0] }
  0xf9   :  { %v3172_v18 = vadd.f32 %v1300_v1, %v1252_v9  ;;  %v1923_v1 = vor.u32 %v2336_v49, %v1920_v52  ;;  %v2353_v49 = vld [vmem:[%s3397_s0 + $0x20c] sm:$0xf] }
  0xfc   :  { %v1204_v26 = vpop.f32.mrf.mxu2 }
  0xfd   :  { %v1205_v27 = vadd.f32 %v1204_v26, %v1156_v16 }
  0xfe   :  { %v1253_v28 = vpop.f32.mrf.mxu3  ;;  %v1158_v31 = vpop.f32.mrf.mxu1 }
  0xff   :  { %v1254_v35 = vadd.f32 %v1253_v28, %v1205_v27  ;;  %v1159_v38 = vadd.f32 %v1158_v31, %v3008_v54  ;;  %v1918_v54 = vld [vmem:[%s3397_s0 + $0x180] sm:$0xf]  ;;  %v1956_v27 = vld [vmem:[%s3397_s0 + $0x1ec] sm:$0xf0] }
 0x100   :  { %v1305_v36 = vpop.f32.mrf.mxu0  ;;  %v1919_v63 = vor.u32 %v2340_v48, %v1918_v54  ;;  %v1962_v28 = vld [vmem:[%s3397_s0 + $0x1d0] sm:$0xf] }
 0x101   :  { %1353 = vmatmul.bf16.gmra.mxu1 %v1879_v29  ;;  %1402 = vmatmul.bf16.gmra.mxu2 %v1883_v30  ;;  %v3192_v37 = vadd.f32 %v1302_v17, %v1254_v35  ;;  %v2350_v29 = vld [vmem:[%s3397_s0 + $0x1f0] sm:$0xf0] }
 0x103   :  { %1451 = vmatmul.bf16.gmra.mxu3 %v1887_v32  ;;  %1500 = vmatmul.bf16.gmra.mxu0 %v1891_v33  ;;  %v1951_v33 = vor.u32 %v2344_v20, %v1948_v12 }
 0x104   :  { %v1207_v39 = vpop.f32.mrf.mxu2 }
 0x105   :  { %v1208_v41 = vadd.f32 %v1207_v39, %v1159_v38  ;;  %v1959_v38 = vor.u32 %v2345_v25, %v1956_v27 }
 0x106   :  { %v1256_v42 = vpop.f32.mrf.mxu3  ;;  %v1160_v43 = vpop.f32.mrf.mxu1 }
 0x107   :  { %v1257_v50 = vadd.f32 %v1256_v42, %v1208_v41  ;;  %v1161_v51 = vadd.f32 %v1160_v43, %v3038_v2  ;;  %v1927_v2 = vor.u32 %v2341_v57, %v1926_v53  ;;  %v2358_v53 = vld [vmem:[%s3397_s0 + $0x230] sm:$0xf0] }
 0x108   :  { %v1307_v45 = vpop.f32.mrf.mxu0  ;;  %v2354_v57 = vld [vmem:[%s3397_s0 + $0x214] sm:$0xf] }
 0x109   :  { %v3201_v47 = vadd.f32 %v1305_v36, %v1257_v50 }
 0x10c   :  { %v1209_v58 = vpop.f32.mrf.mxu2 }
 0x10d   :  { %v1210_v59 = vadd.f32 %v1209_v58, %v1161_v51  ;;  %v1984_v51 = vld [vmem:[%s3397_s0 + $0x22c] sm:$0xf0] }
 0x10e   :  { %v1258_v60 = vpop.f32.mrf.mxu3  ;;  %v1163_v0 = vpop.f32.mrf.mxu1 }
 0x10f   :  { %v1259_v5 = vadd.f32 %v1258_v60, %v1210_v59  ;;  %v1164_v14 = vadd.f32 %v1163_v0, %v3044_v10  ;;  %v1954_v10 = vld [vmem:[%s3397_s0 + $0x1c8] sm:$0xf]  ;;  %v1992_v59 = vld [vmem:[%s3397_s0 + $0x234] sm:$0xf0] }
 0x110   :  { %v1310_v7 = vpop.f32.mrf.mxu0  ;;  %v1955_v35 = vor.u32 %v2349_v24, %v1954_v10  ;;  %v1998_v60 = vld [vmem:[%s3397_s0 + $0x218] sm:$0xf] }
 0x111   :  { %1358 = vmatmul.bf16.gmra.mxu1 %v1915_v61  ;;  %1407 = vmatmul.bf16.gmra.mxu2 %v1919_v63  ;;  %v3222_v8 = vadd.f32 %v1307_v45, %v1259_v5  ;;  %v2359_v61 = vld [vmem:[%s3397_s0 + $0x238] sm:$0xf0] }
 0x113   :  { %1456 = vmatmul.bf16.gmra.mxu3 %v1923_v1  ;;  %1505 = vmatmul.bf16.gmra.mxu0 %v1927_v2  ;;  %v1987_v2 = vor.u32 %v2353_v49, %v1984_v51 }
 0x114   :  { %v1212_v9 = vpop.f32.mrf.mxu2 }
 0x115   :  { %v1213_v16 = vadd.f32 %v1212_v9, %v1164_v14  ;;  %v1995_v14 = vor.u32 %v2354_v57, %v1992_v59 }
 0x116   :  { %v1261_v17 = vpop.f32.mrf.mxu3  ;;  %v1165_v13 = vpop.f32.mrf.mxu1 }
 0x117   :  { %v1262_v6 = vadd.f32 %v1261_v17, %v1213_v16  ;;  %v1166_v26 = vadd.f32 %v1165_v13, %v3074_v22  ;;  %v1963_v22 = vor.u32 %v2350_v29, %v1962_v28 }
 0x118   :  { %v1312_v19 = vpop.f32.mrf.mxu0 }
 0x119   :  { %v3231_v21 = vadd.f32 %v1310_v7, %v1262_v6 }
 0x11c   :  { %v1214_v30 = vpop.f32.mrf.mxu2 }
 0x11d   :  { %v1215_v31 = vadd.f32 %v1214_v30, %v1166_v26 }
 0x11e   :  { %v1263_v32 = vpop.f32.mrf.mxu3  ;;  %v1168_v36 = vpop.f32.mrf.mxu1 }
 0x11f   :  { %v1264_v39 = vadd.f32 %v1263_v32, %v1215_v31  ;;  %v1169_v43 = vadd.f32 %v1168_v36, %v3010_v55  ;;  %v1990_v55 = vld [vmem:[%s3397_s0 + $0x210] sm:$0xf] }
 0x120   :  { %v1315_v41 = vpop.f32.mrf.mxu0  ;;  %v1991_v5 = vor.u32 %v2358_v53, %v1990_v55 }
 0x121   :  { %1363 = vmatmul.bf16.gmra.mxu1 %v1951_v33  ;;  %1412 = vmatmul.bf16.gmra.mxu2 %v1955_v35  ;;  %v3252_v42 = vadd.f32 %v1312_v19, %v1264_v39 }
 0x123   :  { %1461 = vmatmul.bf16.gmra.mxu3 %v1959_v38  ;;  %1510 = vmatmul.bf16.gmra.mxu0 %v1963_v22 }
 0x124   :  { %v1217_v50 = vpop.f32.mrf.mxu2 }
 0x125   :  { %v1218_v45 = vadd.f32 %v1217_v50, %v1169_v43 }
 0x126   :  { %v1266_v46 = vpop.f32.mrf.mxu3  ;;  %v1170_v56 = vpop.f32.mrf.mxu1 }
 0x127   :  { %v1267_v54 = vadd.f32 %v1266_v46, %v1218_v45  ;;  %v1171_v58 = vadd.f32 %v1170_v56, %v3040_v3  ;;  %v1999_v3 = vor.u32 %v2359_v61, %v1998_v60 }
 0x128   :  { %v1317_v48 = vpop.f32.mrf.mxu0 }
 0x129   :  { %v3261_v52 = vadd.f32 %v1315_v41, %v1267_v54 }
 0x12c   :  { %v1219_v63 = vpop.f32.mrf.mxu2 }
 0x12d   :  { %v1220_v0 = vadd.f32 %v1219_v63, %v1171_v58 }
 0x12e   :  { %v1268_v1 = vpop.f32.mrf.mxu3  ;;  %v1173_v7 = vpop.f32.mrf.mxu1 }
 0x12f   :  { %v1269_v9 = vadd.f32 %v1268_v1, %v1220_v0  ;;  %v1174_v13 = vadd.f32 %v1173_v7, %v3046_v11 }
 0x130   :  { %v1320_v16 = vpop.f32.mrf.mxu0 }
 0x131   :  { %1368 = vmatmul.bf16.gmra.mxu1 %v1987_v2  ;;  %1417 = vmatmul.bf16.gmra.mxu2 %v1991_v5  ;;  %v3282_v17 = vadd.f32 %v1317_v48, %v1269_v9  ;;  %v2433_v48 = vld [vmem:[%s3400_s4] sm:$0xff]  }
 0x132   :  { %v2435_v59 = vunpack.c.h.bf16 %v2433_v48 }
 0x133   :  { %1466 = vmatmul.bf16.gmra.mxu3 %v1995_v14  ;;  %1515 = vmatmul.bf16.gmra.mxu0 %v1999_v3 }
 0x134   :  { %v1222_v6 = vpop.f32.mrf.mxu2 }
 0x135   :  { %v1223_v19 = vadd.f32 %v1222_v6, %v1174_v13 }
 0x136   :  { %v1271_v20 = vpop.f32.mrf.mxu3  ;;  %v1175_v12 = vpop.f32.mrf.mxu1 }
 0x137   :  { %v1272_v10 = vadd.f32 %v1271_v20, %v1223_v19  ;;  %v1176_v26 = vadd.f32 %v1175_v12, %v3076_v23  ;;  %v3294_v23 = vld [vmem:[%s3398_s2] ss:$0 sm:$0xff] }
 0x138   :  { %v1322_v24 = vpop.f32.mrf.mxu0 }
 0x139   :  { %v3285_v25 = vadd.f32 %v1320_v16, %v1272_v10 }
 0x13c   :  { %v1224_v27 = vpop.f32.mrf.mxu2 }
 0x13d   :  { %v1225_v28 = vadd.f32 %v1224_v27, %v1176_v26 }
 0x13e   :  { %v1273_v29 = vpop.f32.mrf.mxu3  ;;  %v1334_v30 = vpop.f32.mrf.mxu1 }
 0x13f   :  { %v1274_v31 = vadd.f32 %v1273_v29, %v1225_v28  ;;  %v1335_v11 = vadd.f32 %v1334_v30, %v3084_v40  ;;  %v3301_v40 = vld [vmem:[%s3399_s3] ss:$0 sm:$0xff] }
 0x140   :  { %v1481_v32 = vpop.f32.mrf.mxu0 }
 0x141   :  { %v3288_v33 = vadd.f32 %v1322_v24, %v1274_v31  ;;  %v2504_v24 = vld [vmem:[%s3400_s4 + $0x8] sm:$0xff]  }
 0x142   :  { %v2438_v30 = vunpack.c.l.bf16 %v2504_v24 }
 0x144   :  { %v1383_v35 = vpop.f32.mrf.mxu2 }
 0x145   :  { %v1384_v36 = vadd.f32 %v1383_v35, %v1335_v11 }
 0x146   :  { %v1432_v38 = vpop.f32.mrf.mxu3  ;;  %v1336_v22 = vpop.f32.mrf.mxu1 }
 0x147   :  { %v1433_v39 = vadd.f32 %v1432_v38, %v1384_v36  ;;  %v1337_v50 = vadd.f32 %v1336_v22, %v3104_v62  ;;  %v2434_v62 = vunpack.c.l.bf16 %v2433_v48 }
 0x148   :  { %v1483_v41 = vpop.f32.mrf.mxu0 }
 0x149   :  { %v1482_v43 = vadd.f32 %v1481_v32, %v1433_v39  ;;  %v2439_v32 = vunpack.c.h.bf16 %v2504_v24 }
 0x14b   :  { %v1576_v46 = vmul.f32 %v3294_v23, %v1482_v43 }
 0x14c   :  { %v1385_v45 = vpop.f32.mrf.mxu2 }
 0x14d   :  { %v1386_v56 = vadd.f32 %v1385_v45, %v1337_v50  ;;  %v1596_v53 = vadd.f32 %v3301_v40, %v1576_v46 }
 0x14e   :  { %v1434_v54 = vpop.f32.mrf.mxu3  ;;  %v1339_v49 = vpop.f32.mrf.mxu1 }
 0x14f   :  { %v1435_v51 = vadd.f32 %v1434_v54, %v1386_v56  ;;  %v1340_v60 = vadd.f32 %v1339_v49, %v3112_v15  ;;  %v1644_v63 = vadd.f32 %v2434_v62, %v1596_v53  ;;  %v2505_v62 = vld [vmem:[%s3400_s4 + $0x10] sm:$0xff]  }
 0x150   :  { %v1486_v55 = vpop.f32.mrf.mxu0 }
 0x151   :  { %v1484_v57 = vadd.f32 %v1483_v41, %v1435_v51  ;;  %v1660_v9 = vmax.f32 %v1644_v63, 0.0 }
 0x153   :  { %v1577_v58 = vmul.f32 %v3294_v23, %v1484_v57 }
 0x154   :  { %v1388_v61 = vpop.f32.mrf.mxu2 }
 0x155   :  { %v1597_v0 = vadd.f32 %v3301_v40, %v1577_v58  ;;  %v1389_v1 = vadd.f32 %v1388_v61, %v1340_v60  ;;  %v2442_v61 = vunpack.c.l.bf16 %v2505_v62 }
 0x156   :  { %v1437_v2 = vpop.f32.mrf.mxu3  ;;  %v1341_v5 = vpop.f32.mrf.mxu1 }
 0x157   :  { %v1645_v7 = vadd.f32 %v2435_v59, %v1597_v0  ;;  %v1438_v14 = vadd.f32 %v1437_v2, %v1389_v1  ;;  %v1342_v19 = vadd.f32 %v1341_v5, %v3133_v34  ;;  %v2443_v0 = vunpack.c.h.bf16 %v2505_v62 }
 0x158   :  { %v1488_v3 = vpop.f32.mrf.mxu0 }
 0x159   :  { %v1661_v16 = vmax.f32 %v1645_v7, 0.0  ;;  %v1487_v13 = vadd.f32 %v1486_v55, %v1438_v14 }
 0x15b   :  { %v2467_v6 = vpack.c.bf16 %v1661_v16, %v1660_v9  ;;  %v1578_v15 = vmul.f32 %v3294_v23, %v1487_v13 }
 0x15c   :  { %v1390_v20 = vpop.f32.mrf.mxu2 }
 0x15d   :  { %2468 = vst [vmem:[%s3401_s5] sm:$0xff] %v2467_v6   ;;  %v1391_v12 = vadd.f32 %v1390_v20, %v1342_v19  ;;  %v1598_v29 = vadd.f32 %v3301_v40, %v1578_v15 }
 0x15e   :  { %v1439_v10 = vpop.f32.mrf.mxu3  ;;  %v1344_v26 = vpop.f32.mrf.mxu1 }
 0x15f   :  { %v1440_v27 = vadd.f32 %v1439_v10, %v1391_v12  ;;  %v1345_v11 = vadd.f32 %v1344_v26, %v3142_v44  ;;  %v1646_v36 = vadd.f32 %v2438_v30, %v1598_v29 }
 0x160   :  { %v1491_v28 = vpop.f32.mrf.mxu0 }
 0x161   :  { %v1489_v34 = vadd.f32 %v1488_v3, %v1440_v27  ;;  %v1662_v46 = vmax.f32 %v1646_v36, 0.0 }
 0x163   :  { %v1579_v31 = vmul.f32 %v3294_v23, %v1489_v34 }
 0x164   :  { %v1393_v35 = vpop.f32.mrf.mxu2 }
 0x165   :  { %v1599_v38 = vadd.f32 %v3301_v40, %v1579_v31  ;;  %v1394_v22 = vadd.f32 %v1393_v35, %v1345_v11 }
 0x166   :  { %v1442_v39 = vpop.f32.mrf.mxu3  ;;  %v1346_v41 = vpop.f32.mrf.mxu1 }
 0x167   :  { %v1647_v43 = vadd.f32 %v2439_v32, %v1599_v38  ;;  %v1443_v50 = vadd.f32 %v1442_v39, %v1394_v22  ;;  %v1347_v49 = vadd.f32 %v1346_v41, %v3163_v4 }
 0x168   :  { %v1493_v45 = vpop.f32.mrf.mxu0 }
 0x169   :  { %v1663_v56 = vmax.f32 %v1647_v43, 0.0  ;;  %v1492_v54 = vadd.f32 %v1491_v28, %v1443_v50  ;;  %v2506_v28 = vld [vmem:[%s3400_s4 + $0x18] sm:$0xff]  }
 0x16a   :  { %v2446_v32 = vunpack.c.l.bf16 %v2506_v28  ;;  %v2447_v35 = vunpack.c.h.bf16 %v2506_v28 }
 0x16b   :  { %v2472_v48 = vpack.c.bf16 %v1663_v56, %v1662_v46  ;;  %v1580_v44 = vmul.f32 %v3294_v23, %v1492_v54 }
 0x16c   :  { %v1395_v51 = vpop.f32.mrf.mxu2 }
 0x16d   :  { %2511 = vst [vmem:[%s3401_s5 + $0x8] sm:$0xff] %v2472_v48   ;;  %v1396_v55 = vadd.f32 %v1395_v51, %v1347_v49  ;;  %v1600_v60 = vadd.f32 %v3301_v40, %v1580_v44 }
 0x16e   :  { %v1444_v53 = vpop.f32.mrf.mxu3  ;;  %v1349_v57 = vpop.f32.mrf.mxu1 }
 0x16f   :  { %v1445_v58 = vadd.f32 %v1444_v53, %v1396_v55  ;;  %v1350_v1 = vadd.f32 %v1349_v57, %v3172_v18  ;;  %v1648_v5 = vadd.f32 %v2442_v61, %v1600_v60  ;;  %v2507_v57 = vld [vmem:[%s3400_s4 + $0x20] sm:$0xff]  }
 0x170   :  { %v1496_v59 = vpop.f32.mrf.mxu0 }
 0x171   :  { %v1494_v4 = vadd.f32 %v1493_v45, %v1445_v58  ;;  %v1664_v19 = vmax.f32 %v1648_v5, 0.0 }
 0x173   :  { %v1581_v63 = vmul.f32 %v3294_v23, %v1494_v4  ;;  %v2450_v4 = vunpack.c.l.bf16 %v2507_v57 }
 0x174   :  { %v1398_v2 = vpop.f32.mrf.mxu2 }
 0x175   :  { %v1601_v7 = vadd.f32 %v3301_v40, %v1581_v63  ;;  %v1399_v14 = vadd.f32 %v1398_v2, %v1350_v1 }
 0x176   :  { %v1447_v3 = vpop.f32.mrf.mxu3  ;;  %v1351_v9 = vpop.f32.mrf.mxu1 }
 0x177   :  { %v1649_v16 = vadd.f32 %v2443_v0, %v1601_v7  ;;  %v1448_v13 = vadd.f32 %v1447_v3, %v1399_v14  ;;  %v1352_v10 = vadd.f32 %v1351_v9, %v3192_v37  ;;  %v2451_v0 = vunpack.c.h.bf16 %v2507_v57 }
 0x178   :  { %v1498_v6 = vpop.f32.mrf.mxu0 }
 0x179   :  { %v1665_v20 = vmax.f32 %v1649_v16, 0.0  ;;  %v1497_v15 = vadd.f32 %v1496_v59, %v1448_v13 }
 0x17b   :  { %v2477_v12 = vpack.c.bf16 %v1665_v20, %v1664_v19  ;;  %v1582_v18 = vmul.f32 %v3294_v23, %v1497_v15 }
 0x17c   :  { %v1400_v24 = vpop.f32.mrf.mxu2 }
 0x17d   :  { %2512 = vst [vmem:[%s3401_s5 + $0x10] sm:$0xff] %v2477_v12   ;;  %v1401_v26 = vadd.f32 %v1400_v24, %v1352_v10  ;;  %v1602_v31 = vadd.f32 %v3301_v40, %v1582_v18 }
 0x17e   :  { %v1449_v27 = vpop.f32.mrf.mxu3  ;;  %v1354_v29 = vpop.f32.mrf.mxu1 }
 0x17f   :  { %v1450_v30 = vadd.f32 %v1449_v27, %v1401_v26  ;;  %v1355_v36 = vadd.f32 %v1354_v29, %v3201_v47  ;;  %v1650_v22 = vadd.f32 %v2446_v32, %v1602_v31  ;;  %v2508_v27 = vld [vmem:[%s3400_s4 + $0x28] sm:$0xff]  }
 0x180   :  { %v1501_v34 = vpop.f32.mrf.mxu0 }
 0x181   :  { %v1499_v37 = vadd.f32 %v1498_v6, %v1450_v30  ;;  %v1666_v54 = vmax.f32 %v1650_v22, 0.0 }
 0x183   :  { %v1583_v11 = vmul.f32 %v3294_v23, %v1499_v37  ;;  %v2455_v37 = vunpack.c.h.bf16 %v2508_v27 }
 0x184   :  { %v1403_v38 = vpop.f32.mrf.mxu2 }
 0x185   :  { %v1603_v39 = vadd.f32 %v3301_v40, %v1583_v11  ;;  %v1404_v41 = vadd.f32 %v1403_v38, %v1355_v36 }
 0x186   :  { %v1452_v43 = vpop.f32.mrf.mxu3  ;;  %v1356_v50 = vpop.f32.mrf.mxu1 }
 0x187   :  { %v1651_v45 = vadd.f32 %v2447_v35, %v1603_v39  ;;  %v1453_v46 = vadd.f32 %v1452_v43, %v1404_v41  ;;  %v1357_v44 = vadd.f32 %v1356_v50, %v3222_v8 }
 0x188   :  { %v1503_v56 = vpop.f32.mrf.mxu0 }
 0x189   :  { %v1667_v48 = vmax.f32 %v1651_v45, 0.0  ;;  %v1502_v49 = vadd.f32 %v1501_v34, %v1453_v46  ;;  %v2454_v34 = vunpack.c.l.bf16 %v2508_v27 }
 0x18b   :  { %v2482_v51 = vpack.c.bf16 %v1667_v48, %v1666_v54  ;;  %v1584_v47 = vmul.f32 %v3294_v23, %v1502_v49 }
 0x18c   :  { %v1405_v55 = vpop.f32.mrf.mxu2 }
 0x18d   :  { %2513 = vst [vmem:[%s3401_s5 + $0x18] sm:$0xff] %v2482_v51   ;;  %v1406_v53 = vadd.f32 %v1405_v55, %v1357_v44  ;;  %v1604_v61 = vadd.f32 %v3301_v40, %v1584_v47  ;;  %v2509_v47 = vld [vmem:[%s3400_s4 + $0x30] sm:$0xff]  }
 0x18e   :  { %v1454_v62 = vpop.f32.mrf.mxu3  ;;  %v1359_v58 = vpop.f32.mrf.mxu1 }
 0x18f   :  { %v1455_v59 = vadd.f32 %v1454_v62, %v1406_v53  ;;  %v1360_v1 = vadd.f32 %v1359_v58, %v3231_v21  ;;  %v1652_v5 = vadd.f32 %v2450_v4, %v1604_v61  ;;  %v2458_v58 = vunpack.c.l.bf16 %v2509_v47 }
 0x190   :  { %v1506_v60 = vpop.f32.mrf.mxu0 }
 0x191   :  { %v1504_v8 = vadd.f32 %v1503_v56, %v1455_v59  ;;  %v1668_v19 = vmax.f32 %v1652_v5, 0.0 }
 0x193   :  { %v1585_v63 = vmul.f32 %v3294_v23, %v1504_v8 }
 0x194   :  { %v1408_v2 = vpop.f32.mrf.mxu2 }
 0x195   :  { %v1605_v7 = vadd.f32 %v3301_v40, %v1585_v63  ;;  %v1409_v14 = vadd.f32 %v1408_v2, %v1360_v1 }
 0x196   :  { %v1457_v3 = vpop.f32.mrf.mxu3  ;;  %v1361_v9 = vpop.f32.mrf.mxu1 }
 0x197   :  { %v1653_v16 = vadd.f32 %v2451_v0, %v1605_v7  ;;  %v1458_v13 = vadd.f32 %v1457_v3, %v1409_v14  ;;  %v1362_v10 = vadd.f32 %v1361_v9, %v3252_v42 }
 0x198   :  { %v1508_v6 = vpop.f32.mrf.mxu0 }
 0x199   :  { %v1669_v20 = vmax.f32 %v1653_v16, 0.0  ;;  %v1507_v15 = vadd.f32 %v1506_v60, %v1458_v13  ;;  %v2459_v60 = vunpack.c.h.bf16 %v2509_v47 }
 0x19b   :  { %v2487_v12 = vpack.c.bf16 %v1669_v20, %v1668_v19  ;;  %v1586_v21 = vmul.f32 %v3294_v23, %v1507_v15  ;;  %v2510_v15 = vld [vmem:[%s3400_s4 + $0x38] sm:$0xff]  }
 0x19c   :  { %v1410_v24 = vpop.f32.mrf.mxu2  ;;  %v2463_v27 = vunpack.c.h.bf16 %v2510_v15 }
 0x19d   :  { %2514 = vst [vmem:[%s3401_s5 + $0x20] sm:$0xff] %v2487_v12   ;;  %v1411_v18 = vadd.f32 %v1410_v24, %v1362_v10  ;;  %v1606_v30 = vadd.f32 %v3301_v40, %v1586_v21 }
 0x19e   :  { %v1459_v26 = vpop.f32.mrf.mxu3  ;;  %v1364_v28 = vpop.f32.mrf.mxu1 }
 0x19f   :  { %v1460_v29 = vadd.f32 %v1459_v26, %v1411_v18  ;;  %v1365_v11 = vadd.f32 %v1364_v28, %v3261_v52  ;;  %v1654_v36 = vadd.f32 %v2454_v34, %v1606_v30  ;;  %v2462_v18 = vunpack.c.l.bf16 %v2510_v15 }
 0x1a0   :  { %v1511_v42 = vpop.f32.mrf.mxu0 }
 0x1a1   :  { %v1509_v31 = vadd.f32 %v1508_v6, %v1460_v29  ;;  %v1670_v45 = vmax.f32 %v1654_v36, 0.0 }
 0x1a3   :  { %v1587_v32 = vmul.f32 %v3294_v23, %v1509_v31 }
 0x1a4   :  { %v1413_v35 = vpop.f32.mrf.mxu2 }
 0x1a5   :  { %v1607_v38 = vadd.f32 %v3301_v40, %v1587_v32  ;;  %v1414_v22 = vadd.f32 %v1413_v35, %v1365_v11 }
 0x1a6   :  { %v1462_v39 = vpop.f32.mrf.mxu3  ;;  %v1366_v41 = vpop.f32.mrf.mxu1 }
 0x1a7   :  { %v1655_v43 = vadd.f32 %v2455_v37, %v1607_v38  ;;  %v1463_v50 = vadd.f32 %v1462_v39, %v1414_v22  ;;  %v1367_v48 = vadd.f32 %v1366_v41, %v3282_v17 }
 0x1a8   :  { %v1513_v49 = vpop.f32.mrf.mxu0 }
 0x1a9   :  { %v1671_v46 = vmax.f32 %v1655_v43, 0.0  ;;  %v1512_v56 = vadd.f32 %v1511_v42, %v1463_v50 }
 0x1ab   :  { %v2492_v54 = vpack.c.bf16 %v1671_v46, %v1670_v45  ;;  %v1588_v52 = vmul.f32 %v3294_v23, %v1512_v56 }
 0x1ac   :  { %v1415_v51 = vpop.f32.mrf.mxu2 }
 0x1ad   :  { %2515 = vst [vmem:[%s3401_s5 + $0x28] sm:$0xff] %v2492_v54   ;;  %v1416_v44 = vadd.f32 %v1415_v51, %v1367_v48  ;;  %v1608_v57 = vadd.f32 %v3301_v40, %v1588_v52 }
 0x1ae   :  { %v1464_v55 = vpop.f32.mrf.mxu3  ;;  %v1369_v53 = vpop.f32.mrf.mxu1 }
 0x1af   :  { %v1465_v62 = vadd.f32 %v1464_v55, %v1416_v44  ;;  %v1370_v61 = vadd.f32 %v1369_v53, %v3285_v25  ;;  %v1656_v8 = vadd.f32 %v2458_v58, %v1608_v57 }
 0x1b0   :  { %v1516_v2 = vpop.f32.mrf.mxu0 }
 0x1b1   :  { %v1514_v17 = vadd.f32 %v1513_v49, %v1465_v62  ;;  %v1672_v3 = vmax.f32 %v1656_v8, 0.0 }
 0x1b3   :  { %v1589_v59 = vmul.f32 %v3294_v23, %v1514_v17 }
 0x1b4   :  { %v1418_v4 = vpop.f32.mrf.mxu2 }
 0x1b5   :  { %v1609_v63 = vadd.f32 %v3301_v40, %v1589_v59  ;;  %v1419_v0 = vadd.f32 %v1418_v4, %v1370_v61 }
 0x1b6   :  { %v1467_v1 = vpop.f32.mrf.mxu3  ;;  %v1371_v14 = vpop.f32.mrf.mxu1 }
 0x1b7   :  { %v1657_v5 = vadd.f32 %v2459_v60, %v1609_v63  ;;  %v1468_v7 = vadd.f32 %v1467_v1, %v1419_v0  ;;  %v1372_v6 = vadd.f32 %v1371_v14, %v3288_v33 }
 0x1b8   :  { %v1518_v24 = vpop.f32.mrf.mxu0 }
 0x1b9   :  { %v1673_v9 = vmax.f32 %v1657_v5, 0.0  ;;  %v1517_v16 = vadd.f32 %v1516_v2, %v1468_v7 }
 0x1bb   :  { %v2497_v13 = vpack.c.bf16 %v1673_v9, %v1672_v3  ;;  %v1590_v25 = vmul.f32 %v3294_v23, %v1517_v16 }
 0x1bc   :  { %v1420_v19 = vpop.f32.mrf.mxu2 }
 0x1bd   :  { %2516 = vst [vmem:[%s3401_s5 + $0x30] sm:$0xff] %v2497_v13   ;;  %v1421_v20 = vadd.f32 %v1420_v19, %v1372_v6  ;;  %v1610_v21 = vadd.f32 %v3301_v40, %v1590_v25 }
 0x1be   :  { %v1469_v12 = vpop.f32.mrf.mxu3 }
 0x1bf   :  { %v1470_v10 = vadd.f32 %v1469_v12, %v1421_v20  ;;  %v1658_v28 = vadd.f32 %v2462_v18, %v1610_v21 }
 0x1c1   :  { %v1519_v26 = vadd.f32 %v1518_v24, %v1470_v10  ;;  %v1674_v34 = vmax.f32 %v1658_v28, 0.0 }
 0x1c3   :  { %v1591_v33 = vmul.f32 %v3294_v23, %v1519_v26 }
 0x1c5   :  { %v1611_v29 = vadd.f32 %v3301_v40, %v1591_v33 }
 0x1c7   :  { %v1659_v30 = vadd.f32 %v2463_v27, %v1611_v29 }
 0x1c9   :  { %v1675_v31 = vmax.f32 %v1659_v30, 0.0 }
 0x1cb   :  { %v2502_v42 = vpack.c.bf16 %v1675_v31, %v1674_v34 }
 0x1cd   :  { %2517 = vst [vmem:[%s3401_s5 + $0x38] sm:$0xff] %v2502_v42  }

// kernel: _lambda_.29
= control target key start
LH: loop header
LB: loop body
LE: loop exit
PB: predicated region body
PF: predicated region fallthrough
CT: control target
= control target key end

     0   :  { %9 = vsyncpa [#allocation4], 0  ;;  %s395_s0 = inlined_call_operand.vmem [shape: bf16[32,128], index: 0, kind: input, shape index: {}]   ;;  %s396_s1 = inlined_call_operand.vmem [shape: bf16[128,128], index: 1, kind: input, shape index: {}]   ;;  %s397_s2 = inlined_call_operand.hbm [shape: f32[1,128], index: 2, kind: input, shape index: {}]   ;;  %s398_s3 = inlined_call_operand.hbm [shape: f32[1,128], index: 3, kind: input, shape index: {}]   ;;  %s399_s4 = inlined_call_operand.vmem [shape: bf16[32,128], index: 4, kind: output, shape index: {}]  }
   0x1   :  { %s20_s17 = sshll.u32 %s397_s2, 4  ;;  %s21_s17 = int_to_ptr.hbm [resolvable:$true] %s20_s17 }
   0x2   :  { %10 = vsyncpa [#allocation6], 0  ;;  %s326_s18 = smov [#allocation3]   ;;  %s31_s22 = sshll.u32 %s398_s3, 4  ;;  %s32_s22 = int_to_ptr.hbm [resolvable:$true] %s31_s22 }
   0x3   :  { %s22_s19 = sshll.u32 %s326_s18, 4  ;;  %s327_s23 = smov [#allocation5]   ;;  %s23_s19 = int_to_ptr.vmem [resolvable:$true] %s22_s19 }
   0x4   :  { %25 = dma.hbm_to_vmem [thread:$0]  %s21_s17, 16, %s23_s19, [#allocation4]  }
   0x5   :  { %s33_s24 = sshll.u32 %s327_s23, 4  ;;  %s34_s24 = int_to_ptr.vmem [resolvable:$true] %s33_s24 }
   0x6   :  { %36 = dma.hbm_to_vmem [thread:$0]  %s32_s22, 16, %s34_s24, [#allocation6]  }
   0x7   :  { %322 = dma.done.wait [#allocation4], 16  }
   0x8   :  { %323 = vsyncadd [#allocation4], 4294967280 }
   0x9   :  { %324 = dma.done.wait [#allocation6], 16  }
   0xa   :  { %325 = vsyncadd [#allocation6], 4294967280  ;;  %v250_v0 = vld [vmem:[%s396_s1 + $0x38] sm:$0xff]  ;;  %v249_v1 = vld [vmem:[%s396_s1 + $0x30] sm:$0xff] }
   0xb   :  { %137 = vmatpush.bf16.msra.mxu0 %v250_v0  ;;  %262 = vmatpush.bf16.msra.mxu1 %v250_v0  ;;  %v248_v2 = vld [vmem:[%s396_s1 + $0x28] sm:$0xff]  ;;  %v247_v3 = vld [vmem:[%s396_s1 + $0x20] sm:$0xff]  ;;  %v246_v4 = vld [vmem:[%s396_s1 + $0x18] sm:$0xff] }
   0xc   :  { %v245_v5 = vld [vmem:[%s396_s1 + $0x10] sm:$0xff]  ;;  %v244_v6 = vld [vmem:[%s396_s1 + $0x8] sm:$0xff]  ;;  %v243_v7 = vld [vmem:[%s396_s1] sm:$0xff] }
   0xd   :  { %v241_v8 = vld [vmem:[%s395_s0] sm:$0xff]  ;;  %v242_v9 = vld [vmem:[%s395_s0 + $0x8] sm:$0xff] }
   0xe   :  { %v272_v12 = vld [vmem:[#allocation3] ss:$0 sm:$0xff]  ;;  %v273_v14 = vld [vmem:[#allocation5] ss:$0 sm:$0xff] }
   0xf   :  { %138 = vmatpush.bf16.msra.mxu0 %v249_v1  ;;  %263 = vmatpush.bf16.msra.mxu1 %v249_v1 }
  0x13   :  { %139 = vmatpush.bf16.msra.mxu0 %v248_v2  ;;  %264 = vmatpush.bf16.msra.mxu1 %v248_v2 }
  0x17   :  { %140 = vmatpush.bf16.msra.mxu0 %v247_v3  ;;  %265 = vmatpush.bf16.msra.mxu1 %v247_v3 }
  0x1b   :  { %141 = vmatpush.bf16.msra.mxu0 %v246_v4  ;;  %266 = vmatpush.bf16.msra.mxu1 %v246_v4 }
  0x1f   :  { %142 = vmatpush.bf16.msra.mxu0 %v245_v5  ;;  %267 = vmatpush.bf16.msra.mxu1 %v245_v5 }
  0x23   :  { %143 = vmatpush.bf16.msra.mxu0 %v244_v6  ;;  %268 = vmatpush.bf16.msra.mxu1 %v244_v6 }
  0x27   :  { %144 = vmatpush.bf16.msra.mxu0 %v243_v7  ;;  %269 = vmatpush.bf16.msra.mxu1 %v243_v7 }
  0x2a   :  { %145 = vmatmul.bf16.vlgmr.msra.gmra.mxu0 %v241_v8  ;;  %150 = vmatmul.bf16.vlgmr.msra.gmra.mxu1 %v242_v9 }
  0xa7   :  { %v146_v10 = vpop.f32.mrf.mxu0  ;;  %v151_v11 = vpop.f32.mrf.mxu1 }
  0xa8   :  { %v175_v13 = vmul.f32 %v272_v12, %v146_v10  ;;  %v177_v15 = vmul.f32 %v272_v12, %v151_v11 }
  0xaa   :  { %v183_v20 = vadd.f32 %v273_v14, %v175_v13  ;;  %v185_v21 = vadd.f32 %v273_v14, %v177_v15 }
  0xaf   :  { %v148_v16 = vpop.f32.mrf.mxu0  ;;  %v153_v17 = vpop.f32.mrf.mxu1 }
  0xb0   :  { %v176_v18 = vmul.f32 %v272_v12, %v148_v16  ;;  %v178_v19 = vmul.f32 %v272_v12, %v153_v17 }
  0xb2   :  { %v184_v22 = vadd.f32 %v273_v14, %v176_v18  ;;  %v186_v23 = vadd.f32 %v273_v14, %v178_v19 }
  0xb4   :  { %v254_v24 = vpack.c.bf16 %v184_v22, %v183_v20  ;;  %v259_v25 = vpack.c.bf16 %v186_v23, %v185_v21 }
  0xb6   :  { %255 = vst [vmem:[%s399_s4] sm:$0xff] %v254_v24  }
  0xb7   :  { %261 = vst [vmem:[%s399_s4 + $0x8] sm:$0xff] %v259_v25  }
  0xb8   :  { %199 = vsyncpa [#allocation4], 1 }
  0xb9   :  { %200 = vsyncpa [#allocation6], 1 }

// kernel: _lambda_.28
= control target key start
LH: loop header
LB: loop body
LE: loop exit
PB: predicated region body
PF: predicated region fallthrough
CT: control target
= control target key end

     0   :  { %9 = vsyncpa [#allocation4], 0  ;;  %s1853_s0 = inlined_call_operand.vmem [shape: bf16[32,1152], index: 0, kind: input, shape index: {}]   ;;  %s1854_s1 = inlined_call_operand.vmem [shape: bf16[1152,128], index: 1, kind: input, shape index: {}]   ;;  %s1855_s2 = inlined_call_operand.hbm [shape: f32[1,128], index: 2, kind: input, shape index: {}]   ;;  %s1856_s3 = inlined_call_operand.hbm [shape: f32[1,128], index: 3, kind: input, shape index: {}]   ;;  %s1857_s4 = inlined_call_operand.vmem [shape: bf16[32,128], index: 4, kind: output, shape index: {}]  }
   0x1   :  { %s20_s17 = sshll.u32 %s1855_s2, 4  ;;  %s21_s17 = int_to_ptr.hbm [resolvable:$true] %s20_s17 }
   0x2   :  { %10 = vsyncpa [#allocation6], 0  ;;  %s1490_s18 = smov [#allocation3]   ;;  %s31_s22 = sshll.u32 %s1856_s3, 4  ;;  %s32_s22 = int_to_ptr.hbm [resolvable:$true] %s31_s22 }
   0x3   :  { %s22_s19 = sshll.u32 %s1490_s18, 4  ;;  %s1491_s23 = smov [#allocation5]   ;;  %s23_s19 = int_to_ptr.vmem [resolvable:$true] %s22_s19 }
   0x4   :  { %25 = dma.hbm_to_vmem [thread:$0]  %s21_s17, 16, %s23_s19, [#allocation4]  }
   0x5   :  { %s33_s24 = sshll.u32 %s1491_s23, 4  ;;  %s34_s24 = int_to_ptr.vmem [resolvable:$true] %s33_s24 }
   0x6   :  { %36 = dma.hbm_to_vmem [thread:$0]  %s32_s22, 16, %s34_s24, [#allocation6]  }
   0x7   :  { %1486 = dma.done.wait [#allocation4], 16  }
   0x8   :  { %1487 = vsyncadd [#allocation4], 4294967280 }
   0x9   :  { %1488 = dma.done.wait [#allocation6], 16  }
   0xa   :  { %1489 = vsyncadd [#allocation6], 4294967280  ;;  %v1350_v0 = vld [vmem:[%s1854_s1 + $0x38] sm:$0xff]  ;;  %v1349_v4 = vld [vmem:[%s1854_s1 + $0x30] sm:$0xff] }
   0xb   :  { %v1358_v1 = vld [vmem:[%s1854_s1 + $0x78] sm:$0xff]  ;;  %745 = vmatpush.bf16.msra.mxu0 %v1350_v0  ;;  %v1357_v5 = vld [vmem:[%s1854_s1 + $0x70] sm:$0xff]  ;;  %v1348_v8 = vld [vmem:[%s1854_s1 + $0x28] sm:$0xff] }
   0xc   :  { %v1366_v2 = vld [vmem:[%s1854_s1 + $0xb8] sm:$0xff]  ;;  %764 = vmatpush.bf16.msra.mxu1 %v1358_v1  ;;  %v1365_v6 = vld [vmem:[%s1854_s1 + $0xb0] sm:$0xff]  ;;  %v1356_v9 = vld [vmem:[%s1854_s1 + $0x68] sm:$0xff] }
   0xd   :  { %v1374_v3 = vld [vmem:[%s1854_s1 + $0xf8] sm:$0xff]  ;;  %783 = vmatpush.bf16.msra.mxu2 %v1366_v2  ;;  %v1373_v7 = vld [vmem:[%s1854_s1 + $0xf0] sm:$0xff]  ;;  %v1364_v10 = vld [vmem:[%s1854_s1 + $0xa8] sm:$0xff] }
   0xe   :  { %802 = vmatpush.bf16.msra.mxu3 %v1374_v3  ;;  %v1372_v11 = vld [vmem:[%s1854_s1 + $0xe8] sm:$0xff]  ;;  %v1347_v12 = vld [vmem:[%s1854_s1 + $0x20] sm:$0xff]  ;;  %v1346_v16 = vld [vmem:[%s1854_s1 + $0x18] sm:$0xff] }
   0xf   :  { %746 = vmatpush.bf16.msra.mxu0 %v1349_v4  ;;  %v1355_v13 = vld [vmem:[%s1854_s1 + $0x60] sm:$0xff]  ;;  %v1354_v17 = vld [vmem:[%s1854_s1 + $0x58] sm:$0xff]  ;;  %v1345_v20 = vld [vmem:[%s1854_s1 + $0x10] sm:$0xff] }
  0x10   :  { %765 = vmatpush.bf16.msra.mxu1 %v1357_v5  ;;  %v1363_v14 = vld [vmem:[%s1854_s1 + $0xa0] sm:$0xff]  ;;  %v1362_v18 = vld [vmem:[%s1854_s1 + $0x98] sm:$0xff]  ;;  %v1353_v21 = vld [vmem:[%s1854_s1 + $0x50] sm:$0xff] }
  0x11   :  { %784 = vmatpush.bf16.msra.mxu2 %v1365_v6  ;;  %v1371_v15 = vld [vmem:[%s1854_s1 + $0xe0] sm:$0xff]  ;;  %v1370_v19 = vld [vmem:[%s1854_s1 + $0xd8] sm:$0xff]  ;;  %v1361_v22 = vld [vmem:[%s1854_s1 + $0x90] sm:$0xff] }
  0x12   :  { %803 = vmatpush.bf16.msra.mxu3 %v1373_v7  ;;  %v1369_v23 = vld [vmem:[%s1854_s1 + $0xd0] sm:$0xff]  ;;  %v1344_v24 = vld [vmem:[%s1854_s1 + $0x8] sm:$0xff]  ;;  %v1343_v28 = vld [vmem:[%s1854_s1] sm:$0xff] }
  0x13   :  { %747 = vmatpush.bf16.msra.mxu0 %v1348_v8  ;;  %v1352_v25 = vld [vmem:[%s1854_s1 + $0x48] sm:$0xff]  ;;  %v1351_v29 = vld [vmem:[%s1854_s1 + $0x40] sm:$0xff]  ;;  %v977_v39 = vld [vmem:[%s1853_s0 + $0x2c] sm:$0xf0] }
  0x14   :  { %766 = vmatpush.bf16.msra.mxu1 %v1356_v9  ;;  %v1360_v26 = vld [vmem:[%s1854_s1 + $0x88] sm:$0xff]  ;;  %v967_v30 = vld [vmem:[%s1853_s0] sm:$0xf]  ;;  %v1329_v33 = vld [vmem:[%s1853_s0 + $0x20] sm:$0xf0] }
  0x15   :  { %785 = vmatpush.bf16.msra.mxu2 %v1364_v10  ;;  %v1368_v27 = vld [vmem:[%s1854_s1 + $0xc8] sm:$0xff]  ;;  %v1359_v31 = vld [vmem:[%s1854_s1 + $0x80] sm:$0xff]  ;;  %v1382_v40 = vld [vmem:[%s1854_s1 + $0x138] sm:$0xff]  ;;  %v968_v42 = vor.u32 %v1329_v33, %v967_v30 }
  0x16   :  { %804 = vmatpush.bf16.msra.mxu3 %v1372_v11  ;;  %v1367_v32 = vld [vmem:[%s1854_s1 + $0xc0] sm:$0xff]  ;;  %v969_v35 = vld [vmem:[%s1853_s0 + $0x24] sm:$0xf0]  ;;  %v1330_v37 = vld [vmem:[%s1853_s0 + $0x28] sm:$0xf0] }
  0x17   :  { %748 = vmatpush.bf16.msra.mxu0 %v1347_v12  ;;  %v1325_v34 = vld [vmem:[%s1853_s0 + $0x4] sm:$0xf]  ;;  %v975_v36 = vld [vmem:[%s1853_s0 + $0x8] sm:$0xf]  ;;  %v1326_v38 = vld [vmem:[%s1853_s0 + $0xc] sm:$0xf] }
  0x18   :  { %767 = vmatpush.bf16.msra.mxu1 %v1355_v13  ;;  %v1390_v41 = vld [vmem:[%s1854_s1 + $0x178] sm:$0xff]  ;;  %v972_v43 = vor.u32 %v1325_v34, %v969_v35  ;;  %v976_v44 = vor.u32 %v1330_v37, %v975_v36  ;;  %v980_v45 = vor.u32 %v1326_v38, %v977_v39  ;;  %v1381_v48 = vld [vmem:[%s1854_s1 + $0x130] sm:$0xff]  ;;  %v1380_v52 = vld [vmem:[%s1854_s1 + $0x128] sm:$0xff] }
  0x19   :  { %786 = vmatpush.bf16.msra.mxu2 %v1363_v14  ;;  %v1398_v46 = vld [vmem:[%s1854_s1 + $0x1b8] sm:$0xff]  ;;  %v1389_v49 = vld [vmem:[%s1854_s1 + $0x170] sm:$0xff]  ;;  %v1388_v53 = vld [vmem:[%s1854_s1 + $0x168] sm:$0xff] }
  0x1a   :  { %805 = vmatpush.bf16.msra.mxu3 %v1371_v15  ;;  %v1406_v47 = vld [vmem:[%s1854_s1 + $0x1f8] sm:$0xff]  ;;  %v1397_v50 = vld [vmem:[%s1854_s1 + $0x1b0] sm:$0xff]  ;;  %v1396_v54 = vld [vmem:[%s1854_s1 + $0x1a8] sm:$0xff] }
  0x1b   :  { %749 = vmatpush.bf16.msra.mxu0 %v1346_v16  ;;  %v1405_v51 = vld [vmem:[%s1854_s1 + $0x1f0] sm:$0xff]  ;;  %v1404_v55 = vld [vmem:[%s1854_s1 + $0x1e8] sm:$0xff]  ;;  %v1379_v56 = vld [vmem:[%s1854_s1 + $0x120] sm:$0xff] }
  0x1c   :  { %768 = vmatpush.bf16.msra.mxu1 %v1354_v17  ;;  %v1387_v57 = vld [vmem:[%s1854_s1 + $0x160] sm:$0xff]  ;;  %v1003_v60 = vld [vmem:[%s1853_s0 + $0x48] sm:$0xf]  ;;  %v1338_v61 = vld [vmem:[%s1853_s0 + $0x68] sm:$0xf0] }
  0x1d   :  { %787 = vmatpush.bf16.msra.mxu2 %v1362_v18  ;;  %v1395_v58 = vld [vmem:[%s1854_s1 + $0x1a0] sm:$0xff]  ;;  %v1334_v62 = vld [vmem:[%s1853_s0 + $0x4c] sm:$0xf]  ;;  %v1005_v63 = vld [vmem:[%s1853_s0 + $0x6c] sm:$0xf0]  ;;  %v1004_v6 = vor.u32 %v1338_v61, %v1003_v60 }
  0x1e   :  { %806 = vmatpush.bf16.msra.mxu3 %v1370_v19  ;;  %v1403_v59 = vld [vmem:[%s1854_s1 + $0x1e0] sm:$0xff]  ;;  %v1011_v0 = vld [vmem:[%s1853_s0 + $0x50] sm:$0xf]  ;;  %v1339_v1 = vld [vmem:[%s1853_s0 + $0x70] sm:$0xf0]  ;;  %v1008_v7 = vor.u32 %v1334_v62, %v1005_v63 }
  0x1f   :  { %750 = vmatpush.bf16.msra.mxu0 %v1345_v20  ;;  %v1335_v2 = vld [vmem:[%s1853_s0 + $0x54] sm:$0xf]  ;;  %v1013_v3 = vld [vmem:[%s1853_s0 + $0x74] sm:$0xf0]  ;;  %v1012_v8 = vor.u32 %v1339_v1, %v1011_v0  ;;  %v1376_v16 = vld [vmem:[%s1854_s1 + $0x108] sm:$0xff] }
  0x20   :  { %769 = vmatpush.bf16.msra.mxu1 %v1353_v21  ;;  %v1378_v4 = vld [vmem:[%s1854_s1 + $0x118] sm:$0xff]  ;;  %v1016_v9 = vor.u32 %v1335_v2, %v1013_v3  ;;  %v1377_v12 = vld [vmem:[%s1854_s1 + $0x110] sm:$0xff]  ;;  %v1384_v17 = vld [vmem:[%s1854_s1 + $0x148] sm:$0xff] }
  0x21   :  { %788 = vmatpush.bf16.msra.mxu2 %v1361_v22  ;;  %v1386_v5 = vld [vmem:[%s1854_s1 + $0x158] sm:$0xff]  ;;  %v1385_v13 = vld [vmem:[%s1854_s1 + $0x150] sm:$0xff]  ;;  %v1392_v18 = vld [vmem:[%s1854_s1 + $0x188] sm:$0xff] }
  0x22   :  { %807 = vmatpush.bf16.msra.mxu3 %v1369_v23  ;;  %v1394_v10 = vld [vmem:[%s1854_s1 + $0x198] sm:$0xff]  ;;  %v1393_v14 = vld [vmem:[%s1854_s1 + $0x190] sm:$0xff]  ;;  %v1400_v19 = vld [vmem:[%s1854_s1 + $0x1c8] sm:$0xff] }
  0x23   :  { %751 = vmatpush.bf16.msra.mxu0 %v1344_v24  ;;  %v1402_v11 = vld [vmem:[%s1854_s1 + $0x1d8] sm:$0xff]  ;;  %v1401_v15 = vld [vmem:[%s1854_s1 + $0x1d0] sm:$0xff]  ;;  %v1375_v20 = vld [vmem:[%s1854_s1 + $0x100] sm:$0xff] }
  0x24   :  { %770 = vmatpush.bf16.msra.mxu1 %v1352_v25  ;;  %v1383_v21 = vld [vmem:[%s1854_s1 + $0x140] sm:$0xff]  ;;  %v983_v24 = vld [vmem:[%s1853_s0 + $0x10] sm:$0xf]  ;;  %v1331_v25 = vld [vmem:[%s1853_s0 + $0x30] sm:$0xf0] }
  0x25   :  { %789 = vmatpush.bf16.msra.mxu2 %v1360_v26  ;;  %v1391_v22 = vld [vmem:[%s1854_s1 + $0x180] sm:$0xff]  ;;  %v1414_v26 = vld [vmem:[%s1854_s1 + $0x238] sm:$0xff]  ;;  %v984_v33 = vor.u32 %v1331_v25, %v983_v24  ;;  %v1413_v37 = vld [vmem:[%s1854_s1 + $0x230] sm:$0xff] }
  0x26   :  { %808 = vmatpush.bf16.msra.mxu3 %v1368_v27  ;;  %v1399_v23 = vld [vmem:[%s1854_s1 + $0x1c0] sm:$0xff]  ;;  %v1327_v27 = vld [vmem:[%s1853_s0 + $0x14] sm:$0xf]  ;;  %v1332_v30 = vld [vmem:[%s1853_s0 + $0x38] sm:$0xf0] }
  0x27   :  { %752 = vmatpush.bf16.msra.mxu0 %v1343_v28  ;;  %v985_v28 = vld [vmem:[%s1853_s0 + $0x34] sm:$0xf0]  ;;  %v1412_v38 = vld [vmem:[%s1854_s1 + $0x228] sm:$0xff]  ;;  %v1411_v39 = vld [vmem:[%s1854_s1 + $0x220] sm:$0xff] }
  0x28   :  { %771 = vmatpush.bf16.msra.mxu1 %v1351_v29  ;;  %v991_v29 = vld [vmem:[%s1853_s0 + $0x18] sm:$0xf]  ;;  %v988_v34 = vor.u32 %v1327_v27, %v985_v28 }
  0x29   :  { %790 = vmatpush.bf16.msra.mxu2 %v1359_v31  ;;  %v1328_v31 = vld [vmem:[%s1853_s0 + $0x1c] sm:$0xf]  ;;  %v992_v35 = vor.u32 %v1332_v30, %v991_v29 }
  0x2a   :  { %809 = vmatpush.bf16.msra.mxu3 %v1367_v32  ;;  %753 = vmatmul.bf16.vlgmr.msra.gmra.mxu0 %v968_v42  ;;  %v993_v32 = vld [vmem:[%s1853_s0 + $0x3c] sm:$0xf0]  ;;  %v1336_v42 = vld [vmem:[%s1853_s0 + $0x5c] sm:$0xf] }
  0x2b   :  { %821 = vmatpush.bf16.msrb.mxu0 %v1382_v40  ;;  %772 = vmatmul.bf16.vlgmr.msra.gmra.mxu1 %v972_v43  ;;  %v996_v36 = vor.u32 %v1328_v31, %v993_v32  ;;  %v1019_v40 = vld [vmem:[%s1853_s0 + $0x58] sm:$0xf]  ;;  %v1021_v43 = vld [vmem:[%s1853_s0 + $0x7c] sm:$0xf0] }
  0x2c   :  { %840 = vmatpush.bf16.msrb.mxu1 %v1390_v41  ;;  %791 = vmatmul.bf16.vlgmr.msra.gmra.mxu2 %v976_v44  ;;  %v1340_v41 = vld [vmem:[%s1853_s0 + $0x78] sm:$0xf0]  ;;  %v1027_v44 = vld [vmem:[%s1853_s0 + $0x60] sm:$0xf] }
  0x2d   :  { %810 = vmatmul.bf16.vlgmr.msra.gmra.mxu3 %v980_v45  ;;  %859 = vmatpush.bf16.msrb.mxu2 %v1398_v46  ;;  %v1341_v45 = vld [vmem:[%s1853_s0 + $0x80] sm:$0xf0] }
  0x2e   :  { %878 = vmatpush.bf16.msrb.mxu3 %v1406_v47  ;;  %v1337_v46 = vld [vmem:[%s1853_s0 + $0x64] sm:$0xf]  ;;  %v1029_v47 = vld [vmem:[%s1853_s0 + $0x84] sm:$0xf0] }
  0x2f   :  { %822 = vmatpush.bf16.msrb.mxu0 %v1381_v48  ;;  %v1410_v48 = vld [vmem:[%s1854_s1 + $0x218] sm:$0xff] }
  0x30   :  { %841 = vmatpush.bf16.msrb.mxu1 %v1389_v49  ;;  %v1020_v49 = vor.u32 %v1340_v41, %v1019_v40 }
  0x31   :  { %860 = vmatpush.bf16.msrb.mxu2 %v1397_v50  ;;  %v1024_v50 = vor.u32 %v1336_v42, %v1021_v43 }
  0x32   :  { %879 = vmatpush.bf16.msrb.mxu3 %v1405_v51  ;;  %v1028_v51 = vor.u32 %v1341_v45, %v1027_v44 }
  0x33   :  { %823 = vmatpush.bf16.msrb.mxu0 %v1380_v52  ;;  %v1032_v52 = vor.u32 %v1337_v46, %v1029_v47 }
  0x34   :  { %842 = vmatpush.bf16.msrb.mxu1 %v1388_v53  ;;  %v1409_v53 = vld [vmem:[%s1854_s1 + $0x210] sm:$0xff] }
  0x35   :  { %861 = vmatpush.bf16.msrb.mxu2 %v1396_v54  ;;  %v1408_v54 = vld [vmem:[%s1854_s1 + $0x208] sm:$0xff] }
  0x36   :  { %880 = vmatpush.bf16.msrb.mxu3 %v1404_v55  ;;  %v1407_v55 = vld [vmem:[%s1854_s1 + $0x200] sm:$0xff] }
  0x37   :  { %824 = vmatpush.bf16.msrb.mxu0 %v1379_v56  ;;  %v999_v56 = vld [vmem:[%s1853_s0 + $0x20] sm:$0xf] }
  0x38   :  { %843 = vmatpush.bf16.msrb.mxu1 %v1387_v57  ;;  %v1333_v57 = vld [vmem:[%s1853_s0 + $0x40] sm:$0xf0] }
  0x39   :  { %862 = vmatpush.bf16.msrb.mxu2 %v1395_v58  ;;  %v1035_v58 = vld [vmem:[%s1853_s0 + $0x68] sm:$0xf]  ;;  %v1000_v60 = vor.u32 %v1333_v57, %v999_v56 }
  0x3a   :  { %881 = vmatpush.bf16.msrb.mxu3 %v1403_v59  ;;  %758 = vmatmul.bf16.gmra.mxu0 %v1004_v6  ;;  %v1342_v59 = vld [vmem:[%s1853_s0 + $0x88] sm:$0xf0] }
  0x3b   :  { %825 = vmatpush.bf16.msrb.mxu0 %v1378_v4  ;;  %777 = vmatmul.bf16.gmra.mxu1 %v1008_v7  ;;  %v1036_v61 = vor.u32 %v1342_v59, %v1035_v58  ;;  %v1436_v58 = vld [vmem:[#allocation3] ss:$0 sm:$0xff] }
  0x3c   :  { %844 = vmatpush.bf16.msrb.mxu1 %v1386_v5  ;;  %796 = vmatmul.bf16.gmra.mxu2 %v1012_v8 }
  0x3d   :  { %815 = vmatmul.bf16.gmra.mxu3 %v1016_v9  ;;  %863 = vmatpush.bf16.msrb.mxu2 %v1394_v10 }
  0x3e   :  { %882 = vmatpush.bf16.msrb.mxu3 %v1402_v11 }
  0x3f   :  { %826 = vmatpush.bf16.msrb.mxu0 %v1377_v12 }
  0x40   :  { %845 = vmatpush.bf16.msrb.mxu1 %v1385_v13 }
  0x41   :  { %864 = vmatpush.bf16.msrb.mxu2 %v1393_v14 }
  0x42   :  { %883 = vmatpush.bf16.msrb.mxu3 %v1401_v15 }
  0x43   :  { %827 = vmatpush.bf16.msrb.mxu0 %v1376_v16 }
  0x44   :  { %846 = vmatpush.bf16.msrb.mxu1 %v1384_v17 }
  0x45   :  { %865 = vmatpush.bf16.msrb.mxu2 %v1392_v18 }
  0x46   :  { %884 = vmatpush.bf16.msrb.mxu3 %v1400_v19 }
  0x47   :  { %828 = vmatpush.bf16.msrb.mxu0 %v1375_v20 }
  0x48   :  { %847 = vmatpush.bf16.msrb.mxu1 %v1383_v21 }
  0x49   :  { %866 = vmatpush.bf16.msrb.mxu2 %v1391_v22 }
  0x4a   :  { %885 = vmatpush.bf16.msrb.mxu3 %v1399_v23  ;;  %829 = vmatmul.bf16.vlgmr.msrb.gmra.mxu0 %v984_v33 }
  0x4b   :  { %897 = vmatpush.bf16.msra.mxu0 %v1414_v26  ;;  %848 = vmatmul.bf16.vlgmr.msrb.gmra.mxu1 %v988_v34 }
  0x4c   :  { %1426 = vmatpush.bf16.msra.mxu1 %v1414_v26  ;;  %867 = vmatmul.bf16.vlgmr.msrb.gmra.mxu2 %v992_v35 }
  0x4d   :  { %886 = vmatmul.bf16.vlgmr.msrb.gmra.mxu3 %v996_v36 }
  0x4f   :  { %898 = vmatpush.bf16.msra.mxu0 %v1413_v37 }
  0x50   :  { %1427 = vmatpush.bf16.msra.mxu1 %v1413_v37 }
  0x53   :  { %899 = vmatpush.bf16.msra.mxu0 %v1412_v38 }
  0x54   :  { %1428 = vmatpush.bf16.msra.mxu1 %v1412_v38 }
  0x57   :  { %900 = vmatpush.bf16.msra.mxu0 %v1411_v39 }
  0x58   :  { %1429 = vmatpush.bf16.msra.mxu1 %v1411_v39 }
  0x5a   :  { %834 = vmatmul.bf16.gmra.mxu0 %v1020_v49 }
  0x5b   :  { %901 = vmatpush.bf16.msra.mxu0 %v1410_v48  ;;  %853 = vmatmul.bf16.gmra.mxu1 %v1024_v50 }
  0x5c   :  { %1430 = vmatpush.bf16.msra.mxu1 %v1410_v48  ;;  %872 = vmatmul.bf16.gmra.mxu2 %v1028_v51 }
  0x5d   :  { %891 = vmatmul.bf16.gmra.mxu3 %v1032_v52 }
  0x5f   :  { %902 = vmatpush.bf16.msra.mxu0 %v1409_v53 }
  0x60   :  { %1431 = vmatpush.bf16.msra.mxu1 %v1409_v53 }
  0x63   :  { %903 = vmatpush.bf16.msra.mxu0 %v1408_v54 }
  0x64   :  { %1432 = vmatpush.bf16.msra.mxu1 %v1408_v54 }
  0x67   :  { %904 = vmatpush.bf16.msra.mxu0 %v1407_v55 }
  0x68   :  { %1433 = vmatpush.bf16.msra.mxu1 %v1407_v55 }
  0x6a   :  { %905 = vmatmul.bf16.vlgmr.msra.gmra.mxu0 %v1000_v60 }
  0x6b   :  { %910 = vmatmul.bf16.vlgmr.msra.gmra.mxu1 %v1036_v61 }
  0xa7   :  { %v754_v62 = vpop.f32.mrf.mxu0 }
  0xa8   :  { %v773_v63 = vpop.f32.mrf.mxu1 }
  0xa9   :  { %v774_v20 = vadd.f32 %v773_v63, %v754_v62 }
  0xaf   :  { %v792_v0 = vpop.f32.mrf.mxu2  ;;  %v756_v2 = vpop.f32.mrf.mxu0 }
  0xb0   :  { %v811_v1 = vpop.f32.mrf.mxu3  ;;  %v775_v3 = vpop.f32.mrf.mxu1  ;;  %v793_v25 = vadd.f32 %v792_v0, %v774_v20  ;;  %v1437_v0 = vld [vmem:[#allocation5] ss:$0 sm:$0xff] }
  0xb1   :  { %v776_v29 = vadd.f32 %v775_v3, %v756_v2 }
  0xb2   :  { %v812_v28 = vadd.f32 %v811_v1, %v793_v25 }
  0xb7   :  { %v794_v4 = vpop.f32.mrf.mxu2  ;;  %v759_v6 = vpop.f32.mrf.mxu0 }
  0xb8   :  { %v813_v5 = vpop.f32.mrf.mxu3  ;;  %v778_v7 = vpop.f32.mrf.mxu1  ;;  %v795_v32 = vadd.f32 %v794_v4, %v776_v29 }
  0xb9   :  { %v779_v21 = vadd.f32 %v778_v7, %v759_v6 }
  0xba   :  { %v814_v39 = vadd.f32 %v813_v5, %v795_v32 }
  0xbf   :  { %v797_v8 = vpop.f32.mrf.mxu2  ;;  %v761_v10 = vpop.f32.mrf.mxu0 }
  0xc0   :  { %v816_v9 = vpop.f32.mrf.mxu3  ;;  %v780_v11 = vpop.f32.mrf.mxu1  ;;  %v798_v26 = vadd.f32 %v797_v8, %v779_v21 }
  0xc1   :  { %v781_v31 = vadd.f32 %v780_v11, %v761_v10 }
  0xc2   :  { %v817_v30 = vadd.f32 %v816_v9, %v798_v26 }
  0xc7   :  { %v799_v12 = vpop.f32.mrf.mxu2  ;;  %v830_v14 = vpop.f32.mrf.mxu0 }
  0xc8   :  { %v818_v13 = vpop.f32.mrf.mxu3  ;;  %v849_v15 = vpop.f32.mrf.mxu1  ;;  %v800_v33 = vadd.f32 %v799_v12, %v781_v31  ;;  %v831_v34 = vadd.f32 %v830_v14, %v812_v28 }
  0xca   :  { %v819_v40 = vadd.f32 %v818_v13, %v800_v33  ;;  %v850_v41 = vadd.f32 %v849_v15, %v831_v34 }
  0xcf   :  { %v868_v16 = vpop.f32.mrf.mxu2  ;;  %v832_v18 = vpop.f32.mrf.mxu0 }
  0xd0   :  { %v887_v17 = vpop.f32.mrf.mxu3  ;;  %v851_v19 = vpop.f32.mrf.mxu1  ;;  %v869_v44 = vadd.f32 %v868_v16, %v850_v41  ;;  %v833_v45 = vadd.f32 %v832_v18, %v814_v39 }
  0xd2   :  { %v888_v51 = vadd.f32 %v887_v17, %v869_v44  ;;  %v852_v52 = vadd.f32 %v851_v19, %v833_v45 }
  0xd7   :  { %v870_v22 = vpop.f32.mrf.mxu2  ;;  %v835_v23 = vpop.f32.mrf.mxu0 }
  0xd8   :  { %v854_v24 = vpop.f32.mrf.mxu1  ;;  %v889_v27 = vpop.f32.mrf.mxu3  ;;  %v836_v35 = vadd.f32 %v835_v23, %v817_v30  ;;  %v871_v55 = vadd.f32 %v870_v22, %v852_v52 }
  0xda   :  { %v855_v42 = vadd.f32 %v854_v24, %v836_v35  ;;  %v890_v61 = vadd.f32 %v889_v27, %v871_v55 }
  0xdf   :  { %v873_v36 = vpop.f32.mrf.mxu2  ;;  %v837_v37 = vpop.f32.mrf.mxu0 }
  0xe0   :  { %v856_v38 = vpop.f32.mrf.mxu1  ;;  %v892_v43 = vpop.f32.mrf.mxu3  ;;  %v874_v46 = vadd.f32 %v873_v36, %v855_v42  ;;  %v838_v47 = vadd.f32 %v837_v37, %v819_v40 }
  0xe2   :  { %v893_v53 = vadd.f32 %v892_v43, %v874_v46  ;;  %v857_v54 = vadd.f32 %v856_v38, %v838_v47 }
  0xe7   :  { %v875_v48 = vpop.f32.mrf.mxu2  ;;  %v906_v49 = vpop.f32.mrf.mxu0 }
  0xe8   :  { %v911_v50 = vpop.f32.mrf.mxu1  ;;  %v876_v56 = vadd.f32 %v875_v48, %v857_v54  ;;  %v907_v57 = vadd.f32 %v906_v49, %v888_v51  ;;  %v894_v60 = vpop.f32.mrf.mxu3 }
  0xe9   :  { %v912_v59 = vadd.f32 %v911_v50, %v893_v53 }
  0xea   :  { %v895_v62 = vadd.f32 %v894_v60, %v876_v56  ;;  %v935_v63 = vmul.f32 %v1436_v58, %v907_v57 }
  0xeb   :  { %v937_v1 = vmul.f32 %v1436_v58, %v912_v59 }
  0xec   :  { %v943_v6 = vadd.f32 %v1437_v0, %v935_v63 }
  0xed   :  { %v945_v7 = vadd.f32 %v1437_v0, %v937_v1 }
  0xee   :  { %v947_v12 = vmax.f32 %v943_v6, 0.0 }
  0xef   :  { %v908_v2 = vpop.f32.mrf.mxu0  ;;  %v949_v13 = vmax.f32 %v945_v7, 0.0 }
  0xf0   :  { %v913_v3 = vpop.f32.mrf.mxu1  ;;  %v909_v4 = vadd.f32 %v908_v2, %v890_v61 }
  0xf1   :  { %v914_v5 = vadd.f32 %v913_v3, %v895_v62 }
  0xf2   :  { %v936_v8 = vmul.f32 %v1436_v58, %v909_v4 }
  0xf3   :  { %v938_v9 = vmul.f32 %v1436_v58, %v914_v5 }
  0xf4   :  { %v944_v10 = vadd.f32 %v1437_v0, %v936_v8 }
  0xf5   :  { %v946_v11 = vadd.f32 %v1437_v0, %v938_v9 }
  0xf6   :  { %v948_v14 = vmax.f32 %v944_v10, 0.0 }
  0xf7   :  { %v950_v15 = vmax.f32 %v946_v11, 0.0 }
  0xf8   :  { %v1418_v16 = vpack.c.bf16 %v948_v14, %v947_v12 }
  0xf9   :  { %v1423_v17 = vpack.c.bf16 %v950_v15, %v949_v13 }
  0xfa   :  { %1419 = vst [vmem:[%s1857_s4] sm:$0xff] %v1418_v16  }
  0xfb   :  { %1425 = vst [vmem:[%s1857_s4 + $0x8] sm:$0xff] %v1423_v17  }
  0xfc   :  { %963 = vsyncpa [#allocation4], 1 }
  0xfd   :  { %964 = vsyncpa [#allocation6], 1 }

// kernel: _lambda_.30
= control target key start
LH: loop header
LB: loop body
LE: loop exit
PB: predicated region body
PF: predicated region fallthrough
CT: control target
= control target key end

     0   :  { %10 = vsyncpa [#allocation4], 0  ;;  %s1888_s0 = inlined_call_operand.vmem [shape: bf16[32,1152], index: 0, kind: input, shape index: {}]   ;;  %s1889_s1 = inlined_call_operand.vmem [shape: bf16[1152,128], index: 1, kind: input, shape index: {}]   ;;  %s1890_s2 = inlined_call_operand.hbm [shape: f32[1,128], index: 2, kind: input, shape index: {}]   ;;  %s1891_s3 = inlined_call_operand.hbm [shape: f32[1,128], index: 3, kind: input, shape index: {}]   ;;  %s1892_s4 = inlined_call_operand.vmem [shape: bf16[32,128], index: 4, kind: input, shape index: {}]   ;;  %s1893_s5 = inlined_call_operand.vmem [shape: bf16[32,128], index: 5, kind: output, shape index: {}]  }
   0x1   :  { %s21_s20 = sshll.u32 %s1890_s2, 4  ;;  %s22_s20 = int_to_ptr.hbm [resolvable:$true] %s21_s20 }
   0x2   :  { %11 = vsyncpa [#allocation6], 0  ;;  %s1514_s21 = smov [#allocation3]   ;;  %s32_s25 = sshll.u32 %s1891_s3, 4  ;;  %s33_s25 = int_to_ptr.hbm [resolvable:$true] %s32_s25 }
   0x3   :  { %s23_s22 = sshll.u32 %s1514_s21, 4  ;;  %s1515_s26 = smov [#allocation5]   ;;  %s24_s22 = int_to_ptr.vmem [resolvable:$true] %s23_s22 }
   0x4   :  { %26 = dma.hbm_to_vmem [thread:$0]  %s22_s20, 16, %s24_s22, [#allocation4]  }
   0x5   :  { %s34_s27 = sshll.u32 %s1515_s26, 4  ;;  %s35_s27 = int_to_ptr.vmem [resolvable:$true] %s34_s27 }
   0x6   :  { %37 = dma.hbm_to_vmem [thread:$0]  %s33_s25, 16, %s35_s27, [#allocation6]  }
   0x7   :  { %1510 = dma.done.wait [#allocation4], 16  }
   0x8   :  { %1511 = vsyncadd [#allocation4], 4294967280 }
   0x9   :  { %1512 = dma.done.wait [#allocation6], 16  }
   0xa   :  { %1513 = vsyncadd [#allocation6], 4294967280  ;;  %v1365_v0 = vld [vmem:[%s1889_s1 + $0x38] sm:$0xff]  ;;  %v1364_v4 = vld [vmem:[%s1889_s1 + $0x30] sm:$0xff] }
   0xb   :  { %v1373_v1 = vld [vmem:[%s1889_s1 + $0x78] sm:$0xff]  ;;  %748 = vmatpush.bf16.msra.mxu0 %v1365_v0  ;;  %v1372_v5 = vld [vmem:[%s1889_s1 + $0x70] sm:$0xff]  ;;  %v1363_v8 = vld [vmem:[%s1889_s1 + $0x28] sm:$0xff] }
   0xc   :  { %v1381_v2 = vld [vmem:[%s1889_s1 + $0xb8] sm:$0xff]  ;;  %767 = vmatpush.bf16.msra.mxu1 %v1373_v1  ;;  %v1380_v6 = vld [vmem:[%s1889_s1 + $0xb0] sm:$0xff]  ;;  %v1371_v9 = vld [vmem:[%s1889_s1 + $0x68] sm:$0xff] }
   0xd   :  { %v1389_v3 = vld [vmem:[%s1889_s1 + $0xf8] sm:$0xff]  ;;  %786 = vmatpush.bf16.msra.mxu2 %v1381_v2  ;;  %v1388_v7 = vld [vmem:[%s1889_s1 + $0xf0] sm:$0xff]  ;;  %v1379_v10 = vld [vmem:[%s1889_s1 + $0xa8] sm:$0xff] }
   0xe   :  { %805 = vmatpush.bf16.msra.mxu3 %v1389_v3  ;;  %v1387_v11 = vld [vmem:[%s1889_s1 + $0xe8] sm:$0xff]  ;;  %v1362_v12 = vld [vmem:[%s1889_s1 + $0x20] sm:$0xff]  ;;  %v1361_v16 = vld [vmem:[%s1889_s1 + $0x18] sm:$0xff] }
   0xf   :  { %749 = vmatpush.bf16.msra.mxu0 %v1364_v4  ;;  %v1370_v13 = vld [vmem:[%s1889_s1 + $0x60] sm:$0xff]  ;;  %v1369_v17 = vld [vmem:[%s1889_s1 + $0x58] sm:$0xff]  ;;  %v1360_v20 = vld [vmem:[%s1889_s1 + $0x10] sm:$0xff] }
  0x10   :  { %768 = vmatpush.bf16.msra.mxu1 %v1372_v5  ;;  %v1378_v14 = vld [vmem:[%s1889_s1 + $0xa0] sm:$0xff]  ;;  %v1377_v18 = vld [vmem:[%s1889_s1 + $0x98] sm:$0xff]  ;;  %v1368_v21 = vld [vmem:[%s1889_s1 + $0x50] sm:$0xff] }
  0x11   :  { %787 = vmatpush.bf16.msra.mxu2 %v1380_v6  ;;  %v1386_v15 = vld [vmem:[%s1889_s1 + $0xe0] sm:$0xff]  ;;  %v1385_v19 = vld [vmem:[%s1889_s1 + $0xd8] sm:$0xff]  ;;  %v1376_v22 = vld [vmem:[%s1889_s1 + $0x90] sm:$0xff] }
  0x12   :  { %806 = vmatpush.bf16.msra.mxu3 %v1388_v7  ;;  %v1384_v23 = vld [vmem:[%s1889_s1 + $0xd0] sm:$0xff]  ;;  %v1359_v24 = vld [vmem:[%s1889_s1 + $0x8] sm:$0xff]  ;;  %v1358_v28 = vld [vmem:[%s1889_s1] sm:$0xff] }
  0x13   :  { %750 = vmatpush.bf16.msra.mxu0 %v1363_v8  ;;  %v1367_v25 = vld [vmem:[%s1889_s1 + $0x48] sm:$0xff]  ;;  %v1366_v29 = vld [vmem:[%s1889_s1 + $0x40] sm:$0xff]  ;;  %v992_v39 = vld [vmem:[%s1888_s0 + $0x2c] sm:$0xf0] }
  0x14   :  { %769 = vmatpush.bf16.msra.mxu1 %v1371_v9  ;;  %v1375_v26 = vld [vmem:[%s1889_s1 + $0x88] sm:$0xff]  ;;  %v982_v30 = vld [vmem:[%s1888_s0] sm:$0xf]  ;;  %v1344_v33 = vld [vmem:[%s1888_s0 + $0x20] sm:$0xf0] }
  0x15   :  { %788 = vmatpush.bf16.msra.mxu2 %v1379_v10  ;;  %v1383_v27 = vld [vmem:[%s1889_s1 + $0xc8] sm:$0xff]  ;;  %v1374_v31 = vld [vmem:[%s1889_s1 + $0x80] sm:$0xff]  ;;  %v1397_v40 = vld [vmem:[%s1889_s1 + $0x138] sm:$0xff]  ;;  %v983_v42 = vor.u32 %v1344_v33, %v982_v30 }
  0x16   :  { %807 = vmatpush.bf16.msra.mxu3 %v1387_v11  ;;  %v1382_v32 = vld [vmem:[%s1889_s1 + $0xc0] sm:$0xff]  ;;  %v984_v35 = vld [vmem:[%s1888_s0 + $0x24] sm:$0xf0]  ;;  %v1345_v37 = vld [vmem:[%s1888_s0 + $0x28] sm:$0xf0] }
  0x17   :  { %751 = vmatpush.bf16.msra.mxu0 %v1362_v12  ;;  %v1340_v34 = vld [vmem:[%s1888_s0 + $0x4] sm:$0xf]  ;;  %v990_v36 = vld [vmem:[%s1888_s0 + $0x8] sm:$0xf]  ;;  %v1341_v38 = vld [vmem:[%s1888_s0 + $0xc] sm:$0xf] }
  0x18   :  { %770 = vmatpush.bf16.msra.mxu1 %v1370_v13  ;;  %v1405_v41 = vld [vmem:[%s1889_s1 + $0x178] sm:$0xff]  ;;  %v987_v43 = vor.u32 %v1340_v34, %v984_v35  ;;  %v991_v44 = vor.u32 %v1345_v37, %v990_v36  ;;  %v995_v45 = vor.u32 %v1341_v38, %v992_v39  ;;  %v1396_v48 = vld [vmem:[%s1889_s1 + $0x130] sm:$0xff]  ;;  %v1395_v52 = vld [vmem:[%s1889_s1 + $0x128] sm:$0xff] }
  0x19   :  { %789 = vmatpush.bf16.msra.mxu2 %v1378_v14  ;;  %v1413_v46 = vld [vmem:[%s1889_s1 + $0x1b8] sm:$0xff]  ;;  %v1404_v49 = vld [vmem:[%s1889_s1 + $0x170] sm:$0xff]  ;;  %v1403_v53 = vld [vmem:[%s1889_s1 + $0x168] sm:$0xff] }
  0x1a   :  { %808 = vmatpush.bf16.msra.mxu3 %v1386_v15  ;;  %v1421_v47 = vld [vmem:[%s1889_s1 + $0x1f8] sm:$0xff]  ;;  %v1412_v50 = vld [vmem:[%s1889_s1 + $0x1b0] sm:$0xff]  ;;  %v1411_v54 = vld [vmem:[%s1889_s1 + $0x1a8] sm:$0xff] }
  0x1b   :  { %752 = vmatpush.bf16.msra.mxu0 %v1361_v16  ;;  %v1420_v51 = vld [vmem:[%s1889_s1 + $0x1f0] sm:$0xff]  ;;  %v1419_v55 = vld [vmem:[%s1889_s1 + $0x1e8] sm:$0xff]  ;;  %v1394_v56 = vld [vmem:[%s1889_s1 + $0x120] sm:$0xff] }
  0x1c   :  { %771 = vmatpush.bf16.msra.mxu1 %v1369_v17  ;;  %v1402_v57 = vld [vmem:[%s1889_s1 + $0x160] sm:$0xff]  ;;  %v1018_v60 = vld [vmem:[%s1888_s0 + $0x48] sm:$0xf]  ;;  %v1353_v61 = vld [vmem:[%s1888_s0 + $0x68] sm:$0xf0] }
  0x1d   :  { %790 = vmatpush.bf16.msra.mxu2 %v1377_v18  ;;  %v1410_v58 = vld [vmem:[%s1889_s1 + $0x1a0] sm:$0xff]  ;;  %v1349_v62 = vld [vmem:[%s1888_s0 + $0x4c] sm:$0xf]  ;;  %v1020_v63 = vld [vmem:[%s1888_s0 + $0x6c] sm:$0xf0]  ;;  %v1019_v6 = vor.u32 %v1353_v61, %v1018_v60 }
  0x1e   :  { %809 = vmatpush.bf16.msra.mxu3 %v1385_v19  ;;  %v1418_v59 = vld [vmem:[%s1889_s1 + $0x1e0] sm:$0xff]  ;;  %v1026_v0 = vld [vmem:[%s1888_s0 + $0x50] sm:$0xf]  ;;  %v1354_v1 = vld [vmem:[%s1888_s0 + $0x70] sm:$0xf0]  ;;  %v1023_v7 = vor.u32 %v1349_v62, %v1020_v63 }
  0x1f   :  { %753 = vmatpush.bf16.msra.mxu0 %v1360_v20  ;;  %v1350_v2 = vld [vmem:[%s1888_s0 + $0x54] sm:$0xf]  ;;  %v1028_v3 = vld [vmem:[%s1888_s0 + $0x74] sm:$0xf0]  ;;  %v1027_v8 = vor.u32 %v1354_v1, %v1026_v0  ;;  %v1391_v16 = vld [vmem:[%s1889_s1 + $0x108] sm:$0xff] }
  0x20   :  { %772 = vmatpush.bf16.msra.mxu1 %v1368_v21  ;;  %v1393_v4 = vld [vmem:[%s1889_s1 + $0x118] sm:$0xff]  ;;  %v1031_v9 = vor.u32 %v1350_v2, %v1028_v3  ;;  %v1392_v12 = vld [vmem:[%s1889_s1 + $0x110] sm:$0xff]  ;;  %v1399_v17 = vld [vmem:[%s1889_s1 + $0x148] sm:$0xff] }
  0x21   :  { %791 = vmatpush.bf16.msra.mxu2 %v1376_v22  ;;  %v1401_v5 = vld [vmem:[%s1889_s1 + $0x158] sm:$0xff]  ;;  %v1400_v13 = vld [vmem:[%s1889_s1 + $0x150] sm:$0xff]  ;;  %v1407_v18 = vld [vmem:[%s1889_s1 + $0x188] sm:$0xff] }
  0x22   :  { %810 = vmatpush.bf16.msra.mxu3 %v1384_v23  ;;  %v1409_v10 = vld [vmem:[%s1889_s1 + $0x198] sm:$0xff]  ;;  %v1408_v14 = vld [vmem:[%s1889_s1 + $0x190] sm:$0xff]  ;;  %v1415_v19 = vld [vmem:[%s1889_s1 + $0x1c8] sm:$0xff] }
  0x23   :  { %754 = vmatpush.bf16.msra.mxu0 %v1359_v24  ;;  %v1417_v11 = vld [vmem:[%s1889_s1 + $0x1d8] sm:$0xff]  ;;  %v1416_v15 = vld [vmem:[%s1889_s1 + $0x1d0] sm:$0xff]  ;;  %v1390_v20 = vld [vmem:[%s1889_s1 + $0x100] sm:$0xff] }
  0x24   :  { %773 = vmatpush.bf16.msra.mxu1 %v1367_v25  ;;  %v1398_v21 = vld [vmem:[%s1889_s1 + $0x140] sm:$0xff]  ;;  %v998_v24 = vld [vmem:[%s1888_s0 + $0x10] sm:$0xf]  ;;  %v1346_v25 = vld [vmem:[%s1888_s0 + $0x30] sm:$0xf0] }
  0x25   :  { %792 = vmatpush.bf16.msra.mxu2 %v1375_v26  ;;  %v1406_v22 = vld [vmem:[%s1889_s1 + $0x180] sm:$0xff]  ;;  %v1429_v26 = vld [vmem:[%s1889_s1 + $0x238] sm:$0xff]  ;;  %v999_v33 = vor.u32 %v1346_v25, %v998_v24  ;;  %v1428_v37 = vld [vmem:[%s1889_s1 + $0x230] sm:$0xff] }
  0x26   :  { %811 = vmatpush.bf16.msra.mxu3 %v1383_v27  ;;  %v1414_v23 = vld [vmem:[%s1889_s1 + $0x1c0] sm:$0xff]  ;;  %v1342_v27 = vld [vmem:[%s1888_s0 + $0x14] sm:$0xf]  ;;  %v1347_v30 = vld [vmem:[%s1888_s0 + $0x38] sm:$0xf0] }
  0x27   :  { %755 = vmatpush.bf16.msra.mxu0 %v1358_v28  ;;  %v1000_v28 = vld [vmem:[%s1888_s0 + $0x34] sm:$0xf0]  ;;  %v1427_v38 = vld [vmem:[%s1889_s1 + $0x228] sm:$0xff]  ;;  %v1426_v39 = vld [vmem:[%s1889_s1 + $0x220] sm:$0xff] }
  0x28   :  { %774 = vmatpush.bf16.msra.mxu1 %v1366_v29  ;;  %v1006_v29 = vld [vmem:[%s1888_s0 + $0x18] sm:$0xf]  ;;  %v1003_v34 = vor.u32 %v1342_v27, %v1000_v28 }
  0x29   :  { %793 = vmatpush.bf16.msra.mxu2 %v1374_v31  ;;  %v1343_v31 = vld [vmem:[%s1888_s0 + $0x1c] sm:$0xf]  ;;  %v1007_v35 = vor.u32 %v1347_v30, %v1006_v29 }
  0x2a   :  { %812 = vmatpush.bf16.msra.mxu3 %v1382_v32  ;;  %756 = vmatmul.bf16.vlgmr.msra.gmra.mxu0 %v983_v42  ;;  %v1008_v32 = vld [vmem:[%s1888_s0 + $0x3c] sm:$0xf0]  ;;  %v1351_v42 = vld [vmem:[%s1888_s0 + $0x5c] sm:$0xf] }
  0x2b   :  { %824 = vmatpush.bf16.msrb.mxu0 %v1397_v40  ;;  %775 = vmatmul.bf16.vlgmr.msra.gmra.mxu1 %v987_v43  ;;  %v1011_v36 = vor.u32 %v1343_v31, %v1008_v32  ;;  %v1034_v40 = vld [vmem:[%s1888_s0 + $0x58] sm:$0xf]  ;;  %v1036_v43 = vld [vmem:[%s1888_s0 + $0x7c] sm:$0xf0] }
  0x2c   :  { %843 = vmatpush.bf16.msrb.mxu1 %v1405_v41  ;;  %794 = vmatmul.bf16.vlgmr.msra.gmra.mxu2 %v991_v44  ;;  %v1355_v41 = vld [vmem:[%s1888_s0 + $0x78] sm:$0xf0]  ;;  %v1042_v44 = vld [vmem:[%s1888_s0 + $0x60] sm:$0xf] }
  0x2d   :  { %813 = vmatmul.bf16.vlgmr.msra.gmra.mxu3 %v995_v45  ;;  %862 = vmatpush.bf16.msrb.mxu2 %v1413_v46  ;;  %v1356_v45 = vld [vmem:[%s1888_s0 + $0x80] sm:$0xf0] }
  0x2e   :  { %881 = vmatpush.bf16.msrb.mxu3 %v1421_v47  ;;  %v1352_v46 = vld [vmem:[%s1888_s0 + $0x64] sm:$0xf]  ;;  %v1044_v47 = vld [vmem:[%s1888_s0 + $0x84] sm:$0xf0] }
  0x2f   :  { %825 = vmatpush.bf16.msrb.mxu0 %v1396_v48  ;;  %v1425_v48 = vld [vmem:[%s1889_s1 + $0x218] sm:$0xff] }
  0x30   :  { %844 = vmatpush.bf16.msrb.mxu1 %v1404_v49  ;;  %v1035_v49 = vor.u32 %v1355_v41, %v1034_v40 }
  0x31   :  { %863 = vmatpush.bf16.msrb.mxu2 %v1412_v50  ;;  %v1039_v50 = vor.u32 %v1351_v42, %v1036_v43 }
  0x32   :  { %882 = vmatpush.bf16.msrb.mxu3 %v1420_v51  ;;  %v1043_v51 = vor.u32 %v1356_v45, %v1042_v44 }
  0x33   :  { %826 = vmatpush.bf16.msrb.mxu0 %v1395_v52  ;;  %v1047_v52 = vor.u32 %v1352_v46, %v1044_v47 }
  0x34   :  { %845 = vmatpush.bf16.msrb.mxu1 %v1403_v53  ;;  %v1424_v53 = vld [vmem:[%s1889_s1 + $0x210] sm:$0xff] }
  0x35   :  { %864 = vmatpush.bf16.msrb.mxu2 %v1411_v54  ;;  %v1423_v54 = vld [vmem:[%s1889_s1 + $0x208] sm:$0xff] }
  0x36   :  { %883 = vmatpush.bf16.msrb.mxu3 %v1419_v55  ;;  %v1422_v55 = vld [vmem:[%s1889_s1 + $0x200] sm:$0xff] }
  0x37   :  { %827 = vmatpush.bf16.msrb.mxu0 %v1394_v56  ;;  %v1014_v56 = vld [vmem:[%s1888_s0 + $0x20] sm:$0xf] }
  0x38   :  { %846 = vmatpush.bf16.msrb.mxu1 %v1402_v57  ;;  %v1348_v57 = vld [vmem:[%s1888_s0 + $0x40] sm:$0xf0] }
  0x39   :  { %865 = vmatpush.bf16.msrb.mxu2 %v1410_v58  ;;  %v1050_v58 = vld [vmem:[%s1888_s0 + $0x68] sm:$0xf]  ;;  %v1015_v60 = vor.u32 %v1348_v57, %v1014_v56  ;;  %v1460_v56 = vld [vmem:[#allocation3] ss:$0 sm:$0xff] }
  0x3a   :  { %884 = vmatpush.bf16.msrb.mxu3 %v1418_v59  ;;  %761 = vmatmul.bf16.gmra.mxu0 %v1019_v6  ;;  %v1357_v59 = vld [vmem:[%s1888_s0 + $0x88] sm:$0xf0] }
  0x3b   :  { %828 = vmatpush.bf16.msrb.mxu0 %v1393_v4  ;;  %780 = vmatmul.bf16.gmra.mxu1 %v1023_v7  ;;  %v1051_v61 = vor.u32 %v1357_v59, %v1050_v58 }
  0x3c   :  { %847 = vmatpush.bf16.msrb.mxu1 %v1401_v5  ;;  %799 = vmatmul.bf16.gmra.mxu2 %v1027_v8 }
  0x3d   :  { %818 = vmatmul.bf16.gmra.mxu3 %v1031_v9  ;;  %866 = vmatpush.bf16.msrb.mxu2 %v1409_v10 }
  0x3e   :  { %885 = vmatpush.bf16.msrb.mxu3 %v1417_v11 }
  0x3f   :  { %829 = vmatpush.bf16.msrb.mxu0 %v1392_v12 }
  0x40   :  { %848 = vmatpush.bf16.msrb.mxu1 %v1400_v13 }
  0x41   :  { %867 = vmatpush.bf16.msrb.mxu2 %v1408_v14 }
  0x42   :  { %886 = vmatpush.bf16.msrb.mxu3 %v1416_v15 }
  0x43   :  { %830 = vmatpush.bf16.msrb.mxu0 %v1391_v16 }
  0x44   :  { %849 = vmatpush.bf16.msrb.mxu1 %v1399_v17 }
  0x45   :  { %868 = vmatpush.bf16.msrb.mxu2 %v1407_v18 }
  0x46   :  { %887 = vmatpush.bf16.msrb.mxu3 %v1415_v19 }
  0x47   :  { %831 = vmatpush.bf16.msrb.mxu0 %v1390_v20 }
  0x48   :  { %850 = vmatpush.bf16.msrb.mxu1 %v1398_v21 }
  0x49   :  { %869 = vmatpush.bf16.msrb.mxu2 %v1406_v22 }
  0x4a   :  { %888 = vmatpush.bf16.msrb.mxu3 %v1414_v23  ;;  %832 = vmatmul.bf16.vlgmr.msrb.gmra.mxu0 %v999_v33 }
  0x4b   :  { %900 = vmatpush.bf16.msra.mxu0 %v1429_v26  ;;  %851 = vmatmul.bf16.vlgmr.msrb.gmra.mxu1 %v1003_v34 }
  0x4c   :  { %1450 = vmatpush.bf16.msra.mxu1 %v1429_v26  ;;  %870 = vmatmul.bf16.vlgmr.msrb.gmra.mxu2 %v1007_v35 }
  0x4d   :  { %889 = vmatmul.bf16.vlgmr.msrb.gmra.mxu3 %v1011_v36 }
  0x4f   :  { %901 = vmatpush.bf16.msra.mxu0 %v1428_v37 }
  0x50   :  { %1451 = vmatpush.bf16.msra.mxu1 %v1428_v37 }
  0x53   :  { %902 = vmatpush.bf16.msra.mxu0 %v1427_v38 }
  0x54   :  { %1452 = vmatpush.bf16.msra.mxu1 %v1427_v38 }
  0x57   :  { %903 = vmatpush.bf16.msra.mxu0 %v1426_v39 }
  0x58   :  { %1453 = vmatpush.bf16.msra.mxu1 %v1426_v39 }
  0x5a   :  { %837 = vmatmul.bf16.gmra.mxu0 %v1035_v49 }
  0x5b   :  { %904 = vmatpush.bf16.msra.mxu0 %v1425_v48  ;;  %856 = vmatmul.bf16.gmra.mxu1 %v1039_v50 }
  0x5c   :  { %1454 = vmatpush.bf16.msra.mxu1 %v1425_v48  ;;  %875 = vmatmul.bf16.gmra.mxu2 %v1043_v51 }
  0x5d   :  { %894 = vmatmul.bf16.gmra.mxu3 %v1047_v52 }
  0x5f   :  { %905 = vmatpush.bf16.msra.mxu0 %v1424_v53 }
  0x60   :  { %1455 = vmatpush.bf16.msra.mxu1 %v1424_v53 }
  0x63   :  { %906 = vmatpush.bf16.msra.mxu0 %v1423_v54 }
  0x64   :  { %1456 = vmatpush.bf16.msra.mxu1 %v1423_v54 }
  0x67   :  { %907 = vmatpush.bf16.msra.mxu0 %v1422_v55 }
  0x68   :  { %1457 = vmatpush.bf16.msra.mxu1 %v1422_v55 }
  0x6a   :  { %908 = vmatmul.bf16.vlgmr.msra.gmra.mxu0 %v1015_v60 }
  0x6b   :  { %913 = vmatmul.bf16.vlgmr.msra.gmra.mxu1 %v1051_v61  ;;  %v1461_v61 = vld [vmem:[#allocation5] ss:$0 sm:$0xff] }
  0xa7   :  { %v757_v62 = vpop.f32.mrf.mxu0 }
  0xa8   :  { %v776_v63 = vpop.f32.mrf.mxu1 }
  0xa9   :  { %v777_v20 = vadd.f32 %v776_v63, %v757_v62  ;;  %v1431_v62 = vld [vmem:[%s1892_s4] sm:$0xff]  }
  0xaf   :  { %v795_v0 = vpop.f32.mrf.mxu2  ;;  %v759_v2 = vpop.f32.mrf.mxu0 }
  0xb0   :  { %v814_v1 = vpop.f32.mrf.mxu3  ;;  %v778_v3 = vpop.f32.mrf.mxu1  ;;  %v796_v22 = vadd.f32 %v795_v0, %v777_v20  ;;  %v1448_v0 = vld [vmem:[%s1892_s4 + $0x8] sm:$0xff]  }
  0xb1   :  { %v779_v30 = vadd.f32 %v778_v3, %v759_v2 }
  0xb2   :  { %v815_v28 = vadd.f32 %v814_v1, %v796_v22 }
  0xb7   :  { %v797_v4 = vpop.f32.mrf.mxu2  ;;  %v762_v6 = vpop.f32.mrf.mxu0 }
  0xb8   :  { %v816_v5 = vpop.f32.mrf.mxu3  ;;  %v781_v7 = vpop.f32.mrf.mxu1  ;;  %v798_v34 = vadd.f32 %v797_v4, %v779_v30  ;;  %v1432_v4 = vunpack.c.l.bf16 %v1431_v62 }
  0xb9   :  { %v782_v21 = vadd.f32 %v781_v7, %v762_v6 }
  0xba   :  { %v817_v41 = vadd.f32 %v816_v5, %v798_v34  ;;  %v1436_v5 = vunpack.c.l.bf16 %v1448_v0 }
  0xbf   :  { %v800_v8 = vpop.f32.mrf.mxu2  ;;  %v764_v10 = vpop.f32.mrf.mxu0 }
  0xc0   :  { %v819_v9 = vpop.f32.mrf.mxu3  ;;  %v783_v11 = vpop.f32.mrf.mxu1  ;;  %v801_v23 = vadd.f32 %v800_v8, %v782_v21 }
  0xc1   :  { %v784_v31 = vadd.f32 %v783_v11, %v764_v10 }
  0xc2   :  { %v820_v29 = vadd.f32 %v819_v9, %v801_v23 }
  0xc7   :  { %v802_v12 = vpop.f32.mrf.mxu2  ;;  %v833_v14 = vpop.f32.mrf.mxu0 }
  0xc8   :  { %v821_v13 = vpop.f32.mrf.mxu3  ;;  %v852_v15 = vpop.f32.mrf.mxu1  ;;  %v834_v32 = vadd.f32 %v833_v14, %v815_v28  ;;  %v803_v35 = vadd.f32 %v802_v12, %v784_v31 }
  0xca   :  { %v853_v39 = vadd.f32 %v852_v15, %v834_v32  ;;  %v822_v42 = vadd.f32 %v821_v13, %v803_v35  ;;  %v1433_v13 = vunpack.c.h.bf16 %v1431_v62  ;;  %v1437_v15 = vunpack.c.h.bf16 %v1448_v0 }
  0xcf   :  { %v871_v16 = vpop.f32.mrf.mxu2  ;;  %v835_v18 = vpop.f32.mrf.mxu0 }
  0xd0   :  { %v890_v17 = vpop.f32.mrf.mxu3  ;;  %v854_v19 = vpop.f32.mrf.mxu1  ;;  %v872_v43 = vadd.f32 %v871_v16, %v853_v39  ;;  %v836_v46 = vadd.f32 %v835_v18, %v817_v41 }
  0xd2   :  { %v891_v48 = vadd.f32 %v890_v17, %v872_v43  ;;  %v855_v53 = vadd.f32 %v854_v19, %v836_v46 }
  0xd7   :  { %v873_v24 = vpop.f32.mrf.mxu2  ;;  %v838_v25 = vpop.f32.mrf.mxu0 }
  0xd8   :  { %v857_v26 = vpop.f32.mrf.mxu1  ;;  %v892_v27 = vpop.f32.mrf.mxu3  ;;  %v839_v33 = vadd.f32 %v838_v25, %v820_v29  ;;  %v874_v58 = vadd.f32 %v873_v24, %v855_v53 }
  0xda   :  { %v858_v40 = vadd.f32 %v857_v26, %v839_v33  ;;  %v893_v2 = vadd.f32 %v892_v27, %v874_v58 }
  0xdf   :  { %v876_v36 = vpop.f32.mrf.mxu2  ;;  %v840_v37 = vpop.f32.mrf.mxu0 }
  0xe0   :  { %v859_v38 = vpop.f32.mrf.mxu1  ;;  %v877_v44 = vadd.f32 %v876_v36, %v858_v40  ;;  %v895_v45 = vpop.f32.mrf.mxu3  ;;  %v841_v47 = vadd.f32 %v840_v37, %v822_v42 }
  0xe2   :  { %v896_v49 = vadd.f32 %v895_v45, %v877_v44  ;;  %v860_v54 = vadd.f32 %v859_v38, %v841_v47 }
  0xe7   :  { %v878_v50 = vpop.f32.mrf.mxu2  ;;  %v909_v51 = vpop.f32.mrf.mxu0 }
  0xe8   :  { %v914_v52 = vpop.f32.mrf.mxu1  ;;  %v910_v55 = vadd.f32 %v909_v51, %v891_v48  ;;  %v879_v59 = vadd.f32 %v878_v50, %v860_v54  ;;  %v897_v1 = vpop.f32.mrf.mxu3 }
  0xe9   :  { %v915_v57 = vadd.f32 %v914_v52, %v896_v49 }
  0xea   :  { %v938_v60 = vmul.f32 %v1460_v56, %v910_v55  ;;  %v898_v3 = vadd.f32 %v897_v1, %v879_v59 }
  0xeb   :  { %v940_v63 = vmul.f32 %v1460_v56, %v915_v57 }
  0xec   :  { %v946_v8 = vadd.f32 %v1461_v61, %v938_v60 }
  0xed   :  { %v948_v9 = vadd.f32 %v1461_v61, %v940_v63 }
  0xee   :  { %v958_v16 = vadd.f32 %v1432_v4, %v946_v8 }
  0xef   :  { %v911_v6 = vpop.f32.mrf.mxu0  ;;  %v960_v17 = vadd.f32 %v1436_v5, %v948_v9 }
  0xf0   :  { %v916_v7 = vpop.f32.mrf.mxu1  ;;  %v912_v10 = vadd.f32 %v911_v6, %v893_v2  ;;  %v962_v22 = vmax.f32 %v958_v16, 0.0 }
  0xf1   :  { %v917_v11 = vadd.f32 %v916_v7, %v898_v3  ;;  %v964_v23 = vmax.f32 %v960_v17, 0.0 }
  0xf2   :  { %v939_v12 = vmul.f32 %v1460_v56, %v912_v10 }
  0xf3   :  { %v941_v14 = vmul.f32 %v1460_v56, %v917_v11 }
  0xf4   :  { %v947_v18 = vadd.f32 %v1461_v61, %v939_v12 }
  0xf5   :  { %v949_v19 = vadd.f32 %v1461_v61, %v941_v14 }
  0xf6   :  { %v959_v20 = vadd.f32 %v1433_v13, %v947_v18 }
  0xf7   :  { %v961_v21 = vadd.f32 %v1437_v15, %v949_v19 }
  0xf8   :  { %v963_v24 = vmax.f32 %v959_v20, 0.0 }
  0xf9   :  { %v965_v25 = vmax.f32 %v961_v21, 0.0 }
  0xfa   :  { %v1441_v26 = vpack.c.bf16 %v963_v24, %v962_v22 }
  0xfb   :  { %v1446_v27 = vpack.c.bf16 %v965_v25, %v964_v23 }
  0xfc   :  { %1442 = vst [vmem:[%s1893_s5] sm:$0xff] %v1441_v26  }
  0xfd   :  { %1449 = vst [vmem:[%s1893_s5 + $0x8] sm:$0xff] %v1446_v27  }
  0xfe   :  { %978 = vsyncpa [#allocation4], 1 }
  0xff   :  { %979 = vsyncpa [#allocation6], 1 }

// kernel: _lambda_.32
= control target key start
LH: loop header
LB: loop body
LE: loop exit
PB: predicated region body
PF: predicated region fallthrough
CT: control target
= control target key end

     0   :  { %s1802_s1 = inlined_call_operand.vmem [shape: bf16[1152,128], index: 1, kind: input, shape index: {}]   ;;  %s1803_s0 = inlined_call_operand.vmem [shape: bf16[32,1152], index: 0, kind: input, shape index: {}]   ;;  %s1804_s2 = inlined_call_operand.vmem [shape: f32[1,128], index: 2, kind: input, shape index: {}]   ;;  %s1805_s3 = inlined_call_operand.vmem [shape: f32[1,128], index: 3, kind: input, shape index: {}]   ;;  %s1806_s4 = inlined_call_operand.vmem [shape: bf16[32,128], index: 4, kind: input, shape index: {}]   ;;  %s1807_s5 = inlined_call_operand.vmem [shape: bf16[32,128], index: 5, kind: output, shape index: {}]  }
   0x1   :  { %v1335_v0 = vld [vmem:[%s1802_s1 + $0x38] sm:$0xff]  ;;  %v1334_v4 = vld [vmem:[%s1802_s1 + $0x30] sm:$0xff]  ;;  %v1333_v8 = vld [vmem:[%s1802_s1 + $0x28] sm:$0xff] }
   0x2   :  { %v1343_v1 = vld [vmem:[%s1802_s1 + $0x78] sm:$0xff]  ;;  %720 = vmatpush.bf16.msra.mxu0 %v1335_v0  ;;  %v1342_v5 = vld [vmem:[%s1802_s1 + $0x70] sm:$0xff]  ;;  %v1341_v9 = vld [vmem:[%s1802_s1 + $0x68] sm:$0xff] }
   0x3   :  { %v1351_v2 = vld [vmem:[%s1802_s1 + $0xb8] sm:$0xff]  ;;  %739 = vmatpush.bf16.msra.mxu1 %v1343_v1  ;;  %v1350_v6 = vld [vmem:[%s1802_s1 + $0xb0] sm:$0xff]  ;;  %v1349_v10 = vld [vmem:[%s1802_s1 + $0xa8] sm:$0xff] }
   0x4   :  { %v1359_v3 = vld [vmem:[%s1802_s1 + $0xf8] sm:$0xff]  ;;  %758 = vmatpush.bf16.msra.mxu2 %v1351_v2  ;;  %v1358_v7 = vld [vmem:[%s1802_s1 + $0xf0] sm:$0xff]  ;;  %v1357_v11 = vld [vmem:[%s1802_s1 + $0xe8] sm:$0xff] }
   0x5   :  { %777 = vmatpush.bf16.msra.mxu3 %v1359_v3  ;;  %v1332_v12 = vld [vmem:[%s1802_s1 + $0x20] sm:$0xff]  ;;  %v1331_v16 = vld [vmem:[%s1802_s1 + $0x18] sm:$0xff]  ;;  %v1330_v20 = vld [vmem:[%s1802_s1 + $0x10] sm:$0xff] }
   0x6   :  { %721 = vmatpush.bf16.msra.mxu0 %v1334_v4  ;;  %v1340_v13 = vld [vmem:[%s1802_s1 + $0x60] sm:$0xff]  ;;  %v1339_v17 = vld [vmem:[%s1802_s1 + $0x58] sm:$0xff]  ;;  %v1338_v21 = vld [vmem:[%s1802_s1 + $0x50] sm:$0xff] }
   0x7   :  { %740 = vmatpush.bf16.msra.mxu1 %v1342_v5  ;;  %v1348_v14 = vld [vmem:[%s1802_s1 + $0xa0] sm:$0xff]  ;;  %v1347_v18 = vld [vmem:[%s1802_s1 + $0x98] sm:$0xff]  ;;  %v1346_v22 = vld [vmem:[%s1802_s1 + $0x90] sm:$0xff] }
   0x8   :  { %759 = vmatpush.bf16.msra.mxu2 %v1350_v6  ;;  %v1356_v15 = vld [vmem:[%s1802_s1 + $0xe0] sm:$0xff]  ;;  %v1355_v19 = vld [vmem:[%s1802_s1 + $0xd8] sm:$0xff]  ;;  %v1354_v23 = vld [vmem:[%s1802_s1 + $0xd0] sm:$0xff] }
   0x9   :  { %778 = vmatpush.bf16.msra.mxu3 %v1358_v7  ;;  %v1329_v24 = vld [vmem:[%s1802_s1 + $0x8] sm:$0xff]  ;;  %v1328_v28 = vld [vmem:[%s1802_s1] sm:$0xff]  ;;  %v962_v39 = vld [vmem:[%s1803_s0 + $0x2c] sm:$0xf0] }
   0xa   :  { %722 = vmatpush.bf16.msra.mxu0 %v1333_v8  ;;  %v1337_v25 = vld [vmem:[%s1802_s1 + $0x48] sm:$0xff]  ;;  %v1336_v29 = vld [vmem:[%s1802_s1 + $0x40] sm:$0xff]  ;;  %v1367_v40 = vld [vmem:[%s1802_s1 + $0x138] sm:$0xff] }
   0xb   :  { %741 = vmatpush.bf16.msra.mxu1 %v1341_v9  ;;  %v1345_v26 = vld [vmem:[%s1802_s1 + $0x88] sm:$0xff]  ;;  %v1344_v30 = vld [vmem:[%s1802_s1 + $0x80] sm:$0xff]  ;;  %v1375_v41 = vld [vmem:[%s1802_s1 + $0x178] sm:$0xff] }
   0xc   :  { %760 = vmatpush.bf16.msra.mxu2 %v1349_v10  ;;  %v1353_v27 = vld [vmem:[%s1802_s1 + $0xc8] sm:$0xff]  ;;  %v1352_v31 = vld [vmem:[%s1802_s1 + $0xc0] sm:$0xff]  ;;  %v1383_v46 = vld [vmem:[%s1802_s1 + $0x1b8] sm:$0xff] }
   0xd   :  { %779 = vmatpush.bf16.msra.mxu3 %v1357_v11  ;;  %v952_v32 = vld [vmem:[%s1803_s0] sm:$0xf]  ;;  %v1314_v33 = vld [vmem:[%s1803_s0 + $0x20] sm:$0xf0]  ;;  %v954_v35 = vld [vmem:[%s1803_s0 + $0x24] sm:$0xf0] }
   0xe   :  { %723 = vmatpush.bf16.msra.mxu0 %v1332_v12  ;;  %v1310_v34 = vld [vmem:[%s1803_s0 + $0x4] sm:$0xf]  ;;  %v960_v36 = vld [vmem:[%s1803_s0 + $0x8] sm:$0xf]  ;;  %v1315_v37 = vld [vmem:[%s1803_s0 + $0x28] sm:$0xf0]  ;;  %v953_v42 = vor.u32 %v1314_v33, %v952_v32 }
   0xf   :  { %742 = vmatpush.bf16.msra.mxu1 %v1340_v13  ;;  %v1311_v38 = vld [vmem:[%s1803_s0 + $0xc] sm:$0xf]  ;;  %v957_v43 = vor.u32 %v1310_v34, %v954_v35  ;;  %v961_v44 = vor.u32 %v1315_v37, %v960_v36  ;;  %v1391_v47 = vld [vmem:[%s1802_s1 + $0x1f8] sm:$0xff]  ;;  %v1366_v48 = vld [vmem:[%s1802_s1 + $0x130] sm:$0xff] }
  0x10   :  { %761 = vmatpush.bf16.msra.mxu2 %v1348_v14  ;;  %v965_v45 = vor.u32 %v1311_v38, %v962_v39  ;;  %v1374_v49 = vld [vmem:[%s1802_s1 + $0x170] sm:$0xff]  ;;  %v1365_v52 = vld [vmem:[%s1802_s1 + $0x128] sm:$0xff]  ;;  %v1364_v56 = vld [vmem:[%s1802_s1 + $0x120] sm:$0xff] }
  0x11   :  { %780 = vmatpush.bf16.msra.mxu3 %v1356_v15  ;;  %v1382_v50 = vld [vmem:[%s1802_s1 + $0x1b0] sm:$0xff]  ;;  %v1373_v53 = vld [vmem:[%s1802_s1 + $0x168] sm:$0xff]  ;;  %v1372_v57 = vld [vmem:[%s1802_s1 + $0x160] sm:$0xff] }
  0x12   :  { %724 = vmatpush.bf16.msra.mxu0 %v1331_v16  ;;  %v1390_v51 = vld [vmem:[%s1802_s1 + $0x1f0] sm:$0xff]  ;;  %v1381_v54 = vld [vmem:[%s1802_s1 + $0x1a8] sm:$0xff]  ;;  %v1380_v58 = vld [vmem:[%s1802_s1 + $0x1a0] sm:$0xff] }
  0x13   :  { %743 = vmatpush.bf16.msra.mxu1 %v1339_v17  ;;  %v1389_v55 = vld [vmem:[%s1802_s1 + $0x1e8] sm:$0xff]  ;;  %v1388_v59 = vld [vmem:[%s1802_s1 + $0x1e0] sm:$0xff]  ;;  %v990_v63 = vld [vmem:[%s1803_s0 + $0x6c] sm:$0xf0] }
  0x14   :  { %762 = vmatpush.bf16.msra.mxu2 %v1347_v18  ;;  %v988_v60 = vld [vmem:[%s1803_s0 + $0x48] sm:$0xf]  ;;  %v1323_v61 = vld [vmem:[%s1803_s0 + $0x68] sm:$0xf0]  ;;  %v996_v0 = vld [vmem:[%s1803_s0 + $0x50] sm:$0xf] }
  0x15   :  { %781 = vmatpush.bf16.msra.mxu3 %v1355_v19  ;;  %v1319_v62 = vld [vmem:[%s1803_s0 + $0x4c] sm:$0xf]  ;;  %v1324_v1 = vld [vmem:[%s1803_s0 + $0x70] sm:$0xf0]  ;;  %v998_v3 = vld [vmem:[%s1803_s0 + $0x74] sm:$0xf0]  ;;  %v989_v6 = vor.u32 %v1323_v61, %v988_v60 }
  0x16   :  { %725 = vmatpush.bf16.msra.mxu0 %v1330_v20  ;;  %v1320_v2 = vld [vmem:[%s1803_s0 + $0x54] sm:$0xf]  ;;  %v1363_v4 = vld [vmem:[%s1802_s1 + $0x118] sm:$0xff]  ;;  %v993_v7 = vor.u32 %v1319_v62, %v990_v63  ;;  %v997_v8 = vor.u32 %v1324_v1, %v996_v0  ;;  %v1361_v16 = vld [vmem:[%s1802_s1 + $0x108] sm:$0xff] }
  0x17   :  { %744 = vmatpush.bf16.msra.mxu1 %v1338_v21  ;;  %v1371_v5 = vld [vmem:[%s1802_s1 + $0x158] sm:$0xff]  ;;  %v1001_v9 = vor.u32 %v1320_v2, %v998_v3  ;;  %v1362_v12 = vld [vmem:[%s1802_s1 + $0x110] sm:$0xff]  ;;  %v1369_v17 = vld [vmem:[%s1802_s1 + $0x148] sm:$0xff] }
  0x18   :  { %763 = vmatpush.bf16.msra.mxu2 %v1346_v22  ;;  %v1379_v10 = vld [vmem:[%s1802_s1 + $0x198] sm:$0xff]  ;;  %v1370_v13 = vld [vmem:[%s1802_s1 + $0x150] sm:$0xff]  ;;  %v1377_v18 = vld [vmem:[%s1802_s1 + $0x188] sm:$0xff] }
  0x19   :  { %782 = vmatpush.bf16.msra.mxu3 %v1354_v23  ;;  %v1387_v11 = vld [vmem:[%s1802_s1 + $0x1d8] sm:$0xff]  ;;  %v1378_v14 = vld [vmem:[%s1802_s1 + $0x190] sm:$0xff]  ;;  %v1385_v19 = vld [vmem:[%s1802_s1 + $0x1c8] sm:$0xff] }
  0x1a   :  { %726 = vmatpush.bf16.msra.mxu0 %v1329_v24  ;;  %v1386_v15 = vld [vmem:[%s1802_s1 + $0x1d0] sm:$0xff]  ;;  %v1360_v20 = vld [vmem:[%s1802_s1 + $0x100] sm:$0xff]  ;;  %v1397_v38 = vld [vmem:[%s1802_s1 + $0x228] sm:$0xff] }
  0x1b   :  { %745 = vmatpush.bf16.msra.mxu1 %v1337_v25  ;;  %v1368_v21 = vld [vmem:[%s1802_s1 + $0x140] sm:$0xff]  ;;  %v968_v24 = vld [vmem:[%s1803_s0 + $0x10] sm:$0xf]  ;;  %v1316_v25 = vld [vmem:[%s1803_s0 + $0x30] sm:$0xf0] }
  0x1c   :  { %764 = vmatpush.bf16.msra.mxu2 %v1345_v26  ;;  %v1376_v22 = vld [vmem:[%s1802_s1 + $0x180] sm:$0xff]  ;;  %v1399_v26 = vld [vmem:[%s1802_s1 + $0x238] sm:$0xff]  ;;  %v969_v33 = vor.u32 %v1316_v25, %v968_v24  ;;  %v1398_v37 = vld [vmem:[%s1802_s1 + $0x230] sm:$0xff] }
  0x1d   :  { %783 = vmatpush.bf16.msra.mxu3 %v1353_v27  ;;  %v1384_v23 = vld [vmem:[%s1802_s1 + $0x1c0] sm:$0xff]  ;;  %v1312_v27 = vld [vmem:[%s1803_s0 + $0x14] sm:$0xf] }
  0x1e   :  { %727 = vmatpush.bf16.msra.mxu0 %v1328_v28  ;;  %v970_v28 = vld [vmem:[%s1803_s0 + $0x34] sm:$0xf0]  ;;  %v978_v32 = vld [vmem:[%s1803_s0 + $0x3c] sm:$0xf0] }
  0x1f   :  { %746 = vmatpush.bf16.msra.mxu1 %v1336_v29  ;;  %v976_v29 = vld [vmem:[%s1803_s0 + $0x18] sm:$0xf]  ;;  %v973_v34 = vor.u32 %v1312_v27, %v970_v28  ;;  %v1396_v39 = vld [vmem:[%s1802_s1 + $0x220] sm:$0xff] }
  0x20   :  { %765 = vmatpush.bf16.msra.mxu2 %v1344_v30  ;;  %v1317_v30 = vld [vmem:[%s1803_s0 + $0x38] sm:$0xf0] }
  0x21   :  { %784 = vmatpush.bf16.msra.mxu3 %v1352_v31  ;;  %728 = vmatmul.bf16.vlgmr.msra.gmra.mxu0 %v953_v42  ;;  %v1313_v31 = vld [vmem:[%s1803_s0 + $0x1c] sm:$0xf]  ;;  %v977_v35 = vor.u32 %v1317_v30, %v976_v29 }
  0x22   :  { %796 = vmatpush.bf16.msrb.mxu0 %v1367_v40  ;;  %747 = vmatmul.bf16.vlgmr.msra.gmra.mxu1 %v957_v43  ;;  %v981_v36 = vor.u32 %v1313_v31, %v978_v32  ;;  %v1004_v40 = vld [vmem:[%s1803_s0 + $0x58] sm:$0xf]  ;;  %v1321_v42 = vld [vmem:[%s1803_s0 + $0x5c] sm:$0xf]  ;;  %v1006_v43 = vld [vmem:[%s1803_s0 + $0x7c] sm:$0xf0] }
  0x23   :  { %815 = vmatpush.bf16.msrb.mxu1 %v1375_v41  ;;  %766 = vmatmul.bf16.vlgmr.msra.gmra.mxu2 %v961_v44  ;;  %v1325_v41 = vld [vmem:[%s1803_s0 + $0x78] sm:$0xf0]  ;;  %v1012_v44 = vld [vmem:[%s1803_s0 + $0x60] sm:$0xf] }
  0x24   :  { %785 = vmatmul.bf16.vlgmr.msra.gmra.mxu3 %v965_v45  ;;  %834 = vmatpush.bf16.msrb.mxu2 %v1383_v46  ;;  %v1326_v45 = vld [vmem:[%s1803_s0 + $0x80] sm:$0xf0] }
  0x25   :  { %853 = vmatpush.bf16.msrb.mxu3 %v1391_v47  ;;  %v1322_v46 = vld [vmem:[%s1803_s0 + $0x64] sm:$0xf]  ;;  %v1014_v47 = vld [vmem:[%s1803_s0 + $0x84] sm:$0xf0] }
  0x26   :  { %797 = vmatpush.bf16.msrb.mxu0 %v1366_v48  ;;  %v1395_v48 = vld [vmem:[%s1802_s1 + $0x218] sm:$0xff] }
  0x27   :  { %816 = vmatpush.bf16.msrb.mxu1 %v1374_v49  ;;  %v1005_v49 = vor.u32 %v1325_v41, %v1004_v40 }
  0x28   :  { %835 = vmatpush.bf16.msrb.mxu2 %v1382_v50  ;;  %v1009_v50 = vor.u32 %v1321_v42, %v1006_v43 }
  0x29   :  { %854 = vmatpush.bf16.msrb.mxu3 %v1390_v51  ;;  %v1013_v51 = vor.u32 %v1326_v45, %v1012_v44 }
  0x2a   :  { %798 = vmatpush.bf16.msrb.mxu0 %v1365_v52  ;;  %v1017_v52 = vor.u32 %v1322_v46, %v1014_v47 }
  0x2b   :  { %817 = vmatpush.bf16.msrb.mxu1 %v1373_v53  ;;  %v1394_v53 = vld [vmem:[%s1802_s1 + $0x210] sm:$0xff] }
  0x2c   :  { %836 = vmatpush.bf16.msrb.mxu2 %v1381_v54  ;;  %v1393_v54 = vld [vmem:[%s1802_s1 + $0x208] sm:$0xff] }
  0x2d   :  { %855 = vmatpush.bf16.msrb.mxu3 %v1389_v55  ;;  %v1392_v55 = vld [vmem:[%s1802_s1 + $0x200] sm:$0xff] }
  0x2e   :  { %799 = vmatpush.bf16.msrb.mxu0 %v1364_v56  ;;  %v984_v56 = vld [vmem:[%s1803_s0 + $0x20] sm:$0xf] }
  0x2f   :  { %818 = vmatpush.bf16.msrb.mxu1 %v1372_v57  ;;  %v1318_v57 = vld [vmem:[%s1803_s0 + $0x40] sm:$0xf0] }
  0x30   :  { %837 = vmatpush.bf16.msrb.mxu2 %v1380_v58  ;;  %v1020_v58 = vld [vmem:[%s1803_s0 + $0x68] sm:$0xf]  ;;  %v985_v60 = vor.u32 %v1318_v57, %v984_v56  ;;  %v1428_v56 = vld [vmem:[%s1804_s2] ss:$0 sm:$0xff] }
  0x31   :  { %856 = vmatpush.bf16.msrb.mxu3 %v1388_v59  ;;  %733 = vmatmul.bf16.gmra.mxu0 %v989_v6  ;;  %v1327_v59 = vld [vmem:[%s1803_s0 + $0x88] sm:$0xf0] }
  0x32   :  { %800 = vmatpush.bf16.msrb.mxu0 %v1363_v4  ;;  %752 = vmatmul.bf16.gmra.mxu1 %v993_v7  ;;  %v1021_v61 = vor.u32 %v1327_v59, %v1020_v58 }
  0x33   :  { %819 = vmatpush.bf16.msrb.mxu1 %v1371_v5  ;;  %771 = vmatmul.bf16.gmra.mxu2 %v997_v8 }
  0x34   :  { %790 = vmatmul.bf16.gmra.mxu3 %v1001_v9  ;;  %838 = vmatpush.bf16.msrb.mxu2 %v1379_v10 }
  0x35   :  { %857 = vmatpush.bf16.msrb.mxu3 %v1387_v11 }
  0x36   :  { %801 = vmatpush.bf16.msrb.mxu0 %v1362_v12 }
  0x37   :  { %820 = vmatpush.bf16.msrb.mxu1 %v1370_v13 }
  0x38   :  { %839 = vmatpush.bf16.msrb.mxu2 %v1378_v14 }
  0x39   :  { %858 = vmatpush.bf16.msrb.mxu3 %v1386_v15 }
  0x3a   :  { %802 = vmatpush.bf16.msrb.mxu0 %v1361_v16 }
  0x3b   :  { %821 = vmatpush.bf16.msrb.mxu1 %v1369_v17 }
  0x3c   :  { %840 = vmatpush.bf16.msrb.mxu2 %v1377_v18 }
  0x3d   :  { %859 = vmatpush.bf16.msrb.mxu3 %v1385_v19 }
  0x3e   :  { %803 = vmatpush.bf16.msrb.mxu0 %v1360_v20 }
  0x3f   :  { %822 = vmatpush.bf16.msrb.mxu1 %v1368_v21 }
  0x40   :  { %841 = vmatpush.bf16.msrb.mxu2 %v1376_v22 }
  0x41   :  { %860 = vmatpush.bf16.msrb.mxu3 %v1384_v23  ;;  %804 = vmatmul.bf16.vlgmr.msrb.gmra.mxu0 %v969_v33 }
  0x42   :  { %872 = vmatpush.bf16.msra.mxu0 %v1399_v26  ;;  %823 = vmatmul.bf16.vlgmr.msrb.gmra.mxu1 %v973_v34 }
  0x43   :  { %1420 = vmatpush.bf16.msra.mxu1 %v1399_v26  ;;  %842 = vmatmul.bf16.vlgmr.msrb.gmra.mxu2 %v977_v35 }
  0x44   :  { %861 = vmatmul.bf16.vlgmr.msrb.gmra.mxu3 %v981_v36 }
  0x46   :  { %873 = vmatpush.bf16.msra.mxu0 %v1398_v37 }
  0x47   :  { %1421 = vmatpush.bf16.msra.mxu1 %v1398_v37 }
  0x4a   :  { %874 = vmatpush.bf16.msra.mxu0 %v1397_v38 }
  0x4b   :  { %1422 = vmatpush.bf16.msra.mxu1 %v1397_v38 }
  0x4e   :  { %875 = vmatpush.bf16.msra.mxu0 %v1396_v39 }
  0x4f   :  { %1423 = vmatpush.bf16.msra.mxu1 %v1396_v39 }
  0x51   :  { %809 = vmatmul.bf16.gmra.mxu0 %v1005_v49 }
  0x52   :  { %876 = vmatpush.bf16.msra.mxu0 %v1395_v48  ;;  %828 = vmatmul.bf16.gmra.mxu1 %v1009_v50 }
  0x53   :  { %1424 = vmatpush.bf16.msra.mxu1 %v1395_v48  ;;  %847 = vmatmul.bf16.gmra.mxu2 %v1013_v51 }
  0x54   :  { %866 = vmatmul.bf16.gmra.mxu3 %v1017_v52 }
  0x56   :  { %877 = vmatpush.bf16.msra.mxu0 %v1394_v53 }
  0x57   :  { %1425 = vmatpush.bf16.msra.mxu1 %v1394_v53 }
  0x5a   :  { %878 = vmatpush.bf16.msra.mxu0 %v1393_v54 }
  0x5b   :  { %1426 = vmatpush.bf16.msra.mxu1 %v1393_v54 }
  0x5e   :  { %879 = vmatpush.bf16.msra.mxu0 %v1392_v55 }
  0x5f   :  { %1427 = vmatpush.bf16.msra.mxu1 %v1392_v55 }
  0x61   :  { %880 = vmatmul.bf16.vlgmr.msra.gmra.mxu0 %v985_v60 }
  0x62   :  { %885 = vmatmul.bf16.vlgmr.msra.gmra.mxu1 %v1021_v61  ;;  %v1429_v61 = vld [vmem:[%s1805_s3] ss:$0 sm:$0xff] }
  0x9e   :  { %v729_v62 = vpop.f32.mrf.mxu0 }
  0x9f   :  { %v748_v63 = vpop.f32.mrf.mxu1 }
  0xa0   :  { %v749_v20 = vadd.f32 %v748_v63, %v729_v62  ;;  %v1401_v62 = vld [vmem:[%s1806_s4] sm:$0xff]  }
  0xa6   :  { %v767_v0 = vpop.f32.mrf.mxu2  ;;  %v731_v2 = vpop.f32.mrf.mxu0 }
  0xa7   :  { %v786_v1 = vpop.f32.mrf.mxu3  ;;  %v750_v3 = vpop.f32.mrf.mxu1  ;;  %v768_v22 = vadd.f32 %v767_v0, %v749_v20  ;;  %v1418_v0 = vld [vmem:[%s1806_s4 + $0x8] sm:$0xff]  }
  0xa8   :  { %v751_v30 = vadd.f32 %v750_v3, %v731_v2 }
  0xa9   :  { %v787_v28 = vadd.f32 %v786_v1, %v768_v22 }
  0xae   :  { %v769_v4 = vpop.f32.mrf.mxu2  ;;  %v734_v6 = vpop.f32.mrf.mxu0 }
  0xaf   :  { %v788_v5 = vpop.f32.mrf.mxu3  ;;  %v753_v7 = vpop.f32.mrf.mxu1  ;;  %v770_v34 = vadd.f32 %v769_v4, %v751_v30  ;;  %v1402_v4 = vunpack.c.l.bf16 %v1401_v62 }
  0xb0   :  { %v754_v21 = vadd.f32 %v753_v7, %v734_v6 }
  0xb1   :  { %v789_v41 = vadd.f32 %v788_v5, %v770_v34  ;;  %v1406_v5 = vunpack.c.l.bf16 %v1418_v0 }
  0xb6   :  { %v772_v8 = vpop.f32.mrf.mxu2  ;;  %v736_v10 = vpop.f32.mrf.mxu0 }
  0xb7   :  { %v791_v9 = vpop.f32.mrf.mxu3  ;;  %v755_v11 = vpop.f32.mrf.mxu1  ;;  %v773_v23 = vadd.f32 %v772_v8, %v754_v21 }
  0xb8   :  { %v756_v31 = vadd.f32 %v755_v11, %v736_v10 }
  0xb9   :  { %v792_v29 = vadd.f32 %v791_v9, %v773_v23 }
  0xbe   :  { %v774_v12 = vpop.f32.mrf.mxu2  ;;  %v805_v14 = vpop.f32.mrf.mxu0 }
  0xbf   :  { %v793_v13 = vpop.f32.mrf.mxu3  ;;  %v824_v15 = vpop.f32.mrf.mxu1  ;;  %v806_v32 = vadd.f32 %v805_v14, %v787_v28  ;;  %v775_v35 = vadd.f32 %v774_v12, %v756_v31 }
  0xc1   :  { %v825_v39 = vadd.f32 %v824_v15, %v806_v32  ;;  %v794_v42 = vadd.f32 %v793_v13, %v775_v35  ;;  %v1403_v13 = vunpack.c.h.bf16 %v1401_v62  ;;  %v1407_v15 = vunpack.c.h.bf16 %v1418_v0 }
  0xc6   :  { %v843_v16 = vpop.f32.mrf.mxu2  ;;  %v807_v18 = vpop.f32.mrf.mxu0 }
  0xc7   :  { %v862_v17 = vpop.f32.mrf.mxu3  ;;  %v826_v19 = vpop.f32.mrf.mxu1  ;;  %v844_v43 = vadd.f32 %v843_v16, %v825_v39  ;;  %v808_v46 = vadd.f32 %v807_v18, %v789_v41 }
  0xc9   :  { %v863_v48 = vadd.f32 %v862_v17, %v844_v43  ;;  %v827_v53 = vadd.f32 %v826_v19, %v808_v46 }
  0xce   :  { %v845_v24 = vpop.f32.mrf.mxu2  ;;  %v810_v25 = vpop.f32.mrf.mxu0 }
  0xcf   :  { %v829_v26 = vpop.f32.mrf.mxu1  ;;  %v864_v27 = vpop.f32.mrf.mxu3  ;;  %v811_v33 = vadd.f32 %v810_v25, %v792_v29  ;;  %v846_v58 = vadd.f32 %v845_v24, %v827_v53 }
  0xd1   :  { %v830_v40 = vadd.f32 %v829_v26, %v811_v33  ;;  %v865_v2 = vadd.f32 %v864_v27, %v846_v58 }
  0xd6   :  { %v848_v36 = vpop.f32.mrf.mxu2  ;;  %v812_v37 = vpop.f32.mrf.mxu0 }
  0xd7   :  { %v831_v38 = vpop.f32.mrf.mxu1  ;;  %v849_v44 = vadd.f32 %v848_v36, %v830_v40  ;;  %v867_v45 = vpop.f32.mrf.mxu3  ;;  %v813_v47 = vadd.f32 %v812_v37, %v794_v42 }
  0xd9   :  { %v868_v49 = vadd.f32 %v867_v45, %v849_v44  ;;  %v832_v54 = vadd.f32 %v831_v38, %v813_v47 }
  0xde   :  { %v850_v50 = vpop.f32.mrf.mxu2  ;;  %v881_v51 = vpop.f32.mrf.mxu0 }
  0xdf   :  { %v886_v52 = vpop.f32.mrf.mxu1  ;;  %v882_v55 = vadd.f32 %v881_v51, %v863_v48  ;;  %v851_v59 = vadd.f32 %v850_v50, %v832_v54  ;;  %v869_v1 = vpop.f32.mrf.mxu3 }
  0xe0   :  { %v887_v57 = vadd.f32 %v886_v52, %v868_v49 }
  0xe1   :  { %v910_v60 = vmul.f32 %v1428_v56, %v882_v55  ;;  %v870_v3 = vadd.f32 %v869_v1, %v851_v59 }
  0xe2   :  { %v912_v63 = vmul.f32 %v1428_v56, %v887_v57 }
  0xe3   :  { %v918_v8 = vadd.f32 %v1429_v61, %v910_v60 }
  0xe4   :  { %v920_v9 = vadd.f32 %v1429_v61, %v912_v63 }
  0xe5   :  { %v930_v16 = vadd.f32 %v1402_v4, %v918_v8 }
  0xe6   :  { %v883_v6 = vpop.f32.mrf.mxu0  ;;  %v932_v17 = vadd.f32 %v1406_v5, %v920_v9 }
  0xe7   :  { %v888_v7 = vpop.f32.mrf.mxu1  ;;  %v884_v10 = vadd.f32 %v883_v6, %v865_v2  ;;  %v934_v22 = vmax.f32 %v930_v16, 0.0 }
  0xe8   :  { %v889_v11 = vadd.f32 %v888_v7, %v870_v3  ;;  %v936_v23 = vmax.f32 %v932_v17, 0.0 }
  0xe9   :  { %v911_v12 = vmul.f32 %v1428_v56, %v884_v10 }
  0xea   :  { %v913_v14 = vmul.f32 %v1428_v56, %v889_v11 }
  0xeb   :  { %v919_v18 = vadd.f32 %v1429_v61, %v911_v12 }
  0xec   :  { %v921_v19 = vadd.f32 %v1429_v61, %v913_v14 }
  0xed   :  { %v931_v20 = vadd.f32 %v1403_v13, %v919_v18 }
  0xee   :  { %v933_v21 = vadd.f32 %v1407_v15, %v921_v19 }
  0xef   :  { %v935_v24 = vmax.f32 %v931_v20, 0.0 }
  0xf0   :  { %v937_v25 = vmax.f32 %v933_v21, 0.0 }
  0xf1   :  { %v1411_v26 = vpack.c.bf16 %v935_v24, %v934_v22 }
  0xf2   :  { %v1416_v27 = vpack.c.bf16 %v937_v25, %v936_v23 }
  0xf3   :  { %1412 = vst [vmem:[%s1807_s5] sm:$0xff] %v1411_v26  }
  0xf4   :  { %1419 = vst [vmem:[%s1807_s5 + $0x8] sm:$0xff] %v1416_v27  }

// kernel: _lambda_.33
= control target key start
LH: loop header
LB: loop body
LE: loop exit
PB: predicated region body
PF: predicated region fallthrough
CT: control target
= control target key end

     0   :  { %s1403_s1 = inlined_call_operand.vmem [shape: bf16[1152,128], index: 1, kind: input, shape index: {}]   ;;  %s1404_s0 = inlined_call_operand.vmem [shape: bf16[8,1152], index: 0, kind: input, shape index: {}]   ;;  %s1405_s2 = inlined_call_operand.vmem [shape: f32[1,128], index: 2, kind: input, shape index: {}]   ;;  %s1406_s3 = inlined_call_operand.vmem [shape: f32[1,128], index: 3, kind: input, shape index: {}]   ;;  %s1407_s4 = inlined_call_operand.vmem [shape: bf16[8,128], index: 4, kind: output, shape index: {}]  }
   0x1   :  { %v1071_v0 = vld [vmem:[%s1403_s1 + $0x38] sm:$0xff]  ;;  %v1070_v4 = vld [vmem:[%s1403_s1 + $0x30] sm:$0xff]  ;;  %v1069_v8 = vld [vmem:[%s1403_s1 + $0x28] sm:$0xff] }
   0x2   :  { %v1087_v1 = vld [vmem:[%s1403_s1 + $0xb8] sm:$0xff]  ;;  %636 = vmatpush.bf16.msra.mxu0 %v1071_v0  ;;  %v1086_v5 = vld [vmem:[%s1403_s1 + $0xb0] sm:$0xff]  ;;  %v1085_v9 = vld [vmem:[%s1403_s1 + $0xa8] sm:$0xff] }
   0x3   :  { %v1095_v2 = vld [vmem:[%s1403_s1 + $0xf8] sm:$0xff]  ;;  %662 = vmatpush.bf16.msra.mxu2 %v1087_v1  ;;  %v1094_v6 = vld [vmem:[%s1403_s1 + $0xf0] sm:$0xff]  ;;  %v1093_v10 = vld [vmem:[%s1403_s1 + $0xe8] sm:$0xff] }
   0x4   :  { %v1079_v3 = vld [vmem:[%s1403_s1 + $0x78] sm:$0xff]  ;;  %675 = vmatpush.bf16.msra.mxu3 %v1095_v2  ;;  %v1078_v7 = vld [vmem:[%s1403_s1 + $0x70] sm:$0xff]  ;;  %v1077_v11 = vld [vmem:[%s1403_s1 + $0x68] sm:$0xff] }
   0x5   :  { %649 = vmatpush.bf16.msra.mxu1 %v1079_v3  ;;  %v1068_v12 = vld [vmem:[%s1403_s1 + $0x20] sm:$0xff]  ;;  %v1067_v16 = vld [vmem:[%s1403_s1 + $0x18] sm:$0xff]  ;;  %v1066_v20 = vld [vmem:[%s1403_s1 + $0x10] sm:$0xff] }
   0x6   :  { %637 = vmatpush.bf16.msra.mxu0 %v1070_v4  ;;  %v1084_v13 = vld [vmem:[%s1403_s1 + $0xa0] sm:$0xff]  ;;  %v1083_v17 = vld [vmem:[%s1403_s1 + $0x98] sm:$0xff]  ;;  %v1082_v21 = vld [vmem:[%s1403_s1 + $0x90] sm:$0xff] }
   0x7   :  { %663 = vmatpush.bf16.msra.mxu2 %v1086_v5  ;;  %v1092_v14 = vld [vmem:[%s1403_s1 + $0xe0] sm:$0xff]  ;;  %v1091_v18 = vld [vmem:[%s1403_s1 + $0xd8] sm:$0xff]  ;;  %v1090_v22 = vld [vmem:[%s1403_s1 + $0xd0] sm:$0xff] }
   0x8   :  { %676 = vmatpush.bf16.msra.mxu3 %v1094_v6  ;;  %v1076_v15 = vld [vmem:[%s1403_s1 + $0x60] sm:$0xff]  ;;  %v1075_v19 = vld [vmem:[%s1403_s1 + $0x58] sm:$0xff]  ;;  %v1074_v23 = vld [vmem:[%s1403_s1 + $0x50] sm:$0xff] }
   0x9   :  { %650 = vmatpush.bf16.msra.mxu1 %v1078_v7  ;;  %v1065_v24 = vld [vmem:[%s1403_s1 + $0x8] sm:$0xff]  ;;  %v23_v29 = vld [vmem:[%s1404_s0] sm:$0xff]  ;;  %v1103_v34 = vld [vmem:[%s1403_s1 + $0x138] sm:$0xff] }
   0xa   :  { %638 = vmatpush.bf16.msra.mxu0 %v1069_v8  ;;  %v1081_v25 = vld [vmem:[%s1403_s1 + $0x88] sm:$0xff]  ;;  %v1064_v30 = vld [vmem:[%s1403_s1] sm:$0xff]  ;;  %v177_v33 = vunpack.c.l.b16 %v23_v29  ;;  %v1119_v35 = vld [vmem:[%s1403_s1 + $0x1b8] sm:$0xff]  ;;  %v178_v39 = vunpack.c.h.b16 %v23_v29 }
   0xb   :  { %664 = vmatpush.bf16.msra.mxu2 %v1085_v9  ;;  %v1089_v26 = vld [vmem:[%s1403_s1 + $0xc8] sm:$0xff]  ;;  %v1080_v31 = vld [vmem:[%s1403_s1 + $0x80] sm:$0xff]  ;;  %v1127_v40 = vld [vmem:[%s1403_s1 + $0x1f8] sm:$0xff] }
   0xc   :  { %677 = vmatpush.bf16.msra.mxu3 %v1093_v10  ;;  %v1073_v27 = vld [vmem:[%s1403_s1 + $0x48] sm:$0xff]  ;;  %v1088_v36 = vld [vmem:[%s1403_s1 + $0xc0] sm:$0xff]  ;;  %v1111_v41 = vld [vmem:[%s1403_s1 + $0x178] sm:$0xff]  ;;  %v186_v43 = vpack.c.b16 %v177_v33, %v177_v33  ;;  %v187_v47 = vpack.c.b16 %v178_v39, %v178_v39 }
   0xd   :  { %651 = vmatpush.bf16.msra.mxu1 %v1077_v11  ;;  %v24_v28 = vld [vmem:[%s1404_s0 + $0x8] sm:$0xff]  ;;  %v1072_v37 = vld [vmem:[%s1403_s1 + $0x40] sm:$0xff]  ;;  %v1102_v44 = vld [vmem:[%s1403_s1 + $0x130] sm:$0xff] }
   0xe   :  { %639 = vmatpush.bf16.msra.mxu0 %v1068_v12  ;;  %v179_v32 = vunpack.c.l.b16 %v24_v28  ;;  %v180_v38 = vunpack.c.h.b16 %v24_v28  ;;  %v1118_v45 = vld [vmem:[%s1403_s1 + $0x1b0] sm:$0xff]  ;;  %v1101_v50 = vld [vmem:[%s1403_s1 + $0x128] sm:$0xff]  ;;  %v1100_v54 = vld [vmem:[%s1403_s1 + $0x120] sm:$0xff] }
   0xf   :  { %665 = vmatpush.bf16.msra.mxu2 %v1084_v13  ;;  %v1126_v48 = vld [vmem:[%s1403_s1 + $0x1f0] sm:$0xff]  ;;  %v1117_v51 = vld [vmem:[%s1403_s1 + $0x1a8] sm:$0xff]  ;;  %v1116_v55 = vld [vmem:[%s1403_s1 + $0x1a0] sm:$0xff] }
  0x10   :  { %678 = vmatpush.bf16.msra.mxu3 %v1092_v14  ;;  %v188_v42 = vpack.c.b16 %v179_v32, %v179_v32  ;;  %v189_v46 = vpack.c.b16 %v180_v38, %v180_v38  ;;  %v1110_v49 = vld [vmem:[%s1403_s1 + $0x170] sm:$0xff]  ;;  %v1125_v52 = vld [vmem:[%s1403_s1 + $0x1e8] sm:$0xff]  ;;  %v1124_v56 = vld [vmem:[%s1403_s1 + $0x1e0] sm:$0xff] }
  0x11   :  { %652 = vmatpush.bf16.msra.mxu1 %v1076_v15  ;;  %v1109_v53 = vld [vmem:[%s1403_s1 + $0x168] sm:$0xff]  ;;  %v1108_v57 = vld [vmem:[%s1403_s1 + $0x160] sm:$0xff]  ;;  %v1099_v58 = vld [vmem:[%s1403_s1 + $0x118] sm:$0xff] }
  0x12   :  { %640 = vmatpush.bf16.msra.mxu0 %v1067_v16  ;;  %v1115_v59 = vld [vmem:[%s1403_s1 + $0x198] sm:$0xff]  ;;  %v1098_v62 = vld [vmem:[%s1403_s1 + $0x110] sm:$0xff]  ;;  %v1097_v2 = vld [vmem:[%s1403_s1 + $0x108] sm:$0xff] }
  0x13   :  { %666 = vmatpush.bf16.msra.mxu2 %v1083_v17  ;;  %v1123_v60 = vld [vmem:[%s1403_s1 + $0x1d8] sm:$0xff]  ;;  %v1114_v63 = vld [vmem:[%s1403_s1 + $0x190] sm:$0xff]  ;;  %v1113_v3 = vld [vmem:[%s1403_s1 + $0x188] sm:$0xff] }
  0x14   :  { %679 = vmatpush.bf16.msra.mxu3 %v1091_v18  ;;  %v1107_v61 = vld [vmem:[%s1403_s1 + $0x158] sm:$0xff]  ;;  %v1122_v0 = vld [vmem:[%s1403_s1 + $0x1d0] sm:$0xff]  ;;  %v1121_v6 = vld [vmem:[%s1403_s1 + $0x1c8] sm:$0xff] }
  0x15   :  { %653 = vmatpush.bf16.msra.mxu1 %v1075_v19  ;;  %v1106_v1 = vld [vmem:[%s1403_s1 + $0x150] sm:$0xff]  ;;  %v26_v4 = vld [vmem:[%s1404_s0 + $0x18] sm:$0xff]  ;;  %v1105_v7 = vld [vmem:[%s1403_s1 + $0x148] sm:$0xff] }
  0x16   :  { %641 = vmatpush.bf16.msra.mxu0 %v1066_v20  ;;  %v25_v5 = vld [vmem:[%s1404_s0 + $0x10] sm:$0xff]  ;;  %v183_v8 = vunpack.c.l.b16 %v26_v4  ;;  %v1096_v10 = vld [vmem:[%s1403_s1 + $0x100] sm:$0xff]  ;;  %v1135_v12 = vld [vmem:[%s1403_s1 + $0x238] sm:$0xff]  ;;  %v184_v13 = vunpack.c.h.b16 %v26_v4 }
  0x17   :  { %667 = vmatpush.bf16.msra.mxu2 %v1082_v21  ;;  %v181_v9 = vunpack.c.l.b16 %v25_v5  ;;  %v1112_v11 = vld [vmem:[%s1403_s1 + $0x180] sm:$0xff]  ;;  %v182_v16 = vunpack.c.h.b16 %v25_v5  ;;  %v1134_v19 = vld [vmem:[%s1403_s1 + $0x230] sm:$0xff] }
  0x18   :  { %680 = vmatpush.bf16.msra.mxu3 %v1090_v22  ;;  %v1120_v14 = vld [vmem:[%s1403_s1 + $0x1c0] sm:$0xff]  ;;  %v192_v17 = vpack.c.b16 %v183_v8, %v183_v8  ;;  %v193_v20 = vpack.c.b16 %v184_v13, %v184_v13  ;;  %v1133_v22 = vld [vmem:[%s1403_s1 + $0x228] sm:$0xff] }
  0x19   :  { %654 = vmatpush.bf16.msra.mxu1 %v1074_v23  ;;  %v1104_v15 = vld [vmem:[%s1403_s1 + $0x140] sm:$0xff]  ;;  %v190_v18 = vpack.c.b16 %v181_v9, %v181_v9  ;;  %v191_v21 = vpack.c.b16 %v182_v16, %v182_v16 }
  0x1a   :  { %642 = vmatpush.bf16.msra.mxu0 %v1065_v24  ;;  %v1132_v23 = vld [vmem:[%s1403_s1 + $0x220] sm:$0xff]  ;;  %v1131_v24 = vld [vmem:[%s1403_s1 + $0x218] sm:$0xff] }
  0x1b   :  { %668 = vmatpush.bf16.msra.mxu2 %v1081_v25  ;;  %v1130_v25 = vld [vmem:[%s1403_s1 + $0x210] sm:$0xff]  ;;  %v1128_v29 = vld [vmem:[%s1403_s1 + $0x200] sm:$0xff] }
  0x1c   :  { %681 = vmatpush.bf16.msra.mxu3 %v1089_v26  ;;  %v1129_v26 = vld [vmem:[%s1403_s1 + $0x208] sm:$0xff] }
  0x1d   :  { %655 = vmatpush.bf16.msra.mxu1 %v1073_v27  ;;  %v27_v27 = vld [vmem:[%s1404_s0 + $0x20] sm:$0xf] }
  0x1e   :  { %643 = vmatpush.bf16.msra.mxu0 %v1064_v30  ;;  %v185_v28 = vunpack.c.l.b16 %v27_v27 }
  0x1f   :  { %669 = vmatpush.bf16.msra.mxu2 %v1080_v31 }
  0x20   :  { %682 = vmatpush.bf16.msra.mxu3 %v1088_v36  ;;  %v194_v30 = vpack.c.b16 %v185_v28, %v185_v28 }
  0x21   :  { %656 = vmatpush.bf16.msra.mxu1 %v1072_v37  ;;  %644 = vmatmul.bf16.vlgmr.msra.gmra.mxu0 %v186_v43 }
  0x22   :  { %688 = vmatpush.bf16.msrb.mxu0 %v1103_v34  ;;  %670 = vmatmul.bf16.vlgmr.msra.gmra.mxu2 %v188_v42 }
  0x23   :  { %714 = vmatpush.bf16.msrb.mxu2 %v1119_v35  ;;  %683 = vmatmul.bf16.vlgmr.msra.gmra.mxu3 %v189_v46 }
  0x24   :  { %727 = vmatpush.bf16.msrb.mxu3 %v1127_v40  ;;  %657 = vmatmul.bf16.vlgmr.msra.gmra.mxu1 %v187_v47 }
  0x25   :  { %701 = vmatpush.bf16.msrb.mxu1 %v1111_v41 }
  0x26   :  { %689 = vmatpush.bf16.msrb.mxu0 %v1102_v44 }
  0x27   :  { %715 = vmatpush.bf16.msrb.mxu2 %v1118_v45 }
  0x28   :  { %728 = vmatpush.bf16.msrb.mxu3 %v1126_v48 }
  0x29   :  { %702 = vmatpush.bf16.msrb.mxu1 %v1110_v49 }
  0x2a   :  { %690 = vmatpush.bf16.msrb.mxu0 %v1101_v50 }
  0x2b   :  { %716 = vmatpush.bf16.msrb.mxu2 %v1117_v51 }
  0x2c   :  { %729 = vmatpush.bf16.msrb.mxu3 %v1125_v52 }
  0x2d   :  { %703 = vmatpush.bf16.msrb.mxu1 %v1109_v53 }
  0x2e   :  { %691 = vmatpush.bf16.msrb.mxu0 %v1100_v54  ;;  %v1136_v54 = vld [vmem:[%s1405_s2] ss:$0 sm:$0xff] }
  0x2f   :  { %717 = vmatpush.bf16.msrb.mxu2 %v1116_v55 }
  0x30   :  { %730 = vmatpush.bf16.msrb.mxu3 %v1124_v56 }
  0x31   :  { %704 = vmatpush.bf16.msrb.mxu1 %v1108_v57  ;;  %v1137_v57 = vld [vmem:[%s1406_s3] ss:$0 sm:$0xff] }
  0x32   :  { %692 = vmatpush.bf16.msrb.mxu0 %v1099_v58 }
  0x33   :  { %718 = vmatpush.bf16.msrb.mxu2 %v1115_v59 }
  0x34   :  { %731 = vmatpush.bf16.msrb.mxu3 %v1123_v60 }
  0x35   :  { %705 = vmatpush.bf16.msrb.mxu1 %v1107_v61 }
  0x36   :  { %693 = vmatpush.bf16.msrb.mxu0 %v1098_v62 }
  0x37   :  { %719 = vmatpush.bf16.msrb.mxu2 %v1114_v63 }
  0x38   :  { %732 = vmatpush.bf16.msrb.mxu3 %v1122_v0 }
  0x39   :  { %706 = vmatpush.bf16.msrb.mxu1 %v1106_v1 }
  0x3a   :  { %694 = vmatpush.bf16.msrb.mxu0 %v1097_v2 }
  0x3b   :  { %720 = vmatpush.bf16.msrb.mxu2 %v1113_v3 }
  0x3c   :  { %733 = vmatpush.bf16.msrb.mxu3 %v1121_v6 }
  0x3d   :  { %707 = vmatpush.bf16.msrb.mxu1 %v1105_v7 }
  0x3e   :  { %695 = vmatpush.bf16.msrb.mxu0 %v1096_v10 }
  0x3f   :  { %721 = vmatpush.bf16.msrb.mxu2 %v1112_v11 }
  0x40   :  { %734 = vmatpush.bf16.msrb.mxu3 %v1120_v14 }
  0x41   :  { %708 = vmatpush.bf16.msrb.mxu1 %v1104_v15  ;;  %696 = vmatmul.bf16.vlgmr.msrb.gmra.mxu0 %v190_v18 }
  0x42   :  { %740 = vmatpush.bf16.msra.mxu0 %v1135_v12  ;;  %722 = vmatmul.bf16.vlgmr.msrb.gmra.mxu2 %v192_v17 }
  0x43   :  { %735 = vmatmul.bf16.vlgmr.msrb.gmra.mxu3 %v193_v20 }
  0x44   :  { %709 = vmatmul.bf16.vlgmr.msrb.gmra.mxu1 %v191_v21 }
  0x46   :  { %741 = vmatpush.bf16.msra.mxu0 %v1134_v19 }
  0x4a   :  { %742 = vmatpush.bf16.msra.mxu0 %v1133_v22 }
  0x4e   :  { %743 = vmatpush.bf16.msra.mxu0 %v1132_v23 }
  0x52   :  { %744 = vmatpush.bf16.msra.mxu0 %v1131_v24 }
  0x56   :  { %745 = vmatpush.bf16.msra.mxu0 %v1130_v25 }
  0x5a   :  { %746 = vmatpush.bf16.msra.mxu0 %v1129_v26 }
  0x5e   :  { %747 = vmatpush.bf16.msra.mxu0 %v1128_v29 }
  0x61   :  { %748 = vmatmul.bf16.vlgmr.msra.gmra.mxu0 %v194_v30 }
  0x9e   :  { %v645_v31 = vpop.f32.mrf.mxu0 }
  0xa1   :  { %v658_v32 = vpop.f32.mrf.mxu1 }
  0xa2   :  { %v659_v41 = vadd.f32 %v658_v32, %v645_v31 }
  0xa5   :  { %v671_v33 = vpop.f32.mrf.mxu2 }
  0xa6   :  { %v684_v34 = vpop.f32.mrf.mxu3  ;;  %v647_v35 = vpop.f32.mrf.mxu0  ;;  %v672_v43 = vadd.f32 %v671_v33, %v659_v41 }
  0xa8   :  { %v685_v47 = vadd.f32 %v684_v34, %v672_v43 }
  0xa9   :  { %v660_v36 = vpop.f32.mrf.mxu1 }
  0xad   :  { %v673_v37 = vpop.f32.mrf.mxu2 }
  0xae   :  { %v686_v38 = vpop.f32.mrf.mxu3 }
  0xbe   :  { %v697_v39 = vpop.f32.mrf.mxu0 }
  0xbf   :  { %v698_v49 = vadd.f32 %v697_v39, %v685_v47 }
  0xc1   :  { %v710_v40 = vpop.f32.mrf.mxu1 }
  0xc2   :  { %v711_v51 = vadd.f32 %v710_v40, %v698_v49 }
  0xc5   :  { %v723_v42 = vpop.f32.mrf.mxu2 }
  0xc6   :  { %v736_v44 = vpop.f32.mrf.mxu3  ;;  %v699_v45 = vpop.f32.mrf.mxu0  ;;  %v724_v52 = vadd.f32 %v723_v42, %v711_v51 }
  0xc8   :  { %v737_v53 = vadd.f32 %v736_v44, %v724_v52 }
  0xc9   :  { %v712_v46 = vpop.f32.mrf.mxu1 }
  0xcd   :  { %v725_v48 = vpop.f32.mrf.mxu2 }
  0xce   :  { %v738_v50 = vpop.f32.mrf.mxu3 }
  0xde   :  { %v749_v55 = vpop.f32.mrf.mxu0 }
  0xdf   :  { %v750_v56 = vadd.f32 %v749_v55, %v737_v53 }
  0xe1   :  { %v763_v58 = vmul.f32 %v1136_v54, %v750_v56 }
  0xe3   :  { %v768_v59 = vadd.f32 %v1137_v57, %v763_v58 }
  0xe5   :  { %v769_v60 = vmax.f32 %v768_v59, 0.0 }
  0xe6   :  { %v751_v61 = vpop.f32.mrf.mxu0 }
  0xe7   :  { %v770_v62 = vpack.c.bf16 %v769_v60, %v769_v60 }
  0xe9   :  { %771 = vst [vmem:[%s1407_s4] sm:$0xf] %v770_v62 }

// kernel: _lambda_.34
= control target key start
LH: loop header
LB: loop body
LE: loop exit
PB: predicated region body
PF: predicated region fallthrough
CT: control target
= control target key end

     0   :  { %s226_s1 = inlined_call_operand.vmem [shape: bf16[128,128], index: 1, kind: input, shape index: {}]   ;;  %s227_s2 = inlined_call_operand.vmem [shape: f32[1,128], index: 2, kind: input, shape index: {}]   ;;  %s228_s3 = inlined_call_operand.vmem [shape: f32[1,128], index: 3, kind: input, shape index: {}]   ;;  %s229_s0 = inlined_call_operand.vmem [shape: bf16[8,128], index: 0, kind: input, shape index: {}]   ;;  %s230_s4 = inlined_call_operand.vmem [shape: bf16[8,128], index: 4, kind: output, shape index: {}]  }
   0x1   :  { %v162_v0 = vld [vmem:[%s226_s1 + $0x38] sm:$0xff]  ;;  %v161_v1 = vld [vmem:[%s226_s1 + $0x30] sm:$0xff]  ;;  %v160_v2 = vld [vmem:[%s226_s1 + $0x28] sm:$0xff] }
   0x2   :  { %88 = vmatpush.bf16.msra.mxu0 %v162_v0  ;;  %v159_v3 = vld [vmem:[%s226_s1 + $0x20] sm:$0xff]  ;;  %v158_v4 = vld [vmem:[%s226_s1 + $0x18] sm:$0xff]  ;;  %v157_v5 = vld [vmem:[%s226_s1 + $0x10] sm:$0xff] }
   0x3   :  { %v156_v6 = vld [vmem:[%s226_s1 + $0x8] sm:$0xff]  ;;  %v155_v7 = vld [vmem:[%s226_s1] sm:$0xff] }
   0x4   :  { %v23_v8 = vld [vmem:[%s229_s0] sm:$0xf] }
   0x5   :  { %v163_v9 = vld [vmem:[%s227_s2] ss:$0 sm:$0xff] }
   0x6   :  { %89 = vmatpush.bf16.msra.mxu0 %v161_v1  ;;  %v164_v10 = vld [vmem:[%s228_s3] ss:$0 sm:$0xff] }
   0xa   :  { %90 = vmatpush.bf16.msra.mxu0 %v160_v2 }
   0xe   :  { %91 = vmatpush.bf16.msra.mxu0 %v159_v3 }
  0x12   :  { %92 = vmatpush.bf16.msra.mxu0 %v158_v4 }
  0x16   :  { %93 = vmatpush.bf16.msra.mxu0 %v157_v5 }
  0x1a   :  { %94 = vmatpush.bf16.msra.mxu0 %v156_v6 }
  0x1e   :  { %95 = vmatpush.bf16.msra.mxu0 %v155_v7 }
  0x21   :  { %96 = vmatmul.bf16.vlgmr.msra.gmra.mxu0 %v23_v8 }
  0x9e   :  { %v97_v11 = vpop.f32.mrf.mxu0 }
  0x9f   :  { %v111_v12 = vmul.f32 %v163_v9, %v97_v11 }
  0xa1   :  { %v116_v13 = vadd.f32 %v164_v10, %v111_v12 }
  0xa3   :  { %v117_v14 = vpack.c.bf16 %v116_v13, %v116_v13 }
  0xa5   :  { %118 = vst [vmem:[%s230_s4] sm:$0xf] %v117_v14 }
  0xa6   :  { %v99_v15 = vpop.f32.mrf.mxu0 }

// kernel: _lambda_.35
= control target key start
LH: loop header
LB: loop body
LE: loop exit
PB: predicated region body
PF: predicated region fallthrough
CT: control target
= control target key end

     0   :  { %s1417_s1 = inlined_call_operand.vmem [shape: bf16[1152,128], index: 1, kind: input, shape index: {}]   ;;  %s1418_s0 = inlined_call_operand.vmem [shape: bf16[8,1152], index: 0, kind: input, shape index: {}]   ;;  %s1419_s2 = inlined_call_operand.vmem [shape: f32[1,128], index: 2, kind: input, shape index: {}]   ;;  %s1420_s3 = inlined_call_operand.vmem [shape: f32[1,128], index: 3, kind: input, shape index: {}]   ;;  %s1421_s4 = inlined_call_operand.vmem [shape: bf16[8,128], index: 4, kind: input, shape index: {}]   ;;  %s1422_s5 = inlined_call_operand.vmem [shape: bf16[8,128], index: 5, kind: output, shape index: {}]  }
   0x1   :  { %v1077_v0 = vld [vmem:[%s1417_s1 + $0x38] sm:$0xff]  ;;  %v1076_v4 = vld [vmem:[%s1417_s1 + $0x30] sm:$0xff]  ;;  %v1075_v8 = vld [vmem:[%s1417_s1 + $0x28] sm:$0xff] }
   0x2   :  { %v1093_v1 = vld [vmem:[%s1417_s1 + $0xb8] sm:$0xff]  ;;  %639 = vmatpush.bf16.msra.mxu0 %v1077_v0  ;;  %v1092_v5 = vld [vmem:[%s1417_s1 + $0xb0] sm:$0xff]  ;;  %v1091_v9 = vld [vmem:[%s1417_s1 + $0xa8] sm:$0xff] }
   0x3   :  { %v1101_v2 = vld [vmem:[%s1417_s1 + $0xf8] sm:$0xff]  ;;  %665 = vmatpush.bf16.msra.mxu2 %v1093_v1  ;;  %v1100_v6 = vld [vmem:[%s1417_s1 + $0xf0] sm:$0xff]  ;;  %v1099_v10 = vld [vmem:[%s1417_s1 + $0xe8] sm:$0xff] }
   0x4   :  { %v1085_v3 = vld [vmem:[%s1417_s1 + $0x78] sm:$0xff]  ;;  %678 = vmatpush.bf16.msra.mxu3 %v1101_v2  ;;  %v1084_v7 = vld [vmem:[%s1417_s1 + $0x70] sm:$0xff]  ;;  %v1083_v11 = vld [vmem:[%s1417_s1 + $0x68] sm:$0xff] }
   0x5   :  { %652 = vmatpush.bf16.msra.mxu1 %v1085_v3  ;;  %v1074_v12 = vld [vmem:[%s1417_s1 + $0x20] sm:$0xff]  ;;  %v1073_v16 = vld [vmem:[%s1417_s1 + $0x18] sm:$0xff]  ;;  %v1072_v20 = vld [vmem:[%s1417_s1 + $0x10] sm:$0xff] }
   0x6   :  { %640 = vmatpush.bf16.msra.mxu0 %v1076_v4  ;;  %v1090_v13 = vld [vmem:[%s1417_s1 + $0xa0] sm:$0xff]  ;;  %v1089_v17 = vld [vmem:[%s1417_s1 + $0x98] sm:$0xff]  ;;  %v1088_v21 = vld [vmem:[%s1417_s1 + $0x90] sm:$0xff] }
   0x7   :  { %666 = vmatpush.bf16.msra.mxu2 %v1092_v5  ;;  %v1098_v14 = vld [vmem:[%s1417_s1 + $0xe0] sm:$0xff]  ;;  %v1097_v18 = vld [vmem:[%s1417_s1 + $0xd8] sm:$0xff]  ;;  %v1096_v22 = vld [vmem:[%s1417_s1 + $0xd0] sm:$0xff] }
   0x8   :  { %679 = vmatpush.bf16.msra.mxu3 %v1100_v6  ;;  %v1082_v15 = vld [vmem:[%s1417_s1 + $0x60] sm:$0xff]  ;;  %v1081_v19 = vld [vmem:[%s1417_s1 + $0x58] sm:$0xff]  ;;  %v1080_v23 = vld [vmem:[%s1417_s1 + $0x50] sm:$0xff] }
   0x9   :  { %653 = vmatpush.bf16.msra.mxu1 %v1084_v7  ;;  %v1071_v24 = vld [vmem:[%s1417_s1 + $0x8] sm:$0xff]  ;;  %v26_v29 = vld [vmem:[%s1418_s0] sm:$0xff]  ;;  %v1109_v34 = vld [vmem:[%s1417_s1 + $0x138] sm:$0xff] }
   0xa   :  { %641 = vmatpush.bf16.msra.mxu0 %v1075_v8  ;;  %v1087_v25 = vld [vmem:[%s1417_s1 + $0x88] sm:$0xff]  ;;  %v1070_v30 = vld [vmem:[%s1417_s1] sm:$0xff]  ;;  %v180_v33 = vunpack.c.l.b16 %v26_v29  ;;  %v1125_v35 = vld [vmem:[%s1417_s1 + $0x1b8] sm:$0xff]  ;;  %v181_v39 = vunpack.c.h.b16 %v26_v29 }
   0xb   :  { %667 = vmatpush.bf16.msra.mxu2 %v1091_v9  ;;  %v1095_v26 = vld [vmem:[%s1417_s1 + $0xc8] sm:$0xff]  ;;  %v1086_v31 = vld [vmem:[%s1417_s1 + $0x80] sm:$0xff]  ;;  %v1133_v40 = vld [vmem:[%s1417_s1 + $0x1f8] sm:$0xff] }
   0xc   :  { %680 = vmatpush.bf16.msra.mxu3 %v1099_v10  ;;  %v1079_v27 = vld [vmem:[%s1417_s1 + $0x48] sm:$0xff]  ;;  %v1094_v36 = vld [vmem:[%s1417_s1 + $0xc0] sm:$0xff]  ;;  %v1117_v41 = vld [vmem:[%s1417_s1 + $0x178] sm:$0xff]  ;;  %v189_v43 = vpack.c.b16 %v180_v33, %v180_v33  ;;  %v190_v47 = vpack.c.b16 %v181_v39, %v181_v39 }
   0xd   :  { %654 = vmatpush.bf16.msra.mxu1 %v1083_v11  ;;  %v27_v28 = vld [vmem:[%s1418_s0 + $0x8] sm:$0xff]  ;;  %v1078_v37 = vld [vmem:[%s1417_s1 + $0x40] sm:$0xff]  ;;  %v1108_v44 = vld [vmem:[%s1417_s1 + $0x130] sm:$0xff] }
   0xe   :  { %642 = vmatpush.bf16.msra.mxu0 %v1074_v12  ;;  %v182_v32 = vunpack.c.l.b16 %v27_v28  ;;  %v183_v38 = vunpack.c.h.b16 %v27_v28  ;;  %v1124_v45 = vld [vmem:[%s1417_s1 + $0x1b0] sm:$0xff]  ;;  %v1107_v50 = vld [vmem:[%s1417_s1 + $0x128] sm:$0xff]  ;;  %v1106_v54 = vld [vmem:[%s1417_s1 + $0x120] sm:$0xff] }
   0xf   :  { %668 = vmatpush.bf16.msra.mxu2 %v1090_v13  ;;  %v1132_v48 = vld [vmem:[%s1417_s1 + $0x1f0] sm:$0xff]  ;;  %v1123_v51 = vld [vmem:[%s1417_s1 + $0x1a8] sm:$0xff]  ;;  %v1122_v55 = vld [vmem:[%s1417_s1 + $0x1a0] sm:$0xff] }
  0x10   :  { %681 = vmatpush.bf16.msra.mxu3 %v1098_v14  ;;  %v191_v42 = vpack.c.b16 %v182_v32, %v182_v32  ;;  %v192_v46 = vpack.c.b16 %v183_v38, %v183_v38  ;;  %v1116_v49 = vld [vmem:[%s1417_s1 + $0x170] sm:$0xff]  ;;  %v1131_v52 = vld [vmem:[%s1417_s1 + $0x1e8] sm:$0xff]  ;;  %v1130_v56 = vld [vmem:[%s1417_s1 + $0x1e0] sm:$0xff] }
  0x11   :  { %655 = vmatpush.bf16.msra.mxu1 %v1082_v15  ;;  %v1115_v53 = vld [vmem:[%s1417_s1 + $0x168] sm:$0xff]  ;;  %v1114_v57 = vld [vmem:[%s1417_s1 + $0x160] sm:$0xff]  ;;  %v1105_v58 = vld [vmem:[%s1417_s1 + $0x118] sm:$0xff] }
  0x12   :  { %643 = vmatpush.bf16.msra.mxu0 %v1073_v16  ;;  %v1121_v59 = vld [vmem:[%s1417_s1 + $0x198] sm:$0xff]  ;;  %v1104_v62 = vld [vmem:[%s1417_s1 + $0x110] sm:$0xff]  ;;  %v1103_v2 = vld [vmem:[%s1417_s1 + $0x108] sm:$0xff] }
  0x13   :  { %669 = vmatpush.bf16.msra.mxu2 %v1089_v17  ;;  %v1129_v60 = vld [vmem:[%s1417_s1 + $0x1d8] sm:$0xff]  ;;  %v1120_v63 = vld [vmem:[%s1417_s1 + $0x190] sm:$0xff]  ;;  %v1119_v3 = vld [vmem:[%s1417_s1 + $0x188] sm:$0xff] }
  0x14   :  { %682 = vmatpush.bf16.msra.mxu3 %v1097_v18  ;;  %v1113_v61 = vld [vmem:[%s1417_s1 + $0x158] sm:$0xff]  ;;  %v1128_v0 = vld [vmem:[%s1417_s1 + $0x1d0] sm:$0xff]  ;;  %v1127_v6 = vld [vmem:[%s1417_s1 + $0x1c8] sm:$0xff] }
  0x15   :  { %656 = vmatpush.bf16.msra.mxu1 %v1081_v19  ;;  %v1112_v1 = vld [vmem:[%s1417_s1 + $0x150] sm:$0xff]  ;;  %v29_v4 = vld [vmem:[%s1418_s0 + $0x18] sm:$0xff]  ;;  %v1111_v7 = vld [vmem:[%s1417_s1 + $0x148] sm:$0xff] }
  0x16   :  { %644 = vmatpush.bf16.msra.mxu0 %v1072_v20  ;;  %v28_v5 = vld [vmem:[%s1418_s0 + $0x10] sm:$0xff]  ;;  %v186_v8 = vunpack.c.l.b16 %v29_v4  ;;  %v1102_v10 = vld [vmem:[%s1417_s1 + $0x100] sm:$0xff]  ;;  %v1141_v12 = vld [vmem:[%s1417_s1 + $0x238] sm:$0xff]  ;;  %v187_v13 = vunpack.c.h.b16 %v29_v4 }
  0x17   :  { %670 = vmatpush.bf16.msra.mxu2 %v1088_v21  ;;  %v184_v9 = vunpack.c.l.b16 %v28_v5  ;;  %v1118_v11 = vld [vmem:[%s1417_s1 + $0x180] sm:$0xff]  ;;  %v185_v16 = vunpack.c.h.b16 %v28_v5  ;;  %v1140_v19 = vld [vmem:[%s1417_s1 + $0x230] sm:$0xff] }
  0x18   :  { %683 = vmatpush.bf16.msra.mxu3 %v1096_v22  ;;  %v1126_v14 = vld [vmem:[%s1417_s1 + $0x1c0] sm:$0xff]  ;;  %v195_v17 = vpack.c.b16 %v186_v8, %v186_v8  ;;  %v196_v20 = vpack.c.b16 %v187_v13, %v187_v13  ;;  %v1139_v22 = vld [vmem:[%s1417_s1 + $0x228] sm:$0xff] }
  0x19   :  { %657 = vmatpush.bf16.msra.mxu1 %v1080_v23  ;;  %v1110_v15 = vld [vmem:[%s1417_s1 + $0x140] sm:$0xff]  ;;  %v193_v18 = vpack.c.b16 %v184_v9, %v184_v9  ;;  %v194_v21 = vpack.c.b16 %v185_v16, %v185_v16 }
  0x1a   :  { %645 = vmatpush.bf16.msra.mxu0 %v1071_v24  ;;  %v1138_v23 = vld [vmem:[%s1417_s1 + $0x220] sm:$0xff]  ;;  %v1137_v24 = vld [vmem:[%s1417_s1 + $0x218] sm:$0xff] }
  0x1b   :  { %671 = vmatpush.bf16.msra.mxu2 %v1087_v25  ;;  %v1136_v25 = vld [vmem:[%s1417_s1 + $0x210] sm:$0xff]  ;;  %v1134_v29 = vld [vmem:[%s1417_s1 + $0x200] sm:$0xff] }
  0x1c   :  { %684 = vmatpush.bf16.msra.mxu3 %v1095_v26  ;;  %v1135_v26 = vld [vmem:[%s1417_s1 + $0x208] sm:$0xff] }
  0x1d   :  { %658 = vmatpush.bf16.msra.mxu1 %v1079_v27  ;;  %v30_v27 = vld [vmem:[%s1418_s0 + $0x20] sm:$0xf] }
  0x1e   :  { %646 = vmatpush.bf16.msra.mxu0 %v1070_v30  ;;  %v188_v28 = vunpack.c.l.b16 %v30_v27 }
  0x1f   :  { %672 = vmatpush.bf16.msra.mxu2 %v1086_v31 }
  0x20   :  { %685 = vmatpush.bf16.msra.mxu3 %v1094_v36  ;;  %v197_v30 = vpack.c.b16 %v188_v28, %v188_v28 }
  0x21   :  { %659 = vmatpush.bf16.msra.mxu1 %v1078_v37  ;;  %647 = vmatmul.bf16.vlgmr.msra.gmra.mxu0 %v189_v43 }
  0x22   :  { %691 = vmatpush.bf16.msrb.mxu0 %v1109_v34  ;;  %673 = vmatmul.bf16.vlgmr.msra.gmra.mxu2 %v191_v42 }
  0x23   :  { %717 = vmatpush.bf16.msrb.mxu2 %v1125_v35  ;;  %686 = vmatmul.bf16.vlgmr.msra.gmra.mxu3 %v192_v46 }
  0x24   :  { %730 = vmatpush.bf16.msrb.mxu3 %v1133_v40  ;;  %660 = vmatmul.bf16.vlgmr.msra.gmra.mxu1 %v190_v47 }
  0x25   :  { %704 = vmatpush.bf16.msrb.mxu1 %v1117_v41 }
  0x26   :  { %692 = vmatpush.bf16.msrb.mxu0 %v1108_v44 }
  0x27   :  { %718 = vmatpush.bf16.msrb.mxu2 %v1124_v45 }
  0x28   :  { %731 = vmatpush.bf16.msrb.mxu3 %v1132_v48 }
  0x29   :  { %705 = vmatpush.bf16.msrb.mxu1 %v1116_v49 }
  0x2a   :  { %693 = vmatpush.bf16.msrb.mxu0 %v1107_v50 }
  0x2b   :  { %719 = vmatpush.bf16.msrb.mxu2 %v1123_v51 }
  0x2c   :  { %732 = vmatpush.bf16.msrb.mxu3 %v1131_v52 }
  0x2d   :  { %706 = vmatpush.bf16.msrb.mxu1 %v1115_v53 }
  0x2e   :  { %694 = vmatpush.bf16.msrb.mxu0 %v1106_v54  ;;  %v1142_v54 = vld [vmem:[%s1419_s2] ss:$0 sm:$0xff] }
  0x2f   :  { %720 = vmatpush.bf16.msrb.mxu2 %v1122_v55 }
  0x30   :  { %733 = vmatpush.bf16.msrb.mxu3 %v1130_v56  ;;  %v772_v56 = vld [vmem:[%s1421_s4] sm:$0xf] }
  0x31   :  { %707 = vmatpush.bf16.msrb.mxu1 %v1114_v57 }
  0x32   :  { %695 = vmatpush.bf16.msrb.mxu0 %v1105_v58  ;;  %v1143_v58 = vld [vmem:[%s1420_s3] ss:$0 sm:$0xff] }
  0x33   :  { %721 = vmatpush.bf16.msrb.mxu2 %v1121_v59 }
  0x34   :  { %734 = vmatpush.bf16.msrb.mxu3 %v1129_v60  ;;  %v773_v60 = vunpack.c.l.bf16 %v772_v56 }
  0x35   :  { %708 = vmatpush.bf16.msrb.mxu1 %v1113_v61 }
  0x36   :  { %696 = vmatpush.bf16.msrb.mxu0 %v1104_v62 }
  0x37   :  { %722 = vmatpush.bf16.msrb.mxu2 %v1120_v63 }
  0x38   :  { %735 = vmatpush.bf16.msrb.mxu3 %v1128_v0 }
  0x39   :  { %709 = vmatpush.bf16.msrb.mxu1 %v1112_v1 }
  0x3a   :  { %697 = vmatpush.bf16.msrb.mxu0 %v1103_v2 }
  0x3b   :  { %723 = vmatpush.bf16.msrb.mxu2 %v1119_v3 }
  0x3c   :  { %736 = vmatpush.bf16.msrb.mxu3 %v1127_v6 }
  0x3d   :  { %710 = vmatpush.bf16.msrb.mxu1 %v1111_v7 }
  0x3e   :  { %698 = vmatpush.bf16.msrb.mxu0 %v1102_v10 }
  0x3f   :  { %724 = vmatpush.bf16.msrb.mxu2 %v1118_v11 }
  0x40   :  { %737 = vmatpush.bf16.msrb.mxu3 %v1126_v14 }
  0x41   :  { %711 = vmatpush.bf16.msrb.mxu1 %v1110_v15  ;;  %699 = vmatmul.bf16.vlgmr.msrb.gmra.mxu0 %v193_v18 }
  0x42   :  { %743 = vmatpush.bf16.msra.mxu0 %v1141_v12  ;;  %725 = vmatmul.bf16.vlgmr.msrb.gmra.mxu2 %v195_v17 }
  0x43   :  { %738 = vmatmul.bf16.vlgmr.msrb.gmra.mxu3 %v196_v20 }
  0x44   :  { %712 = vmatmul.bf16.vlgmr.msrb.gmra.mxu1 %v194_v21 }
  0x46   :  { %744 = vmatpush.bf16.msra.mxu0 %v1140_v19 }
  0x4a   :  { %745 = vmatpush.bf16.msra.mxu0 %v1139_v22 }
  0x4e   :  { %746 = vmatpush.bf16.msra.mxu0 %v1138_v23 }
  0x52   :  { %747 = vmatpush.bf16.msra.mxu0 %v1137_v24 }
  0x56   :  { %748 = vmatpush.bf16.msra.mxu0 %v1136_v25 }
  0x5a   :  { %749 = vmatpush.bf16.msra.mxu0 %v1135_v26 }
  0x5e   :  { %750 = vmatpush.bf16.msra.mxu0 %v1134_v29 }
  0x61   :  { %751 = vmatmul.bf16.vlgmr.msra.gmra.mxu0 %v197_v30 }
  0x9e   :  { %v648_v31 = vpop.f32.mrf.mxu0 }
  0xa1   :  { %v661_v32 = vpop.f32.mrf.mxu1 }
  0xa2   :  { %v662_v41 = vadd.f32 %v661_v32, %v648_v31 }
  0xa5   :  { %v674_v33 = vpop.f32.mrf.mxu2 }
  0xa6   :  { %v687_v34 = vpop.f32.mrf.mxu3  ;;  %v650_v35 = vpop.f32.mrf.mxu0  ;;  %v675_v43 = vadd.f32 %v674_v33, %v662_v41 }
  0xa8   :  { %v688_v47 = vadd.f32 %v687_v34, %v675_v43 }
  0xa9   :  { %v663_v36 = vpop.f32.mrf.mxu1 }
  0xad   :  { %v676_v37 = vpop.f32.mrf.mxu2 }
  0xae   :  { %v689_v38 = vpop.f32.mrf.mxu3 }
  0xbe   :  { %v700_v39 = vpop.f32.mrf.mxu0 }
  0xbf   :  { %v701_v49 = vadd.f32 %v700_v39, %v688_v47 }
  0xc1   :  { %v713_v40 = vpop.f32.mrf.mxu1 }
  0xc2   :  { %v714_v51 = vadd.f32 %v713_v40, %v701_v49 }
  0xc5   :  { %v726_v42 = vpop.f32.mrf.mxu2 }
  0xc6   :  { %v739_v44 = vpop.f32.mrf.mxu3  ;;  %v702_v45 = vpop.f32.mrf.mxu0  ;;  %v727_v52 = vadd.f32 %v726_v42, %v714_v51 }
  0xc8   :  { %v740_v53 = vadd.f32 %v739_v44, %v727_v52 }
  0xc9   :  { %v715_v46 = vpop.f32.mrf.mxu1 }
  0xcd   :  { %v728_v48 = vpop.f32.mrf.mxu2 }
  0xce   :  { %v741_v50 = vpop.f32.mrf.mxu3 }
  0xde   :  { %v752_v55 = vpop.f32.mrf.mxu0 }
  0xdf   :  { %v753_v57 = vadd.f32 %v752_v55, %v740_v53 }
  0xe1   :  { %v766_v59 = vmul.f32 %v1142_v54, %v753_v57 }
  0xe3   :  { %v771_v61 = vadd.f32 %v1143_v58, %v766_v59 }
  0xe5   :  { %v774_v62 = vadd.f32 %v773_v60, %v771_v61 }
  0xe6   :  { %v754_v63 = vpop.f32.mrf.mxu0 }
  0xe7   :  { %v775_v0 = vmax.f32 %v774_v62, 0.0 }
  0xe9   :  { %v776_v1 = vpack.c.bf16 %v775_v0, %v775_v0 }
  0xeb   :  { %777 = vst [vmem:[%s1422_s5] sm:$0xf] %v776_v1 }

// kernel: _lambda_.43
= control target key start
LH: loop header
LB: loop body
LE: loop exit
PB: predicated region body
PF: predicated region fallthrough
CT: control target
= control target key end

     0   :  { %s255_s0 = inlined_call_operand.vmem [shape: bf16[2,1,128], index: 0, kind: input, shape index: {}]   ;;  %s256_s1 = inlined_call_operand.vmem [shape: bf16[128,128], index: 1, kind: input, shape index: {}]   ;;  %s257_s2 = inlined_call_operand.vmem [shape: f32[1,128], index: 2, kind: input, shape index: {}]   ;;  %s258_s3 = inlined_call_operand.hbm [shape: f32[2,128], index: 3, kind: output, shape index: {}]  }
   0x1   :  { %v169_v0 = vld [vmem:[%s256_s1 + $0x38] sm:$0xff]  ;;  %v168_v1 = vld [vmem:[%s256_s1 + $0x30] sm:$0xff] }
   0x2   :  { %100 = vmatpush.bf16.msra.mxu0 %v169_v0 }
   0x3   :  { %8 = vsyncpa [#allocation3], 0  ;;  %v167_v2 = vld [vmem:[%s256_s1 + $0x28] sm:$0xff]  ;;  %v16_v3 = vld [vmem:[%s255_s0 + $0x1] sm:$0x1]  ;;  %vm48_vm0 = vcmask 1041409  }
   0x4   :  { %v166_v4 = vld [vmem:[%s256_s1 + $0x20] sm:$0xff]  ;;  %v18_v5 = vunpack.c.l.bf16 %v16_v3  ;;  %v165_v7 = vld [vmem:[%s256_s1 + $0x18] sm:$0xff]  ;;  %v164_v10 = vld [vmem:[%s256_s1 + $0x10] sm:$0xff]  ;;  %s198_s6 = smov [#allocation2]   ;;  %s121_s10 = sshll.u32 %s258_s3, 4  ;;  %s122_s10 = int_to_ptr.hbm [resolvable:$true] %s121_s10 }
   0x5   :  { %v15_v6 = vld [vmem:[%s255_s0] sm:$0x1]  ;;  %v163_v13 = vld [vmem:[%s256_s1 + $0x8] sm:$0xff]  ;;  %s119_s7 = sshll.u32 %s198_s6, 4  ;;  %s120_s7 = int_to_ptr.vmem [resolvable:$true] %s119_s7 }
   0x6   :  { %101 = vmatpush.bf16.msra.mxu0 %v168_v1  ;;  %v17_v8 = vunpack.c.l.bf16 %v15_v6  ;;  %v22_v9 = vpack.c.bf16 %v18_v5, %v18_v5  ;;  %v162_v16 = vld [vmem:[%s256_s1] sm:$0xff] }
   0x7   :  { %v171_v19 = vld [vmem:[%s257_s2] ss:$0 sm:$0xff] }
   0x8   :  { %v21_v11 = vpack.c.bf16 %v17_v8, %v17_v8  ;;  %v46_v12 = vunpack.c.l.b16 %v22_v9 }
   0xa   :  { %102 = vmatpush.bf16.msra.mxu0 %v167_v2  ;;  %v45_v14 = vunpack.c.l.b16 %v21_v11  ;;  %v47_v15 = vrot.slane %v46_v12, 7 }
   0xc   :  { %v49_v17 = vsel %vm48_vm0, %v47_v15, %v45_v14 }
   0xd   :  { %v50_v18 = vpack.c.b16 %v49_v17, %v49_v17 }
   0xe   :  { %103 = vmatpush.bf16.msra.mxu0 %v166_v4 }
  0x12   :  { %104 = vmatpush.bf16.msra.mxu0 %v165_v7 }
  0x16   :  { %105 = vmatpush.bf16.msra.mxu0 %v164_v10 }
  0x1a   :  { %106 = vmatpush.bf16.msra.mxu0 %v163_v13 }
  0x1e   :  { %107 = vmatpush.bf16.msra.mxu0 %v162_v16 }
  0x21   :  { %108 = vmatmul.bf16.vlgmr.msra.gmra.mxu0 %v50_v18 }
  0x9e   :  { %v109_v20 = vpop.f32.mrf.mxu0 }
  0x9f   :  { %v110_v21 = vadd.f32 %v171_v19, %v109_v20 }
  0xa1   :  { %113 = vst [vmem:[#allocation2] sm:$0x3] %v110_v21 }
  0xa2   :  { %124 = dma.vmem_to_hbm [thread:$0]  %s120_s7, 32, %s122_s10, [#allocation3]  }
  0xa6   :  { %v111_v22 = vpop.f32.mrf.mxu0 }
  0xa7   :  { %196 = dma.done.wait [#allocation3], 32  }
  0xa8   :  { %197 = vsyncadd [#allocation3], 4294967264 }
  0xa9   :  { %129 = vsyncpa [#allocation3], 1 }

</bundles_post_ra>
